<compile_context>
chip_gen: v5e
topology: v5e:2x2
jax: 0.10.0
libtpu: 0.0.40
codegen_flags: <defaults>
</compile_context>

<pallas_src>
import jax
import jax.numpy as jnp
from jax.experimental import pallas as pl
from jax.experimental.pallas import tpu as pltpu

NEG_SLOPE = 0.01      # nn.LeakyReLU default
EPS = 1e-5            # nn.InstanceNorm2d default
P = 3                 # largest padding among the three convs (dilation 3)


def _leaky(x):
    return jnp.where(x > 0, x, NEG_SLOPE * x)


def expansion_cell(s0, s1, w00, w10, w12):
    """s0, s1: (N, H, W, C) f32.  w*: (3, 3, C, C) HWIO f32.  Returns (N, H, W, 3C)."""
    N, H, W, C = s0.shape
    Hp, Wp = H + 2 * P, W + 2 * P
    HW = H * W
    K = 9 * C        # per-edge im2col depth (9 taps x C input channels)
    CO = 3 * C       # output channels = concat of three nodes
    inv_hw = 1.0 / HW

    # Dense per-edge weights (9C, C): row order (tap_i, tap_j, c_in) == HWIO.reshape.
    w0 = w00.reshape(K, C)     # edge_s0_0 : dilation 1
    w1 = w10.reshape(K, C)     # edge_s1_0 : dilation 3
    w2 = w12.reshape(K, C)     # edge_s1_2 : dilation 2

    def kernel(s0_ref, s1_ref, w0_ref, w1_ref, w2_ref, out_ref, a0p, a1p, s1p1):
        s0_in = s0_ref[0]                      # (H, W, C)
        s1_in = s1_ref[0]

        # --- zero ONLY the halo strips (interior is fully overwritten below) ----
        def zero_halo(ref, p, h, w):
            hp, wp = h + 2 * p, w + 2 * p
            zrow = jnp.zeros((p, wp, C), jnp.float32)
            zcol = jnp.zeros((hp, p, C), jnp.float32)
            ref[0:p, :, :] = zrow
            ref[hp - p:hp, :, :] = zrow
            ref[:, 0:p, :] = zcol
            ref[:, wp - p:wp, :] = zcol

        zero_halo(a0p, P, H, W)
        zero_halo(a1p, P, H, W)
        zero_halo(s1p1, 1, H, W)

        # --- pad + activation, hoisted: LeakyReLU evaluated once per input ------
        a0p[P:P + H, P:P + W, :] = _leaky(s0_in)
        a1p[P:P + H, P:P + W, :] = _leaky(s1_in)
        s1p1[1:1 + H, 1:1 + W, :] = s1_in      # raw (un-activated) s1 for the pool

        # --- per-edge im2col as a value: 9 shifted (HW, C) slices -> (HW, 9C) ---
        # (no scratch stores; the concatenated value is fed straight to the MXU)
        def im2col(src, d):
            cols = []
            for i in range(3):
                for j in range(3):
                    oy = P - d + i * d
                    ox = P - d + j * d
                    cols.append(src[oy:oy + H, ox:ox + W, :].reshape(HW, C))
            return jnp.concatenate(cols, axis=-1)          # (HW, 9C)

        # --- dense per-edge MXU matmuls (no zero-block FLOPs) --------------------
        y0 = jnp.dot(im2col(a0p, 1), w0_ref[...], preferred_element_type=jnp.float32)
        y1 = jnp.dot(im2col(a1p, 3), w1_ref[...], preferred_element_type=jnp.float32)
        y2 = jnp.dot(im2col(a1p, 2), w2_ref[...], preferred_element_type=jnp.float32)

        # --- InstanceNorm(affine=False): one-pass per-channel stats over H*W -----
        def inorm(y):
            mean = jnp.sum(y, axis=0, keepdims=True) * inv_hw
            msq = jnp.sum(y * y, axis=0, keepdims=True) * inv_hw
            var = msq - mean * mean
            return (y - mean) * jax.lax.rsqrt(var + EPS)

        s0_flat = s0_in.reshape(HW, C)
        node0 = inorm(y0) + inorm(y1)
        node1 = s0_flat + node0
        node2 = inorm(y2) + node1

        # --- AvgPool2d(3,1,1, count_include_pad=True): separable (4 adds) --------
        colsum = s1p1[0:H, :, :] + s1p1[1:H + 1, :, :] + s1p1[2:H + 2, :, :]
        pool = colsum[:, 0:W, :] + colsum[:, 1:W + 1, :] + colsum[:, 2:W + 2, :]
        node3 = s0_flat + pool.reshape(HW, C) * (1.0 / 9.0)

        # fused output: concat([node_1, node_2, node_3], channel), one store
        out_ref[0] = jnp.concatenate([node1, node2, node3], axis=-1)

    in_spec = pl.BlockSpec((1, H, W, C), lambda n: (n, 0, 0, 0))
    w_spec = pl.BlockSpec((K, C), lambda n: (0, 0))
    out_spec = pl.BlockSpec((1, HW, CO), lambda n: (n, 0, 0))

    out = pl.pallas_call(
        kernel,
        out_shape=jax.ShapeDtypeStruct((N, HW, CO), jnp.float32),
        grid_spec=pltpu.PrefetchScalarGridSpec(
            num_scalar_prefetch=0,
            grid=(N,),
            in_specs=[in_spec, in_spec, w_spec, w_spec, w_spec],
            out_specs=out_spec,
            scratch_shapes=[
                pltpu.VMEM((Hp, Wp, C), jnp.float32),         # leaky(s0), zero halo
                pltpu.VMEM((Hp, Wp, C), jnp.float32),         # leaky(s1), zero halo
                pltpu.VMEM((H + 2, W + 2, C), jnp.float32),   # raw s1, pad 1 (pool)
            ],
        ),
        compiler_params=pltpu.CompilerParams(
            dimension_semantics=("parallel",),
        ),
    )(s0, s1, w0, w1, w2)

    return out.reshape(N, H, W, CO)


def reference_cell(s0, s1, w00, w10, w12):
    """Pure-JAX reference (NHWC) mirroring the PyTorch module."""
    def rcb(x, w, d):
        y = _leaky(x)
        y = jax.lax.conv_general_dilated(
            y, w, window_strides=(1, 1), padding=[(d, d), (d, d)],
            rhs_dilation=(d, d), dimension_numbers=("NHWC", "HWIO", "NHWC"))
        mean = jnp.mean(y, axis=(1, 2), keepdims=True)
        var = jnp.mean((y - mean) ** 2, axis=(1, 2), keepdims=True)
        return (y - mean) * jax.lax.rsqrt(var + EPS)

    node0 = rcb(s0, w00, 1) + rcb(s1, w10, 3)
    node1 = s0 + node0
    node2 = rcb(s1, w12, 2) + node1
    s1p = jnp.pad(s1, ((0, 0), (1, 1), (1, 1), (0, 0)))
    H, W = s0.shape[1], s0.shape[2]
    pool = sum(s1p[:, i:i + H, j:j + W, :] for i in range(3) for j in range(3)) / 9.0
    node3 = s0 + pool
    return jnp.concatenate([node1, node2, node3], axis=-1)


if __name__ == "__main__":
    N, C, H, W = 2, 8, 16, 16  # small shapes; C is the cell width

    key = jax.random.PRNGKey(0)
    k0, k1, k2, k3, k4 = jax.random.split(key, 5)
    s0 = jax.random.normal(k0, (N, H, W, C), dtype=jnp.float32)
    s1 = jax.random.normal(k1, (N, H, W, C), dtype=jnp.float32)
    wscale = 1.0 / jnp.sqrt(9.0 * C)
    # HWIO weights (torch Conv2d (C_out, C_in, 3, 3) transposed to (3, 3, C_in, C_out))
    w00 = jax.random.normal(k2, (3, 3, C, C), dtype=jnp.float32) * wscale
    w10 = jax.random.normal(k3, (3, 3, C, C), dtype=jnp.float32) * wscale
    w12 = jax.random.normal(k4, (3, 3, C, C), dtype=jnp.float32) * wscale

    out = jax.jit(expansion_cell)(s0, s1, w00, w10, w12)
    out = jax.block_until_ready(out)
    assert out.shape == (N, H, W, 3 * C), out.shape

    ref = jax.block_until_ready(reference_cell(s0, s1, w00, w10, w12))
    assert jnp.allclose(out, ref, atol=2e-4, rtol=2e-4), float(jnp.max(jnp.abs(out - ref)))

    print("KERNEL_OK")
</pallas_src>

<mosaic_0001>
module attributes {stable_mosaic.version = 11 : i64} {
  func.func @kernel(%arg0: i32, %arg1: memref<1x16x16x8xf32, #tpu.memory_space<vmem>>, %arg2: memref<1x16x16x8xf32, #tpu.memory_space<vmem>>, %arg3: memref<72x8xf32, #tpu.memory_space<vmem>>, %arg4: memref<72x8xf32, #tpu.memory_space<vmem>>, %arg5: memref<72x8xf32, #tpu.memory_space<vmem>>, %arg6: memref<1x256x24xf32, #tpu.memory_space<vmem>>, %arg7: memref<22x22x8xf32, #tpu.memory_space<vmem>>, %arg8: memref<22x22x8xf32, #tpu.memory_space<vmem>>, %arg9: memref<18x18x8xf32, #tpu.memory_space<vmem>>) attributes {dimension_semantics = [#tpu.dimension_semantics<parallel>], iteration_bounds = array<i64: 2>, scalar_prefetch = 0 : i64, scratch_operands = 3 : i64, tpu.core_type = #tpu.core_type<tc>, window_params = [{transform_indices = @transform_0, window_bounds = array<i64: 1, 16, 16, 8>}, {transform_indices = @transform_1, window_bounds = array<i64: 1, 16, 16, 8>}, {pipeline_mode = #tpu.pipeline_mode<synchronous>, transform_indices = @transform_2, window_bounds = array<i64: 72, 8>}, {pipeline_mode = #tpu.pipeline_mode<synchronous>, transform_indices = @transform_3, window_bounds = array<i64: 72, 8>}, {pipeline_mode = #tpu.pipeline_mode<synchronous>, transform_indices = @transform_4, window_bounds = array<i64: 72, 8>}, {transform_indices = @transform_5, window_bounds = array<i64: 1, 256, 24>}]} {
    %c0 = arith.constant 0 : index
    %c0_0 = arith.constant 0 : index
    %c0_1 = arith.constant 0 : index
    %c0_2 = arith.constant 0 : index
    %0 = vector.load %arg1[%c0, %c0_0, %c0_1, %c0_2] : memref<1x16x16x8xf32, #tpu.memory_space<vmem>>, vector<1x16x16x8xf32>
    %1 = vector.shape_cast %0 : vector<1x16x16x8xf32> to vector<16x16x8xf32>
    %c0_3 = arith.constant 0 : index
    %c0_4 = arith.constant 0 : index
    %c0_5 = arith.constant 0 : index
    %c0_6 = arith.constant 0 : index
    %2 = vector.load %arg2[%c0_3, %c0_4, %c0_5, %c0_6] : memref<1x16x16x8xf32, #tpu.memory_space<vmem>>, vector<1x16x16x8xf32>
    %3 = vector.shape_cast %2 : vector<1x16x16x8xf32> to vector<16x16x8xf32>
    %cst = arith.constant 0.000000e+00 : f32
    %4 = vector.broadcast %cst : f32 to vector<3x22x8xf32>
    %cst_7 = arith.constant 0.000000e+00 : f32
    %5 = vector.broadcast %cst_7 : f32 to vector<22x3x8xf32>
    %c0_8 = arith.constant 0 : index
    %c0_9 = arith.constant 0 : index
    %c0_10 = arith.constant 0 : index
    %6 = vector.load %arg7[%c0_8, %c0_9, %c0_10] : memref<22x22x8xf32, #tpu.memory_space<vmem>>, vector<3x22x8xf32>
    tpu.vector_store %arg7[%c0_8, %c0_9, %c0_10], %4 {strides = array<i32>} : memref<22x22x8xf32, #tpu.memory_space<vmem>>, vector<3x22x8xf32>,
    %c19 = arith.constant 19 : index
    %c0_11 = arith.constant 0 : index
    %c0_12 = arith.constant 0 : index
    %7 = vector.load %arg7[%c19, %c0_11, %c0_12] : memref<22x22x8xf32, #tpu.memory_space<vmem>>, vector<3x22x8xf32>
    tpu.vector_store %arg7[%c19, %c0_11, %c0_12], %4 {strides = array<i32>} : memref<22x22x8xf32, #tpu.memory_space<vmem>>, vector<3x22x8xf32>,
    %c0_13 = arith.constant 0 : index
    %c0_14 = arith.constant 0 : index
    %c0_15 = arith.constant 0 : index
    %8 = vector.load %arg7[%c0_13, %c0_14, %c0_15] : memref<22x22x8xf32, #tpu.memory_space<vmem>>, vector<22x3x8xf32>
    tpu.vector_store %arg7[%c0_13, %c0_14, %c0_15], %5 {strides = array<i32>} : memref<22x22x8xf32, #tpu.memory_space<vmem>>, vector<22x3x8xf32>,
    %c0_16 = arith.constant 0 : index
    %c19_17 = arith.constant 19 : index
    %c0_18 = arith.constant 0 : index
    %9 = vector.load %arg7[%c0_16, %c19_17, %c0_18] : memref<22x22x8xf32, #tpu.memory_space<vmem>>, vector<22x3x8xf32>
    tpu.vector_store %arg7[%c0_16, %c19_17, %c0_18], %5 {strides = array<i32>} : memref<22x22x8xf32, #tpu.memory_space<vmem>>, vector<22x3x8xf32>,
    %cst_19 = arith.constant 0.000000e+00 : f32
    %10 = vector.broadcast %cst_19 : f32 to vector<3x22x8xf32>
    %cst_20 = arith.constant 0.000000e+00 : f32
    %11 = vector.broadcast %cst_20 : f32 to vector<22x3x8xf32>
    %c0_21 = arith.constant 0 : index
    %c0_22 = arith.constant 0 : index
    %c0_23 = arith.constant 0 : index
    %12 = vector.load %arg8[%c0_21, %c0_22, %c0_23] : memref<22x22x8xf32, #tpu.memory_space<vmem>>, vector<3x22x8xf32>
    tpu.vector_store %arg8[%c0_21, %c0_22, %c0_23], %10 {strides = array<i32>} : memref<22x22x8xf32, #tpu.memory_space<vmem>>, vector<3x22x8xf32>,
    %c19_24 = arith.constant 19 : index
    %c0_25 = arith.constant 0 : index
    %c0_26 = arith.constant 0 : index
    %13 = vector.load %arg8[%c19_24, %c0_25, %c0_26] : memref<22x22x8xf32, #tpu.memory_space<vmem>>, vector<3x22x8xf32>
    tpu.vector_store %arg8[%c19_24, %c0_25, %c0_26], %10 {strides = array<i32>} : memref<22x22x8xf32, #tpu.memory_space<vmem>>, vector<3x22x8xf32>,
    %c0_27 = arith.constant 0 : index
    %c0_28 = arith.constant 0 : index
    %c0_29 = arith.constant 0 : index
    %14 = vector.load %arg8[%c0_27, %c0_28, %c0_29] : memref<22x22x8xf32, #tpu.memory_space<vmem>>, vector<22x3x8xf32>
    tpu.vector_store %arg8[%c0_27, %c0_28, %c0_29], %11 {strides = array<i32>} : memref<22x22x8xf32, #tpu.memory_space<vmem>>, vector<22x3x8xf32>,
    %c0_30 = arith.constant 0 : index
    %c19_31 = arith.constant 19 : index
    %c0_32 = arith.constant 0 : index
    %15 = vector.load %arg8[%c0_30, %c19_31, %c0_32] : memref<22x22x8xf32, #tpu.memory_space<vmem>>, vector<22x3x8xf32>
    tpu.vector_store %arg8[%c0_30, %c19_31, %c0_32], %11 {strides = array<i32>} : memref<22x22x8xf32, #tpu.memory_space<vmem>>, vector<22x3x8xf32>,
    %cst_33 = arith.constant 0.000000e+00 : f32
    %16 = vector.broadcast %cst_33 : f32 to vector<1x18x8xf32>
    %cst_34 = arith.constant 0.000000e+00 : f32
    %17 = vector.broadcast %cst_34 : f32 to vector<18x1x8xf32>
    %c0_35 = arith.constant 0 : index
    %c0_36 = arith.constant 0 : index
    %c0_37 = arith.constant 0 : index
    %18 = vector.load %arg9[%c0_35, %c0_36, %c0_37] : memref<18x18x8xf32, #tpu.memory_space<vmem>>, vector<1x18x8xf32>
    tpu.vector_store %arg9[%c0_35, %c0_36, %c0_37], %16 {strides = array<i32>} : memref<18x18x8xf32, #tpu.memory_space<vmem>>, vector<1x18x8xf32>,
    %c17 = arith.constant 17 : index
    %c0_38 = arith.constant 0 : index
    %c0_39 = arith.constant 0 : index
    %19 = vector.load %arg9[%c17, %c0_38, %c0_39] : memref<18x18x8xf32, #tpu.memory_space<vmem>>, vector<1x18x8xf32>
    tpu.vector_store %arg9[%c17, %c0_38, %c0_39], %16 {strides = array<i32>} : memref<18x18x8xf32, #tpu.memory_space<vmem>>, vector<1x18x8xf32>,
    %c0_40 = arith.constant 0 : index
    %c0_41 = arith.constant 0 : index
    %c0_42 = arith.constant 0 : index
    %20 = vector.load %arg9[%c0_40, %c0_41, %c0_42] : memref<18x18x8xf32, #tpu.memory_space<vmem>>, vector<18x1x8xf32>
    tpu.vector_store %arg9[%c0_40, %c0_41, %c0_42], %17 {strides = array<i32>} : memref<18x18x8xf32, #tpu.memory_space<vmem>>, vector<18x1x8xf32>,
    %c0_43 = arith.constant 0 : index
    %c17_44 = arith.constant 17 : index
    %c0_45 = arith.constant 0 : index
    %21 = vector.load %arg9[%c0_43, %c17_44, %c0_45] : memref<18x18x8xf32, #tpu.memory_space<vmem>>, vector<18x1x8xf32>
    tpu.vector_store %arg9[%c0_43, %c17_44, %c0_45], %17 {strides = array<i32>} : memref<18x18x8xf32, #tpu.memory_space<vmem>>, vector<18x1x8xf32>,
    %cst_46 = arith.constant 0.000000e+00 : f32
    %22 = vector.broadcast %cst_46 : f32 to vector<16x16x8xf32>
    %23 = arith.cmpf ogt, %1, %22 : vector<16x16x8xf32>
    %cst_47 = arith.constant 0.00999999977 : f32
    %24 = vector.broadcast %cst_47 : f32 to vector<16x16x8xf32>
    %25 = arith.mulf %24, %1 : vector<16x16x8xf32>
    %26 = arith.select %23, %1, %25 : vector<16x16x8xi1>, vector<16x16x8xf32>
    %c3 = arith.constant 3 : index
    %c3_48 = arith.constant 3 : index
    %c0_49 = arith.constant 0 : index
    %27 = vector.load %arg7[%c3, %c3_48, %c0_49] : memref<22x22x8xf32, #tpu.memory_space<vmem>>, vector<16x16x8xf32>
    tpu.vector_store %arg7[%c3, %c3_48, %c0_49], %26 {strides = array<i32>} : memref<22x22x8xf32, #tpu.memory_space<vmem>>, vector<16x16x8xf32>,
    %cst_50 = arith.constant 0.000000e+00 : f32
    %28 = vector.broadcast %cst_50 : f32 to vector<16x16x8xf32>
    %29 = arith.cmpf ogt, %3, %28 : vector<16x16x8xf32>
    %cst_51 = arith.constant 0.00999999977 : f32
    %30 = vector.broadcast %cst_51 : f32 to vector<16x16x8xf32>
    %31 = arith.mulf %30, %3 : vector<16x16x8xf32>
    %32 = arith.select %29, %3, %31 : vector<16x16x8xi1>, vector<16x16x8xf32>
    %c3_52 = arith.constant 3 : index
    %c3_53 = arith.constant 3 : index
    %c0_54 = arith.constant 0 : index
    %33 = vector.load %arg8[%c3_52, %c3_53, %c0_54] : memref<22x22x8xf32, #tpu.memory_space<vmem>>, vector<16x16x8xf32>
    tpu.vector_store %arg8[%c3_52, %c3_53, %c0_54], %32 {strides = array<i32>} : memref<22x22x8xf32, #tpu.memory_space<vmem>>, vector<16x16x8xf32>,
    %c1 = arith.constant 1 : index
    %c1_55 = arith.constant 1 : index
    %c0_56 = arith.constant 0 : index
    %34 = vector.load %arg9[%c1, %c1_55, %c0_56] : memref<18x18x8xf32, #tpu.memory_space<vmem>>, vector<16x16x8xf32>
    tpu.vector_store %arg9[%c1, %c1_55, %c0_56], %3 {strides = array<i32>} : memref<18x18x8xf32, #tpu.memory_space<vmem>>, vector<16x16x8xf32>,
    %c2 = arith.constant 2 : index
    %c2_57 = arith.constant 2 : index
    %c0_58 = arith.constant 0 : index
    %35 = vector.load %arg7[%c2, %c2_57, %c0_58] : memref<22x22x8xf32, #tpu.memory_space<vmem>>, vector<16x16x8xf32>
    %36 = vector.shape_cast %35 : vector<16x16x8xf32> to vector<256x8xf32>
    %c2_59 = arith.constant 2 : index
    %c3_60 = arith.constant 3 : index
    %c0_61 = arith.constant 0 : index
    %37 = vector.load %arg7[%c2_59, %c3_60, %c0_61] : memref<22x22x8xf32, #tpu.memory_space<vmem>>, vector<16x16x8xf32>
    %38 = vector.shape_cast %37 : vector<16x16x8xf32> to vector<256x8xf32>
    %c2_62 = arith.constant 2 : index
    %c4 = arith.constant 4 : index
    %c0_63 = arith.constant 0 : index
    %39 = vector.load %arg7[%c2_62, %c4, %c0_63] : memref<22x22x8xf32, #tpu.memory_space<vmem>>, vector<16x16x8xf32>
    %40 = vector.shape_cast %39 : vector<16x16x8xf32> to vector<256x8xf32>
    %c3_64 = arith.constant 3 : index
    %c2_65 = arith.constant 2 : index
    %c0_66 = arith.constant 0 : index
    %41 = vector.load %arg7[%c3_64, %c2_65, %c0_66] : memref<22x22x8xf32, #tpu.memory_space<vmem>>, vector<16x16x8xf32>
    %42 = vector.shape_cast %41 : vector<16x16x8xf32> to vector<256x8xf32>
    %c3_67 = arith.constant 3 : index
    %c3_68 = arith.constant 3 : index
    %c0_69 = arith.constant 0 : index
    %43 = vector.load %arg7[%c3_67, %c3_68, %c0_69] : memref<22x22x8xf32, #tpu.memory_space<vmem>>, vector<16x16x8xf32>
    %44 = vector.shape_cast %43 : vector<16x16x8xf32> to vector<256x8xf32>
    %c3_70 = arith.constant 3 : index
    %c4_71 = arith.constant 4 : index
    %c0_72 = arith.constant 0 : index
    %45 = vector.load %arg7[%c3_70, %c4_71, %c0_72] : memref<22x22x8xf32, #tpu.memory_space<vmem>>, vector<16x16x8xf32>
    %46 = vector.shape_cast %45 : vector<16x16x8xf32> to vector<256x8xf32>
    %c4_73 = arith.constant 4 : index
    %c2_74 = arith.constant 2 : index
    %c0_75 = arith.constant 0 : index
    %47 = vector.load %arg7[%c4_73, %c2_74, %c0_75] : memref<22x22x8xf32, #tpu.memory_space<vmem>>, vector<16x16x8xf32>
    %48 = vector.shape_cast %47 : vector<16x16x8xf32> to vector<256x8xf32>
    %c4_76 = arith.constant 4 : index
    %c3_77 = arith.constant 3 : index
    %c0_78 = arith.constant 0 : index
    %49 = vector.load %arg7[%c4_76, %c3_77, %c0_78] : memref<22x22x8xf32, #tpu.memory_space<vmem>>, vector<16x16x8xf32>
    %50 = vector.shape_cast %49 : vector<16x16x8xf32> to vector<256x8xf32>
    %c4_79 = arith.constant 4 : index
    %c4_80 = arith.constant 4 : index
    %c0_81 = arith.constant 0 : index
    %51 = vector.load %arg7[%c4_79, %c4_80, %c0_81] : memref<22x22x8xf32, #tpu.memory_space<vmem>>, vector<16x16x8xf32>
    %52 = vector.shape_cast %51 : vector<16x16x8xf32> to vector<256x8xf32>
    %53 = tpu.concatenate %36, %38, %40, %42, %44, %46, %48, %50, %52 in 1 : vector<256x8xf32>, vector<256x8xf32>, vector<256x8xf32>, vector<256x8xf32>, vector<256x8xf32>, vector<256x8xf32>, vector<256x8xf32>, vector<256x8xf32>, vector<256x8xf32> -> vector<256x72xf32>
    %c0_82 = arith.constant 0 : index
    %c0_83 = arith.constant 0 : index
    %54 = vector.load %arg3[%c0_82, %c0_83] : memref<72x8xf32, #tpu.memory_space<vmem>>, vector<72x8xf32>
    %cst_84 = arith.constant dense<0.000000e+00> : vector<256x8xf32>
    %55 = tpu.matmul %53, %54, %cst_84 {dimension_numbers = #tpu.dot_dimension_numbers<[1], [0], [0], [1], [0, 0, 1, 1], [], []>} : vector<256x72xf32>, vector<72x8xf32>, vector<256x8xf32> -> vector<256x8xf32>
    %c0_85 = arith.constant 0 : index
    %c0_86 = arith.constant 0 : index
    %c0_87 = arith.constant 0 : index
    %56 = vector.load %arg8[%c0_85, %c0_86, %c0_87] : memref<22x22x8xf32, #tpu.memory_space<vmem>>, vector<16x16x8xf32>
    %57 = vector.shape_cast %56 : vector<16x16x8xf32> to vector<256x8xf32>
    %c0_88 = arith.constant 0 : index
    %c3_89 = arith.constant 3 : index
    %c0_90 = arith.constant 0 : index
    %58 = vector.load %arg8[%c0_88, %c3_89, %c0_90] : memref<22x22x8xf32, #tpu.memory_space<vmem>>, vector<16x16x8xf32>
    %59 = vector.shape_cast %58 : vector<16x16x8xf32> to vector<256x8xf32>
    %c0_91 = arith.constant 0 : index
    %c6 = arith.constant 6 : index
    %c0_92 = arith.constant 0 : index
    %60 = vector.load %arg8[%c0_91, %c6, %c0_92] : memref<22x22x8xf32, #tpu.memory_space<vmem>>, vector<16x16x8xf32>
    %61 = vector.shape_cast %60 : vector<16x16x8xf32> to vector<256x8xf32>
    %c3_93 = arith.constant 3 : index
    %c0_94 = arith.constant 0 : index
    %c0_95 = arith.constant 0 : index
    %62 = vector.load %arg8[%c3_93, %c0_94, %c0_95] : memref<22x22x8xf32, #tpu.memory_space<vmem>>, vector<16x16x8xf32>
    %63 = vector.shape_cast %62 : vector<16x16x8xf32> to vector<256x8xf32>
    %c3_96 = arith.constant 3 : index
    %c3_97 = arith.constant 3 : index
    %c0_98 = arith.constant 0 : index
    %64 = vector.load %arg8[%c3_96, %c3_97, %c0_98] : memref<22x22x8xf32, #tpu.memory_space<vmem>>, vector<16x16x8xf32>
    %65 = vector.shape_cast %64 : vector<16x16x8xf32> to vector<256x8xf32>
    %c3_99 = arith.constant 3 : index
    %c6_100 = arith.constant 6 : index
    %c0_101 = arith.constant 0 : index
    %66 = vector.load %arg8[%c3_99, %c6_100, %c0_101] : memref<22x22x8xf32, #tpu.memory_space<vmem>>, vector<16x16x8xf32>
    %67 = vector.shape_cast %66 : vector<16x16x8xf32> to vector<256x8xf32>
    %c6_102 = arith.constant 6 : index
    %c0_103 = arith.constant 0 : index
    %c0_104 = arith.constant 0 : index
    %68 = vector.load %arg8[%c6_102, %c0_103, %c0_104] : memref<22x22x8xf32, #tpu.memory_space<vmem>>, vector<16x16x8xf32>
    %69 = vector.shape_cast %68 : vector<16x16x8xf32> to vector<256x8xf32>
    %c6_105 = arith.constant 6 : index
    %c3_106 = arith.constant 3 : index
    %c0_107 = arith.constant 0 : index
    %70 = vector.load %arg8[%c6_105, %c3_106, %c0_107] : memref<22x22x8xf32, #tpu.memory_space<vmem>>, vector<16x16x8xf32>
    %71 = vector.shape_cast %70 : vector<16x16x8xf32> to vector<256x8xf32>
    %c6_108 = arith.constant 6 : index
    %c6_109 = arith.constant 6 : index
    %c0_110 = arith.constant 0 : index
    %72 = vector.load %arg8[%c6_108, %c6_109, %c0_110] : memref<22x22x8xf32, #tpu.memory_space<vmem>>, vector<16x16x8xf32>
    %73 = vector.shape_cast %72 : vector<16x16x8xf32> to vector<256x8xf32>
    %74 = tpu.concatenate %57, %59, %61, %63, %65, %67, %69, %71, %73 in 1 : vector<256x8xf32>, vector<256x8xf32>, vector<256x8xf32>, vector<256x8xf32>, vector<256x8xf32>, vector<256x8xf32>, vector<256x8xf32>, vector<256x8xf32>, vector<256x8xf32> -> vector<256x72xf32>
    %c0_111 = arith.constant 0 : index
    %c0_112 = arith.constant 0 : index
    %75 = vector.load %arg4[%c0_111, %c0_112] : memref<72x8xf32, #tpu.memory_space<vmem>>, vector<72x8xf32>
    %cst_113 = arith.constant dense<0.000000e+00> : vector<256x8xf32>
    %76 = tpu.matmul %74, %75, %cst_113 {dimension_numbers = #tpu.dot_dimension_numbers<[1], [0], [0], [1], [0, 0, 1, 1], [], []>} : vector<256x72xf32>, vector<72x8xf32>, vector<256x8xf32> -> vector<256x8xf32>
    %c1_114 = arith.constant 1 : index
    %c1_115 = arith.constant 1 : index
    %c0_116 = arith.constant 0 : index
    %77 = vector.load %arg8[%c1_114, %c1_115, %c0_116] : memref<22x22x8xf32, #tpu.memory_space<vmem>>, vector<16x16x8xf32>
    %78 = vector.shape_cast %77 : vector<16x16x8xf32> to vector<256x8xf32>
    %c1_117 = arith.constant 1 : index
    %c3_118 = arith.constant 3 : index
    %c0_119 = arith.constant 0 : index
    %79 = vector.load %arg8[%c1_117, %c3_118, %c0_119] : memref<22x22x8xf32, #tpu.memory_space<vmem>>, vector<16x16x8xf32>
    %80 = vector.shape_cast %79 : vector<16x16x8xf32> to vector<256x8xf32>
    %c1_120 = arith.constant 1 : index
    %c5 = arith.constant 5 : index
    %c0_121 = arith.constant 0 : index
    %81 = vector.load %arg8[%c1_120, %c5, %c0_121] : memref<22x22x8xf32, #tpu.memory_space<vmem>>, vector<16x16x8xf32>
    %82 = vector.shape_cast %81 : vector<16x16x8xf32> to vector<256x8xf32>
    %c3_122 = arith.constant 3 : index
    %c1_123 = arith.constant 1 : index
    %c0_124 = arith.constant 0 : index
    %83 = vector.load %arg8[%c3_122, %c1_123, %c0_124] : memref<22x22x8xf32, #tpu.memory_space<vmem>>, vector<16x16x8xf32>
    %84 = vector.shape_cast %83 : vector<16x16x8xf32> to vector<256x8xf32>
    %c3_125 = arith.constant 3 : index
    %c3_126 = arith.constant 3 : index
    %c0_127 = arith.constant 0 : index
    %85 = vector.load %arg8[%c3_125, %c3_126, %c0_127] : memref<22x22x8xf32, #tpu.memory_space<vmem>>, vector<16x16x8xf32>
    %86 = vector.shape_cast %85 : vector<16x16x8xf32> to vector<256x8xf32>
    %c3_128 = arith.constant 3 : index
    %c5_129 = arith.constant 5 : index
    %c0_130 = arith.constant 0 : index
    %87 = vector.load %arg8[%c3_128, %c5_129, %c0_130] : memref<22x22x8xf32, #tpu.memory_space<vmem>>, vector<16x16x8xf32>
    %88 = vector.shape_cast %87 : vector<16x16x8xf32> to vector<256x8xf32>
    %c5_131 = arith.constant 5 : index
    %c1_132 = arith.constant 1 : index
    %c0_133 = arith.constant 0 : index
    %89 = vector.load %arg8[%c5_131, %c1_132, %c0_133] : memref<22x22x8xf32, #tpu.memory_space<vmem>>, vector<16x16x8xf32>
    %90 = vector.shape_cast %89 : vector<16x16x8xf32> to vector<256x8xf32>
    %c5_134 = arith.constant 5 : index
    %c3_135 = arith.constant 3 : index
    %c0_136 = arith.constant 0 : index
    %91 = vector.load %arg8[%c5_134, %c3_135, %c0_136] : memref<22x22x8xf32, #tpu.memory_space<vmem>>, vector<16x16x8xf32>
    %92 = vector.shape_cast %91 : vector<16x16x8xf32> to vector<256x8xf32>
    %c5_137 = arith.constant 5 : index
    %c5_138 = arith.constant 5 : index
    %c0_139 = arith.constant 0 : index
    %93 = vector.load %arg8[%c5_137, %c5_138, %c0_139] : memref<22x22x8xf32, #tpu.memory_space<vmem>>, vector<16x16x8xf32>
    %94 = vector.shape_cast %93 : vector<16x16x8xf32> to vector<256x8xf32>
    %95 = tpu.concatenate %78, %80, %82, %84, %86, %88, %90, %92, %94 in 1 : vector<256x8xf32>, vector<256x8xf32>, vector<256x8xf32>, vector<256x8xf32>, vector<256x8xf32>, vector<256x8xf32>, vector<256x8xf32>, vector<256x8xf32>, vector<256x8xf32> -> vector<256x72xf32>
    %c0_140 = arith.constant 0 : index
    %c0_141 = arith.constant 0 : index
    %96 = vector.load %arg5[%c0_140, %c0_141] : memref<72x8xf32, #tpu.memory_space<vmem>>, vector<72x8xf32>
    %cst_142 = arith.constant dense<0.000000e+00> : vector<256x8xf32>
    %97 = tpu.matmul %95, %96, %cst_142 {dimension_numbers = #tpu.dot_dimension_numbers<[1], [0], [0], [1], [0, 0, 1, 1], [], []>} : vector<256x72xf32>, vector<72x8xf32>, vector<256x8xf32> -> vector<256x8xf32>
    %98 = vector.shape_cast %1 : vector<16x16x8xf32> to vector<256x8xf32>
    %cst_143 = arith.constant dense<0.000000e+00> : vector<8xf32>
    %99 = vector.multi_reduction <add>, %55, %cst_143 [0] : vector<256x8xf32> to vector<8xf32>
    %100 = vector.shape_cast %99 : vector<8xf32> to vector<1x8xf32>
    %cst_144 = arith.constant 3.906250e-03 : f32
    %101 = vector.broadcast %cst_144 : f32 to vector<1x8xf32>
    %102 = arith.mulf %100, %101 : vector<1x8xf32>
    %103 = arith.mulf %55, %55 : vector<256x8xf32>
    %cst_145 = arith.constant dense<0.000000e+00> : vector<8xf32>
    %104 = vector.multi_reduction <add>, %103, %cst_145 [0] : vector<256x8xf32> to vector<8xf32>
    %105 = vector.shape_cast %104 : vector<8xf32> to vector<1x8xf32>
    %cst_146 = arith.constant 3.906250e-03 : f32
    %106 = vector.broadcast %cst_146 : f32 to vector<1x8xf32>
    %107 = arith.mulf %105, %106 : vector<1x8xf32>
    %108 = arith.mulf %102, %102 : vector<1x8xf32>
    %109 = arith.subf %107, %108 : vector<1x8xf32>
    %110 = vector.broadcast %102 : vector<1x8xf32> to vector<256x8xf32>
    %111 = arith.subf %55, %110 : vector<256x8xf32>
    %cst_147 = arith.constant 9.99999974E-6 : f32
    %112 = vector.broadcast %cst_147 : f32 to vector<1x8xf32>
    %113 = arith.addf %109, %112 : vector<1x8xf32>
    %114 = math.rsqrt %113 : vector<1x8xf32>
    %115 = vector.broadcast %114 : vector<1x8xf32> to vector<256x8xf32>
    %116 = arith.mulf %111, %115 : vector<256x8xf32>
    %cst_148 = arith.constant dense<0.000000e+00> : vector<8xf32>
    %117 = vector.multi_reduction <add>, %76, %cst_148 [0] : vector<256x8xf32> to vector<8xf32>
    %118 = vector.shape_cast %117 : vector<8xf32> to vector<1x8xf32>
    %cst_149 = arith.constant 3.906250e-03 : f32
    %119 = vector.broadcast %cst_149 : f32 to vector<1x8xf32>
    %120 = arith.mulf %118, %119 : vector<1x8xf32>
    %121 = arith.mulf %76, %76 : vector<256x8xf32>
    %cst_150 = arith.constant dense<0.000000e+00> : vector<8xf32>
    %122 = vector.multi_reduction <add>, %121, %cst_150 [0] : vector<256x8xf32> to vector<8xf32>
    %123 = vector.shape_cast %122 : vector<8xf32> to vector<1x8xf32>
    %cst_151 = arith.constant 3.906250e-03 : f32
    %124 = vector.broadcast %cst_151 : f32 to vector<1x8xf32>
    %125 = arith.mulf %123, %124 : vector<1x8xf32>
    %126 = arith.mulf %120, %120 : vector<1x8xf32>
    %127 = arith.subf %125, %126 : vector<1x8xf32>
    %128 = vector.broadcast %120 : vector<1x8xf32> to vector<256x8xf32>
    %129 = arith.subf %76, %128 : vector<256x8xf32>
    %cst_152 = arith.constant 9.99999974E-6 : f32
    %130 = vector.broadcast %cst_152 : f32 to vector<1x8xf32>
    %131 = arith.addf %127, %130 : vector<1x8xf32>
    %132 = math.rsqrt %131 : vector<1x8xf32>
    %133 = vector.broadcast %132 : vector<1x8xf32> to vector<256x8xf32>
    %134 = arith.mulf %129, %133 : vector<256x8xf32>
    %135 = arith.addf %116, %134 : vector<256x8xf32>
    %136 = arith.addf %98, %135 : vector<256x8xf32>
    %cst_153 = arith.constant dense<0.000000e+00> : vector<8xf32>
    %137 = vector.multi_reduction <add>, %97, %cst_153 [0] : vector<256x8xf32> to vector<8xf32>
    %138 = vector.shape_cast %137 : vector<8xf32> to vector<1x8xf32>
    %cst_154 = arith.constant 3.906250e-03 : f32
    %139 = vector.broadcast %cst_154 : f32 to vector<1x8xf32>
    %140 = arith.mulf %138, %139 : vector<1x8xf32>
    %141 = arith.mulf %97, %97 : vector<256x8xf32>
    %cst_155 = arith.constant dense<0.000000e+00> : vector<8xf32>
    %142 = vector.multi_reduction <add>, %141, %cst_155 [0] : vector<256x8xf32> to vector<8xf32>
    %143 = vector.shape_cast %142 : vector<8xf32> to vector<1x8xf32>
    %cst_156 = arith.constant 3.906250e-03 : f32
    %144 = vector.broadcast %cst_156 : f32 to vector<1x8xf32>
    %145 = arith.mulf %143, %144 : vector<1x8xf32>
    %146 = arith.mulf %140, %140 : vector<1x8xf32>
    %147 = arith.subf %145, %146 : vector<1x8xf32>
    %148 = vector.broadcast %140 : vector<1x8xf32> to vector<256x8xf32>
    %149 = arith.subf %97, %148 : vector<256x8xf32>
    %cst_157 = arith.constant 9.99999974E-6 : f32
    %150 = vector.broadcast %cst_157 : f32 to vector<1x8xf32>
    %151 = arith.addf %147, %150 : vector<1x8xf32>
    %152 = math.rsqrt %151 : vector<1x8xf32>
    %153 = vector.broadcast %152 : vector<1x8xf32> to vector<256x8xf32>
    %154 = arith.mulf %149, %153 : vector<256x8xf32>
    %155 = arith.addf %154, %136 : vector<256x8xf32>
    %c0_158 = arith.constant 0 : index
    %c0_159 = arith.constant 0 : index
    %c0_160 = arith.constant 0 : index
    %156 = vector.load %arg9[%c0_158, %c0_159, %c0_160] : memref<18x18x8xf32, #tpu.memory_space<vmem>>, vector<16x18x8xf32>
    %c1_161 = arith.constant 1 : index
    %c0_162 = arith.constant 0 : index
    %c0_163 = arith.constant 0 : index
    %157 = vector.load %arg9[%c1_161, %c0_162, %c0_163] : memref<18x18x8xf32, #tpu.memory_space<vmem>>, vector<16x18x8xf32>
    %158 = arith.addf %156, %157 : vector<16x18x8xf32>
    %c2_164 = arith.constant 2 : index
    %c0_165 = arith.constant 0 : index
    %c0_166 = arith.constant 0 : index
    %159 = vector.load %arg9[%c2_164, %c0_165, %c0_166] : memref<18x18x8xf32, #tpu.memory_space<vmem>>, vector<16x18x8xf32>
    %160 = arith.addf %158, %159 : vector<16x18x8xf32>
    %161 = vector.extract_strided_slice %160 {offsets = [0, 0, 0], sizes = [16, 16, 8], strides = [1, 1, 1]} : vector<16x18x8xf32> to vector<16x16x8xf32>
    %162 = vector.extract_strided_slice %160 {offsets = [0, 1, 0], sizes = [16, 16, 8], strides = [1, 1, 1]} : vector<16x18x8xf32> to vector<16x16x8xf32>
    %163 = arith.addf %161, %162 : vector<16x16x8xf32>
    %164 = vector.extract_strided_slice %160 {offsets = [0, 2, 0], sizes = [16, 16, 8], strides = [1, 1, 1]} : vector<16x18x8xf32> to vector<16x16x8xf32>
    %165 = arith.addf %163, %164 : vector<16x16x8xf32>
    %166 = vector.shape_cast %165 : vector<16x16x8xf32> to vector<256x8xf32>
    %cst_167 = arith.constant 0.111111112 : f32
    %167 = vector.broadcast %cst_167 : f32 to vector<256x8xf32>
    %168 = arith.mulf %166, %167 : vector<256x8xf32>
    %169 = arith.addf %98, %168 : vector<256x8xf32>
    %170 = tpu.concatenate %136, %155, %169 in 1 : vector<256x8xf32>, vector<256x8xf32>, vector<256x8xf32> -> vector<256x24xf32>
    %c0_168 = arith.constant 0 : index
    %c0_169 = arith.constant 0 : index
    %c0_170 = arith.constant 0 : index
    %171 = vector.load %arg6[%c0_168, %c0_169, %c0_170] : memref<1x256x24xf32, #tpu.memory_space<vmem>>, vector<1x256x24xf32>
    %172 = vector.shape_cast %171 : vector<1x256x24xf32> to vector<256x24xf32>
    %173 = vector.shape_cast %170 : vector<256x24xf32> to vector<1x256x24xf32>
    tpu.vector_store %arg6[%c0_168, %c0_169, %c0_170], %173 {strides = array<i32>} : memref<1x256x24xf32, #tpu.memory_space<vmem>>, vector<1x256x24xf32>,
    return
  }
  func.func @transform_0(%arg0: i32) -> (i32, i32, i32, i32) {
    %c0_i32 = arith.constant 0 : i32
    %c0_i32_0 = arith.constant 0 : i32
    %c0_i32_1 = arith.constant 0 : i32
    %c0_i32_2 = arith.constant 0 : i32
    return %arg0, %c0_i32, %c0_i32_0, %c0_i32_1 : i32, i32, i32, i32
  }
  func.func @transform_1(%arg0: i32) -> (i32, i32, i32, i32) {
    %c0_i32 = arith.constant 0 : i32
    %c0_i32_0 = arith.constant 0 : i32
    %c0_i32_1 = arith.constant 0 : i32
    %c0_i32_2 = arith.constant 0 : i32
    return %arg0, %c0_i32, %c0_i32_0, %c0_i32_1 : i32, i32, i32, i32
  }
  func.func @transform_2(%arg0: i32) -> (i32, i32) {
    %c0_i32 = arith.constant 0 : i32
    %c0_i32_0 = arith.constant 0 : i32
    %c0_i32_1 = arith.constant 0 : i32
    return %c0_i32, %c0_i32_0 : i32, i32
  }
  func.func @transform_3(%arg0: i32) -> (i32, i32) {
    %c0_i32 = arith.constant 0 : i32
    %c0_i32_0 = arith.constant 0 : i32
    %c0_i32_1 = arith.constant 0 : i32
    return %c0_i32, %c0_i32_0 : i32, i32
  }
  func.func @transform_4(%arg0: i32) -> (i32, i32) {
    %c0_i32 = arith.constant 0 : i32
    %c0_i32_0 = arith.constant 0 : i32
    %c0_i32_1 = arith.constant 0 : i32
    return %c0_i32, %c0_i32_0 : i32, i32
  }
  func.func @transform_5(%arg0: i32) -> (i32, i32, i32) {
    %c0_i32 = arith.constant 0 : i32
    %c0_i32_0 = arith.constant 0 : i32
    %c0_i32_1 = arith.constant 0 : i32
    return %arg0, %c0_i32, %c0_i32_0 : i32, i32, i32
  }
}

</mosaic_0001>

<bundles_post_ra>
// kernel: expansion_cell.1
= control target key start
LH: loop header
LB: loop body
LE: loop exit
PB: predicated region body
PF: predicated region fallthrough
CT: control target
= control target key end

     0   :  { %10 = vsyncpa [#allocation6], 0  ;;  %s15205_s0 = inlined_call_operand.vmem [shape: f32[2,16,16,8], index: 0, kind: input, shape index: {}]   ;;  %s15206_s1 = inlined_call_operand.vmem [shape: f32[2,16,16,8], index: 1, kind: input, shape index: {}]   ;;  %s15207_s2 = inlined_call_operand.vmem [shape: f32[72,8], index: 2, kind: input, shape index: {}]   ;;  %s15208_s3 = inlined_call_operand.vmem [shape: f32[72,8], index: 3, kind: input, shape index: {}]   ;;  %s15209_s4 = inlined_call_operand.vmem [shape: f32[72,8], index: 4, kind: input, shape index: {}]   ;;  %s15210_s5 = inlined_call_operand.hbm [shape: f32[2,256,24], index: 5, kind: output, shape index: {}]  }
   0x1   :  { %12 = vsyncpa [#allocation6 + $0x1], 0  ;;  %s8327_s18 = smov 0   ;;  %s8329_s19 = smov 0  }
   0x2   :  { %s8331_s20 = smov 0   ;;  %s8333_s21 = smov 0  }
   0x3 LB: > { %s8348_s22 = sadd.s32 4294967295, %s8285_s21   ;;  %s7911_s23 = sadd.s32 4294967294, %s8285_s21   ;;  %s8285_s21 = sphi %s8333_s21, %s16537_s21   ;;  %s8281_s20 = sphi %s8331_s20, %s16536_s20   ;;  %s8277_s19 = sphi %s8329_s19, %s16535_s19   ;;  %s8273_s18 = sphi %s8327_s18, %s16534_s18  }
   0x4   : > { %s8352_s24 = sadd.s32 1, %s8285_s21   ;;  %s140_s25 = sadd.s32 1, %s8281_s20 }
   0x5   : > { %s137_s26 = ssub.s32 %s8285_s21, %s8352_s24  ;;  %p150_p0 = scmp.ne.s32.totalorder %s8281_s20, %s8277_s19 }
   0x6   : > { %p138_p1 = scmp.eq.s32.totalorder %s137_s26, 0  ;;  %p151_p2 = scmp.eq.s32.totalorder %s8348_s22, 1 }
   0x7   : > { %p156_p3 = scmp.ne.s32.totalorder %s8277_s19, %s8273_s18  ;;  %p157_p4 = scmp.eq.s32.totalorder %s7911_s23, 1 }
   0x8   : > { %s8363_s27 = scalar_select %p138_p1, %s8281_s20, %s140_s25  }
   0x9   : > { %p8365_p5 = por %p151_p2, %p150_p0  ;;  %p8369_p6 = por %p157_p4, %p156_p3 }
   0xa   : > { %p7914_p7 = scmp.ge.s32.totalorder %s8285_s21, 1  ;;  %p200_p8 = scmp.lt.s32.totalorder %s8285_s21, 3 }
   0xc   : > { %p201_p9 = pnand %p7914_p7, %p200_p8 }
   0xe   : > { %204 = sbr.rel (%p201_p9) target bundleno = 2695 (0xa87), region = 40 }
  0x13   : > { %vm307_vm0 = vcmask 64512   ;;  %v15211_v0 = vmov 0.0   ;;  %s8288_s30 = smov 8   ;;  %vm310_vm1 = vcmask 62464   ;;  %vm328_vm2 = vcmask 59392   ;;  %p233_p10 = scmp.lt.s32.totalorder %s8348_s22, 1 }
  0x14   : > { %315 = vst.msk [vmem:[#allocation2 + $0x30] sm:$0xff] %vm307_vm0, %v15211_v0  ;;  %s8289_s11 = smov 16   ;;  %s8290_s12 = smov 24  }
  0x15   : > { %316 = vst.msk [vmem:[#allocation2 + $0x38] sm:$0xff] %vm307_vm0, %v15211_v0  ;;  %s8543_s6 = scalar_select %p233_p10, %s8348_s22, 1 }
  0x16   : > { %319 = vst.msk [vmem:[#allocation2 + $0x1c8] sm:$0xff] %vm307_vm0, %v15211_v0  ;;  %s8291_s13 = smov 32   ;;  %s8292_s14 = smov 40  }
  0x17   : > { %320 = vst.msk [vmem:[#allocation2 + $0x1d0] sm:$0xff] %vm307_vm0, %v15211_v0  ;;  %s8021_s7 = sshll.u32 %s8543_s6, 8  ;;  %s8293_s15 = smov 48  }
  0x18   : > { %373 = vst.msk [vmem:[#allocation3] sm:$0xff] %vm307_vm0, %v15211_v0  ;;  %s8565_s10 = scalar_lea.vmem %s15205_s0, %s8021_s7  ;;  %s15234_s16 = smov 56  }
  0x19   : > { %374 = vst.msk [vmem:[#allocation3 + $0x8] sm:$0xff] %vm307_vm0, %v15211_v0  ;;  %v245_v3 = vld [vmem:[%s8565_s10 + $0x10] sm:$0xff]  ;;  %v243_v6 = vld [vmem:[%s8565_s10] sm:$0xff]  ;;  %v246_v8 = vld [vmem:[%s8565_s10 + $0x18] sm:$0xff]  ;;  %s8295_s17 = smov 64   ;;  %s9699_s23 = scalar_lea.vmem %s15206_s1, %s8021_s7 }
  0x1a   : > { %376 = vst.msk [vmem:[#allocation3 + $0x18] sm:$0xff] %vm307_vm0, %v15211_v0  ;;  %v515_v4 = vmul.f32 0.01, %v245_v3  ;;  %vm483_vm3 = vcmp.gt.f32.partialorder %v245_v3, 0.0  ;;  %v247_v7 = vld [vmem:[%s8565_s10 + $0x20] sm:$0xff]  ;;  %vm481_vm4 = vcmp.gt.f32.partialorder %v243_v6, 0.0 }
  0x1b   : > { %377 = vst.msk [vmem:[#allocation3 + $0x20] sm:$0xff] %vm307_vm0, %v15211_v0  ;;  %v513_v9 = vmul.f32 0.01, %v243_v6  ;;  %v244_v10 = vld [vmem:[%s8565_s10 + $0x8] sm:$0xff]  ;;  %vm485_vm5 = vcmp.gt.f32.partialorder %v247_v7, 0.0  ;;  %v250_v12 = vld [vmem:[%s8565_s10 + $0x38] sm:$0xff] }
  0x1c   : > { %v805_v1 = vld [vmem:[#allocation2 + $0x33] sm:$0xff]  ;;  %379 = vst.msk [vmem:[#allocation3 + $0x30] sm:$0xff] %vm307_vm0, %v15211_v0  ;;  %v547_v5 = vsel %vm483_vm3, %v245_v3, %v515_v4  ;;  %v517_v11 = vmul.f32 0.01, %v247_v7  ;;  %vm484_vm6 = vcmp.gt.f32.partialorder %v246_v8, 0.0  ;;  %vm482_vm7 = vcmp.gt.f32.partialorder %v244_v10, 0.0 }
  0x1d   : > { %1094 = vrot.lane.b32.xlu0 %v805_v1, %s8288_s30  ;;  %380 = vst.msk [vmem:[#allocation3 + $0x38] sm:$0xff] %vm307_vm0, %v15211_v0  ;;  %v516_v13 = vmul.f32 0.01, %v246_v8  ;;  %v249_v14 = vld [vmem:[%s8565_s10 + $0x30] sm:$0xff]  ;;  %v514_v15 = vmul.f32 0.01, %v244_v10  ;;  %v545_v17 = vsel %vm481_vm4, %v243_v6, %v513_v9 }
  0x1e   : > { %383 = vst.msk [vmem:[#allocation3 + $0x1c8] sm:$0xff] %vm307_vm0, %v15211_v0  ;;  %v248_v16 = vld [vmem:[%s8565_s10 + $0x28] sm:$0xff]  ;;  %vm488_vm8 = vcmp.gt.f32.partialorder %v250_v12, 0.0  ;;  %v520_v18 = vmul.f32 0.01, %v250_v12  ;;  %v253_v19 = vld [vmem:[%s8565_s10 + $0x50] sm:$0xff]  ;;  %v549_v20 = vsel %vm485_vm5, %v247_v7, %v517_v11 }
  0x1f   : > { %384 = vst.msk [vmem:[#allocation3 + $0x1d0] sm:$0xff] %vm307_vm0, %v15211_v0  ;;  %vm487_vm9 = vcmp.gt.f32.partialorder %v249_v14, 0.0  ;;  %v519_v21 = vmul.f32 0.01, %v249_v14  ;;  %v252_v22 = vld [vmem:[%s8565_s10 + $0x48] sm:$0xff]  ;;  %v548_v24 = vsel %vm484_vm6, %v246_v8, %v516_v13  ;;  %v251_v26 = vld [vmem:[%s8565_s10 + $0x40] sm:$0xff]  ;;  %v546_v27 = vsel %vm482_vm7, %v244_v10, %v514_v15 }
  0x20   : > { %386 = vst.msk [vmem:[#allocation3 + $0x1e0] sm:$0xff] %vm307_vm0, %v15211_v0  ;;  %v518_v25 = vmul.f32 0.01, %v248_v16  ;;  %vm486_vm10 = vcmp.gt.f32.partialorder %v248_v16, 0.0  ;;  %v523_v28 = vmul.f32 0.01, %v253_v19  ;;  %v552_v30 = vsel %vm488_vm8, %v250_v12, %v520_v18 }
  0x21   : > { %387 = vst.msk [vmem:[#allocation3 + $0x1e8] sm:$0xff] %vm307_vm0, %v15211_v0  ;;  %v256_v29 = vld [vmem:[%s8565_s10 + $0x68] sm:$0xff]  ;;  %vm491_vm11 = vcmp.gt.f32.partialorder %v253_v19, 0.0  ;;  %v522_v31 = vmul.f32 0.01, %v252_v22  ;;  %v255_v32 = vld [vmem:[%s8565_s10 + $0x60] sm:$0xff]  ;;  %v551_v33 = vsel %vm487_vm9, %v249_v14, %v519_v21 }
  0x22   : > { %389 = vst.msk [vmem:[#allocation3 + $0x1f8] sm:$0xff] %vm307_vm0, %v15211_v0  ;;  %vm490_vm12 = vcmp.gt.f32.partialorder %v252_v22, 0.0  ;;  %v521_v34 = vmul.f32 0.01, %v251_v26  ;;  %v254_v35 = vld [vmem:[%s8565_s10 + $0x58] sm:$0xff]  ;;  %v550_v36 = vsel %vm486_vm10, %v248_v16, %v518_v25  ;;  %vm489_vm13 = vcmp.gt.f32.partialorder %v251_v26, 0.0 }
  0x23   : > { %390 = vst.msk [vmem:[#allocation3 + $0x200] sm:$0xff] %vm307_vm0, %v15211_v0  ;;  %v526_v37 = vmul.f32 0.01, %v256_v29  ;;  %v259_v38 = vld [vmem:[%s8565_s10 + $0x80] sm:$0xff]  ;;  %v555_v39 = vsel %vm491_vm11, %v253_v19, %v523_v28  ;;  %vm494_vm14 = vcmp.gt.f32.partialorder %v256_v29, 0.0  ;;  %v258_v41 = vld [vmem:[%s8565_s10 + $0x78] sm:$0xff]  ;;  %v554_v42 = vsel %vm490_vm12, %v252_v22, %v522_v31 }
  0x24   : > { %436 = vst.msk [vmem:[#allocation4] sm:$0xff] %vm307_vm0, %v15211_v0  ;;  %v525_v40 = vmul.f32 0.01, %v255_v32  ;;  %vm493_vm15 = vcmp.gt.f32.partialorder %v255_v32, 0.0  ;;  %v524_v43 = vmul.f32 0.01, %v254_v35  ;;  %v553_v45 = vsel %vm489_vm13, %v251_v26, %v521_v34 }
  0x25   : > { %437 = vst.msk [vmem:[#allocation4 + $0x8] sm:$0xff] %vm307_vm0, %v15211_v0  ;;  %v257_v44 = vld [vmem:[%s8565_s10 + $0x70] sm:$0xff]  ;;  %v529_v46 = vmul.f32 0.01, %v259_v38  ;;  %v558_v48 = vsel %vm494_vm14, %v256_v29, %v526_v37  ;;  %v528_v49 = vmul.f32 0.01, %v258_v41 }
  0x26   : > { %441 = vst.msk [vmem:[#allocation4 + $0x198] sm:$0xff] %vm307_vm0, %v15211_v0  ;;  %v557_v51 = vsel %vm493_vm15, %v255_v32, %v525_v40  ;;  %vm496_vm3 = vcmp.gt.f32.partialorder %v258_v41, 0.0  ;;  %v527_v52 = vmul.f32 0.01, %v257_v44  ;;  %vm495_vm4 = vcmp.gt.f32.partialorder %v257_v44, 0.0  ;;  %v262_v57 = vld [vmem:[%s8565_s10 + $0x98] sm:$0xff] }
  0x27   : > { %442 = vst.msk [vmem:[#allocation4 + $0x1a0] sm:$0xff] %vm307_vm0, %v15211_v0  ;;  %v560_v56 = vsel %vm496_vm3, %v258_v41, %v528_v49  ;;  %v532_v59 = vmul.f32 0.01, %v262_v57  ;;  %v261_v60 = vld [vmem:[%s8565_s10 + $0x90] sm:$0xff]  ;;  %v260_v61 = vld [vmem:[%s8565_s10 + $0x88] sm:$0xff]  ;;  %vm500_vm5 = vcmp.gt.f32.partialorder %v262_v57, 0.0 }
  0x28   : > { %317 = vst.msk [vmem:[#allocation2 + $0x40] sm:$0x3f] %vm310_vm1, %v15211_v0  ;;  %v559_v58 = vsel %vm495_vm4, %v257_v44, %v527_v52  ;;  %v531_v63 = vmul.f32 0.01, %v261_v60  ;;  %vm499_vm6 = vcmp.gt.f32.partialorder %v261_v60, 0.0  ;;  %vm498_vm7 = vcmp.gt.f32.partialorder %v260_v61, 0.0 }
  0x29   : > { %321 = vst.msk [vmem:[#allocation2 + $0x1d8] sm:$0x3f] %vm310_vm1, %v15211_v0  ;;  %v530_v3 = vmul.f32 0.01, %v260_v61  ;;  %v265_v7 = vld [vmem:[%s8565_s10 + $0xb0] sm:$0xff]  ;;  %v264_v9 = vld [vmem:[%s8565_s10 + $0xa8] sm:$0xff] }
  0x2a   : > { %331 = vst.msk [vmem:[#allocation2 + $0x30] sm:$0x7] %vm328_vm2, %v15211_v0  ;;  %v535_v8 = vmul.f32 0.01, %v265_v7  ;;  %v263_v10 = vld [vmem:[%s8565_s10 + $0xa0] sm:$0xff]  ;;  %vm503_vm8 = vcmp.gt.f32.partialorder %v265_v7, 0.0 }
  0x2b   : > { %332 = vst.msk [vmem:[#allocation2 + $0x48] sm:$0x7] %vm328_vm2, %v15211_v0  ;;  %v562_v6 = vsel %vm498_vm7, %v260_v61, %v530_v3  ;;  %v534_v12 = vmul.f32 0.01, %v264_v9  ;;  %v533_v13 = vmul.f32 0.01, %v263_v10 }
  0x2c   : > { %333 = vst.msk [vmem:[#allocation2 + $0x60] sm:$0x7] %vm328_vm2, %v15211_v0  ;;  %v567_v15 = vsel %vm503_vm8, %v265_v7, %v535_v8  ;;  %vm502_vm9 = vcmp.gt.f32.partialorder %v264_v9, 0.0  ;;  %vm501_vm10 = vcmp.gt.f32.partialorder %v263_v10, 0.0  ;;  %v268_v19 = vld [vmem:[%s8565_s10 + $0xc8] sm:$0xff]  ;;  %v267_v21 = vld [vmem:[%s8565_s10 + $0xc0] sm:$0xff] }
  0x2d   : > { %334 = vst.msk [vmem:[#allocation2 + $0x78] sm:$0x7] %vm328_vm2, %v15211_v0  ;;  %v565_v18 = vsel %vm501_vm10, %v263_v10, %v533_v13  ;;  %v266_v22 = vld [vmem:[%s8565_s10 + $0xb8] sm:$0xff]  ;;  %vm506_vm11 = vcmp.gt.f32.partialorder %v268_v19, 0.0  ;;  %v537_v25 = vmul.f32 0.01, %v267_v21 }
  0x2e   : > { %335 = vst.msk [vmem:[#allocation2 + $0x90] sm:$0x7] %vm328_vm2, %v15211_v0  ;;  %v536_v26 = vmul.f32 0.01, %v266_v22  ;;  %vm505_vm12 = vcmp.gt.f32.partialorder %v267_v21, 0.0  ;;  %vm504_vm13 = vcmp.gt.f32.partialorder %v266_v22, 0.0 }
  0x2f   : > { %v806_v2 = vld [vmem:[#allocation2 + $0x3b] sm:$0xff]  ;;  %336 = vst.msk [vmem:[#allocation2 + $0xa8] sm:$0x7] %vm328_vm2, %v15211_v0  ;;  %v272_v44 = vld [vmem:[%s8565_s10 + $0xe8] sm:$0xff]  ;;  %s15924_s6 = smov 56   ;;  %s8243_s25 = scalar_lea.hbm %s15210_s5, 512 }
  0x30   : > { %1096 = vrot.lane.b32.xlu0 %v806_v2, %s8288_s30  ;;  %337 = vst.msk [vmem:[#allocation2 + $0xc0] sm:$0x7] %vm328_vm2, %v15211_v0  ;;  %v564_v2 = vsel %vm500_vm5, %v262_v57, %v532_v59  ;;  %v568_v31 = vsel %vm504_vm13, %v266_v22, %v536_v26  ;;  %v271_v32 = vld [vmem:[%s8565_s10 + $0xe0] sm:$0xff]  ;;  %v270_v34 = vld [vmem:[%s8565_s10 + $0xd8] sm:$0xff] }
  0x31   : > { %338 = vst.msk [vmem:[#allocation2 + $0xd8] sm:$0x7] %vm328_vm2, %v15211_v0  ;;  %vm509_vm14 = vcmp.gt.f32.partialorder %v271_v32, 0.0  ;;  %v540_v37 = vmul.f32 0.01, %v270_v34  ;;  %vm508_vm15 = vcmp.gt.f32.partialorder %v270_v34, 0.0 }
  0x32   : > { %339 = vst.msk [vmem:[#allocation2 + $0xf0] sm:$0x7] %vm328_vm2, %v15211_v0  ;;  %v837_v3 = vld [vmem:[#allocation2 + $0x34] sm:$0xff] }
  0x33   : > { %340 = vst.msk [vmem:[#allocation2 + $0x108] sm:$0x7] %vm328_vm2, %v15211_v0 }
  0x34   : > { %341 = vst.msk [vmem:[#allocation2 + $0x120] sm:$0x7] %vm328_vm2, %v15211_v0 }
  0x35   : > { %342 = vst.msk [vmem:[#allocation2 + $0x138] sm:$0x7] %vm328_vm2, %v15211_v0 }
  0x36   : > { %343 = vst.msk [vmem:[#allocation2 + $0x150] sm:$0x7] %vm328_vm2, %v15211_v0 }
  0x37   : > { %344 = vst.msk [vmem:[#allocation2 + $0x168] sm:$0x7] %vm328_vm2, %v15211_v0 }
  0x38   : > { %345 = vst.msk [vmem:[#allocation2 + $0x180] sm:$0x7] %vm328_vm2, %v15211_v0 }
  0x39   : > { %346 = vst.msk [vmem:[#allocation2 + $0x198] sm:$0x7] %vm328_vm2, %v15211_v0 }
  0x3a   : > { %347 = vst.msk [vmem:[#allocation2 + $0x1b0] sm:$0x7] %vm328_vm2, %v15211_v0 }
  0x3b   : > { %348 = vst.msk [vmem:[#allocation2 + $0x1c8] sm:$0x7] %vm328_vm2, %v15211_v0 }
  0x3c   : > { %353 = vst.msk [vmem:[#allocation2 + $0x43] sm:$0x7] %vm328_vm2, %v15211_v0 }
  0x3d   : > { %354 = vst.msk [vmem:[#allocation2 + $0x5b] sm:$0x7] %vm328_vm2, %v15211_v0 }
  0x3e   : > { %355 = vst.msk [vmem:[#allocation2 + $0x73] sm:$0x7] %vm328_vm2, %v15211_v0 }
  0x3f   : > { %356 = vst.msk [vmem:[#allocation2 + $0x8b] sm:$0x7] %vm328_vm2, %v15211_v0 }
  0x40   : > { %357 = vst.msk [vmem:[#allocation2 + $0xa3] sm:$0x7] %vm328_vm2, %v15211_v0 }
  0x41   : > { %358 = vst.msk [vmem:[#allocation2 + $0xbb] sm:$0x7] %vm328_vm2, %v15211_v0 }
  0x42   : > { %359 = vst.msk [vmem:[#allocation2 + $0xd3] sm:$0x7] %vm328_vm2, %v15211_v0 }
  0x43   : > { %360 = vst.msk [vmem:[#allocation2 + $0xeb] sm:$0x7] %vm328_vm2, %v15211_v0 }
  0x44   : > { %361 = vst.msk [vmem:[#allocation2 + $0x103] sm:$0x7] %vm328_vm2, %v15211_v0 }
  0x45   : > { %362 = vst.msk [vmem:[#allocation2 + $0x11b] sm:$0x7] %vm328_vm2, %v15211_v0 }
  0x46   : > { %363 = vst.msk [vmem:[#allocation2 + $0x133] sm:$0x7] %vm328_vm2, %v15211_v0 }
  0x47   : > { %364 = vst.msk [vmem:[#allocation2 + $0x14b] sm:$0x7] %vm328_vm2, %v15211_v0 }
  0x48   : > { %365 = vst.msk [vmem:[#allocation2 + $0x163] sm:$0x7] %vm328_vm2, %v15211_v0 }
  0x49   : > { %366 = vst.msk [vmem:[#allocation2 + $0x17b] sm:$0x7] %vm328_vm2, %v15211_v0 }
  0x4a   : > { %367 = vst.msk [vmem:[#allocation2 + $0x193] sm:$0x7] %vm328_vm2, %v15211_v0 }
  0x4b   : > { %368 = vst.msk [vmem:[#allocation2 + $0x1ab] sm:$0x7] %vm328_vm2, %v15211_v0 }
  0x4c   : > { %369 = vst.msk [vmem:[#allocation2 + $0x1c3] sm:$0x7] %vm328_vm2, %v15211_v0 }
  0x4d   : > { %375 = vst.msk [vmem:[#allocation3 + $0x10] sm:$0x3f] %vm310_vm1, %v15211_v0 }
  0x4e   : > { %378 = vst.msk [vmem:[#allocation3 + $0x28] sm:$0x3f] %vm310_vm1, %v15211_v0 }
  0x4f   : > { %381 = vst.msk [vmem:[#allocation3 + $0x40] sm:$0x3f] %vm310_vm1, %v15211_v0 }
  0x50   : > { %385 = vst.msk [vmem:[#allocation3 + $0x1d8] sm:$0x3f] %vm310_vm1, %v15211_v0 }
  0x51   : > { %388 = vst.msk [vmem:[#allocation3 + $0x1f0] sm:$0x3f] %vm310_vm1, %v15211_v0 }
  0x52   : > { %391 = vst.msk [vmem:[#allocation3 + $0x208] sm:$0x3f] %vm310_vm1, %v15211_v0  ;;  %vm492_vm1 = vcmp.gt.f32.partialorder %v254_v35, 0.0 }
  0x53   : > { %392 = vst.msk [vmem:[#allocation3] sm:$0x7] %vm328_vm2, %v15211_v0  ;;  %v556_v54 = vsel %vm492_vm1, %v254_v35, %v524_v43  ;;  %v269_v35 = vld [vmem:[%s8565_s10 + $0xd0] sm:$0xff] }
  0x54   : > { %393 = vst.msk [vmem:[#allocation3 + $0x18] sm:$0x7] %vm328_vm2, %v15211_v0  ;;  %vm507_vm1 = vcmp.gt.f32.partialorder %v269_v35, 0.0 }
  0x55   : > { %394 = vst.msk [vmem:[#allocation3 + $0x30] sm:$0x7] %vm328_vm2, %v15211_v0 }
  0x56   : > { %395 = vst.msk [vmem:[#allocation3 + $0x48] sm:$0x7] %vm328_vm2, %v15211_v0 }
  0x57   : > { %396 = vst.msk [vmem:[#allocation3 + $0x60] sm:$0x7] %vm328_vm2, %v15211_v0 }
  0x58   : > { %397 = vst.msk [vmem:[#allocation3 + $0x78] sm:$0x7] %vm328_vm2, %v15211_v0 }
  0x59   : > { %398 = vst.msk [vmem:[#allocation3 + $0x90] sm:$0x7] %vm328_vm2, %v15211_v0 }
  0x5a   : > { %399 = vst.msk [vmem:[#allocation3 + $0xa8] sm:$0x7] %vm328_vm2, %v15211_v0 }
  0x5b   : > { %400 = vst.msk [vmem:[#allocation3 + $0xc0] sm:$0x7] %vm328_vm2, %v15211_v0 }
  0x5c   : > { %401 = vst.msk [vmem:[#allocation3 + $0xd8] sm:$0x7] %vm328_vm2, %v15211_v0 }
  0x5d   : > { %402 = vst.msk [vmem:[#allocation3 + $0xf0] sm:$0x7] %vm328_vm2, %v15211_v0 }
  0x5e   : > { %403 = vst.msk [vmem:[#allocation3 + $0x108] sm:$0x7] %vm328_vm2, %v15211_v0 }
  0x5f   : > { %404 = vst.msk [vmem:[#allocation3 + $0x120] sm:$0x7] %vm328_vm2, %v15211_v0 }
  0x60   : > { %405 = vst.msk [vmem:[#allocation3 + $0x138] sm:$0x7] %vm328_vm2, %v15211_v0 }
  0x61   : > { %406 = vst.msk [vmem:[#allocation3 + $0x150] sm:$0x7] %vm328_vm2, %v15211_v0 }
  0x62   : > { %407 = vst.msk [vmem:[#allocation3 + $0x168] sm:$0x7] %vm328_vm2, %v15211_v0 }
  0x63   : > { %408 = vst.msk [vmem:[#allocation3 + $0x180] sm:$0x7] %vm328_vm2, %v15211_v0 }
  0x64   : > { %409 = vst.msk [vmem:[#allocation3 + $0x198] sm:$0x7] %vm328_vm2, %v15211_v0 }
  0x65   : > { %410 = vst.msk [vmem:[#allocation3 + $0x1b0] sm:$0x7] %vm328_vm2, %v15211_v0 }
  0x66   : > { %411 = vst.msk [vmem:[#allocation3 + $0x1c8] sm:$0x7] %vm328_vm2, %v15211_v0 }
  0x67   : > { %412 = vst.msk [vmem:[#allocation3 + $0x1e0] sm:$0x7] %vm328_vm2, %v15211_v0 }
  0x68   : > { %413 = vst.msk [vmem:[#allocation3 + $0x1f8] sm:$0x7] %vm328_vm2, %v15211_v0 }
  0x69   : > { %417 = vst.msk [vmem:[#allocation3 + $0x5b] sm:$0x7] %vm328_vm2, %v15211_v0 }
  0x6a   : > { %418 = vst.msk [vmem:[#allocation3 + $0x73] sm:$0x7] %vm328_vm2, %v15211_v0 }
  0x6b   : > { %419 = vst.msk [vmem:[#allocation3 + $0x8b] sm:$0x7] %vm328_vm2, %v15211_v0 }
  0x6c   : > { %420 = vst.msk [vmem:[#allocation3 + $0xa3] sm:$0x7] %vm328_vm2, %v15211_v0 }
  0x6d   : > { %421 = vst.msk [vmem:[#allocation3 + $0xbb] sm:$0x7] %vm328_vm2, %v15211_v0 }
  0x6e   : > { %422 = vst.msk [vmem:[#allocation3 + $0xd3] sm:$0x7] %vm328_vm2, %v15211_v0 }
  0x6f   : > { %423 = vst.msk [vmem:[#allocation3 + $0xeb] sm:$0x7] %vm328_vm2, %v15211_v0 }
  0x70   : > { %424 = vst.msk [vmem:[#allocation3 + $0x103] sm:$0x7] %vm328_vm2, %v15211_v0 }
  0x71   : > { %425 = vst.msk [vmem:[#allocation3 + $0x11b] sm:$0x7] %vm328_vm2, %v15211_v0 }
  0x72   : > { %426 = vst.msk [vmem:[#allocation3 + $0x133] sm:$0x7] %vm328_vm2, %v15211_v0 }
  0x73   : > { %427 = vst.msk [vmem:[#allocation3 + $0x14b] sm:$0x7] %vm328_vm2, %v15211_v0 }
  0x74   : > { %428 = vst.msk [vmem:[#allocation3 + $0x163] sm:$0x7] %vm328_vm2, %v15211_v0 }
  0x75   : > { %429 = vst.msk [vmem:[#allocation3 + $0x17b] sm:$0x7] %vm328_vm2, %v15211_v0 }
  0x76   : > { %430 = vst.msk [vmem:[#allocation3 + $0x193] sm:$0x7] %vm328_vm2, %v15211_v0 }
  0x77   : > { %431 = vst.msk [vmem:[#allocation3 + $0x1ab] sm:$0x7] %vm328_vm2, %v15211_v0 }
  0x78   : > { %432 = vst.msk [vmem:[#allocation3 + $0x1c3] sm:$0x7] %vm328_vm2, %v15211_v0 }
  0x79   : > { %580 = vst.msk [vmem:[#allocation2 + $0x63] sm:$0xff] %vm307_vm0, %v547_v5  ;;  %v563_v5 = vsel %vm499_vm6, %v261_v60, %v531_v63 }
  0x7a   : > { %370 = vst.msk [vmem:[#allocation2 + $0x1db] sm:$0x7] %vm328_vm2, %v15211_v0 }
  0x7b   : > { %414 = vst.msk [vmem:[#allocation3 + $0x13] sm:$0x7] %vm328_vm2, %v15211_v0 }
  0x7c   : > { %415 = vst.msk [vmem:[#allocation3 + $0x2b] sm:$0x7] %vm328_vm2, %v15211_v0 }
  0x7d   : > { %416 = vst.msk [vmem:[#allocation3 + $0x43] sm:$0x7] %vm328_vm2, %v15211_v0 }
  0x7e   : > { %433 = vst.msk [vmem:[#allocation3 + $0x1db] sm:$0x7] %vm328_vm2, %v15211_v0 }
  0x7f   : > { %434 = vst.msk [vmem:[#allocation3 + $0x1f3] sm:$0x7] %vm328_vm2, %v15211_v0 }
  0x80   : > { %v8616_v23 = vld [vmem:[#allocation2 + $0x63] sm:$0xff]  ;;  %435 = vst.msk [vmem:[#allocation3 + $0x20b] sm:$0x7] %vm328_vm2, %v15211_v0  ;;  %vm497_vm2 = vcmp.gt.f32.partialorder %v259_v38, 0.0 }
  0x81   : > { %1102 = vrot.lane.b32.xlu2 %v8616_v23, %s8288_s30  ;;  %578 = vst.msk [vmem:[#allocation2 + $0x4b] sm:$0xff] %vm307_vm0, %v545_v17  ;;  %v561_v55 = vsel %vm497_vm2, %v259_v38, %v529_v46  ;;  %v566_v17 = vsel %vm502_vm9, %v264_v9, %v534_v12  ;;  %v539_v38 = vmul.f32 0.01, %v269_v35  ;;  %v542_v46 = vmul.f32 0.01, %v272_v44 }
  0x82   : > { %582 = vst.msk [vmem:[#allocation2 + $0x7b] sm:$0xff] %vm307_vm0, %v549_v20  ;;  %v538_v20 = vmul.f32 0.01, %v268_v19  ;;  %vm510_vm2 = vcmp.gt.f32.partialorder %v272_v44, 0.0 }
  0x83   : > { %581 = vst.msk [vmem:[#allocation2 + $0x6b] sm:$0xff] %vm307_vm0, %v548_v24  ;;  %v571_v43 = vsel %vm507_vm1, %v269_v35, %v539_v38  ;;  %vm2217_vm1 = vcmask 326656  }
  0x84   : > { %579 = vst.msk [vmem:[#allocation2 + $0x53] sm:$0xff] %vm307_vm0, %v546_v27  ;;  %v570_v28 = vsel %vm506_vm11, %v268_v19, %v538_v20  ;;  %vm2118_vm11 = vcmask 130048  }
  0x85   : > { %585 = vst.msk [vmem:[#allocation2 + $0x9b] sm:$0xff] %vm307_vm0, %v552_v30  ;;  %v569_v30 = vsel %vm505_vm12, %v267_v21, %v537_v25 }
  0x86   : > { %584 = vst.msk [vmem:[#allocation2 + $0x93] sm:$0xff] %vm307_vm0, %v551_v33  ;;  %v541_v33 = vmul.f32 0.01, %v271_v32 }
  0x87   : > { %583 = vst.msk [vmem:[#allocation2 + $0x83] sm:$0xff] %vm307_vm0, %v550_v36 }
  0x88   : > { %v8640_v47 = vld [vmem:[#allocation2 + $0x4b] sm:$0xff]  ;;  %588 = vst.msk [vmem:[#allocation2 + $0xc3] sm:$0xff] %vm307_vm0, %v555_v39  ;;  %v573_v40 = vsel %vm509_vm14, %v271_v32, %v541_v33 }
  0x89   : > { %1098 = vrot.lane.b32.xlu1 %v8640_v47, %s8288_s30  ;;  %v8645_v50 = vld [vmem:[#allocation2 + $0x7b] sm:$0xff]  ;;  %587 = vst.msk [vmem:[#allocation2 + $0xb3] sm:$0xff] %vm307_vm0, %v554_v42  ;;  %v572_v42 = vsel %vm508_vm15, %v270_v34, %v540_v37  ;;  %vm2151_vm15 = vcmask 195584  }
  0x8a   : > { %1106 = vrot.lane.b32.xlu0 %v8645_v50, %s8288_s30  ;;  %v8650_v53 = vld [vmem:[#allocation2 + $0x6b] sm:$0xff]  ;;  %586 = vst.msk [vmem:[#allocation2 + $0xab] sm:$0xff] %vm307_vm0, %v553_v45 }
  0x8b   : > { %1104 = vrot.lane.b32.xlu2 %v8650_v53, %s8288_s30  ;;  %591 = vst.msk [vmem:[#allocation2 + $0xe3] sm:$0xff] %vm307_vm0, %v558_v48  ;;  %v8662_v62 = vld [vmem:[#allocation2 + $0x53] sm:$0xff] }
  0x8c   : > { %590 = vst.msk [vmem:[#allocation2 + $0xdb] sm:$0xff] %vm307_vm0, %v557_v51  ;;  %v8665_v1 = vld [vmem:[#allocation2 + $0x9b] sm:$0xff]  ;;  %v574_v51 = vsel %vm510_vm2, %v272_v44, %v542_v46  ;;  %v8804_v9 = vld [vmem:[#allocation2 + $0x4c] sm:$0xff]  ;;  %vm2184_vm2 = vcmask 261120  }
  0x8d   : > { %589 = vst.msk [vmem:[#allocation2 + $0xcb] sm:$0xff] %vm307_vm0, %v556_v54  ;;  %v8668_v4 = vld [vmem:[#allocation2 + $0x93] sm:$0xff] }
  0x8e   : > { %594 = vst.msk [vmem:[#allocation2 + $0x10b] sm:$0xff] %vm307_vm0, %v561_v55  ;;  %v8683_v11 = vld [vmem:[#allocation2 + $0x83] sm:$0xff]  ;;  %v8794_v7 = vld [vmem:[#allocation2 + $0x54] sm:$0xff] }
  0x8f   : > { %593 = vst.msk [vmem:[#allocation2 + $0xfb] sm:$0xff] %vm307_vm0, %v560_v56  ;;  %v8685_v14 = vld [vmem:[#allocation2 + $0xc3] sm:$0xff]  ;;  %v8824_v19 = vpop.permute.xlu0 %1094  ;;  %v8834_v21 = vld [vmem:[#allocation2 + $0x94] sm:$0xff] }
  0x90   : > { %592 = vst.msk [vmem:[#allocation2 + $0xf3] sm:$0xff] %vm307_vm0, %v559_v58  ;;  %v8687_v16 = vld [vmem:[#allocation2 + $0xb3] sm:$0xff]  ;;  %v8806_v10 = vld [vmem:[#allocation2 + $0x84] sm:$0xff]  ;;  %v8808_v12 = vld [vmem:[#allocation2 + $0x7c] sm:$0xff] }
  0x91   : > { %1100 = vrot.lane.b32.xlu1 %v8662_v62, %s8288_s30  ;;  %597 = vst.msk [vmem:[#allocation2 + $0x12b] sm:$0xff] %vm307_vm0, %v564_v2  ;;  %v8701_v24 = vld [vmem:[#allocation2 + $0xab] sm:$0xff]  ;;  %v838_v2 = vld [vmem:[#allocation2 + $0x3c] sm:$0xff] }
  0x92   : > { %1112 = vrot.lane.b32.xlu0 %v8665_v1, %s8288_s30  ;;  %596 = vst.msk [vmem:[#allocation2 + $0x123] sm:$0xff] %vm307_vm0, %v563_v5  ;;  %v8703_v27 = vld [vmem:[#allocation2 + $0xe3] sm:$0xff] }
  0x93   : > { %1110 = vrot.lane.b32.xlu2 %v8668_v4, %s8288_s30  ;;  %595 = vst.msk [vmem:[#allocation2 + $0x113] sm:$0xff] %vm307_vm0, %v562_v6  ;;  %v8705_v29 = vld [vmem:[#allocation2 + $0xdb] sm:$0xff]  ;;  %v8792_v6 = vld [vmem:[#allocation2 + $0x64] sm:$0xff] }
  0x94   : > { %600 = vst.msk [vmem:[#allocation2 + $0x153] sm:$0xff] %vm307_vm0, %v567_v15  ;;  %v8719_v36 = vld [vmem:[#allocation2 + $0xcb] sm:$0xff]  ;;  %v8868_v37 = vld [vmem:[#allocation2 + $0xdc] sm:$0xff] }
  0x95   : > { %599 = vst.msk [vmem:[#allocation2 + $0x143] sm:$0xff] %vm307_vm0, %v566_v17  ;;  %v8721_v39 = vld [vmem:[#allocation2 + $0x10b] sm:$0xff] }
  0x96   : > { %598 = vst.msk [vmem:[#allocation2 + $0x13b] sm:$0xff] %vm307_vm0, %v565_v18  ;;  %v8723_v41 = vld [vmem:[#allocation2 + $0xfb] sm:$0xff]  ;;  %v8818_v15 = vld [vmem:[#allocation2 + $0x6c] sm:$0xff]  ;;  %v8838_v25 = vld [vmem:[#allocation2 + $0xc4] sm:$0xff] }
  0x97   : > { %603 = vst.msk [vmem:[#allocation2 + $0x173] sm:$0xff] %vm307_vm0, %v570_v28  ;;  %v8735_v45 = vld [vmem:[#allocation2 + $0xf3] sm:$0xff]  ;;  %v8822_v18 = vld [vmem:[#allocation2 + $0x9c] sm:$0xff]  ;;  %v8854_v32 = vld [vmem:[#allocation2 + $0xe4] sm:$0xff] }
  0x98   : > { %602 = vst.msk [vmem:[#allocation2 + $0x16b] sm:$0xff] %vm307_vm0, %v569_v30  ;;  %v8737_v48 = vld [vmem:[#allocation2 + $0x12b] sm:$0xff]  ;;  %v8850_v30 = vld [vmem:[#allocation2 + $0xb4] sm:$0xff]  ;;  %v8886_v46 = vld [vmem:[#allocation2 + $0xfc] sm:$0xff] }
  0x99   : > { %1108 = vrot.lane.b32.xlu1 %v8683_v11, %s8288_s30  ;;  %601 = vst.msk [vmem:[#allocation2 + $0x15b] sm:$0xff] %vm307_vm0, %v568_v31  ;;  %v8739_v49 = vld [vmem:[#allocation2 + $0x123] sm:$0xff]  ;;  %v8820_v17 = vld [vmem:[#allocation2 + $0xac] sm:$0xff]  ;;  %v8852_v31 = vld [vmem:[#allocation2 + $0xf4] sm:$0xff] }
  0x9a   : > { %1118 = vrot.lane.b32.xlu0 %v8685_v14, %s8288_s30  ;;  %606 = vst.msk [vmem:[#allocation2 + $0x19b] sm:$0xff] %vm307_vm0, %v573_v40  ;;  %v8748_v52 = vld [vmem:[#allocation2 + $0x113] sm:$0xff] }
  0x9b   : > { %1116 = vrot.lane.b32.xlu2 %v8687_v16, %s8288_s30  ;;  %605 = vst.msk [vmem:[#allocation2 + $0x18b] sm:$0xff] %vm307_vm0, %v572_v42  ;;  %v8750_v54 = vld [vmem:[#allocation2 + $0x153] sm:$0xff] }
  0x9c   : > { %604 = vst.msk [vmem:[#allocation2 + $0x183] sm:$0xff] %vm307_vm0, %v571_v43  ;;  %v8752_v55 = vld [vmem:[#allocation2 + $0x143] sm:$0xff]  ;;  %v8836_v22 = vld [vmem:[#allocation2 + $0xcc] sm:$0xff]  ;;  %v8870_v38 = vld [vmem:[#allocation2 + $0x114] sm:$0xff] }
  0x9d   : > { %607 = vst.msk [vmem:[#allocation2 + $0x1a3] sm:$0xff] %vm307_vm0, %v574_v51  ;;  %v8760_v56 = vld [vmem:[#allocation2 + $0x13b] sm:$0xff]  ;;  %v8872_v40 = vld [vmem:[#allocation2 + $0x10c] sm:$0xff] }
  0x9e   : > { %v8762_v57 = vld [vmem:[#allocation2 + $0x173] sm:$0xff]  ;;  %15359 = vst [vmem:[#allocation10_spill] sm:$0xff] %v8824_v19  ;;  %v8888_v51 = vld [vmem:[#allocation2 + $0x13c] sm:$0xff] }
  0x9f   : > { %v8764_v58 = vld [vmem:[#allocation2 + $0x16b] sm:$0xff]  ;;  %15369 = vst [vmem:[#allocation20_spill] sm:$0xff] %v8888_v51  ;;  %v777_v19 = vld [vmem:[#allocation2 + $0x62] sm:$0xff] }
  0xa0   : > { %v8772_v59 = vld [vmem:[#allocation2 + $0x15b] sm:$0xff] }
  0xa1   : > { %1114 = vrot.lane.b32.xlu1 %v8701_v24, %s8288_s30  ;;  %v8774_v60 = vld [vmem:[#allocation2 + $0x19b] sm:$0xff] }
  0xa2   : > { %1124 = vrot.lane.b32.xlu0 %v8703_v27, %s8288_s30  ;;  %v8776_v61 = vld [vmem:[#allocation2 + $0x18b] sm:$0xff]  ;;  %v8844_v26 = vpop.permute.xlu0 %1096 }
  0xa3   : > { %1122 = vrot.lane.b32.xlu2 %v8705_v29, %s8288_s30  ;;  %v8784_v63 = vld [vmem:[#allocation2 + $0x183] sm:$0xff]  ;;  %15361 = vst [vmem:[#allocation12_spill] sm:$0xff] %v8844_v26  ;;  %v8958_v26 = vld [vmem:[#allocation2 + $0x18c] sm:$0xff] }
  0xa4   : > { %v8790_v5 = vld [vmem:[#allocation2 + $0x1a3] sm:$0xff]  ;;  %15389 = vst [vmem:[#allocation40_spill] sm:$0xff] %v8958_v26 }
  0xa9   : > { %1120 = vrot.lane.b32.xlu1 %v8719_v36, %s8288_s30 }
  0xaa   : > { %1130 = vrot.lane.b32.xlu0 %v8721_v39, %s8288_s30 }
  0xab   : > { %1128 = vrot.lane.b32.xlu2 %v8723_v41, %s8288_s30 }
  0xb1   : > { %1126 = vrot.lane.b32.xlu1 %v8735_v45, %s8288_s30 }
  0xb2   : > { %1136 = vrot.lane.b32.xlu0 %v8737_v48, %s8288_s30 }
  0xb3   : > { %1134 = vrot.lane.b32.xlu2 %v8739_v49, %s8288_s30 }
  0xb9   : > { %1132 = vrot.lane.b32.xlu1 %v8748_v52, %s8288_s30 }
  0xba   : > { %1142 = vrot.lane.b32.xlu0 %v8750_v54, %s8288_s30 }
  0xbb   : > { %1140 = vrot.lane.b32.xlu2 %v8752_v55, %s8288_s30 }
  0xc1   : > { %1138 = vrot.lane.b32.xlu1 %v8760_v56, %s8288_s30 }
  0xc2   : > { %1148 = vrot.lane.b32.xlu0 %v8762_v57, %s8288_s30 }
  0xc3   : > { %1146 = vrot.lane.b32.xlu2 %v8764_v58, %s8288_s30 }
  0xc9   : > { %1144 = vrot.lane.b32.xlu1 %v8772_v59, %s8288_s30 }
  0xca   : > { %1154 = vrot.lane.b32.xlu0 %v8774_v60, %s8288_s30 }
  0xcb   : > { %1152 = vrot.lane.b32.xlu2 %v8776_v61, %s8288_s30 }
  0xd1   : > { %1150 = vrot.lane.b32.xlu1 %v8784_v63, %s8288_s30 }
  0xd2   : > { %1224 = vrot.lane.b32.xlu0 %v838_v2, %s8289_s11  ;;  %v8890_v2 = vld [vmem:[#allocation2 + $0x12c] sm:$0xff] }
  0xd3   : > { %1222 = vrot.lane.b32.xlu2 %v837_v3, %s8289_s11 }
  0xd9   : > { %1156 = vrot.lane.b32.xlu1 %v8790_v5, %s8288_s30 }
  0xda   : > { %1230 = vrot.lane.b32.xlu0 %v8792_v6, %s8289_s11 }
  0xdb   : > { %1228 = vrot.lane.b32.xlu2 %v8794_v7, %s8289_s11  ;;  %v8802_v8 = vpop.permute.xlu2 %1102 }
  0xdc   : > { %15357 = vst [vmem:[#allocation8_spill] sm:$0xff] %v8802_v8  ;;  %v8940_v8 = vld [vmem:[#allocation2 + $0x16c] sm:$0xff] }
  0xdd   : > { %15383 = vst [vmem:[#allocation34_spill] sm:$0xff] %v8940_v8 }
  0xe1   : > { %1226 = vrot.lane.b32.xlu1 %v8804_v9, %s8289_s11 }
  0xe2   : > { %1236 = vrot.lane.b32.xlu0 %v8806_v10, %s8289_s11 }
  0xe3   : > { %1234 = vrot.lane.b32.xlu2 %v8808_v12, %s8289_s11 }
  0xe5   : > { %v8816_v13 = vpop.permute.xlu2 %1104 }
  0xe6   : > { %15358 = vst [vmem:[#allocation9_spill] sm:$0xff] %v8816_v13  ;;  %v8926_v13 = vld [vmem:[#allocation2 + $0x174] sm:$0xff] }
  0xe7   : > { %15379 = vst [vmem:[#allocation30_spill] sm:$0xff] %v8926_v13 }
  0xe9   : > { %1232 = vrot.lane.b32.xlu1 %v8818_v15, %s8289_s11 }
  0xea   : > { %1242 = vrot.lane.b32.xlu0 %v8820_v17, %s8289_s11 }
  0xeb   : > { %1240 = vrot.lane.b32.xlu2 %v8822_v18, %s8289_s11 }
  0xed   : > { %v8832_v20 = vpop.permute.xlu2 %1110 }
  0xee   : > { %15360 = vst [vmem:[#allocation11_spill] sm:$0xff] %v8832_v20 }
  0xf1   : > { %1238 = vrot.lane.b32.xlu1 %v8834_v21, %s8289_s11 }
  0xf2   : > { %1248 = vrot.lane.b32.xlu0 %v8836_v22, %s8289_s11 }
  0xf3   : > { %1246 = vrot.lane.b32.xlu2 %v8838_v25, %s8289_s11 }
  0xf5   : > { %v8848_v28 = vpop.permute.xlu2 %1116 }
  0xf6   : > { %15362 = vst [vmem:[#allocation13_spill] sm:$0xff] %v8848_v28  ;;  %v8906_v28 = vld [vmem:[#allocation2 + $0x15c] sm:$0xff] }
  0xf7   : > { %15373 = vst [vmem:[#allocation24_spill] sm:$0xff] %v8906_v28 }
  0xf9   : > { %1244 = vrot.lane.b32.xlu1 %v8850_v30, %s8289_s11 }
  0xfa   : > { %1254 = vrot.lane.b32.xlu0 %v8852_v31, %s8289_s11 }
  0xfb   : > { %v8860_v33 = vpop.permute.xlu1 %1098  ;;  %1252 = vrot.lane.b32.xlu2 %v8854_v32, %s8289_s11 }
  0xfc   : > { %15363 = vst [vmem:[#allocation14_spill] sm:$0xff] %v8860_v33  ;;  %v8864_v34 = vpop.permute.xlu0 %1106  ;;  %v8944_v33 = vld [vmem:[#allocation2 + $0x19c] sm:$0xff] }
  0xfd   : > { %15364 = vst [vmem:[#allocation15_spill] sm:$0xff] %v8864_v34  ;;  %v8866_v35 = vpop.permute.xlu2 %1122  ;;  %v8924_v34 = vld [vmem:[#allocation2 + $0x184] sm:$0xff] }
  0xfe   : > { %15365 = vst [vmem:[#allocation16_spill] sm:$0xff] %v8866_v35  ;;  %v8904_v35 = vld [vmem:[#allocation2 + $0x124] sm:$0xff] }
  0xff   : > { %15378 = vst [vmem:[#allocation29_spill] sm:$0xff] %v8924_v34 }
 0x100   : > { %15385 = vst [vmem:[#allocation36_spill] sm:$0xff] %v8944_v33 }
 0x101   : > { %1250 = vrot.lane.b32.xlu1 %v8868_v37, %s8289_s11 }
 0x102   : > { %1260 = vrot.lane.b32.xlu0 %v8870_v38, %s8289_s11 }
 0x103   : > { %v8878_v42 = vpop.permute.xlu1 %1100  ;;  %1258 = vrot.lane.b32.xlu2 %v8872_v40, %s8289_s11 }
 0x104   : > { %15366 = vst [vmem:[#allocation17_spill] sm:$0xff] %v8878_v42  ;;  %v8882_v43 = vpop.permute.xlu0 %1112  ;;  %v8942_v42 = vld [vmem:[#allocation2 + $0x1a4] sm:$0xff] }
 0x105   : > { %15367 = vst [vmem:[#allocation18_spill] sm:$0xff] %v8882_v43  ;;  %v8884_v44 = vpop.permute.xlu2 %1128  ;;  %v8908_v43 = vld [vmem:[#allocation2 + $0x154] sm:$0xff] }
 0x106   : > { %15368 = vst [vmem:[#allocation19_spill] sm:$0xff] %v8884_v44 }
 0x107   : > { %15384 = vst [vmem:[#allocation35_spill] sm:$0xff] %v8942_v42 }
 0x109   : > { %1256 = vrot.lane.b32.xlu1 %v8886_v46, %s8289_s11 }
 0x10a   : > { %1266 = vrot.lane.b32.xlu0 %v8888_v51, %s8289_s11 }
 0x10b   : > { %v8896_v3 = vpop.permute.xlu1 %1108  ;;  %1264 = vrot.lane.b32.xlu2 %v8890_v2, %s8289_s11 }
 0x10c   : > { %15370 = vst [vmem:[#allocation21_spill] sm:$0xff] %v8896_v3  ;;  %v8900_v0 = vpop.permute.xlu0 %1118  ;;  %v8922_v3 = vld [vmem:[#allocation2 + $0x144] sm:$0xff] }
 0x10d   : > { %15371 = vst [vmem:[#allocation22_spill] sm:$0xff] %v8900_v0  ;;  %v8902_v44 = vpop.permute.xlu2 %1134 }
 0x10e   : > { %15372 = vst [vmem:[#allocation23_spill] sm:$0xff] %v8902_v44 }
 0x10f   : > { %15377 = vst [vmem:[#allocation28_spill] sm:$0xff] %v8922_v3 }
 0x111   : > { %1262 = vrot.lane.b32.xlu1 %v8904_v35, %s8289_s11 }
 0x112   : > { %1272 = vrot.lane.b32.xlu0 %v8906_v28, %s8289_s11  ;;  %v8973_v28 = vld [vmem:[#allocation2 + $0x7a] sm:$0xff] }
 0x113   : > { %v8914_v20 = vpop.permute.xlu1 %1114  ;;  %1270 = vrot.lane.b32.xlu2 %v8908_v43, %s8289_s11  ;;  %15394 = vst [vmem:[#allocation45_spill] sm:$0xff] %v8973_v28 }
 0x114   : > { %15374 = vst [vmem:[#allocation25_spill] sm:$0xff] %v8914_v20  ;;  %v8918_v0 = vpop.permute.xlu0 %1124 }
 0x115   : > { %15375 = vst [vmem:[#allocation26_spill] sm:$0xff] %v8918_v0  ;;  %v8920_v44 = vpop.permute.xlu2 %1140 }
 0x116   : > { %15376 = vst [vmem:[#allocation27_spill] sm:$0xff] %v8920_v44 }
 0x119   : > { %1268 = vrot.lane.b32.xlu1 %v8922_v3, %s8289_s11  ;;  %v9047_v3 = vld [vmem:[#allocation2 + $0x13a] sm:$0xff] }
 0x11a   : > { %1278 = vrot.lane.b32.xlu0 %v8924_v34, %s8289_s11  ;;  %v776_v34 = vld [vmem:[#allocation2 + $0x52] sm:$0xff] }
 0x11b   : > { %v8932_v20 = vpop.permute.xlu1 %1120  ;;  %1276 = vrot.lane.b32.xlu2 %v8926_v13, %s8289_s11 }
 0x11c   : > { %15380 = vst [vmem:[#allocation31_spill] sm:$0xff] %v8932_v20  ;;  %v8936_v0 = vpop.permute.xlu0 %1130 }
 0x11d   : > { %15381 = vst [vmem:[#allocation32_spill] sm:$0xff] %v8936_v0  ;;  %v8938_v44 = vpop.permute.xlu2 %1146 }
 0x11e   : > { %15382 = vst [vmem:[#allocation33_spill] sm:$0xff] %v8938_v44 }
 0x121   : > { %1274 = vrot.lane.b32.xlu1 %v8940_v8, %s8289_s11 }
 0x122   : > { %1284 = vrot.lane.b32.xlu0 %v8942_v42, %s8289_s11 }
 0x123   : > { %v8950_v20 = vpop.permute.xlu1 %1126  ;;  %1282 = vrot.lane.b32.xlu2 %v8944_v33, %s8289_s11 }
 0x124   : > { %15386 = vst [vmem:[#allocation37_spill] sm:$0xff] %v8950_v20  ;;  %v8954_v0 = vpop.permute.xlu0 %1136 }
 0x125   : > { %15387 = vst [vmem:[#allocation38_spill] sm:$0xff] %v8954_v0  ;;  %v8956_v44 = vpop.permute.xlu2 %1152  ;;  %v775_v0 = vld [vmem:[#allocation2 + $0x4a] sm:$0xff] }
 0x126   : > { %15388 = vst [vmem:[#allocation39_spill] sm:$0xff] %v8956_v44  ;;  %v8970_v44 = vld [vmem:[#allocation2 + $0x82] sm:$0xff] }
 0x127   : > { %15393 = vst [vmem:[#allocation44_spill] sm:$0xff] %v8970_v44 }
 0x129   : > { %1280 = vrot.lane.b32.xlu1 %v8958_v26, %s8289_s11 }
 0x12a   : > { %1354 = vrot.lane.b32.xlu0 %v777_v19, %s8290_s12 }
 0x12b   : > { %v8963_v42 = vpop.permute.xlu1 %1132  ;;  %1352 = vrot.lane.b32.xlu2 %v776_v34, %s8290_s12 }
 0x12c   : > { %15390 = vst [vmem:[#allocation41_spill] sm:$0xff] %v8963_v42  ;;  %v8966_v20 = vpop.permute.xlu0 %1142  ;;  %v778_v42 = vld [vmem:[#allocation2 + $0x6a] sm:$0xff] }
 0x12d   : > { %15391 = vst [vmem:[#allocation42_spill] sm:$0xff] %v8966_v20  ;;  %v8968_v33 = vpop.permute.xlu2 %1222  ;;  %v8985_v20 = vld [vmem:[#allocation2 + $0xaa] sm:$0xff] }
 0x12e   : > { %15392 = vst [vmem:[#allocation43_spill] sm:$0xff] %v8968_v33 }
 0x12f   : > { %15398 = vst [vmem:[#allocation49_spill] sm:$0xff] %v8985_v20 }
 0x131   : > { %1350 = vrot.lane.b32.xlu1 %v775_v0, %s8290_s12  ;;  %v8988_v0 = vld [vmem:[#allocation2 + $0x9a] sm:$0xff] }
 0x132   : > { %1360 = vrot.lane.b32.xlu0 %v8970_v44, %s8290_s12  ;;  %15399 = vst [vmem:[#allocation50_spill] sm:$0xff] %v8988_v0  ;;  %v9000_v44 = vld [vmem:[#allocation2 + $0xca] sm:$0xff] }
 0x133   : > { %v8977_v26 = vpop.permute.xlu1 %1138  ;;  %1358 = vrot.lane.b32.xlu2 %v8973_v28, %s8290_s12  ;;  %15403 = vst [vmem:[#allocation54_spill] sm:$0xff] %v9000_v44 }
 0x134   : > { %15395 = vst [vmem:[#allocation46_spill] sm:$0xff] %v8977_v26  ;;  %v8981_v19 = vpop.permute.xlu0 %1148 }
 0x135   : > { %15396 = vst [vmem:[#allocation47_spill] sm:$0xff] %v8981_v19  ;;  %v8983_v34 = vpop.permute.xlu2 %1228 }
 0x136   : > { %15397 = vst [vmem:[#allocation48_spill] sm:$0xff] %v8983_v34  ;;  %v781_v34 = vld [vmem:[#allocation2 + $0x92] sm:$0xff] }
 0x139   : > { %1356 = vrot.lane.b32.xlu1 %v778_v42, %s8290_s12  ;;  %v9003_v42 = vld [vmem:[#allocation2 + $0xc2] sm:$0xff] }
 0x13a   : > { %1366 = vrot.lane.b32.xlu0 %v8985_v20, %s8290_s12  ;;  %15404 = vst [vmem:[#allocation55_spill] sm:$0xff] %v9003_v42 }
 0x13b   : > { %v8992_v33 = vpop.permute.xlu1 %1144  ;;  %1364 = vrot.lane.b32.xlu2 %v8988_v0, %s8290_s12  ;;  %v9015_v0 = vld [vmem:[#allocation2 + $0xf2] sm:$0xff] }
 0x13c   : > { %15400 = vst [vmem:[#allocation51_spill] sm:$0xff] %v8992_v33  ;;  %v8996_v26 = vpop.permute.xlu0 %1154 }
 0x13d   : > { %15401 = vst [vmem:[#allocation52_spill] sm:$0xff] %v8996_v26  ;;  %v8998_v19 = vpop.permute.xlu2 %1234 }
 0x13e   : > { %15402 = vst [vmem:[#allocation53_spill] sm:$0xff] %v8998_v19  ;;  %v784_v19 = vld [vmem:[#allocation2 + $0xb2] sm:$0xff] }
 0x13f   : > { %15408 = vst [vmem:[#allocation59_spill] sm:$0xff] %v9015_v0 }
 0x141   : > { %1362 = vrot.lane.b32.xlu1 %v781_v34, %s8290_s12  ;;  %v9018_v34 = vld [vmem:[#allocation2 + $0xe2] sm:$0xff] }
 0x142   : > { %1372 = vrot.lane.b32.xlu0 %v9000_v44, %s8290_s12  ;;  %15409 = vst [vmem:[#allocation60_spill] sm:$0xff] %v9018_v34  ;;  %v787_v44 = vld [vmem:[#allocation2 + $0xda] sm:$0xff] }
 0x143   : > { %v9007_v20 = vpop.permute.xlu1 %1150  ;;  %1370 = vrot.lane.b32.xlu2 %v9003_v42, %s8290_s12  ;;  %v9030_v42 = vld [vmem:[#allocation2 + $0x112] sm:$0xff] }
 0x144   : > { %15405 = vst [vmem:[#allocation56_spill] sm:$0xff] %v9007_v20  ;;  %v9011_v33 = vpop.permute.xlu0 %1224 }
 0x145   : > { %15406 = vst [vmem:[#allocation57_spill] sm:$0xff] %v9011_v33  ;;  %v9013_v26 = vpop.permute.xlu2 %1240 }
 0x146   : > { %15407 = vst [vmem:[#allocation58_spill] sm:$0xff] %v9013_v26 }
 0x149   : > { %1368 = vrot.lane.b32.xlu1 %v784_v19, %s8290_s12  ;;  %v9033_v19 = vld [vmem:[#allocation2 + $0x10a] sm:$0xff] }
 0x14a   : > { %1378 = vrot.lane.b32.xlu0 %v9015_v0, %s8290_s12 }
 0x14b   : > { %v9022_v20 = vpop.permute.xlu1 %1156  ;;  %1376 = vrot.lane.b32.xlu2 %v9018_v34, %s8290_s12  ;;  %v274_v34 = vld [vmem:[%s8565_s10 + $0xf8] sm:$0xff] }
 0x14c   : > { %15410 = vst [vmem:[#allocation61_spill] sm:$0xff] %v9022_v20  ;;  %v9026_v33 = vpop.permute.xlu0 %1230  ;;  %v544_v8 = vmul.f32 0.01, %v274_v34  ;;  %vm512_vm4 = vcmp.gt.f32.partialorder %v274_v34, 0.0 }
 0x14d   : > { %15411 = vst [vmem:[#allocation62_spill] sm:$0xff] %v9026_v33  ;;  %v9028_v26 = vpop.permute.xlu2 %1246 }
 0x14e   : > { %15412 = vst [vmem:[#allocation63_spill] sm:$0xff] %v9028_v26  ;;  %v273_v26 = vld [vmem:[%s8565_s10 + $0xf0] sm:$0xff]  ;;  %v576_v51 = vsel %vm512_vm4, %v274_v34, %v544_v8  ;;  %v9064_v34 = vld [vmem:[#allocation2 + $0x15a] sm:$0xff]  ;;  %vm2316_vm4 = vcmask 523264  }
 0x14f   : > { %v543_v28 = vmul.f32 0.01, %v273_v26  ;;  %vm511_vm3 = vcmp.gt.f32.partialorder %v273_v26, 0.0  ;;  %609 = vst.msk [vmem:[#allocation2 + $0x1bb] sm:$0xff] %vm307_vm0, %v576_v51 }
 0x150   : > { %15419 = vst [vmem:[#allocation70_spill] sm:$0xff] %v9064_v34 }
 0x151   : > { %1374 = vrot.lane.b32.xlu1 %v787_v44, %s8290_s12  ;;  %v790_v44 = vld [vmem:[#allocation2 + $0xfa] sm:$0xff]  ;;  %v575_v13 = vsel %vm511_vm3, %v273_v26, %v543_v28  ;;  %v793_v28 = vld [vmem:[#allocation2 + $0x122] sm:$0xff]  ;;  %vm2250_vm3 = vcmask 392192  }
 0x152   : > { %1384 = vrot.lane.b32.xlu0 %v9030_v42, %s8290_s12  ;;  %608 = vst.msk [vmem:[#allocation2 + $0x1b3] sm:$0xff] %vm307_vm0, %v575_v13  ;;  %v9067_v13 = vld [vmem:[#allocation2 + $0x152] sm:$0xff] }
 0x153   : > { %v9037_v0 = vpop.permute.xlu1 %1226  ;;  %1382 = vrot.lane.b32.xlu2 %v9033_v19, %s8290_s12 }
 0x154   : > { %15413 = vst [vmem:[#allocation64_spill] sm:$0xff] %v9037_v0  ;;  %v9041_v20 = vpop.permute.xlu0 %1236  ;;  %v9051_v0 = vld [vmem:[#allocation2 + $0x12a] sm:$0xff] }
 0x155   : > { %15414 = vst [vmem:[#allocation65_spill] sm:$0xff] %v9041_v20  ;;  %v9043_v33 = vpop.permute.xlu2 %1252  ;;  %v9079_v20 = vld [vmem:[#allocation2 + $0x182] sm:$0xff] }
 0x156   : > { %15415 = vst [vmem:[#allocation66_spill] sm:$0xff] %v9043_v33 }
 0x157   : > { %15423 = vst [vmem:[#allocation74_spill] sm:$0xff] %v9079_v20 }
 0x159   : > { %1380 = vrot.lane.b32.xlu1 %v790_v44, %s8290_s12 }
 0x15a   : > { %1390 = vrot.lane.b32.xlu0 %v9047_v3, %s8290_s12 }
 0x15b   : > { %v9056_v33 = vpop.permute.xlu1 %1232  ;;  %1388 = vrot.lane.b32.xlu2 %v9051_v0, %s8290_s12 }
 0x15c   : > { %15416 = vst [vmem:[#allocation67_spill] sm:$0xff] %v9056_v33  ;;  %v9060_v26 = vpop.permute.xlu0 %1242 }
 0x15d   : > { %15417 = vst [vmem:[#allocation68_spill] sm:$0xff] %v9060_v26  ;;  %v9062_v8 = vpop.permute.xlu2 %1258 }
 0x15e   : > { %15418 = vst [vmem:[#allocation69_spill] sm:$0xff] %v9062_v8  ;;  %v796_v8 = vld [vmem:[#allocation2 + $0x142] sm:$0xff] }
 0x161   : > { %1386 = vrot.lane.b32.xlu1 %v793_v28, %s8290_s12  ;;  %v9082_v28 = vld [vmem:[#allocation2 + $0x172] sm:$0xff] }
 0x162   : > { %1396 = vrot.lane.b32.xlu0 %v9064_v34, %s8290_s12  ;;  %15424 = vst [vmem:[#allocation75_spill] sm:$0xff] %v9082_v28  ;;  %v9094_v34 = vld [vmem:[#allocation2 + $0x1a2] sm:$0xff] }
 0x163   : > { %v9071_v51 = vpop.permute.xlu1 %1238  ;;  %1394 = vrot.lane.b32.xlu2 %v9067_v13, %s8290_s12  ;;  %15428 = vst [vmem:[#allocation79_spill] sm:$0xff] %v9094_v34 }
 0x164   : > { %15420 = vst [vmem:[#allocation71_spill] sm:$0xff] %v9071_v51  ;;  %v9075_v44 = vpop.permute.xlu0 %1248 }
 0x165   : > { %15421 = vst [vmem:[#allocation72_spill] sm:$0xff] %v9075_v44  ;;  %v9077_v26 = vpop.permute.xlu2 %1264 }
 0x166   : > { %15422 = vst [vmem:[#allocation73_spill] sm:$0xff] %v9077_v26  ;;  %v799_v26 = vld [vmem:[#allocation2 + $0x16a] sm:$0xff] }
 0x169   : > { %1392 = vrot.lane.b32.xlu1 %v796_v8, %s8290_s12  ;;  %v9097_v8 = vld [vmem:[#allocation2 + $0x19a] sm:$0xff] }
 0x16a   : > { %1402 = vrot.lane.b32.xlu0 %v9079_v20, %s8290_s12 }
 0x16b   : > { %v9086_v33 = vpop.permute.xlu1 %1244  ;;  %1400 = vrot.lane.b32.xlu2 %v9082_v28, %s8290_s12  ;;  %v9109_v28 = vld [vmem:[#allocation2 + $0x1ba] sm:$0xff] }
 0x16c   : > { %15425 = vst [vmem:[#allocation76_spill] sm:$0xff] %v9086_v33  ;;  %v9090_v51 = vpop.permute.xlu0 %1254 }
 0x16d   : > { %15426 = vst [vmem:[#allocation77_spill] sm:$0xff] %v9090_v51  ;;  %v9092_v44 = vpop.permute.xlu2 %1270 }
 0x16e   : > { %15427 = vst [vmem:[#allocation78_spill] sm:$0xff] %v9092_v44  ;;  %v802_v44 = vld [vmem:[#allocation2 + $0x18a] sm:$0xff] }
 0x171   : > { %1398 = vrot.lane.b32.xlu1 %v799_v26, %s8290_s12 }
 0x172   : > { %1408 = vrot.lane.b32.xlu0 %v9094_v34, %s8290_s12 }
 0x173   : > { %v9101_v20 = vpop.permute.xlu1 %1250  ;;  %1406 = vrot.lane.b32.xlu2 %v9097_v8, %s8290_s12 }
 0x174   : > { %15429 = vst [vmem:[#allocation80_spill] sm:$0xff] %v9101_v20  ;;  %v9105_v33 = vpop.permute.xlu0 %1260 }
 0x175   : > { %15430 = vst [vmem:[#allocation81_spill] sm:$0xff] %v9105_v33  ;;  %v9107_v51 = vpop.permute.xlu2 %1276  ;;  %v9122_v33 = vld [vmem:[#allocation2 + $0x1b2] sm:$0xff] }
 0x176   : > { %15431 = vst [vmem:[#allocation82_spill] sm:$0xff] %v9107_v51  ;;  %v1019_v51 = vld [vmem:[#allocation2 + $0x15b] sm:$0xff] }
 0x179   : > { %1404 = vrot.lane.b32.xlu1 %v802_v44, %s8290_s12 }
 0x17a   : > { %1478 = vrot.lane.b32.xlu0 %v8640_v47, %s8291_s13 }
 0x17b   : > { %v9114_v26 = vpop.permute.xlu1 %1256  ;;  %1412 = vrot.lane.b32.xlu2 %v9109_v28, %s8290_s12 }
 0x17c   : > { %15432 = vst [vmem:[#allocation83_spill] sm:$0xff] %v9114_v26  ;;  %v9118_v20 = vpop.permute.xlu0 %1266 }
 0x17d   : > { %15433 = vst [vmem:[#allocation84_spill] sm:$0xff] %v9118_v20  ;;  %v9120_v34 = vpop.permute.xlu2 %1282 }
 0x17e   : > { %15434 = vst [vmem:[#allocation85_spill] sm:$0xff] %v9120_v34  ;;  %v15492_v34 = vld [vmem:[#allocation55_spill] sm:$0xff] }
 0x181   : > { %1410 = vrot.lane.b32.xlu1 %v9122_v33, %s8290_s12 }
 0x182   : > { %1484 = vrot.lane.b32.xlu0 %v8650_v53, %s8291_s13 }
 0x183   : > { %v9128_v44 = vpop.permute.xlu1 %1262  ;;  %1482 = vrot.lane.b32.xlu2 %v8616_v23, %s8291_s13 }
 0x184   : > { %15435 = vst [vmem:[#allocation86_spill] sm:$0xff] %v9128_v44  ;;  %v9132_v47 = vpop.permute.xlu0 %1272 }
 0x185   : > { %v9134_v26 = vpop.permute.xlu2 %1352 }
 0x189   : > { %1480 = vrot.lane.b32.xlu1 %v8662_v62, %s8291_s13 }
 0x18a   : > { %1490 = vrot.lane.b32.xlu0 %v8668_v4, %s8291_s13 }
 0x18b   : > { %v9140_v20 = vpop.permute.xlu1 %1268  ;;  %1488 = vrot.lane.b32.xlu2 %v8683_v11, %s8291_s13 }
 0x18c   : > { %15436 = vst [vmem:[#allocation87_spill] sm:$0xff] %v9140_v20  ;;  %v9144_v53 = vpop.permute.xlu0 %1278 }
 0x18d   : > { %15437 = vst [vmem:[#allocation88_spill] sm:$0xff] %v9144_v53  ;;  %v9146_v44 = vpop.permute.xlu2 %1358  ;;  %v1006_v53 = vld [vmem:[#allocation2 + $0xc3] sm:$0xff] }
 0x191   : > { %1486 = vrot.lane.b32.xlu1 %v8645_v50, %s8291_s13 }
 0x192   : > { %1496 = vrot.lane.b32.xlu0 %v8687_v16, %s8291_s13 }
 0x193   : > { %v9152_v23 = vpop.permute.xlu1 %1274  ;;  %1494 = vrot.lane.b32.xlu2 %v8701_v24, %s8291_s13 }
 0x194   : > { %15438 = vst [vmem:[#allocation89_spill] sm:$0xff] %v9152_v23  ;;  %v9156_v62 = vpop.permute.xlu0 %1284  ;;  %v1045_v23 = vld [vmem:[#allocation2 + $0x114] sm:$0xff] }
 0x195   : > { %15439 = vst [vmem:[#allocation90_spill] sm:$0xff] %v9156_v62  ;;  %v9158_v4 = vpop.permute.xlu2 %1364 }
 0x199   : > { %1492 = vrot.lane.b32.xlu1 %v8665_v1, %s8291_s13 }
 0x19a   : > { %1502 = vrot.lane.b32.xlu0 %v8705_v29, %s8291_s13 }
 0x19b   : > { %v9164_v11 = vpop.permute.xlu1 %1280  ;;  %1500 = vrot.lane.b32.xlu2 %v8719_v36, %s8291_s13 }
 0x19c   : > { %15440 = vst [vmem:[#allocation91_spill] sm:$0xff] %v9164_v11  ;;  %v9168_v50 = vpop.permute.xlu0 %1354  ;;  %v15502_v11 = vld [vmem:[#allocation59_spill] sm:$0xff] }
 0x19d   : > { %v9170_v16 = vpop.permute.xlu2 %1370 }
 0x19e   : > { %15441 = vst [vmem:[#allocation92_spill] sm:$0xff] %v9170_v16 }
 0x1a1   : > { %1498 = vrot.lane.b32.xlu1 %v8685_v14, %s8291_s13 }
 0x1a2   : > { %1508 = vrot.lane.b32.xlu0 %v8723_v41, %s8291_s13 }
 0x1a3   : > { %v9176_v24 = vpop.permute.xlu1 %1350  ;;  %1506 = vrot.lane.b32.xlu2 %v8735_v45, %s8291_s13 }
 0x1a4   : > { %v9180_v1 = vpop.permute.xlu0 %1360 }
 0x1a5   : > { %v9182_v29 = vpop.permute.xlu2 %1376 }
 0x1a6   : > { %15442 = vst [vmem:[#allocation93_spill] sm:$0xff] %v9182_v29 }
 0x1a9   : > { %1504 = vrot.lane.b32.xlu1 %v8703_v27, %s8291_s13 }
 0x1aa   : > { %1514 = vrot.lane.b32.xlu0 %v8739_v49, %s8291_s13 }
 0x1ab   : > { %v9188_v36 = vpop.permute.xlu1 %1356  ;;  %1512 = vrot.lane.b32.xlu2 %v8748_v52, %s8291_s13 }
 0x1ac   : > { %v9192_v14 = vpop.permute.xlu0 %1366 }
 0x1ad   : > { %v9194_v41 = vpop.permute.xlu2 %1382 }
 0x1ae   : > { %15443 = vst [vmem:[#allocation94_spill] sm:$0xff] %v9194_v41 }
 0x1b1   : > { %1510 = vrot.lane.b32.xlu1 %v8721_v39, %s8291_s13 }
 0x1b2   : > { %1520 = vrot.lane.b32.xlu0 %v8752_v55, %s8291_s13 }
 0x1b3   : > { %v9200_v45 = vpop.permute.xlu1 %1362  ;;  %1518 = vrot.lane.b32.xlu2 %v8760_v56, %s8291_s13 }
 0x1b4   : > { %v9204_v27 = vpop.permute.xlu0 %1372 }
 0x1b5   : > { %15444 = vst [vmem:[#allocation95_spill] sm:$0xff] %v9204_v27  ;;  %v9206_v49 = vpop.permute.xlu2 %1388 }
 0x1b6   : > { %15445 = vst [vmem:[#allocation96_spill] sm:$0xff] %v9206_v49  ;;  %v15470_v49 = vld [vmem:[#allocation30_spill] sm:$0xff] }
 0x1b9   : > { %1516 = vrot.lane.b32.xlu1 %v8737_v48, %s8291_s13 }
 0x1ba   : > { %1526 = vrot.lane.b32.xlu0 %v8764_v58, %s8291_s13 }
 0x1bb   : > { %v9212_v52 = vpop.permute.xlu1 %1368  ;;  %1524 = vrot.lane.b32.xlu2 %v8772_v59, %s8291_s13  ;;  %v9232_v59 = vld [vmem:[#allocation2 + $0x1b3] sm:$0xff] }
 0x1bc   : > { %15446 = vst [vmem:[#allocation97_spill] sm:$0xff] %v9212_v52  ;;  %v9216_v39 = vpop.permute.xlu0 %1378  ;;  %v1055_v52 = vld [vmem:[#allocation2 + $0x18c] sm:$0xff] }
 0x1bd   : > { %15447 = vst [vmem:[#allocation98_spill] sm:$0xff] %v9216_v39  ;;  %v9218_v55 = vpop.permute.xlu2 %1394  ;;  %v15491_v39 = vld [vmem:[#allocation44_spill] sm:$0xff] }
 0x1be   : > { %15448 = vst [vmem:[#allocation99_spill] sm:$0xff] %v9218_v55 }
 0x1c1   : > { %1522 = vrot.lane.b32.xlu1 %v8750_v54, %s8291_s13 }
 0x1c2   : > { %1532 = vrot.lane.b32.xlu0 %v8776_v61, %s8291_s13 }
 0x1c3   : > { %v9224_v56 = vpop.permute.xlu1 %1374  ;;  %1530 = vrot.lane.b32.xlu2 %v8784_v63, %s8291_s13 }
 0x1c4   : > { %15449 = vst [vmem:[#allocation100_spill] sm:$0xff] %v9224_v56  ;;  %v9228_v48 = vpop.permute.xlu0 %1384 }
 0x1c5   : > { %15450 = vst [vmem:[#allocation101_spill] sm:$0xff] %v9228_v48  ;;  %v9230_v58 = vpop.permute.xlu2 %1400 }
 0x1c9   : > { %1528 = vrot.lane.b32.xlu1 %v8762_v57, %s8291_s13 }
 0x1ca   : > { %1538 = vrot.lane.b32.xlu0 %v9232_v59, %s8291_s13 }
 0x1cb   : > { %v9238_v54 = vpop.permute.xlu1 %1380  ;;  %1536 = vrot.lane.b32.xlu2 %v8790_v5, %s8291_s13  ;;  %v9258_v5 = vld [vmem:[#allocation2 + $0x1bb] sm:$0xff] }
 0x1cc   : > { %15451 = vst [vmem:[#allocation102_spill] sm:$0xff] %v9238_v54  ;;  %v9242_v61 = vpop.permute.xlu0 %1390  ;;  %v15486_v54 = vld [vmem:[#allocation45_spill] sm:$0xff] }
 0x1cd   : > { %15452 = vst [vmem:[#allocation103_spill] sm:$0xff] %v9242_v61  ;;  %v9244_v63 = vpop.permute.xlu2 %1406 }
 0x1ce   : > { %15453 = vst [vmem:[#allocation104_spill] sm:$0xff] %v9244_v63  ;;  %v1000_v63 = vld [vmem:[#allocation2 + $0x7b] sm:$0xff] }
 0x1d1   : > { %1534 = vrot.lane.b32.xlu1 %v8774_v60, %s8291_s13 }
 0x1d2   : > { %1608 = vrot.lane.b32.xlu0 %v8794_v7, %s8292_s14 }
 0x1d3   : > { %v9250_v57 = vpop.permute.xlu1 %1386  ;;  %1606 = vrot.lane.b32.xlu2 %v8804_v9, %s8292_s14 }
 0x1d4   : > { %15454 = vst [vmem:[#allocation105_spill] sm:$0xff] %v9250_v57  ;;  %v9254_v20 = vpop.permute.xlu0 %1396 }
 0x1d5   : > { %15455 = vst [vmem:[#allocation106_spill] sm:$0xff] %v9254_v20  ;;  %v9256_v55 = vpop.permute.xlu2 %1412 }
 0x1d6   : > { %15456 = vst [vmem:[#allocation107_spill] sm:$0xff] %v9256_v55  ;;  %v15485_v55 = vld [vmem:[#allocation35_spill] sm:$0xff] }
 0x1d9   : > { %1540 = vrot.lane.b32.xlu1 %v9258_v5, %s8291_s13 }
 0x1da   : > { %1614 = vrot.lane.b32.xlu0 %v8808_v12, %s8292_s14 }
 0x1db   : > { %v9264_v60 = vpop.permute.xlu1 %1392  ;;  %1612 = vrot.lane.b32.xlu2 %v8818_v15, %s8292_s14 }
 0x1dc   : > { %15457 = vst [vmem:[#allocation108_spill] sm:$0xff] %v9264_v60  ;;  %v9268_v7 = vpop.permute.xlu0 %1402 }
 0x1dd   : > { %15458 = vst [vmem:[#allocation109_spill] sm:$0xff] %v9268_v7  ;;  %v9270_v9 = vpop.permute.xlu2 %1482  ;;  %v1043_v7 = vld [vmem:[#allocation2 + $0xfc] sm:$0xff] }
 0x1e1   : > { %1610 = vrot.lane.b32.xlu1 %v8792_v6, %s8292_s14 }
 0x1e2   : > { %1620 = vrot.lane.b32.xlu0 %v8822_v18, %s8292_s14 }
 0x1e3   : > { %v9276_v20 = vpop.permute.xlu1 %1398  ;;  %1618 = vrot.lane.b32.xlu2 %v8834_v21, %s8292_s14 }
 0x1e4   : > { %v9280_v12 = vpop.permute.xlu0 %1408 }
 0x1e5   : > { %15459 = vst [vmem:[#allocation110_spill] sm:$0xff] %v9280_v12  ;;  %v9282_v60 = vpop.permute.xlu2 %1488 }
 0x1e9   : > { %1616 = vrot.lane.b32.xlu1 %v8806_v10, %s8292_s14 }
 0x1ea   : > { %1626 = vrot.lane.b32.xlu0 %v8838_v25, %s8292_s14 }
 0x1eb   : > { %v9288_v15 = vpop.permute.xlu1 %1404  ;;  %1624 = vrot.lane.b32.xlu2 %v8850_v30, %s8292_s14 }
 0x1ec   : > { %15460 = vst [vmem:[#allocation111_spill] sm:$0xff] %v9288_v15  ;;  %v9292_v6 = vpop.permute.xlu0 %1478  ;;  %v1015_v15 = vld [vmem:[#allocation2 + $0x12b] sm:$0xff] }
 0x1ed   : > { %v9294_v18 = vpop.permute.xlu2 %1494 }
 0x1f1   : > { %1622 = vrot.lane.b32.xlu1 %v8820_v17, %s8292_s14 }
 0x1f2   : > { %1632 = vrot.lane.b32.xlu0 %v8854_v32, %s8292_s14 }
 0x1f3   : > { %v9300_v21 = vpop.permute.xlu1 %1410  ;;  %1630 = vrot.lane.b32.xlu2 %v8868_v37, %s8292_s14 }
 0x1f4   : > { %15461 = vst [vmem:[#allocation112_spill] sm:$0xff] %v9300_v21  ;;  %v9304_v10 = vpop.permute.xlu0 %1484  ;;  %v15488_v21 = vld [vmem:[#allocation50_spill] sm:$0xff] }
 0x1f5   : > { %v9306_v25 = vpop.permute.xlu2 %1500 }
 0x1f6   : > { %15462 = vst [vmem:[#allocation113_spill] sm:$0xff] %v9306_v25 }
 0x1f9   : > { %1628 = vrot.lane.b32.xlu1 %v8836_v22, %s8292_s14 }
 0x1fa   : > { %1638 = vrot.lane.b32.xlu0 %v8872_v40, %s8292_s14 }
 0x1fb   : > { %v9312_v30 = vpop.permute.xlu1 %1480  ;;  %1636 = vrot.lane.b32.xlu2 %v8886_v46, %s8292_s14 }
 0x1fc   : > { %v9316_v17 = vpop.permute.xlu0 %1490 }
 0x1fd   : > { %v9318_v32 = vpop.permute.xlu2 %1506 }
 0x1fe   : > { %15463 = vst [vmem:[#allocation114_spill] sm:$0xff] %v9318_v32  ;;  %v966_v32 = vld [vmem:[#allocation2 + $0x62] sm:$0xff] }
 0x201   : > { %1634 = vrot.lane.b32.xlu1 %v8852_v31, %s8292_s14  ;;  %v15466_v31 = vld [vmem:[#allocation28_spill] sm:$0xff] }
 0x202   : > { %1644 = vrot.lane.b32.xlu0 %v8890_v2, %s8292_s14 }
 0x203   : > { %v9324_v37 = vpop.permute.xlu1 %1486  ;;  %1642 = vrot.lane.b32.xlu2 %v8904_v35, %s8292_s14  ;;  %v15469_v35 = vld [vmem:[#allocation20_spill] sm:$0xff] }
 0x204   : > { %v9328_v22 = vpop.permute.xlu0 %1496 }
 0x205   : > { %15464 = vst [vmem:[#allocation115_spill] sm:$0xff] %v9328_v22  ;;  %v9330_v40 = vpop.permute.xlu2 %1512  ;;  %v1051_v22 = vld [vmem:[#allocation2 + $0x15c] sm:$0xff] }
 0x206   : > { %15465 = vst [vmem:[#allocation116_spill] sm:$0xff] %v9330_v40 }
 0x209   : > { %1640 = vrot.lane.b32.xlu1 %v8870_v38, %s8292_s14  ;;  %v15472_v38 = vld [vmem:[#allocation34_spill] sm:$0xff] }
 0x20a   : > { %1650 = vrot.lane.b32.xlu0 %v8908_v43, %s8292_s14 }
 0x20b   : > { %v9336_v46 = vpop.permute.xlu1 %1492  ;;  %1648 = vrot.lane.b32.xlu2 %v15466_v31, %s8292_s14  ;;  %v15475_v31 = vld [vmem:[#allocation24_spill] sm:$0xff] }
 0x20c   : > { %v9340_v2 = vpop.permute.xlu0 %1502 }
 0x20d   : > { %15467 = vst [vmem:[#allocation28_spill] sm:$0xff] %v9340_v2  ;;  %v9342_v61 = vpop.permute.xlu2 %1518  ;;  %v15510_v2 = vld [vmem:[#allocation70_spill] sm:$0xff] }
 0x20e   : > { %15468 = vst [vmem:[#allocation117_spill] sm:$0xff] %v9342_v61  ;;  %v15476_v61 = vld [vmem:[#allocation36_spill] sm:$0xff] }
 0x211   : > { %1646 = vrot.lane.b32.xlu1 %v15469_v35, %s8292_s14  ;;  %v15478_v35 = vld [vmem:[#allocation40_spill] sm:$0xff] }
 0x212   : > { %1656 = vrot.lane.b32.xlu0 %v15470_v49, %s8292_s14 }
 0x213   : > { %v9348_v57 = vpop.permute.xlu1 %1498  ;;  %1654 = vrot.lane.b32.xlu2 %v15472_v38, %s8292_s14  ;;  %v9368_v38 = vld [vmem:[#allocation2 + $0x1bc] sm:$0xff] }
 0x214   : > { %15471 = vst [vmem:[#allocation20_spill] sm:$0xff] %v9348_v57  ;;  %v9352_v43 = vpop.permute.xlu0 %1508  ;;  %v1028_v57 = vld [vmem:[#allocation2 + $0x1cb] sm:$0xff] }
 0x215   : > { %15473 = vst [vmem:[#allocation30_spill] sm:$0xff] %v9352_v43  ;;  %v9354_v40 = vpop.permute.xlu2 %1524  ;;  %v9370_v43 = vld [vmem:[#allocation2 + $0x1b4] sm:$0xff] }
 0x216   : > { %15474 = vst [vmem:[#allocation34_spill] sm:$0xff] %v9354_v40  ;;  %v15481_v40 = vld [vmem:[#allocation29_spill] sm:$0xff] }
 0x219   : > { %1652 = vrot.lane.b32.xlu1 %v15475_v31, %s8292_s14 }
 0x21a   : > { %1662 = vrot.lane.b32.xlu0 %v15476_v61, %s8292_s14 }
 0x21b   : > { %v9360_v48 = vpop.permute.xlu1 %1504  ;;  %1660 = vrot.lane.b32.xlu2 %v15478_v35, %s8292_s14 }
 0x21c   : > { %15477 = vst [vmem:[#allocation24_spill] sm:$0xff] %v9360_v48  ;;  %v9364_v49 = vpop.permute.xlu0 %1514  ;;  %v15496_v48 = vld [vmem:[#allocation60_spill] sm:$0xff] }
 0x21d   : > { %15479 = vst [vmem:[#allocation36_spill] sm:$0xff] %v9364_v49  ;;  %v9366_v41 = vpop.permute.xlu2 %1530  ;;  %v967_v49 = vld [vmem:[#allocation2 + $0x6a] sm:$0xff] }
 0x21e   : > { %15480 = vst [vmem:[#allocation40_spill] sm:$0xff] %v9366_v41  ;;  %v1025_v41 = vld [vmem:[#allocation2 + $0x1a3] sm:$0xff] }
 0x221   : > { %1658 = vrot.lane.b32.xlu1 %v15481_v40, %s8292_s14 }
 0x222   : > { %1668 = vrot.lane.b32.xlu0 %v9368_v38, %s8292_s14 }
 0x223   : > { %v9376_v61 = vpop.permute.xlu1 %1510  ;;  %1666 = vrot.lane.b32.xlu2 %v9370_v43, %s8292_s14 }
 0x224   : > { %15482 = vst [vmem:[#allocation29_spill] sm:$0xff] %v9376_v61  ;;  %v9380_v31 = vpop.permute.xlu0 %1520 }
 0x225   : > { %15483 = vst [vmem:[#allocation118_spill] sm:$0xff] %v9380_v31  ;;  %v9382_v35 = vpop.permute.xlu2 %1536  ;;  %v970_v31 = vld [vmem:[#allocation2 + $0x92] sm:$0xff] }
 0x226   : > { %15484 = vst [vmem:[#allocation119_spill] sm:$0xff] %v9382_v35 }
 0x229   : > { %1664 = vrot.lane.b32.xlu1 %v15485_v55, %s8292_s14 }
 0x22a   : > { %1738 = vrot.lane.b32.xlu0 %v15486_v54, %s8293_s15 }
 0x22b   : > { %v9388_v40 = vpop.permute.xlu1 %1516  ;;  %1736 = vrot.lane.b32.xlu2 %v967_v49, %s8293_s15  ;;  %v973_v49 = vld [vmem:[#allocation2 + $0xb2] sm:$0xff] }
 0x22c   : > { %15487 = vst [vmem:[#allocation35_spill] sm:$0xff] %v9388_v40  ;;  %v9391_v61 = vpop.permute.xlu0 %1526 }
 0x22d   : > { %v9393_v62 = vpop.permute.xlu2 %1606 }
 0x231   : > { %1734 = vrot.lane.b32.xlu1 %v966_v32, %s8293_s15 }
 0x232   : > { %1744 = vrot.lane.b32.xlu0 %v15488_v21, %s8293_s15 }
 0x233   : > { %v9398_v55 = vpop.permute.xlu1 %1522  ;;  %1742 = vrot.lane.b32.xlu2 %v970_v31, %s8293_s15  ;;  %v976_v31 = vld [vmem:[#allocation2 + $0xda] sm:$0xff] }
 0x234   : > { %15489 = vst [vmem:[#allocation45_spill] sm:$0xff] %v9398_v55  ;;  %v9401_v54 = vpop.permute.xlu0 %1532  ;;  %v15495_v55 = vld [vmem:[#allocation49_spill] sm:$0xff] }
 0x235   : > { %15490 = vst [vmem:[#allocation50_spill] sm:$0xff] %v9401_v54  ;;  %v9403_v40 = vpop.permute.xlu2 %1612  ;;  %v1013_v54 = vld [vmem:[#allocation2 + $0x113] sm:$0xff] }
 0x239   : > { %1740 = vrot.lane.b32.xlu1 %v15491_v39, %s8293_s15 }
 0x23a   : > { %1750 = vrot.lane.b32.xlu0 %v15492_v34, %s8293_s15 }
 0x23b   : > { %v9409_v35 = vpop.permute.xlu1 %1528  ;;  %1748 = vrot.lane.b32.xlu2 %v973_v49, %s8293_s15  ;;  %v979_v49 = vld [vmem:[#allocation2 + $0xfa] sm:$0xff] }
 0x23c   : > { %15493 = vst [vmem:[#allocation44_spill] sm:$0xff] %v9409_v35  ;;  %v9412_v21 = vpop.permute.xlu0 %1538 }
 0x23d   : > { %15494 = vst [vmem:[#allocation55_spill] sm:$0xff] %v9412_v21  ;;  %v9414_v32 = vpop.permute.xlu2 %1618  ;;  %v15499_v21 = vld [vmem:[#allocation54_spill] sm:$0xff] }
 0x241   : > { %1746 = vrot.lane.b32.xlu1 %v15495_v55, %s8293_s15 }
 0x242   : > { %1756 = vrot.lane.b32.xlu0 %v15496_v48, %s8293_s15 }
 0x243   : > { %v9420_v12 = vpop.permute.xlu1 %1534  ;;  %1754 = vrot.lane.b32.xlu2 %v976_v31, %s8293_s15  ;;  %v982_v31 = vld [vmem:[#allocation2 + $0x122] sm:$0xff] }
 0x244   : > { %15497 = vst [vmem:[#allocation49_spill] sm:$0xff] %v9420_v12  ;;  %v9423_v34 = vpop.permute.xlu0 %1608 }
 0x245   : > { %v9425_v39 = vpop.permute.xlu2 %1624 }
 0x246   : > { %15498 = vst [vmem:[#allocation60_spill] sm:$0xff] %v9425_v39  ;;  %v1048_v39 = vld [vmem:[#allocation2 + $0x13c] sm:$0xff] }
 0x249   : > { %1752 = vrot.lane.b32.xlu1 %v15499_v21, %s8293_s15 }
 0x24a   : > { %1762 = vrot.lane.b32.xlu0 %v9033_v19, %s8293_s15 }
 0x24b   : > { %v9431_v29 = vpop.permute.xlu1 %1540  ;;  %1760 = vrot.lane.b32.xlu2 %v979_v49, %s8293_s15  ;;  %v985_v49 = vld [vmem:[#allocation2 + $0x142] sm:$0xff] }
 0x24c   : > { %15500 = vst [vmem:[#allocation54_spill] sm:$0xff] %v9431_v29  ;;  %v9434_v48 = vpop.permute.xlu0 %1614 }
 0x24d   : > { %v9436_v55 = vpop.permute.xlu2 %1630 }
 0x24e   : > { %15501 = vst [vmem:[#allocation120_spill] sm:$0xff] %v9436_v55 }
 0x251   : > { %1758 = vrot.lane.b32.xlu1 %v15502_v11, %s8293_s15 }
 0x252   : > { %1768 = vrot.lane.b32.xlu0 %v9051_v0, %s8293_s15 }
 0x253   : > { %v9442_v12 = vpop.permute.xlu1 %1610  ;;  %1766 = vrot.lane.b32.xlu2 %v982_v31, %s8293_s15  ;;  %v988_v31 = vld [vmem:[#allocation2 + $0x16a] sm:$0xff] }
 0x254   : > { %v9445_v19 = vpop.permute.xlu0 %1620 }
 0x255   : > { %v9447_v21 = vpop.permute.xlu2 %1636 }
 0x256   : > { %15503 = vst [vmem:[#allocation59_spill] sm:$0xff] %v9447_v21  ;;  %v15506_v21 = vld [vmem:[#allocation75_spill] sm:$0xff] }
 0x259   : > { %1764 = vrot.lane.b32.xlu1 %v9030_v42, %s8293_s15 }
 0x25a   : > { %1774 = vrot.lane.b32.xlu0 %v9067_v13, %s8293_s15 }
 0x25b   : > { %v9453_v29 = vpop.permute.xlu1 %1616  ;;  %1772 = vrot.lane.b32.xlu2 %v985_v49, %s8293_s15  ;;  %v991_v49 = vld [vmem:[#allocation2 + $0x18a] sm:$0xff] }
 0x25c   : > { %v9456_v0 = vpop.permute.xlu0 %1626 }
 0x25d   : > { %15504 = vst [vmem:[#allocation121_spill] sm:$0xff] %v9456_v0  ;;  %v9458_v11 = vpop.permute.xlu2 %1642  ;;  %v1021_v0 = vld [vmem:[#allocation2 + $0x173] sm:$0xff] }
 0x25e   : > { %15505 = vst [vmem:[#allocation122_spill] sm:$0xff] %v9458_v11 }
 0x261   : > { %1770 = vrot.lane.b32.xlu1 %v9047_v3, %s8293_s15 }
 0x262   : > { %1780 = vrot.lane.b32.xlu0 %v15506_v21, %s8293_s15 }
 0x263   : > { %v9464_v55 = vpop.permute.xlu1 %1622  ;;  %1778 = vrot.lane.b32.xlu2 %v988_v31, %s8293_s15  ;;  %v15513_v31 = vld [vmem:[#allocation74_spill] sm:$0xff] }
 0x264   : > { %15507 = vst [vmem:[#allocation75_spill] sm:$0xff] %v9464_v55  ;;  %v9467_v42 = vpop.permute.xlu0 %1632 }
 0x265   : > { %15508 = vst [vmem:[#allocation123_spill] sm:$0xff] %v9467_v42  ;;  %v9469_v13 = vpop.permute.xlu2 %1648  ;;  %v997_v42 = vld [vmem:[#allocation2 + $0x1d2] sm:$0xff] }
 0x266   : > { %15509 = vst [vmem:[#allocation124_spill] sm:$0xff] %v9469_v13 }
 0x269   : > { %1776 = vrot.lane.b32.xlu1 %v15510_v2, %s8293_s15 }
 0x26a   : > { %1786 = vrot.lane.b32.xlu0 %v9097_v8, %s8293_s15 }
 0x26b   : > { %v9475_v11 = vpop.permute.xlu1 %1628  ;;  %1784 = vrot.lane.b32.xlu2 %v991_v49, %s8293_s15  ;;  %v998_v49 = vld [vmem:[#allocation2 + $0x63] sm:$0xff] }
 0x26c   : > { %15511 = vst [vmem:[#allocation70_spill] sm:$0xff] %v9475_v11  ;;  %v9478_v3 = vpop.permute.xlu0 %1638 }
 0x26d   : > { %15512 = vst [vmem:[#allocation125_spill] sm:$0xff] %v9478_v3  ;;  %v9480_v21 = vpop.permute.xlu2 %1654  ;;  %v15517_v3 = vld [vmem:[#allocation79_spill] sm:$0xff] }
 0x271   : > { %1782 = vrot.lane.b32.xlu1 %v15513_v31, %s8293_s15 }
 0x272   : > { %1792 = vrot.lane.b32.xlu0 %v9109_v28, %s8293_s15 }
 0x273   : > { %v9486_v13 = vpop.permute.xlu1 %1634  ;;  %1790 = vrot.lane.b32.xlu2 %v9122_v33, %s8293_s15  ;;  %v996_v33 = vld [vmem:[#allocation2 + $0x1ca] sm:$0xff] }
 0x274   : > { %15514 = vst [vmem:[#allocation74_spill] sm:$0xff] %v9486_v13  ;;  %v9490_v8 = vpop.permute.xlu0 %1644 }
 0x275   : > { %15515 = vst [vmem:[#allocation126_spill] sm:$0xff] %v9490_v8  ;;  %v9492_v2 = vpop.permute.xlu2 %1660  ;;  %v1001_v8 = vld [vmem:[#allocation2 + $0x83] sm:$0xff] }
 0x276   : > { %15516 = vst [vmem:[#allocation127_spill] sm:$0xff] %v9492_v2 }
 0x279   : > { %1788 = vrot.lane.b32.xlu1 %v15517_v3, %s8293_s15 }
 0x27a   : > { %1862 = vrot.lane.b32.xlu0 %v998_v49, %s15234_s16 }
 0x27b   : > { %v9497_v31 = vpop.permute.xlu1 %1640  ;;  %1796 = vrot.lane.b32.xlu2 %v997_v42, %s8293_s15  ;;  %v999_v42 = vld [vmem:[#allocation2 + $0x6b] sm:$0xff] }
 0x27c   : > { %15518 = vst [vmem:[#allocation79_spill] sm:$0xff] %v9497_v31  ;;  %v9500_v28 = vpop.permute.xlu0 %1650  ;;  %v1004_v31 = vld [vmem:[#allocation2 + $0xab] sm:$0xff] }
 0x27d   : > { %15519 = vst [vmem:[#allocation128_spill] sm:$0xff] %v9500_v28  ;;  %v9502_v13 = vpop.permute.xlu2 %1666  ;;  %v1003_v28 = vld [vmem:[#allocation2 + $0x9b] sm:$0xff] }
 0x27e   : > { %15520 = vst [vmem:[#allocation129_spill] sm:$0xff] %v9502_v13 }
 0x281   : > { %1794 = vrot.lane.b32.xlu1 %v996_v33, %s8293_s15 }
 0x282   : > { %1868 = vrot.lane.b32.xlu0 %v1001_v8, %s15234_s16 }
 0x283   : > { %v9506_v56 = vpop.permute.xlu1 %1646  ;;  %1866 = vrot.lane.b32.xlu2 %v1000_v63, %s15234_s16  ;;  %v1002_v63 = vld [vmem:[#allocation2 + $0x93] sm:$0xff] }
 0x284   : > { %15521 = vst [vmem:[#allocation130_spill] sm:$0xff] %v9506_v56  ;;  %v9509_v3 = vpop.permute.xlu0 %1656  ;;  %v1007_v56 = vld [vmem:[#allocation2 + $0xcb] sm:$0xff] }
 0x285   : > { %15522 = vst [vmem:[#allocation131_spill] sm:$0xff] %v9509_v3  ;;  %v9511_v49 = vpop.permute.xlu2 %1736 }
 0x289   : > { %1864 = vrot.lane.b32.xlu1 %v999_v42, %s15234_s16 }
 0x28a   : > { %1874 = vrot.lane.b32.xlu0 %v1004_v31, %s15234_s16 }
 0x28b   : > { %v9515_v13 = vpop.permute.xlu1 %1652  ;;  %1872 = vrot.lane.b32.xlu2 %v1003_v28, %s15234_s16  ;;  %v1005_v28 = vld [vmem:[#allocation2 + $0xb3] sm:$0xff] }
 0x28c   : > { %15523 = vst [vmem:[#allocation132_spill] sm:$0xff] %v9515_v13  ;;  %v9518_v8 = vpop.permute.xlu0 %1662  ;;  %v1010_v13 = vld [vmem:[#allocation2 + $0xf3] sm:$0xff] }
 0x28d   : > { %15524 = vst [vmem:[#allocation133_spill] sm:$0xff] %v9518_v8  ;;  %v9520_v33 = vpop.permute.xlu2 %1742  ;;  %v1009_v8 = vld [vmem:[#allocation2 + $0xe3] sm:$0xff] }
 0x291   : > { %1870 = vrot.lane.b32.xlu1 %v1002_v63, %s15234_s16 }
 0x292   : > { %1880 = vrot.lane.b32.xlu0 %v1007_v56, %s15234_s16 }
 0x293   : > { %v9524_v2 = vpop.permute.xlu1 %1658  ;;  %1878 = vrot.lane.b32.xlu2 %v1006_v53, %s15234_s16  ;;  %v1008_v53 = vld [vmem:[#allocation2 + $0xdb] sm:$0xff] }
 0x294   : > { %15525 = vst [vmem:[#allocation134_spill] sm:$0xff] %v9524_v2  ;;  %v9527_v31 = vpop.permute.xlu0 %1668  ;;  %v1022_v2 = vld [vmem:[#allocation2 + $0x183] sm:$0xff] }
 0x295   : > { %15526 = vst [vmem:[#allocation135_spill] sm:$0xff] %v9527_v31  ;;  %v9529_v42 = vpop.permute.xlu2 %1748  ;;  %v1012_v31 = vld [vmem:[#allocation2 + $0x10b] sm:$0xff] }
 0x299   : > { %1876 = vrot.lane.b32.xlu1 %v1005_v28, %s15234_s16 }
 0x29a   : > { %1886 = vrot.lane.b32.xlu0 %v1010_v13, %s15234_s16 }
 0x29b   : > { %v9533_v11 = vpop.permute.xlu1 %1664  ;;  %1884 = vrot.lane.b32.xlu2 %v1009_v8, %s15234_s16  ;;  %v1011_v8 = vld [vmem:[#allocation2 + $0xfb] sm:$0xff] }
 0x29c   : > { %15527 = vst [vmem:[#allocation136_spill] sm:$0xff] %v9533_v11  ;;  %v9536_v56 = vpop.permute.xlu0 %1738  ;;  %v1016_v11 = vld [vmem:[#allocation2 + $0x13b] sm:$0xff] }
 0x29d   : > { %v9538_v63 = vpop.permute.xlu2 %1754 }
 0x29e   : > { %15528 = vst [vmem:[#allocation137_spill] sm:$0xff] %v9538_v63  ;;  %v1018_v63 = vld [vmem:[#allocation2 + $0x153] sm:$0xff] }
 0x2a1   : > { %1882 = vrot.lane.b32.xlu1 %v1008_v53, %s15234_s16 }
 0x2a2   : > { %1892 = vrot.lane.b32.xlu0 %v1013_v54, %s15234_s16 }
 0x2a3   : > { %v9542_v25 = vpop.permute.xlu1 %1734  ;;  %1890 = vrot.lane.b32.xlu2 %v1012_v31, %s15234_s16  ;;  %v1014_v31 = vld [vmem:[#allocation2 + $0x123] sm:$0xff] }
 0x2a4   : > { %v9545_v13 = vpop.permute.xlu0 %1744 }
 0x2a5   : > { %v9547_v28 = vpop.permute.xlu2 %1760 }
 0x2a6   : > { %15529 = vst [vmem:[#allocation138_spill] sm:$0xff] %v9547_v28 }
 0x2a9   : > { %1888 = vrot.lane.b32.xlu1 %v1011_v8, %s15234_s16 }
 0x2aa   : > { %1898 = vrot.lane.b32.xlu0 %v1016_v11, %s15234_s16 }
 0x2ab   : > { %v9551_v27 = vpop.permute.xlu1 %1740  ;;  %1896 = vrot.lane.b32.xlu2 %v1015_v15, %s15234_s16  ;;  %v1017_v15 = vld [vmem:[#allocation2 + $0x143] sm:$0xff] }
 0x2ac   : > { %v9554_v54 = vpop.permute.xlu0 %1750 }
 0x2ad   : > { %15530 = vst [vmem:[#allocation139_spill] sm:$0xff] %v9554_v54  ;;  %v9556_v53 = vpop.permute.xlu2 %1766 }
 0x2ae   : > { %15531 = vst [vmem:[#allocation140_spill] sm:$0xff] %v9556_v53 }
 0x2b1   : > { %1894 = vrot.lane.b32.xlu1 %v1014_v31, %s15234_s16 }
 0x2b2   : > { %1904 = vrot.lane.b32.xlu0 %v1019_v51, %s15234_s16 }
 0x2b3   : > { %v9560_v28 = vpop.permute.xlu1 %1746  ;;  %1902 = vrot.lane.b32.xlu2 %v1018_v63, %s15234_s16  ;;  %v1020_v63 = vld [vmem:[#allocation2 + $0x16b] sm:$0xff] }
 0x2b4   : > { %v9563_v11 = vpop.permute.xlu0 %1756 }
 0x2b5   : > { %15532 = vst [vmem:[#allocation141_spill] sm:$0xff] %v9563_v11  ;;  %v9565_v8 = vpop.permute.xlu2 %1772  ;;  %v1024_v11 = vld [vmem:[#allocation2 + $0x19b] sm:$0xff] }
 0x2b6   : > { %15533 = vst [vmem:[#allocation142_spill] sm:$0xff] %v9565_v8 }
 0x2b9   : > { %1900 = vrot.lane.b32.xlu1 %v1017_v15, %s15234_s16 }
 0x2ba   : > { %1910 = vrot.lane.b32.xlu0 %v1022_v2, %s15234_s16 }
 0x2bb   : > { %v9569_v53 = vpop.permute.xlu1 %1752  ;;  %1908 = vrot.lane.b32.xlu2 %v1021_v0, %s15234_s16  ;;  %v1023_v0 = vld [vmem:[#allocation2 + $0x18b] sm:$0xff] }
 0x2bc   : > { %15534 = vst [vmem:[#allocation143_spill] sm:$0xff] %v9569_v53  ;;  %v9572_v51 = vpop.permute.xlu0 %1762 }
 0x2bd   : > { %15535 = vst [vmem:[#allocation144_spill] sm:$0xff] %v9572_v51  ;;  %v9574_v31 = vpop.permute.xlu2 %1778  ;;  %v1030_v51 = vld [vmem:[#allocation2 + $0x64] sm:$0xff] }
 0x2be   : > { %15536 = vst [vmem:[#allocation145_spill] sm:$0xff] %v9574_v31 }
 0x2c1   : > { %1906 = vrot.lane.b32.xlu1 %v1020_v63, %s15234_s16 }
 0x2c2   : > { %1916 = vrot.lane.b32.xlu0 %v1025_v41, %s15234_s16 }
 0x2c3   : > { %v9578_v8 = vpop.permute.xlu1 %1758  ;;  %1914 = vrot.lane.b32.xlu2 %v1024_v11, %s15234_s16  ;;  %v1031_v11 = vld [vmem:[#allocation2 + $0x6c] sm:$0xff] }
 0x2c4   : > { %15537 = vst [vmem:[#allocation146_spill] sm:$0xff] %v9578_v8  ;;  %v9581_v2 = vpop.permute.xlu0 %1768  ;;  %v1039_v8 = vld [vmem:[#allocation2 + $0xcc] sm:$0xff] }
 0x2c5   : > { %15538 = vst [vmem:[#allocation147_spill] sm:$0xff] %v9581_v2  ;;  %v9583_v15 = vpop.permute.xlu2 %1784 }
 0x2c6   : > { %15539 = vst [vmem:[#allocation148_spill] sm:$0xff] %v9583_v15  ;;  %v275_v15 = vld [vmem:[%s9699_s23] sm:$0xff] }
 0x2c7   : > { %vm610_vm7 = vcmp.gt.f32.partialorder %v275_v15, 0.0  ;;  %740 = vst.msk [vmem:[#allocation4 + $0x19] sm:$0xff] %vm307_vm0, %v275_v15 }
 0x2c9   : > { %1912 = vrot.lane.b32.xlu1 %v1023_v0, %s15234_s16 }
 0x2ca   : > { %1922 = vrot.lane.b32.xlu0 %v1028_v57, %s15234_s16 }
 0x2cb   : > { %v9587_v31 = vpop.permute.xlu1 %1764  ;;  %1920 = vrot.lane.b32.xlu2 %v9258_v5, %s15234_s16  ;;  %v1029_v5 = vld [vmem:[#allocation2 + $0x1d3] sm:$0xff] }
 0x2cc   : > { %15540 = vst [vmem:[#allocation149_spill] sm:$0xff] %v9587_v31  ;;  %v9591_v41 = vpop.permute.xlu0 %1774  ;;  %v1033_v31 = vld [vmem:[#allocation2 + $0x84] sm:$0xff] }
 0x2cd   : > { %15541 = vst [vmem:[#allocation150_spill] sm:$0xff] %v9591_v41  ;;  %v9593_v63 = vpop.permute.xlu2 %1790  ;;  %v1034_v41 = vld [vmem:[#allocation2 + $0x94] sm:$0xff] }
 0x2ce   : > { %15542 = vst [vmem:[#allocation151_spill] sm:$0xff] %v9593_v63 }
 0x2d1   : > { %1918 = vrot.lane.b32.xlu1 %v9232_v59, %s15234_s16 }
 0x2d2   : > { %1992 = vrot.lane.b32.xlu0 %v1031_v11, %s8295_s17 }
 0x2d3   : > { %v9598_v0 = vpop.permute.xlu1 %1770  ;;  %1990 = vrot.lane.b32.xlu2 %v1030_v51, %s8295_s17  ;;  %v1032_v51 = vld [vmem:[#allocation2 + $0x7c] sm:$0xff] }
 0x2d4   : > { %15543 = vst [vmem:[#allocation152_spill] sm:$0xff] %v9598_v0  ;;  %v9601_v57 = vpop.permute.xlu0 %1780  ;;  %v1037_v0 = vld [vmem:[#allocation2 + $0xb4] sm:$0xff] }
 0x2d5   : > { %15544 = vst [vmem:[#allocation153_spill] sm:$0xff] %v9601_v57  ;;  %v9603_v2 = vpop.permute.xlu2 %1796  ;;  %v1036_v57 = vld [vmem:[#allocation2 + $0xac] sm:$0xff] }
 0x2d6   : > { %15545 = vst [vmem:[#allocation154_spill] sm:$0xff] %v9603_v2 }
 0x2d9   : > { %1924 = vrot.lane.b32.xlu1 %v1029_v5, %s15234_s16 }
 0x2da   : > { %1998 = vrot.lane.b32.xlu0 %v1034_v41, %s8295_s17 }
 0x2db   : > { %v9607_v63 = vpop.permute.xlu1 %1776  ;;  %1996 = vrot.lane.b32.xlu2 %v1033_v31, %s8295_s17  ;;  %v1035_v31 = vld [vmem:[#allocation2 + $0x9c] sm:$0xff] }
 0x2dc   : > { %15546 = vst [vmem:[#allocation155_spill] sm:$0xff] %v9607_v63  ;;  %v9610_v59 = vpop.permute.xlu0 %1786  ;;  %v1040_v63 = vld [vmem:[#allocation2 + $0xdc] sm:$0xff] }
 0x2dd   : > { %15547 = vst [vmem:[#allocation156_spill] sm:$0xff] %v9610_v59  ;;  %v9612_v11 = vpop.permute.xlu2 %1866 }
 0x2e1   : > { %1994 = vrot.lane.b32.xlu1 %v1032_v51, %s8295_s17 }
 0x2e2   : > { %2004 = vrot.lane.b32.xlu0 %v1037_v0, %s8295_s17 }
 0x2e3   : > { %v9616_v2 = vpop.permute.xlu1 %1782  ;;  %2002 = vrot.lane.b32.xlu2 %v1036_v57, %s8295_s17  ;;  %v1038_v57 = vld [vmem:[#allocation2 + $0xc4] sm:$0xff] }
 0x2e4   : > { %v9619_v41 = vpop.permute.xlu0 %1792 }
 0x2e5   : > { %15548 = vst [vmem:[#allocation157_spill] sm:$0xff] %v9619_v41  ;;  %v9621_v5 = vpop.permute.xlu2 %1872  ;;  %v1042_v41 = vld [vmem:[#allocation2 + $0xf4] sm:$0xff] }
 0x2e9   : > { %2000 = vrot.lane.b32.xlu1 %v1035_v31, %s8295_s17 }
 0x2ea   : > { %2010 = vrot.lane.b32.xlu0 %v1040_v63, %s8295_s17 }
 0x2eb   : > { %v9625_v59 = vpop.permute.xlu1 %1788  ;;  %2008 = vrot.lane.b32.xlu2 %v1039_v8, %s8295_s17  ;;  %v1041_v8 = vld [vmem:[#allocation2 + $0xe4] sm:$0xff] }
 0x2ec   : > { %15549 = vst [vmem:[#allocation158_spill] sm:$0xff] %v9625_v59  ;;  %v9628_v0 = vpop.permute.xlu0 %1862  ;;  %v1046_v59 = vld [vmem:[#allocation2 + $0x124] sm:$0xff] }
 0x2ed   : > { %v9630_v51 = vpop.permute.xlu2 %1878 }
 0x2ee   : > { %15550 = vst [vmem:[#allocation159_spill] sm:$0xff] %v9630_v51  ;;  %v276_v51 = vld [vmem:[%s9699_s23 + $0x8] sm:$0xff] }
 0x2ef   : > { %vm611_vm6 = vcmp.gt.f32.partialorder %v276_v51, 0.0  ;;  %741 = vst.msk [vmem:[#allocation4 + $0x21] sm:$0xff] %vm307_vm0, %v276_v51 }
 0x2f1   : > { %2006 = vrot.lane.b32.xlu1 %v1038_v57, %s8295_s17 }
 0x2f2   : > { %2016 = vrot.lane.b32.xlu0 %v1043_v7, %s8295_s17 }
 0x2f3   : > { %v9634_v16 = vpop.permute.xlu1 %1794  ;;  %2014 = vrot.lane.b32.xlu2 %v1042_v41, %s8295_s17  ;;  %v1044_v41 = vld [vmem:[#allocation2 + $0x10c] sm:$0xff] }
 0x2f4   : > { %15551 = vst [vmem:[#allocation160_spill] sm:$0xff] %v9634_v16  ;;  %v9637_v63 = vpop.permute.xlu0 %1868  ;;  %v1049_v16 = vld [vmem:[#allocation2 + $0x144] sm:$0xff] }
 0x2f5   : > { %v9639_v31 = vpop.permute.xlu2 %1884 }
 0x2f6   : > { %15552 = vst [vmem:[#allocation161_spill] sm:$0xff] %v9639_v31 }
 0x2f9   : > { %2012 = vrot.lane.b32.xlu1 %v1041_v8, %s8295_s17  ;;  %v2356_v8 = vld [vmem:[%s15207_s2 + $0x38] sm:$0xff] }
 0x2fa   : > { %2022 = vrot.lane.b32.xlu0 %v1046_v59, %s8295_s17  ;;  %v2357_v59 = vld [vmem:[%s15207_s2 + $0x40] sm:$0xff] }
 0x2fb   : > { %v9643_v53 = vpop.permute.xlu1 %1864  ;;  %2020 = vrot.lane.b32.xlu2 %v1045_v23, %s8295_s17  ;;  %2462 = vmatpush.msra.mxu0 %v2357_v59 }
 0x2fc   : > { %v9646_v7 = vpop.permute.xlu0 %1874  ;;  %8024 = vmatpush.msra.mxu3 %v2357_v59 }
 0x2fd   : > { %v9648_v57 = vpop.permute.xlu2 %1890  ;;  %2463 = vmatpush.msra.mxu0 %v2356_v8 }
 0x2fe   : > { %15553 = vst [vmem:[#allocation162_spill] sm:$0xff] %v9648_v57  ;;  %8025 = vmatpush.msra.mxu3 %v2356_v8  ;;  %v2353_v8 = vld [vmem:[%s15207_s2 + $0x20] sm:$0xff] }
 0x301   : > { %2018 = vrot.lane.b32.xlu1 %v1044_v41, %s8295_s17  ;;  %v1047_v41 = vld [vmem:[#allocation2 + $0x12c] sm:$0xff] }
 0x302   : > { %2028 = vrot.lane.b32.xlu0 %v1049_v16, %s8295_s17  ;;  %v2355_v16 = vld [vmem:[%s15207_s2 + $0x30] sm:$0xff] }
 0x303   : > { %v9652_v31 = vpop.permute.xlu1 %1870  ;;  %2026 = vrot.lane.b32.xlu2 %v1048_v39, %s8295_s17  ;;  %v1052_v39 = vld [vmem:[#allocation2 + $0x16c] sm:$0xff]  ;;  %2464 = vmatpush.msra.mxu0 %v2355_v16 }
 0x304   : > { %v9658_v23 = vpop.permute.xlu0 %1880  ;;  %8026 = vmatpush.msra.mxu3 %v2355_v16  ;;  %v2352_v16 = vld [vmem:[%s15207_s2 + $0x18] sm:$0xff] }
 0x305   : > { %15554 = vst [vmem:[#allocation163_spill] sm:$0xff] %v9658_v23  ;;  %v9663_v57 = vpop.permute.xlu2 %1896  ;;  %v2354_v23 = vld [vmem:[%s15207_s2 + $0x28] sm:$0xff] }
 0x306   : > { %15555 = vst [vmem:[#allocation164_spill] sm:$0xff] %v9663_v57  ;;  %2465 = vmatpush.msra.mxu0 %v2354_v23  ;;  %8027 = vmatpush.msra.mxu3 %v2354_v23  ;;  %v1054_v23 = vld [vmem:[#allocation2 + $0x184] sm:$0xff] }
 0x308   : > { %2466 = vmatpush.msra.mxu0 %v2353_v8  ;;  %8028 = vmatpush.msra.mxu3 %v2353_v8 }
 0x309   : > { %2024 = vrot.lane.b32.xlu1 %v1047_v41, %s8295_s17 }
 0x30a   : > { %2034 = vrot.lane.b32.xlu0 %v1052_v39, %s8295_s17  ;;  %v2351_v39 = vld [vmem:[%s15207_s2 + $0x10] sm:$0xff]  ;;  %2467 = vmatpush.msra.mxu0 %v2352_v16 }
 0x30b   : > { %v9673_v59 = vpop.permute.xlu1 %1876  ;;  %2032 = vrot.lane.b32.xlu2 %v1051_v22, %s8295_s17  ;;  %v1050_v22 = vld [vmem:[#allocation2 + $0x154] sm:$0xff]  ;;  %8029 = vmatpush.msra.mxu3 %v2352_v16  ;;  %v2349_v16 = vld [vmem:[%s15207_s2] sm:$0xff] }
 0x30c   : > { %v9679_v57 = vpop.permute.xlu0 %1886  ;;  %2468 = vmatpush.msra.mxu0 %v2351_v39 }
 0x30d   : > { %15556 = vst [vmem:[#allocation165_spill] sm:$0xff] %v9679_v57  ;;  %v9684_v41 = vpop.permute.xlu2 %1902  ;;  %v2350_v57 = vld [vmem:[%s15207_s2 + $0x8] sm:$0xff]  ;;  %8030 = vmatpush.msra.mxu3 %v2351_v39 }
 0x30e   : > { %15557 = vst [vmem:[#allocation166_spill] sm:$0xff] %v9684_v41  ;;  %2469 = vmatpush.msra.mxu0 %v2350_v57  ;;  %v277_v41 = vld [vmem:[%s9699_s23 + $0x10] sm:$0xff] }
 0x30f   : > { %8031 = vmatpush.msra.mxu3 %v2350_v57  ;;  %vm612_vm5 = vcmp.gt.f32.partialorder %v277_v41, 0.0  ;;  %v644_v54 = vmul.f32 0.01, %v277_v41  ;;  %742 = vst.msk [vmem:[#allocation4 + $0x31] sm:$0xff] %vm307_vm0, %v277_v41  ;;  %v642_v57 = vmul.f32 0.01, %v275_v15 }
 0x310   : > { %2470 = vmatpush.msra.mxu0 %v2349_v16 }
 0x311   : > { %2030 = vrot.lane.b32.xlu1 %v1050_v22, %s8295_s17  ;;  %8032 = vmatpush.msra.mxu3 %v2349_v16  ;;  %v674_v16 = vsel %vm610_vm7, %v275_v15, %v642_v57  ;;  %v279_v15 = vld [vmem:[%s9699_s23 + $0x20] sm:$0xff]  ;;  %v1061_v57 = vld [vmem:[#allocation2 + $0x1d4] sm:$0xff] }
 0x312   : > { %2040 = vrot.lane.b32.xlu0 %v1055_v52, %s8295_s17  ;;  %v1053_v52 = vld [vmem:[#allocation2 + $0x174] sm:$0xff]  ;;  %707 = vst.msk [vmem:[#allocation3 + $0x4b] sm:$0xff] %vm307_vm0, %v674_v16  ;;  %vm614_vm9 = vcmp.gt.f32.partialorder %v279_v15, 0.0  ;;  %v1060_v16 = vld [vmem:[#allocation2 + $0x1cc] sm:$0xff] }
 0x313   : > { %v9701_v8 = vpop.permute.xlu1 %1882  ;;  %2038 = vrot.lane.b32.xlu2 %v1054_v23, %s8295_s17  ;;  %v643_v23 = vmul.f32 0.01, %v276_v51  ;;  %744 = vst.msk [vmem:[#allocation4 + $0x49] sm:$0xff] %vm307_vm0, %v279_v15 }
 0x314   : > { %15558 = vst [vmem:[#allocation167_spill] sm:$0xff] %v9701_v8  ;;  %v9707_v39 = vpop.permute.xlu0 %1892  ;;  %v1057_v8 = vld [vmem:[#allocation2 + $0x1a4] sm:$0xff] }
 0x315   : > { %15559 = vst [vmem:[#allocation168_spill] sm:$0xff] %v9707_v39  ;;  %v9709_v22 = vpop.permute.xlu2 %1908  ;;  %v676_v39 = vsel %vm612_vm5, %v277_v41, %v644_v54  ;;  %v675_v3 = vsel %vm611_vm6, %v276_v51, %v643_v23  ;;  %v280_v51 = vld [vmem:[%s9699_s23 + $0x28] sm:$0xff]  ;;  %v1056_v41 = vld [vmem:[#allocation2 + $0x19c] sm:$0xff]  ;;  %vm2283_vm5 = vcmask 457728   ;;  %vm2358_vm6 = vcmask 588800  }
 0x316   : > { %15560 = vst [vmem:[#allocation169_spill] sm:$0xff] %v9709_v22  ;;  %vm615_vm8 = vcmp.gt.f32.partialorder %v280_v51, 0.0 }
 0x317   : > { %709 = vst.msk [vmem:[#allocation3 + $0x63] sm:$0xff] %vm307_vm0, %v676_v39  ;;  %v278_v39 = vld [vmem:[%s9699_s23 + $0x18] sm:$0xff] }
 0x318   : > { %708 = vst.msk [vmem:[#allocation3 + $0x53] sm:$0xff] %vm307_vm0, %v675_v3  ;;  %v645_v3 = vmul.f32 0.01, %v278_v39  ;;  %vm613_vm10 = vcmp.gt.f32.partialorder %v278_v39, 0.0 }
 0x319   : > { %2036 = vrot.lane.b32.xlu1 %v1053_v52, %s8295_s17  ;;  %v647_v52 = vmul.f32 0.01, %v280_v51  ;;  %745 = vst.msk [vmem:[#allocation4 + $0x51] sm:$0xff] %vm307_vm0, %v280_v51 }
 0x31a   : > { %2046 = vrot.lane.b32.xlu0 %v9370_v43, %s8295_s17  ;;  %v646_v43 = vmul.f32 0.01, %v279_v15  ;;  %743 = vst.msk [vmem:[#allocation4 + $0x39] sm:$0xff] %vm307_vm0, %v278_v39 }
 0x31b   : > { %v9722_v22 = vpop.permute.xlu1 %1888  ;;  %2044 = vrot.lane.b32.xlu2 %v1057_v8, %s8295_s17  ;;  %v679_v8 = vsel %vm615_vm8, %v280_v51, %v647_v52  ;;  %v773_v51 = vld [vmem:[#allocation2 + $0x32] sm:$0xff] }
 0x31c   : > { %15561 = vst [vmem:[#allocation170_spill] sm:$0xff] %v9722_v22  ;;  %v9726_v54 = vpop.permute.xlu0 %1898  ;;  %v677_v22 = vsel %vm613_vm10, %v278_v39, %v645_v3 }
 0x31d   : > { %15562 = vst [vmem:[#allocation171_spill] sm:$0xff] %v9726_v54  ;;  %v9729_v23 = vpop.permute.xlu2 %1914  ;;  %v678_v54 = vsel %vm614_vm9, %v279_v15, %v646_v43  ;;  %v15567_v43 = vld [vmem:[#allocation10_spill] sm:$0xff] }
 0x31e   : > { %15563 = vst [vmem:[#allocation172_spill] sm:$0xff] %v9729_v23  ;;  %v2086_v3 = vsel %vm307_vm0, %v773_v51, %v15567_v43 }
 0x31f   : > { %712 = vst.msk [vmem:[#allocation3 + $0x83] sm:$0xff] %vm307_vm0, %v679_v8  ;;  %v283_v8 = vld [vmem:[%s9699_s23 + $0x40] sm:$0xff] }
 0x320   : > { %711 = vst.msk [vmem:[#allocation3 + $0x7b] sm:$0xff] %vm307_vm0, %v678_v54  ;;  %v650_v39 = vmul.f32 0.01, %v283_v8  ;;  %v281_v54 = vld [vmem:[%s9699_s23 + $0x30] sm:$0xff]  ;;  %vm618_vm12 = vcmp.gt.f32.partialorder %v283_v8, 0.0 }
 0x321   : > { %2042 = vrot.lane.b32.xlu1 %v1056_v41, %s8295_s17  ;;  %710 = vst.msk [vmem:[#allocation3 + $0x6b] sm:$0xff] %vm307_vm0, %v677_v22  ;;  %v282_v41 = vld [vmem:[%s9699_s23 + $0x38] sm:$0xff]  ;;  %vm616_vm14 = vcmp.gt.f32.partialorder %v281_v54, 0.0 }
 0x322   : > { %2052 = vrot.lane.b32.xlu0 %v1061_v57, %s8295_s17  ;;  %748 = vst.msk [vmem:[#allocation4 + $0x79] sm:$0xff] %vm307_vm0, %v283_v8  ;;  %v649_v22 = vmul.f32 0.01, %v282_v41  ;;  %v648_v57 = vmul.f32 0.01, %v281_v54  ;;  %v682_v55 = vsel %vm618_vm12, %v283_v8, %v650_v39  ;;  %vm617_vm13 = vcmp.gt.f32.partialorder %v282_v41, 0.0 }
 0x323   : > { %v9741_v52 = vpop.permute.xlu1 %1894  ;;  %2050 = vrot.lane.b32.xlu2 %v1060_v16, %s8295_s17  ;;  %747 = vst.msk [vmem:[#allocation4 + $0x69] sm:$0xff] %vm307_vm0, %v282_v41  ;;  %v15568_v16 = vld [vmem:[#allocation43_spill] sm:$0xff] }
 0x324   : > { %15564 = vst [vmem:[#allocation173_spill] sm:$0xff] %v9741_v52  ;;  %v9744_v23 = vpop.permute.xlu0 %1904  ;;  %v2119_v52 = vsel %vm2118_vm11, %v2086_v3, %v15568_v16  ;;  %v681_v51 = vsel %vm617_vm13, %v282_v41, %v649_v22  ;;  %v680_v43 = vsel %vm616_vm14, %v281_v54, %v648_v57  ;;  %v285_v41 = vld [vmem:[%s9699_s23 + $0x50] sm:$0xff] }
 0x325   : > { %15565 = vst [vmem:[#allocation174_spill] sm:$0xff] %v9744_v23  ;;  %v9747_v15 = vpop.permute.xlu2 %1920  ;;  %v2602_v23 = vld [vmem:[#allocation3 + $0x1b] sm:$0xff]  ;;  %v2152_v35 = vsel %vm2151_vm15, %v2119_v52, %v9176_v24  ;;  %v2600_v52 = vld [vmem:[#allocation3 + $0x3] sm:$0xff]  ;;  %v652_v3 = vmul.f32 0.01, %v285_v41  ;;  %vm620_vm8 = vcmp.gt.f32.partialorder %v285_v41, 0.0 }
 0x326   : > { %15566 = vst [vmem:[#allocation175_spill] sm:$0xff] %v9747_v15  ;;  %v2601_v15 = vld [vmem:[#allocation3 + $0xb] sm:$0xff]  ;;  %v2185_v8 = vsel %vm2184_vm2, %v2152_v35, %v9292_v6  ;;  %v2605_v22 = vld [vmem:[#allocation3 + $0x3b] sm:$0xff] }
 0x327   : > { %746 = vst.msk [vmem:[#allocation4 + $0x61] sm:$0xff] %vm307_vm0, %v281_v54  ;;  %v286_v35 = vld [vmem:[%s9699_s23 + $0x58] sm:$0xff]  ;;  %v284_v54 = vld [vmem:[%s9699_s23 + $0x48] sm:$0xff]  ;;  %v684_v16 = vsel %vm620_vm8, %v285_v41, %v652_v3 }
 0x328   : > { %715 = vst.msk [vmem:[#allocation3 + $0xab] sm:$0xff] %vm307_vm0, %v682_v55  ;;  %v2218_v55 = vsel %vm2217_vm1, %v2185_v8, %v9393_v62  ;;  %v653_v39 = vmul.f32 0.01, %v286_v35  ;;  %vm621_vm7 = vcmp.gt.f32.partialorder %v286_v35, 0.0  ;;  %vm619_vm9 = vcmp.gt.f32.partialorder %v284_v54, 0.0  ;;  %v2607_v3 = vld [vmem:[#allocation3 + $0x53] sm:$0xff] }
 0x329   : > { %2048 = vrot.lane.b32.xlu1 %v9368_v38, %s8295_s17  ;;  %714 = vst.msk [vmem:[#allocation3 + $0x9b] sm:$0xff] %vm307_vm0, %v681_v51  ;;  %v2251_v38 = vsel %vm2250_vm3, %v2218_v55, %v9542_v25  ;;  %v651_v25 = vmul.f32 0.01, %v284_v54  ;;  %v289_v55 = vld [vmem:[%s9699_s23 + $0x70] sm:$0xff] }
 0x32a   : > { %2893 = vrot.lane.b32.xlu0 %v2602_v23, %s8288_s30  ;;  %713 = vst.msk [vmem:[#allocation3 + $0x93] sm:$0xff] %vm307_vm0, %v680_v43  ;;  %v2284_v23 = vsel %vm2283_vm5, %v2251_v38, %v9628_v0  ;;  %v685_v57 = vsel %vm621_vm7, %v286_v35, %v653_v39  ;;  %v2604_v0 = vld [vmem:[#allocation3 + $0x33] sm:$0xff]  ;;  %v2603_v38 = vld [vmem:[#allocation3 + $0x23] sm:$0xff]  ;;  %vm624_vm10 = vcmp.gt.f32.partialorder %v289_v55, 0.0 }
 0x32b   : > { %v9770_v24 = vpop.permute.xlu1 %1900  ;;  %2891 = vrot.lane.b32.xlu2 %v2601_v15, %s8288_s30  ;;  %751 = vst.msk [vmem:[#allocation4 + $0x99] sm:$0xff] %vm307_vm0, %v286_v35  ;;  %v683_v51 = vsel %vm619_vm9, %v284_v54, %v651_v25 }
 0x32c   : > { %15569 = vst [vmem:[#allocation10_spill] sm:$0xff] %v9770_v24  ;;  %v9775_v6 = vpop.permute.xlu0 %1910 }
 0x32d   : > { %v1991_v62 = vpop.permute.xlu2 %1990  ;;  %750 = vst.msk [vmem:[#allocation4 + $0x91] sm:$0xff] %vm307_vm0, %v285_v41 }
 0x32e   : > { %v2317_v15 = vsel %vm2316_vm4, %v2284_v23, %v1991_v62  ;;  %749 = vst.msk [vmem:[#allocation4 + $0x81] sm:$0xff] %vm307_vm0, %v284_v54  ;;  %v656_v23 = vmul.f32 0.01, %v289_v55  ;;  %v287_v62 = vld [vmem:[%s9699_s23 + $0x60] sm:$0xff]  ;;  %v2608_v54 = vld [vmem:[#allocation3 + $0x63] sm:$0xff] }
 0x32f   : > { %7920 = vmatmul.msk.f32.vlgmr.msra.gmra.mxu0 %vm2358_vm6, %v2317_v15  ;;  %718 = vst.msk [vmem:[#allocation3 + $0xcb] sm:$0xff] %vm307_vm0, %v685_v57  ;;  %v654_v41 = vmul.f32 0.01, %v287_v62  ;;  %vm622_vm13 = vcmp.gt.f32.partialorder %v287_v62, 0.0  ;;  %v774_v57 = vld [vmem:[#allocation2 + $0x3a] sm:$0xff] }
 0x330   : > { %717 = vst.msk [vmem:[#allocation3 + $0xc3] sm:$0xff] %vm307_vm0, %v684_v16  ;;  %v688_v15 = vsel %vm624_vm10, %v289_v55, %v656_v23 }
 0x331   : > { %2889 = vrot.lane.b32.xlu1 %v2600_v52, %s8288_s30  ;;  %716 = vst.msk [vmem:[#allocation3 + $0xb3] sm:$0xff] %vm307_vm0, %v683_v51  ;;  %v288_v52 = vld [vmem:[%s9699_s23 + $0x68] sm:$0xff] }
 0x332   : > { %2899 = vrot.lane.b32.xlu0 %v2605_v22, %s8288_s30  ;;  %754 = vst.msk [vmem:[#allocation4 + $0xc1] sm:$0xff] %vm307_vm0, %v289_v55  ;;  %v655_v39 = vmul.f32 0.01, %v288_v52  ;;  %vm623_vm12 = vcmp.gt.f32.partialorder %v288_v52, 0.0  ;;  %v686_v22 = vsel %vm622_vm13, %v287_v62, %v654_v41  ;;  %v292_v51 = vld [vmem:[%s9699_s23 + $0x88] sm:$0xff]  ;;  %v2606_v55 = vld [vmem:[#allocation3 + $0x4b] sm:$0xff] }
 0x333   : > { %v9792_v43 = vpop.permute.xlu1 %1906  ;;  %2897 = vrot.lane.b32.xlu2 %v2604_v0, %s8288_s30  ;;  %753 = vst.msk [vmem:[#allocation4 + $0xb1] sm:$0xff] %vm307_vm0, %v288_v52  ;;  %vm627_vm14 = vcmp.gt.f32.partialorder %v292_v51, 0.0 }
 0x334   : > { %15570 = vst [vmem:[#allocation43_spill] sm:$0xff] %v9792_v43  ;;  %v9795_v8 = vpop.permute.xlu0 %1916  ;;  %v687_v25 = vsel %vm623_vm12, %v288_v52, %v655_v39  ;;  %v659_v52 = vmul.f32 0.01, %v292_v51  ;;  %v15573_v39 = vld [vmem:[#allocation12_spill] sm:$0xff] }
 0x335   : > { %15571 = vst [vmem:[#allocation176_spill] sm:$0xff] %v9795_v8  ;;  %v9798_v35 = vpop.permute.xlu2 %1996  ;;  %v2087_v41 = vsel %vm307_vm0, %v774_v57, %v15573_v39 }
 0x336   : > { %752 = vst.msk [vmem:[#allocation4 + $0xa9] sm:$0xff] %vm307_vm0, %v287_v62  ;;  %v290_v62 = vld [vmem:[%s9699_s23 + $0x78] sm:$0xff]  ;;  %v691_v43 = vsel %vm627_vm14, %v292_v51, %v659_v52 }
 0x337   : > { %721 = vst.msk [vmem:[#allocation3 + $0xf3] sm:$0xff] %vm307_vm0, %v688_v15  ;;  %v657_v15 = vmul.f32 0.01, %v290_v62  ;;  %vm625_vm8 = vcmp.gt.f32.partialorder %v290_v62, 0.0  ;;  %v2609_v52 = vld [vmem:[#allocation3 + $0x6b] sm:$0xff] }
 0x338   : > { %720 = vst.msk [vmem:[#allocation3 + $0xe3] sm:$0xff] %vm307_vm0, %v687_v25 }
 0x339   : > { %2895 = vrot.lane.b32.xlu1 %v2603_v38, %s8288_s30  ;;  %719 = vst.msk [vmem:[#allocation3 + $0xdb] sm:$0xff] %vm307_vm0, %v686_v22  ;;  %v291_v38 = vld [vmem:[%s9699_s23 + $0x80] sm:$0xff]  ;;  %v2611_v22 = vld [vmem:[#allocation3 + $0x83] sm:$0xff]  ;;  %v689_v39 = vsel %vm625_vm8, %v290_v62, %v657_v15  ;;  %v2613_v15 = vld [vmem:[#allocation3 + $0x9b] sm:$0xff] }
 0x33a   : > { %2905 = vrot.lane.b32.xlu0 %v2608_v54, %s8288_s30  ;;  %757 = vst.msk [vmem:[#allocation4 + $0xe1] sm:$0xff] %vm307_vm0, %v292_v51  ;;  %v658_v54 = vmul.f32 0.01, %v291_v38  ;;  %vm626_vm7 = vcmp.gt.f32.partialorder %v291_v38, 0.0 }
 0x33b   : > { %v9810_v0 = vpop.permute.xlu1 %1912  ;;  %2903 = vrot.lane.b32.xlu2 %v2607_v3, %s8288_s30  ;;  %756 = vst.msk [vmem:[#allocation4 + $0xd9] sm:$0xff] %vm307_vm0, %v291_v38  ;;  %v15574_v3 = vld [vmem:[#allocation57_spill] sm:$0xff] }
 0x33c   : > { %v9813_v16 = vpop.permute.xlu0 %1922  ;;  %v2120_v25 = vsel %vm2118_vm11, %v2087_v41, %v15574_v3  ;;  %755 = vst.msk [vmem:[#allocation4 + $0xc9] sm:$0xff] %vm307_vm0, %v290_v62  ;;  %v690_v57 = vsel %vm626_vm7, %v291_v38, %v658_v54  ;;  %v294_v62 = vld [vmem:[%s9699_s23 + $0x98] sm:$0xff]  ;;  %v293_v41 = vld [vmem:[%s9699_s23 + $0x90] sm:$0xff] }
 0x33d   : > { %15572 = vst [vmem:[#allocation177_spill] sm:$0xff] %v9813_v16  ;;  %v9816_v23 = vpop.permute.xlu2 %2002  ;;  %v2153_v24 = vsel %vm2151_vm15, %v2120_v25, %v9134_v26  ;;  %v2610_v16 = vld [vmem:[#allocation3 + $0x7b] sm:$0xff]  ;;  %vm629_vm10 = vcmp.gt.f32.partialorder %v294_v62, 0.0  ;;  %vm628_vm12 = vcmp.gt.f32.partialorder %v293_v41, 0.0 }
 0x33e   : > { %724 = vst.msk [vmem:[#allocation3 + $0x113] sm:$0xff] %vm307_vm0, %v691_v43  ;;  %v2186_v8 = vsel %vm2184_vm2, %v2153_v24, %v9312_v30 }
 0x33f   : > { %723 = vst.msk [vmem:[#allocation3 + $0x10b] sm:$0xff] %vm307_vm0, %v690_v57  ;;  %v2219_v51 = vsel %vm2217_vm1, %v2186_v8, %v9423_v34 }
 0x340   : > { %722 = vst.msk [vmem:[#allocation3 + $0xfb] sm:$0xff] %vm307_vm0, %v689_v39  ;;  %v2252_v26 = vsel %vm2250_vm3, %v2219_v51, %v9511_v49  ;;  %v661_v49 = vmul.f32 0.01, %v294_v62  ;;  %v298_v39 = vld [vmem:[%s9699_s23 + $0xb8] sm:$0xff]  ;;  %v8106_v51 = vld [vmem:[#allocation2 + $0x4a] sm:$0xff] }
 0x341   : > { %2901 = vrot.lane.b32.xlu1 %v2606_v55, %s8288_s30  ;;  %v2285_v30 = vsel %vm2283_vm5, %v2252_v26, %v9643_v53  ;;  %v295_v55 = vld [vmem:[%s9699_s23 + $0xa0] sm:$0xff]  ;;  %759 = vst.msk [vmem:[#allocation4 + $0xf9] sm:$0xff] %vm307_vm0, %v294_v62  ;;  %vm633_vm13 = vcmp.gt.f32.partialorder %v298_v39, 0.0 }
 0x342   : > { %2911 = vrot.lane.b32.xlu0 %v2611_v22, %s8288_s30  ;;  %v662_v8 = vmul.f32 0.01, %v295_v55  ;;  %760 = vst.msk [vmem:[#allocation4 + $0x109] sm:$0xff] %vm307_vm0, %v295_v55  ;;  %vm630_vm9 = vcmp.gt.f32.partialorder %v295_v55, 0.0  ;;  %v2614_v53 = vld [vmem:[#allocation3 + $0xab] sm:$0xff]  ;;  %v693_v3 = vsel %vm629_vm10, %v294_v62, %v661_v49  ;;  %v15576_v62 = vld [vmem:[#allocation64_spill] sm:$0xff] }
 0x343   : > { %v9840_v43 = vpop.permute.xlu1 %1918  ;;  %2909 = vrot.lane.b32.xlu2 %v2610_v16, %s8288_s30  ;;  %v660_v16 = vmul.f32 0.01, %v293_v41  ;;  %758 = vst.msk [vmem:[#allocation4 + $0xf1] sm:$0xff] %vm307_vm0, %v293_v41  ;;  %v15575_v26 = vld [vmem:[#allocation14_spill] sm:$0xff] }
 0x344   : > { %v1993_v24 = vpop.permute.xlu0 %1992  ;;  %v694_v54 = vsel %vm630_vm9, %v295_v55, %v662_v8  ;;  %726 = vst.msk [vmem:[#allocation3 + $0x12b] sm:$0xff] %vm307_vm0, %v693_v3  ;;  %v296_v8 = vld [vmem:[%s9699_s23 + $0xa8] sm:$0xff] }
 0x345   : > { %v9846_v38 = vpop.permute.xlu2 %2008  ;;  %v2318_v34 = vsel %vm2316_vm4, %v2285_v30, %v1993_v24  ;;  %727 = vst.msk [vmem:[#allocation3 + $0x13b] sm:$0xff] %vm307_vm0, %v694_v54  ;;  %v692_v25 = vsel %vm628_vm12, %v293_v41, %v660_v16  ;;  %v2088_v30 = vsel %vm307_vm0, %v8106_v51, %v15575_v26  ;;  %v2612_v24 = vld [vmem:[#allocation3 + $0x93] sm:$0xff]  ;;  %v663_v16 = vmul.f32 0.01, %v296_v8  ;;  %v2617_v54 = vld [vmem:[#allocation3 + $0xcb] sm:$0xff] }
 0x346   : > { %7921 = vmatmul.msk.f32.gmra.mxu0 %vm2358_vm6, %v2318_v34  ;;  %725 = vst.msk [vmem:[#allocation3 + $0x123] sm:$0xff] %vm307_vm0, %v692_v25  ;;  %v297_v34 = vld [vmem:[%s9699_s23 + $0xb0] sm:$0xff]  ;;  %v2121_v41 = vsel %vm2118_vm11, %v2088_v30, %v15576_v62  ;;  %vm631_vm7 = vcmp.gt.f32.partialorder %v296_v8, 0.0  ;;  %v300_v62 = vld [vmem:[%s9699_s23 + $0xc8] sm:$0xff] }
 0x347   : > { %763 = vst.msk [vmem:[#allocation4 + $0x129] sm:$0xff] %vm307_vm0, %v298_v39  ;;  %v664_v49 = vmul.f32 0.01, %v297_v34  ;;  %vm632_vm14 = vcmp.gt.f32.partialorder %v297_v34, 0.0  ;;  %v2616_v25 = vld [vmem:[#allocation3 + $0xc3] sm:$0xff]  ;;  %v695_v26 = vsel %vm631_vm7, %v296_v8, %v663_v16  ;;  %v2615_v16 = vld [vmem:[#allocation3 + $0xb3] sm:$0xff] }
 0x348   : > { %762 = vst.msk [vmem:[#allocation4 + $0x121] sm:$0xff] %vm307_vm0, %v297_v34  ;;  %vm635_vm8 = vcmp.gt.f32.partialorder %v300_v62, 0.0 }
 0x349   : > { %2907 = vrot.lane.b32.xlu1 %v2609_v52, %s8288_s30  ;;  %v665_v52 = vmul.f32 0.01, %v298_v39  ;;  %761 = vst.msk [vmem:[#allocation4 + $0x111] sm:$0xff] %vm307_vm0, %v296_v8  ;;  %v696_v51 = vsel %vm632_vm14, %v297_v34, %v664_v49  ;;  %v15577_v34 = vld [vmem:[#allocation17_spill] sm:$0xff]  ;;  %v15578_v49 = vld [vmem:[#allocation48_spill] sm:$0xff] }
 0x34a   : > { %2917 = vrot.lane.b32.xlu0 %v2614_v53, %s8288_s30  ;;  %v2154_v53 = vsel %vm2151_vm15, %v2121_v41, %v9168_v50  ;;  %729 = vst.msk [vmem:[#allocation3 + $0x153] sm:$0xff] %vm307_vm0, %v696_v51  ;;  %v299_v41 = vld [vmem:[%s9699_s23 + $0xc0] sm:$0xff]  ;;  %v2619_v51 = vld [vmem:[#allocation3 + $0xe3] sm:$0xff] }
 0x34b   : > { %v9860_v22 = vpop.permute.xlu1 %1924  ;;  %2915 = vrot.lane.b32.xlu2 %v2613_v15, %s8288_s30  ;;  %v697_v15 = vsel %vm633_vm13, %v298_v39, %v665_v52  ;;  %v2187_v3 = vsel %vm2184_vm2, %v2154_v53, %v9270_v9  ;;  %728 = vst.msk [vmem:[#allocation3 + $0x143] sm:$0xff] %vm307_vm0, %v695_v26  ;;  %v667_v53 = vmul.f32 0.01, %v300_v62  ;;  %vm634_vm9 = vcmp.gt.f32.partialorder %v299_v41, 0.0 }
 0x34c   : > { %v9863_v57 = vpop.permute.xlu0 %1998  ;;  %730 = vst.msk [vmem:[#allocation3 + $0x15b] sm:$0xff] %vm307_vm0, %v697_v15  ;;  %v2220_v30 = vsel %vm2217_vm1, %v2187_v3, %v9442_v12  ;;  %v2620_v3 = vld [vmem:[#allocation3 + $0xf3] sm:$0xff] }
 0x34d   : > { %v9868_v55 = vpop.permute.xlu2 %2014  ;;  %v2253_v50 = vsel %vm2250_vm3, %v2220_v30, %v9536_v56  ;;  %765 = vst.msk [vmem:[#allocation4 + $0x141] sm:$0xff] %vm307_vm0, %v300_v62  ;;  %v699_v26 = vsel %vm635_vm8, %v300_v62, %v667_v53 }
 0x34e   : > { %v2286_v9 = vsel %vm2283_vm5, %v2253_v50, %v9612_v11  ;;  %764 = vst.msk [vmem:[#allocation4 + $0x139] sm:$0xff] %vm307_vm0, %v299_v41 }
 0x34f   : > { %732 = vst.msk [vmem:[#allocation3 + $0x173] sm:$0xff] %vm307_vm0, %v699_v26  ;;  %v2621_v26 = vld [vmem:[#allocation3 + $0xfb] sm:$0xff] }
 0x351   : > { %2913 = vrot.lane.b32.xlu1 %v2612_v24, %s8288_s30  ;;  %v8107_v24 = vld [vmem:[#allocation2 + $0x52] sm:$0xff] }
 0x352   : > { %2923 = vrot.lane.b32.xlu0 %v2617_v54, %s8288_s30  ;;  %v2089_v8 = vsel %vm307_vm0, %v8107_v24, %v15577_v34  ;;  %v666_v54 = vmul.f32 0.01, %v299_v41  ;;  %v15579_v24 = vld [vmem:[#allocation8_spill] sm:$0xff] }
 0x353   : > { %v1995_v39 = vpop.permute.xlu1 %1994  ;;  %2921 = vrot.lane.b32.xlu2 %v2616_v25, %s8288_s30  ;;  %v2122_v11 = vsel %vm2118_vm11, %v2089_v8, %v15578_v49  ;;  %v15580_v8 = vld [vmem:[#allocation62_spill] sm:$0xff] }
 0x354   : > { %v2319_v12 = vsel %vm2316_vm4, %v2286_v9, %v1995_v39  ;;  %v9894_v52 = vpop.permute.xlu0 %2004  ;;  %v2155_v15 = vsel %vm2151_vm15, %v2122_v11, %v9188_v36  ;;  %v698_v30 = vsel %vm634_vm9, %v299_v41, %v666_v54  ;;  %v2623_v49 = vld [vmem:[#allocation3 + $0x113] sm:$0xff]  ;;  %v2622_v11 = vld [vmem:[#allocation3 + $0x10b] sm:$0xff] }
 0x355   : > { %7922 = vmatmul.msk.f32.gmra.mxu0 %vm2358_vm6, %v2319_v12  ;;  %v9899_v56 = vpop.permute.xlu2 %2020  ;;  %v2188_v25 = vsel %vm2184_vm2, %v2155_v15, %v9304_v10  ;;  %731 = vst.msk [vmem:[#allocation3 + $0x16b] sm:$0xff] %vm307_vm0, %v698_v30  ;;  %v8108_v12 = vld [vmem:[#allocation2 + $0x62] sm:$0xff]  ;;  %v8110_v30 = vld [vmem:[#allocation2 + $0x152] sm:$0xff] }
 0x356   : > { %v2221_v50 = vsel %vm2217_vm1, %v2188_v25, %v9403_v40  ;;  %v2090_v34 = vsel %vm307_vm0, %v8108_v12, %v15579_v24 }
 0x357   : > { %v2254_v36 = vsel %vm2250_vm3, %v2221_v50, %v9551_v27  ;;  %v2123_v62 = vsel %vm2118_vm11, %v2090_v34, %v15580_v8  ;;  %v15583_v50 = vld [vmem:[#allocation42_spill] sm:$0xff] }
 0x358   : > { %v2287_v10 = vsel %vm2283_vm5, %v2254_v36, %v9637_v63  ;;  %v2618_v63 = vld [vmem:[#allocation3 + $0xdb] sm:$0xff]  ;;  %v2156_v41 = vsel %vm2151_vm15, %v2123_v62, %v9146_v44  ;;  %v2110_v36 = vsel %vm307_vm0, %v8110_v30, %v15583_v50  ;;  %v2625_v34 = vld [vmem:[#allocation3 + $0x12b] sm:$0xff] }
 0x359   : > { %2919 = vrot.lane.b32.xlu1 %v2615_v16, %s8288_s30  ;;  %v2320_v40 = vsel %vm2316_vm4, %v2287_v10, %v9798_v35  ;;  %v2189_v35 = vsel %vm2184_vm2, %v2156_v41, %v9324_v37  ;;  %v2626_v10 = vld [vmem:[#allocation3 + $0x13b] sm:$0xff]  ;;  %v15588_v50 = vld [vmem:[#allocation65_spill] sm:$0xff] }
 0x35a   : > { %2929 = vrot.lane.b32.xlu0 %v2620_v3, %s8288_s30  ;;  %v2222_v16 = vsel %vm2217_vm1, %v2189_v35, %v9434_v48  ;;  %v8109_v48 = vld [vmem:[#allocation2 + $0x6a] sm:$0xff]  ;;  %v15581_v3 = vld [vmem:[#allocation9_spill] sm:$0xff] }
 0x35b   : > { %v2001_v9 = vpop.permute.xlu1 %2000  ;;  %2927 = vrot.lane.b32.xlu2 %v2619_v51, %s8288_s30  ;;  %v2255_v53 = vsel %vm2250_vm3, %v2222_v16, %v9520_v33  ;;  %v2091_v25 = vsel %vm307_vm0, %v8109_v48, %v15581_v3  ;;  %v15582_v51 = vld [vmem:[#allocation67_spill] sm:$0xff]  ;;  %v15586_v16 = vld [vmem:[#allocation53_spill] sm:$0xff] }
 0x35c   : > { %v9924_v39 = vpop.permute.xlu0 %2010  ;;  %v2288_v54 = vsel %vm2283_vm5, %v2255_v53, %v9652_v31  ;;  %v2124_v31 = vsel %vm2118_vm11, %v2091_v25, %v15582_v51  ;;  %v15585_v35 = vld [vmem:[#allocation15_spill] sm:$0xff] }
 0x35d   : > { %7923 = vmatmul.msk.f32.gmra.mxu0 %vm2358_vm6, %v2320_v40  ;;  %v9929_v27 = vpop.permute.xlu2 %2026  ;;  %v2321_v44 = vsel %vm2316_vm4, %v2288_v54, %v9863_v57  ;;  %v2157_v57 = vsel %vm2151_vm15, %v2124_v31, %v9180_v1  ;;  %v15584_v40 = vld [vmem:[#allocation78_spill] sm:$0xff]  ;;  %v2624_v54 = vld [vmem:[#allocation3 + $0x123] sm:$0xff] }
 0x35e   : > { %v2143_v12 = vsel %vm2118_vm11, %v2110_v36, %v15584_v40  ;;  %v2190_v24 = vsel %vm2184_vm2, %v2157_v57, %v9282_v60  ;;  %v2628_v3 = vld [vmem:[#allocation3 + $0x153] sm:$0xff]  ;;  %v2627_v36 = vld [vmem:[#allocation3 + $0x143] sm:$0xff] }
 0x35f   : > { %v2176_v8 = vsel %vm2151_vm15, %v2143_v12, %v9276_v20  ;;  %v2223_v62 = vsel %vm2217_vm1, %v2190_v24, %v9453_v29  ;;  %v2631_v40 = vld [vmem:[#allocation3 + $0x173] sm:$0xff] }
 0x360   : > { %v2256_v1 = vsel %vm2250_vm3, %v2223_v62, %v9545_v13  ;;  %v8111_v13 = vld [vmem:[#allocation2 + $0x7a] sm:$0xff]  ;;  %v15589_v62 = vld [vmem:[#allocation11_spill] sm:$0xff] }
 0x361   : > { %2925 = vrot.lane.b32.xlu1 %v2618_v63, %s8288_s30  ;;  %v2209_v63 = vsel %vm2184_vm2, %v2176_v8, %v9391_v61  ;;  %v2289_v41 = vsel %vm2283_vm5, %v2256_v1, %v9621_v5  ;;  %v8114_v1 = vld [vmem:[#allocation2 + $0x15a] sm:$0xff] }
 0x362   : > { %2935 = vrot.lane.b32.xlu0 %v2623_v49, %s8288_s30  ;;  %v2242_v60 = vsel %vm2217_vm1, %v2209_v63, %v9480_v21  ;;  %v2322_v61 = vsel %vm2316_vm4, %v2289_v41, %v2001_v9  ;;  %v15591_v41 = vld [vmem:[#allocation71_spill] sm:$0xff] }
 0x363   : > { %v9945_v15 = vpop.permute.xlu1 %2006  ;;  %2933 = vrot.lane.b32.xlu2 %v2622_v11, %s8288_s30  ;;  %v2275_v29 = vsel %vm2250_vm3, %v2242_v60, %v9616_v2  ;;  %v2092_v11 = vsel %vm307_vm0, %v8111_v13, %v15585_v35  ;;  %v15590_v60 = vld [vmem:[#allocation51_spill] sm:$0xff]  ;;  %v2635_v35 = vld [vmem:[#allocation3 + $0x26] sm:$0xff] }
 0x364   : > { %v9950_v37 = vpop.permute.xlu0 %2016  ;;  %v2308_v21 = vsel %vm2283_vm5, %v2275_v29, %v9775_v6  ;;  %v2125_v53 = vsel %vm2118_vm11, %v2092_v11, %v15586_v16  ;;  %v15592_v16 = vld [vmem:[#allocation44_spill] sm:$0xff] }
 0x365   : > { %7924 = vmatmul.msk.f32.gmra.mxu0 %vm2358_vm6, %v2321_v44  ;;  %v9955_v33 = vpop.permute.xlu2 %2032  ;;  %v2158_v9 = vsel %vm2151_vm15, %v2125_v53, %v9200_v45  ;;  %v2629_v44 = vld [vmem:[#allocation3 + $0x15b] sm:$0xff] }
 0x366   : > { %v2191_v48 = vsel %vm2184_vm2, %v2158_v9, %v9316_v17 }
 0x367   : > { %v2224_v6 = vsel %vm2217_vm1, %v2191_v48, %v9414_v32  ;;  %v8112_v32 = vld [vmem:[#allocation2 + $0x82] sm:$0xff] }
 0x368   : > { %v2257_v25 = vsel %vm2250_vm3, %v2224_v6, %v9560_v28  ;;  %v15597_v48 = vld [vmem:[#allocation159_spill] sm:$0xff] }
 0x369   : > { %2931 = vrot.lane.b32.xlu1 %v2621_v26, %s8288_s30  ;;  %v2290_v45 = vsel %vm2283_vm5, %v2257_v25, %v9646_v7  ;;  %v15587_v26 = vld [vmem:[#allocation21_spill] sm:$0xff] }
 0x36a   : > { %2941 = vrot.lane.b32.xlu0 %v2626_v10, %s8288_s30  ;;  %v2323_v17 = vsel %vm2316_vm4, %v2290_v45, %v9816_v23  ;;  %v2093_v30 = vsel %vm307_vm0, %v8112_v32, %v15587_v26  ;;  %v2632_v10 = vld [vmem:[#allocation3 + $0x6] sm:$0xff]  ;;  %v15598_v26 = vld [vmem:[#allocation18_spill] sm:$0xff] }
 0x36b   : > { %v9981_v20 = vpop.permute.xlu1 %2012  ;;  %2939 = vrot.lane.b32.xlu2 %v2625_v34, %s8288_s30  ;;  %v2126_v7 = vsel %vm2118_vm11, %v2093_v30, %v15588_v50  ;;  %v8115_v32 = vld [vmem:[#allocation2 + $0x9a] sm:$0xff] }
 0x36c   : > { %v9987_v49 = vpop.permute.xlu0 %2022  ;;  %v2159_v57 = vsel %vm2151_vm15, %v2126_v7, %v9158_v4  ;;  %v2095_v30 = vsel %vm307_vm0, %v8115_v32, %v15598_v26  ;;  %v15616_v32 = vld [vmem:[#allocation134_spill] sm:$0xff] }
 0x36d   : > { %7925 = vmatmul.msk.f32.gmra.mxu0 %vm2358_vm6, %v2322_v61  ;;  %v2039_v5 = vpop.permute.xlu2 %2038  ;;  %v2192_v23 = vsel %vm2184_vm2, %v2159_v57, %v9336_v46  ;;  %v2630_v61 = vld [vmem:[#allocation3 + $0x16b] sm:$0xff] }
 0x36e   : > { %v2341_v2 = vsel %vm2316_vm4, %v2308_v21, %v2039_v5  ;;  %v2225_v12 = vsel %vm2217_vm1, %v2192_v23, %v9445_v19  ;;  %v8113_v19 = vld [vmem:[#allocation2 + $0x92] sm:$0xff]  ;;  %v2638_v23 = vld [vmem:[#allocation3 + $0x4e] sm:$0xff] }
 0x36f   : > { %7944 = vmatmul.msk.f32.vlgmr.msra.gmra.mxu3 %vm2358_vm6, %v2341_v2  ;;  %v2258_v24 = vsel %vm2250_vm3, %v2225_v12, %v9529_v42  ;;  %v2094_v63 = vsel %vm307_vm0, %v8113_v19, %v15589_v62  ;;  %v2634_v5 = vld [vmem:[#allocation3 + $0x1e] sm:$0xff] }
 0x370   : > { %v2291_v34 = vsel %vm2283_vm5, %v2258_v24, %v9673_v59  ;;  %v2111_v59 = vsel %vm307_vm0, %v8114_v1, %v15590_v60  ;;  %v2127_v29 = vsel %vm2118_vm11, %v2094_v63, %v15591_v41  ;;  %v2637_v24 = vld [vmem:[#allocation3 + $0x3e] sm:$0xff] }
 0x371   : > { %2937 = vrot.lane.b32.xlu1 %v2624_v54, %s8288_s30  ;;  %v2324_v4 = vsel %vm2316_vm4, %v2291_v34, %v9894_v52  ;;  %v2144_v52 = vsel %vm2118_vm11, %v2111_v59, %v9132_v47  ;;  %v2160_v13 = vsel %vm2151_vm15, %v2127_v29, %v9192_v14  ;;  %v15593_v54 = vld [vmem:[#allocation75_spill] sm:$0xff]  ;;  %v15603_v34 = vld [vmem:[#allocation60_spill] sm:$0xff] }
 0x372   : > { %2947 = vrot.lane.b32.xlu0 %v2629_v44, %s8288_s30  ;;  %v2177_v11 = vsel %vm2151_vm15, %v2144_v52, %v9230_v58  ;;  %v2193_v21 = vsel %vm2184_vm2, %v2160_v13, %v9294_v18  ;;  %v15594_v47 = vld [vmem:[#allocation131_spill] sm:$0xff]  ;;  %v15596_v58 = vld [vmem:[#allocation148_spill] sm:$0xff] }
 0x373   : > { %v10010_v51 = vpop.permute.xlu1 %2018  ;;  %2945 = vrot.lane.b32.xlu2 %v2628_v3, %s8288_s30  ;;  %v2210_v53 = vsel %vm2184_vm2, %v2177_v11, %v15592_v16  ;;  %v2226_v2 = vsel %vm2217_vm1, %v2193_v21, %v15593_v54  ;;  %v15595_v14 = vld [vmem:[#allocation139_spill] sm:$0xff] }
 0x374   : > { %v10015_v31 = vpop.permute.xlu0 %2028  ;;  %v2243_v9 = vsel %vm2217_vm1, %v2210_v53, %v15594_v47  ;;  %v2259_v44 = vsel %vm2250_vm3, %v2226_v2, %v15595_v14  ;;  %v15604_v19 = vld [vmem:[#allocation143_spill] sm:$0xff]  ;;  %v15610_v53 = vld [vmem:[#allocation89_spill] sm:$0xff]  ;;  %v15611_v2 = vld [vmem:[#allocation92_spill] sm:$0xff] }
 0x375   : > { %7926 = vmatmul.msk.f32.gmra.mxu0 %vm2358_vm6, %v2323_v17  ;;  %v10020_v28 = vpop.permute.xlu2 %2044  ;;  %v2276_v18 = vsel %vm2250_vm3, %v2243_v9, %v15596_v58  ;;  %v2292_v3 = vsel %vm2283_vm5, %v2259_v44, %v15597_v48  ;;  %v15605_v63 = vld [vmem:[#allocation163_spill] sm:$0xff]  ;;  %v15612_v9 = vld [vmem:[#allocation109_spill] sm:$0xff]  ;;  %v15613_v58 = vld [vmem:[#allocation20_spill] sm:$0xff] }
 0x376   : > { %v2309_v25 = vsel %vm2283_vm5, %v2276_v18, %v9810_v0  ;;  %v2325_v45 = vsel %vm2316_vm4, %v2292_v3, %v9945_v15  ;;  %v15601_v0 = vld [vmem:[#allocation97_spill] sm:$0xff]  ;;  %v8116_v29 = vld [vmem:[#allocation2 + $0xaa] sm:$0xff] }
 0x377   : > { %v8117_v13 = vld [vmem:[#allocation2 + $0x16a] sm:$0xff]  ;;  %v2641_v44 = vld [vmem:[#allocation3 + $0x6e] sm:$0xff] }
 0x378   : > { %v2636_v54 = vld [vmem:[#allocation3 + $0x36] sm:$0xff]  ;;  %v15614_v48 = vld [vmem:[#allocation40_spill] sm:$0xff] }
 0x379   : > { %2943 = vrot.lane.b32.xlu1 %v2627_v36, %s8288_s30  ;;  %v15600_v36 = vld [vmem:[#allocation58_spill] sm:$0xff] }
 0x37a   : > { %3017 = vrot.lane.b32.xlu0 %v2632_v10, %s8289_s11  ;;  %v2128_v57 = vsel %vm2118_vm11, %v2095_v30, %v15600_v36  ;;  %v2633_v10 = vld [vmem:[#allocation3 + $0xe] sm:$0xff]  ;;  %v15618_v36 = vld [vmem:[#allocation156_spill] sm:$0xff] }
 0x37b   : > { %v10036_v8 = vpop.permute.xlu1 %2024  ;;  %2951 = vrot.lane.b32.xlu2 %v2631_v40, %s8288_s30  ;;  %v2161_v15 = vsel %vm2151_vm15, %v2128_v57, %v15601_v0  ;;  %v15602_v40 = vld [vmem:[#allocation115_spill] sm:$0xff]  ;;  %v15617_v30 = vld [vmem:[#allocation137_spill] sm:$0xff] }
 0x37c   : > { %v10041_v46 = vpop.permute.xlu0 %2034  ;;  %v2194_v12 = vsel %vm2184_vm2, %v2161_v15, %v15602_v40  ;;  %v15620_v15 = vld [vmem:[#allocation172_spill] sm:$0xff] }
 0x37d   : > { %7927 = vmatmul.msk.f32.gmra.mxu0 %vm2358_vm6, %v2324_v4  ;;  %v10046_v42 = vpop.permute.xlu2 %2050  ;;  %v2227_v4 = vsel %vm2217_vm1, %v2194_v12, %v15603_v34 }
 0x37e   : > { %v2260_v62 = vsel %vm2250_vm3, %v2227_v4, %v15604_v19  ;;  %v8118_v4 = vld [vmem:[#allocation2 + $0xb2] sm:$0xff] }
 0x37f   : > { %v2293_v1 = vsel %vm2283_vm5, %v2260_v62, %v15605_v63  ;;  %v15621_v19 = vld [vmem:[#allocation13_spill] sm:$0xff] }
 0x380   : > { %v2326_v59 = vsel %vm2316_vm4, %v2293_v1, %v9846_v38  ;;  %v2097_v62 = vsel %vm307_vm0, %v8118_v4, %v15621_v19  ;;  %v8119_v63 = vld [vmem:[#allocation2 + $0x172] sm:$0xff]  ;;  %v15622_v1 = vld [vmem:[#allocation47_spill] sm:$0xff] }
 0x381   : > { %2949 = vrot.lane.b32.xlu1 %v2630_v61, %s8288_s30  ;;  %v15606_v61 = vld [vmem:[#allocation25_spill] sm:$0xff] }
 0x382   : > { %3023 = vrot.lane.b32.xlu0 %v2635_v35, %s8289_s11  ;;  %v2096_v52 = vsel %vm307_vm0, %v8116_v29, %v15606_v61  ;;  %v15607_v35 = vld [vmem:[#allocation33_spill] sm:$0xff]  ;;  %v15624_v61 = vld [vmem:[#allocation76_spill] sm:$0xff] }
 0x383   : > { %v10074_v6 = vpop.permute.xlu1 %2030  ;;  %3021 = vrot.lane.b32.xlu2 %v2634_v5, %s8289_s11  ;;  %v2112_v11 = vsel %vm307_vm0, %v8117_v13, %v15607_v35  ;;  %v15609_v5 = vld [vmem:[#allocation68_spill] sm:$0xff]  ;;  %v2639_v35 = vld [vmem:[#allocation3 + $0x56] sm:$0xff] }
 0x384   : > { %v2041_v17 = vpop.permute.xlu0 %2040  ;;  %v2129_v16 = vsel %vm2118_vm11, %v2096_v52, %v15609_v5  ;;  %v2145_v38 = vsel %vm2118_vm11, %v2112_v11, %v15610_v53  ;;  %v15625_v52 = vld [vmem:[#allocation82_spill] sm:$0xff]  ;;  %v15626_v11 = vld [vmem:[#allocation95_spill] sm:$0xff] }
 0x385   : > { %7928 = vmatmul.msk.f32.gmra.mxu0 %vm2358_vm6, %v2325_v45  ;;  %v10084_v50 = vpop.permute.xlu2 %2891  ;;  %v2342_v7 = vsel %vm2316_vm4, %v2309_v25, %v2041_v17  ;;  %v2162_v47 = vsel %vm2151_vm15, %v2129_v16, %v15611_v2  ;;  %v2178_v14 = vsel %vm2151_vm15, %v2145_v38, %v15612_v9  ;;  %v2640_v25 = vld [vmem:[#allocation3 + $0x66] sm:$0xff]  ;;  %v15627_v16 = vld [vmem:[#allocation111_spill] sm:$0xff] }
 0x386   : > { %15599 = vst [vmem:[#allocation12_spill] sm:$0xff] %v10084_v50  ;;  %7945 = vmatmul.msk.f32.gmra.mxu3 %vm2358_vm6, %v2342_v7  ;;  %v2195_v18 = vsel %vm2184_vm2, %v2162_v47, %v15613_v58  ;;  %v2211_v3 = vsel %vm2184_vm2, %v2178_v14, %v15614_v48  ;;  %v15615_v45 = vld [vmem:[#allocation121_spill] sm:$0xff]  ;;  %v2644_v38 = vld [vmem:[#allocation3 + $0x96] sm:$0xff]  ;;  %v2776_v50 = vld [vmem:[#allocation3 + $0x140] sm:$0xff] }
 0x387   : > { %v2228_v17 = vsel %vm2217_vm1, %v2195_v18, %v15615_v45  ;;  %v2244_v26 = vsel %vm2217_vm1, %v2211_v3, %v15616_v32  ;;  %v15629_v47 = vld [vmem:[#allocation50_spill] sm:$0xff]  ;;  %v2643_v14 = vld [vmem:[#allocation3 + $0x86] sm:$0xff]  ;;  %v15631_v18 = vld [vmem:[#allocation127_spill] sm:$0xff] }
 0x388   : > { %v2261_v7 = vsel %vm2250_vm3, %v2228_v17, %v15617_v30  ;;  %v2277_v57 = vsel %vm2250_vm3, %v2244_v26, %v15618_v36  ;;  %v15632_v3 = vld [vmem:[#allocation141_spill] sm:$0xff]  ;;  %v15633_v45 = vld [vmem:[#allocation158_spill] sm:$0xff]  ;;  %v15635_v30 = vld [vmem:[#allocation176_spill] sm:$0xff] }
 0x389   : > { %3019 = vrot.lane.b32.xlu1 %v2633_v10, %s8289_s11  ;;  %v15619_v10 = vld [vmem:[#allocation167_spill] sm:$0xff]  ;;  %v15634_v32 = vld [vmem:[#allocation161_spill] sm:$0xff] }
 0x38a   : > { %3029 = vrot.lane.b32.xlu0 %v2638_v23, %s8289_s11  ;;  %v2294_v0 = vsel %vm2283_vm5, %v2261_v7, %v15619_v10  ;;  %v2310_v23 = vsel %vm2283_vm5, %v2277_v57, %v15620_v15  ;;  %v8120_v15 = vld [vmem:[#allocation2 + $0xc2] sm:$0xff] }
 0x38b   : > { %v10102_v60 = vpop.permute.xlu1 %2036  ;;  %3027 = vrot.lane.b32.xlu2 %v2637_v24, %s8289_s11  ;;  %v2327_v12 = vsel %vm2316_vm4, %v2294_v0, %v9924_v39  ;;  %v2130_v39 = vsel %vm2118_vm11, %v2097_v62, %v15624_v61 }
 0x38c   : > { %v10107_v41 = vpop.permute.xlu0 %2046  ;;  %v2163_v5 = vsel %vm2151_vm15, %v2130_v39, %v15626_v11  ;;  %v15643_v39 = vld [vmem:[#allocation104_spill] sm:$0xff] }
 0x38d   : > { %7929 = vmatmul.msk.f32.gmra.mxu0 %vm2358_vm6, %v2326_v59  ;;  %v10114_v21 = vpop.permute.xlu2 %2897  ;;  %v2113_v59 = vsel %vm307_vm0, %v8119_v63, %v15622_v1  ;;  %v2642_v1 = vld [vmem:[#allocation3 + $0x7e] sm:$0xff] }
 0x38e   : > { %15608 = vst [vmem:[#allocation57_spill] sm:$0xff] %v10114_v21  ;;  %v2146_v13 = vsel %vm2118_vm11, %v2113_v59, %v15625_v52  ;;  %v15642_v59 = vld [vmem:[#allocation100_spill] sm:$0xff]  ;;  %v2729_v21 = vld [vmem:[#allocation3 + $0x56] sm:$0xff] }
 0x38f   : > { %v2179_v53 = vsel %vm2151_vm15, %v2146_v13, %v15627_v16  ;;  %v2647_v13 = vld [vmem:[#allocation3 + $0xb6] sm:$0xff] }
 0x390   : > { %v2212_v9 = vsel %vm2184_vm2, %v2179_v53, %v15629_v47  ;;  %v2646_v53 = vld [vmem:[#allocation3 + $0xae] sm:$0xff] }
 0x391   : > { %3025 = vrot.lane.b32.xlu1 %v2636_v54, %s8289_s11  ;;  %v15628_v54 = vld [vmem:[#allocation113_spill] sm:$0xff]  ;;  %v2245_v48 = vsel %vm2217_vm1, %v2212_v9, %v15631_v18  ;;  %v15648_v9 = vld [vmem:[#allocation146_spill] sm:$0xff] }
 0x392   : > { %3035 = vrot.lane.b32.xlu0 %v2641_v44, %s8289_s11  ;;  %v2196_v2 = vsel %vm2184_vm2, %v2163_v5, %v15628_v54  ;;  %v15630_v44 = vld [vmem:[#allocation70_spill] sm:$0xff]  ;;  %v2278_v17 = vsel %vm2250_vm3, %v2245_v48, %v15633_v45  ;;  %v15645_v5 = vld [vmem:[#allocation49_spill] sm:$0xff] }
 0x393   : > { %v2043_v40 = vpop.permute.xlu1 %2042  ;;  %3033 = vrot.lane.b32.xlu2 %v2640_v25, %s8289_s11  ;;  %v2229_v58 = vsel %vm2217_vm1, %v2196_v2, %v15630_v44  ;;  %v2311_v7 = vsel %vm2283_vm5, %v2278_v17, %v15635_v30  ;;  %v15647_v2 = vld [vmem:[#allocation133_spill] sm:$0xff]  ;;  %v15649_v44 = vld [vmem:[#allocation151_spill] sm:$0xff] }
 0x394   : > { %v2343_v24 = vsel %vm2316_vm4, %v2310_v23, %v2043_v40  ;;  %v10146_v34 = vpop.permute.xlu0 %2052  ;;  %v2262_v25 = vsel %vm2250_vm3, %v2229_v58, %v15632_v3  ;;  %v2344_v10 = vsel %vm2316_vm4, %v2311_v7, %v10020_v28  ;;  %v15637_v23 = vld [vmem:[#allocation22_spill] sm:$0xff]  ;;  %v15641_v28 = vld [vmem:[#allocation88_spill] sm:$0xff]  ;;  %v15650_v18 = vld [vmem:[#allocation165_spill] sm:$0xff] }
 0x395   : > { %7930 = vmatmul.msk.f32.gmra.mxu0 %vm2358_vm6, %v2327_v12  ;;  %7946 = vmatmul.msk.f32.gmra.mxu3 %vm2358_vm6, %v2343_v24  ;;  %v10154_v29 = vpop.permute.xlu2 %2903  ;;  %v2295_v26 = vsel %vm2283_vm5, %v2262_v25, %v15634_v32  ;;  %v2098_v40 = vsel %vm307_vm0, %v8120_v15, %v15637_v23  ;;  %v8121_v12 = vld [vmem:[#allocation2 + $0x182] sm:$0xff]  ;;  %v15638_v24 = vld [vmem:[#allocation56_spill] sm:$0xff] }
 0x396   : > { %15623 = vst [vmem:[#allocation14_spill] sm:$0xff] %v10154_v29  ;;  %v2328_v57 = vsel %vm2316_vm4, %v2295_v26, %v9981_v20  ;;  %v2114_v4 = vsel %vm307_vm0, %v8121_v12, %v15638_v24  ;;  %v15640_v20 = vld [vmem:[#allocation63_spill] sm:$0xff]  ;;  %v15657_v24 = vld [vmem:[#allocation93_spill] sm:$0xff] }
 0x397   : > { %v2131_v62 = vsel %vm2118_vm11, %v2098_v40, %v15640_v20  ;;  %v2147_v63 = vsel %vm2118_vm11, %v2114_v4, %v15641_v28  ;;  %v8122_v26 = vld [vmem:[#allocation2 + $0xca] sm:$0xff]  ;;  %v15658_v20 = vld [vmem:[#allocation110_spill] sm:$0xff] }
 0x398   : > { %v2164_v61 = vsel %vm2151_vm15, %v2131_v62, %v15642_v59  ;;  %v2180_v52 = vsel %vm2151_vm15, %v2147_v63, %v15643_v39  ;;  %v15652_v30 = vld [vmem:[#allocation31_spill] sm:$0xff]  ;;  %v15659_v63 = vld [vmem:[#allocation24_spill] sm:$0xff]  ;;  %v2649_v39 = vld [vmem:[#allocation3 + $0xce] sm:$0xff] }
 0x399   : > { %3031 = vrot.lane.b32.xlu1 %v2639_v35, %s8289_s11  ;;  %v15644_v35 = vld [vmem:[#allocation28_spill] sm:$0xff]  ;;  %v2213_v16 = vsel %vm2184_vm2, %v2180_v52, %v15645_v5  ;;  %v2099_v7 = vsel %vm307_vm0, %v8122_v26, %v15652_v30  ;;  %v15660_v59 = vld [vmem:[#allocation119_spill] sm:$0xff]  ;;  %v15663_v5 = vld [vmem:[#allocation138_spill] sm:$0xff] }
 0x39a   : > { %3041 = vrot.lane.b32.xlu0 %v2644_v38, %s8289_s11  ;;  %v2197_v11 = vsel %vm2184_vm2, %v2164_v61, %v15644_v35  ;;  %v15646_v38 = vld [vmem:[#allocation120_spill] sm:$0xff]  ;;  %v2246_v47 = vsel %vm2217_vm1, %v2213_v16, %v15647_v2  ;;  %v15661_v52 = vld [vmem:[#allocation123_spill] sm:$0xff] }
 0x39b   : > { %v2049_v36 = vpop.permute.xlu1 %2048  ;;  %3039 = vrot.lane.b32.xlu2 %v2643_v14, %s8289_s11  ;;  %v2230_v54 = vsel %vm2217_vm1, %v2197_v11, %v15646_v38  ;;  %v2279_v58 = vsel %vm2250_vm3, %v2246_v47, %v15649_v44  ;;  %v2645_v12 = vld [vmem:[#allocation3 + $0x9e] sm:$0xff] }
 0x39c   : > { %v10187_v0 = vpop.permute.xlu0 %2893  ;;  %v2263_v14 = vsel %vm2250_vm3, %v2230_v54, %v15648_v9  ;;  %v2312_v3 = vsel %vm2283_vm5, %v2279_v58, %v9840_v43  ;;  %v2650_v28 = vld [vmem:[#allocation3 + $0xde] sm:$0xff]  ;;  %v15665_v54 = vld [vmem:[#allocation170_spill] sm:$0xff] }
 0x39d   : > { %15636 = vst [vmem:[#allocation64_spill] sm:$0xff] %v10187_v0  ;;  %7931 = vmatmul.msk.f32.gmra.mxu0 %vm2358_vm6, %v2328_v57  ;;  %7947 = vmatmul.msk.f32.gmra.mxu3 %vm2358_vm6, %v2344_v10  ;;  %v10195_v19 = vpop.permute.xlu2 %2909  ;;  %v2296_v48 = vsel %vm2283_vm5, %v2263_v14, %v15650_v18  ;;  %v2345_v17 = vsel %vm2316_vm4, %v2312_v3, %v10107_v41  ;;  %v8123_v57 = vld [vmem:[#allocation2 + $0x18a] sm:$0xff] }
 0x39e   : > { %15639 = vst [vmem:[#allocation17_spill] sm:$0xff] %v10195_v19  ;;  %v2329_v45 = vsel %vm2316_vm4, %v2296_v48, %v9868_v55  ;;  %v15653_v10 = vld [vmem:[#allocation39_spill] sm:$0xff]  ;;  %v15655_v55 = vld [vmem:[#allocation72_spill] sm:$0xff]  ;;  %v8124_v48 = vld [vmem:[#allocation2 + $0xda] sm:$0xff] }
 0x39f   : > { %v2115_v43 = vsel %vm307_vm0, %v8123_v57, %v15653_v10  ;;  %v2132_v23 = vsel %vm2118_vm11, %v2099_v7, %v15655_v55  ;;  %v15656_v41 = vld [vmem:[#allocation91_spill] sm:$0xff]  ;;  %v15662_v35 = vld [vmem:[#allocation136_spill] sm:$0xff]  ;;  %v15674_v55 = vld [vmem:[#allocation98_spill] sm:$0xff] }
 0x3a0   : > { %v2148_v40 = vsel %vm2118_vm11, %v2115_v43, %v15656_v41  ;;  %v2165_v4 = vsel %vm2151_vm15, %v2132_v23, %v15657_v24  ;;  %v15666_v47 = vld [vmem:[#allocation175_spill] sm:$0xff]  ;;  %v15669_v3 = vld [vmem:[#allocation16_spill] sm:$0xff]  ;;  %v15676_v24 = vld [vmem:[#allocation114_spill] sm:$0xff] }
 0x3a1   : > { %3037 = vrot.lane.b32.xlu1 %v2642_v1, %s8289_s11  ;;  %v2181_v62 = vsel %vm2151_vm15, %v2148_v40, %v15658_v20  ;;  %v2198_v1 = vsel %vm2184_vm2, %v2165_v4, %v15659_v63  ;;  %v15670_v26 = vld [vmem:[#allocation52_spill] sm:$0xff]  ;;  %v15677_v20 = vld [vmem:[#allocation55_spill] sm:$0xff]  ;;  %v15678_v63 = vld [vmem:[#allocation74_spill] sm:$0xff] }
 0x3a2   : > { %3047 = vrot.lane.b32.xlu0 %v2647_v13, %s8289_s11  ;;  %v2214_v61 = vsel %vm2184_vm2, %v2181_v62, %v15660_v59  ;;  %v2231_v13 = vsel %vm2217_vm1, %v2198_v1, %v15661_v52  ;;  %v15672_v57 = vld [vmem:[#allocation80_spill] sm:$0xff]  ;;  %v15679_v59 = vld [vmem:[#allocation129_spill] sm:$0xff] }
 0x3a3   : > { %v10223_v25 = vpop.permute.xlu1 %2889  ;;  %3045 = vrot.lane.b32.xlu2 %v2646_v53, %s8289_s11  ;;  %v2247_v11 = vsel %vm2217_vm1, %v2214_v61, %v15662_v35  ;;  %v2264_v16 = vsel %vm2250_vm3, %v2231_v13, %v15663_v5  ;;  %v15664_v53 = vld [vmem:[#allocation157_spill] sm:$0xff]  ;;  %v15675_v41 = vld [vmem:[#allocation112_spill] sm:$0xff] }
 0x3a4   : > { %v10230_v32 = vpop.permute.xlu0 %2899  ;;  %v2280_v38 = vsel %vm2250_vm3, %v2247_v11, %v15664_v53  ;;  %v2297_v2 = vsel %vm2283_vm5, %v2264_v16, %v15665_v54  ;;  %v2648_v43 = vld [vmem:[#allocation3 + $0xc6] sm:$0xff]  ;;  %v15682_v11 = vld [vmem:[#allocation162_spill] sm:$0xff]  ;;  %v11133_v0 = vld [vmem:[#allocation3 + $0x13e] sm:$0xff] }
 0x3a5   : > { %15651 = vst [vmem:[#allocation48_spill] sm:$0xff] %v10230_v32  ;;  %7932 = vmatmul.msk.f32.gmra.mxu0 %vm2358_vm6, %v2329_v45  ;;  %7948 = vmatmul.msk.f32.gmra.mxu3 %vm2358_vm6, %v2345_v17  ;;  %v10238_v15 = vpop.permute.xlu2 %2915  ;;  %v2313_v9 = vsel %vm2283_vm5, %v2280_v38, %v15666_v47  ;;  %v2330_v44 = vsel %vm2316_vm4, %v2297_v2, %v9950_v37  ;;  %v8125_v17 = vld [vmem:[#allocation2 + $0x19a] sm:$0xff]  ;;  %v15681_v13 = vld [vmem:[#allocation160_spill] sm:$0xff] }
 0x3a6   : > { %15654 = vst [vmem:[#allocation8_spill] sm:$0xff] %v10238_v15  ;;  %v2346_v58 = vsel %vm2316_vm4, %v2313_v9, %v2049_v36  ;;  %v2100_v45 = vsel %vm307_vm0, %v8124_v48, %v15669_v3  ;;  %v2116_v30 = vsel %vm307_vm0, %v8125_v17, %v15670_v26  ;;  %v15673_v36 = vld [vmem:[#allocation85_spill] sm:$0xff]  ;;  %v8126_v9 = vld [vmem:[#allocation2 + $0xe2] sm:$0xff] }
 0x3a7   : > { %v2133_v37 = vsel %vm2118_vm11, %v2100_v45, %v15672_v57  ;;  %v2149_v10 = vsel %vm2118_vm11, %v2116_v30, %v15673_v36  ;;  %v15683_v16 = vld [vmem:[#allocation177_spill] sm:$0xff]  ;;  %v8127_v48 = vld [vmem:[#allocation2 + $0x1a2] sm:$0xff] }
 0x3a8   : > { %v2166_v23 = vsel %vm2151_vm15, %v2133_v37, %v15674_v55  ;;  %v2182_v40 = vsel %vm2151_vm15, %v2149_v10, %v15675_v41  ;;  %v15687_v3 = vld [vmem:[#allocation61_spill] sm:$0xff]  ;;  %v15691_v37 = vld [vmem:[#allocation102_spill] sm:$0xff]  ;;  %v15692_v10 = vld [vmem:[#allocation107_spill] sm:$0xff] }
 0x3a9   : > { %3043 = vrot.lane.b32.xlu1 %v2645_v12, %s8289_s11  ;;  %v2653_v12 = vld [vmem:[#allocation3 + $0xfe] sm:$0xff]  ;;  %v2199_v4 = vsel %vm2184_vm2, %v2166_v23, %v15676_v24  ;;  %v2215_v62 = vsel %vm2184_vm2, %v2182_v40, %v15677_v20  ;;  %v2117_v45 = vsel %vm307_vm0, %v8127_v48, %v15687_v3  ;;  %v2651_v57 = vld [vmem:[#allocation3 + $0xe6] sm:$0xff]  ;;  %v15693_v23 = vld [vmem:[#allocation30_spill] sm:$0xff] }
 0x3aa   : > { %3053 = vrot.lane.b32.xlu0 %v2650_v28, %s8289_s11  ;;  %v2652_v28 = vld [vmem:[#allocation3 + $0xf6] sm:$0xff]  ;;  %v2232_v1 = vsel %vm2217_vm1, %v2199_v4, %v15678_v63  ;;  %v2248_v61 = vsel %vm2217_vm1, %v2215_v62, %v15679_v59  ;;  %v2656_v55 = vld [vmem:[#allocation3 + $0x126] sm:$0xff] }
 0x3ab   : > { %v10266_v14 = vpop.permute.xlu1 %2895  ;;  %3051 = vrot.lane.b32.xlu2 %v2649_v39, %s8289_s11  ;;  %v15680_v39 = vld [vmem:[#allocation144_spill] sm:$0xff]  ;;  %v2281_v35 = vsel %vm2250_vm3, %v2248_v61, %v15681_v13  ;;  %v15694_v40 = vld [vmem:[#allocation54_spill] sm:$0xff]  ;;  %v15695_v4 = vld [vmem:[#allocation59_spill] sm:$0xff] }
 0x3ac   : > { %15667 = vst [vmem:[#allocation62_spill] sm:$0xff] %v10266_v14  ;;  %v10272_v18 = vpop.permute.xlu0 %2905  ;;  %v2265_v52 = vsel %vm2250_vm3, %v2232_v1, %v15680_v39  ;;  %v2314_v53 = vsel %vm2283_vm5, %v2281_v35, %v15683_v16  ;;  %v2655_v24 = vld [vmem:[#allocation3 + $0x116] sm:$0xff]  ;;  %v15697_v63 = vld [vmem:[#allocation149_spill] sm:$0xff]  ;;  %v15699_v39 = vld [vmem:[#allocation168_spill] sm:$0xff] }
 0x3ad   : > { %15668 = vst [vmem:[#allocation9_spill] sm:$0xff] %v10272_v18  ;;  %7933 = vmatmul.msk.f32.gmra.mxu0 %vm2358_vm6, %v2330_v44  ;;  %7949 = vmatmul.msk.f32.gmra.mxu3 %vm2358_vm6, %v2346_v58  ;;  %v10280_v7 = vpop.permute.xlu2 %2921  ;;  %v2298_v5 = vsel %vm2283_vm5, %v2265_v52, %v15682_v11  ;;  %v2347_v2 = vsel %vm2316_vm4, %v2314_v53, %v10046_v42  ;;  %v15686_v44 = vld [vmem:[#allocation26_spill] sm:$0xff]  ;;  %v15696_v62 = vld [vmem:[#allocation135_spill] sm:$0xff]  ;;  %v8128_v53 = vld [vmem:[#allocation2 + $0xf2] sm:$0xff] }
 0x3ae   : > { %15671 = vst [vmem:[#allocation67_spill] sm:$0xff] %v10280_v7  ;;  %v2331_v54 = vsel %vm2316_vm4, %v2298_v5, %v10010_v51  ;;  %v2101_v58 = vsel %vm307_vm0, %v8126_v9, %v15686_v44  ;;  %v15689_v51 = vld [vmem:[#allocation66_spill] sm:$0xff]  ;;  %v15704_v9 = vld [vmem:[#allocation77_spill] sm:$0xff] }
 0x3af   : > { %v2134_v26 = vsel %vm2118_vm11, %v2101_v58, %v15689_v51  ;;  %v15690_v42 = vld [vmem:[#allocation90_spill] sm:$0xff]  ;;  %v15706_v3 = vld [vmem:[#allocation29_spill] sm:$0xff]  ;;  %v10372_v51 = vpop.f32.mrf.mxu0 }
 0x3b0   : > { %v2150_v30 = vsel %vm2118_vm11, %v2117_v45, %v15690_v42  ;;  %v2167_v36 = vsel %vm2151_vm15, %v2134_v26, %v15691_v37  ;;  %v15698_v59 = vld [vmem:[#allocation154_spill] sm:$0xff]  ;;  %15707 = vst [vmem:[#allocation11_spill] sm:$0xff] %v10372_v51  ;;  %v2658_v26 = vld [vmem:[#allocation3 + $0x13e] sm:$0xff]  ;;  %v15708_v42 = vld [vmem:[#allocation125_spill] sm:$0xff] }
 0x3b1   : > { %3049 = vrot.lane.b32.xlu1 %v2648_v43, %s8289_s11  ;;  %v2183_v43 = vsel %vm2151_vm15, %v2150_v30, %v15692_v10  ;;  %v2200_v41 = vsel %vm2184_vm2, %v2167_v36, %v15693_v23  ;;  %v2654_v58 = vld [vmem:[#allocation3 + $0x10e] sm:$0xff] }
 0x3b2   : > { %3059 = vrot.lane.b32.xlu0 %v2653_v12, %s8289_s11  ;;  %v2216_v12 = vsel %vm2184_vm2, %v2183_v43, %v15694_v40  ;;  %v2233_v20 = vsel %vm2217_vm1, %v2200_v41, %v15695_v4  ;;  %v15710_v36 = vld [vmem:[#allocation173_spill] sm:$0xff]  ;;  %v15713_v40 = vld [vmem:[#allocation19_spill] sm:$0xff] }
 0x3b3   : > { %v10308_v38 = vpop.permute.xlu1 %2901  ;;  %3057 = vrot.lane.b32.xlu2 %v2652_v28, %s8289_s11  ;;  %v2249_v28 = vsel %vm2217_vm1, %v2216_v12, %v15696_v62  ;;  %v2266_v1 = vsel %vm2250_vm3, %v2233_v20, %v15697_v63  ;;  %v8129_v41 = vld [vmem:[#allocation2 + $0xfa] sm:$0xff]  ;;  %v15715_v4 = vld [vmem:[#allocation83_spill] sm:$0xff] }
 0x3b4   : > { %15684 = vst [vmem:[#allocation42_spill] sm:$0xff] %v10308_v38  ;;  %v10315_v47 = vpop.permute.xlu0 %2911  ;;  %v2282_v61 = vsel %vm2250_vm3, %v2249_v28, %v15698_v59  ;;  %v2299_v52 = vsel %vm2283_vm5, %v2266_v1, %v15699_v39  ;;  %v2103_v12 = vsel %vm307_vm0, %v8129_v41, %v15713_v40  ;;  %v2657_v62 = vld [vmem:[#allocation3 + $0x12e] sm:$0xff]  ;;  %v15717_v59 = vld [vmem:[#allocation116_spill] sm:$0xff] }
 0x3b5   : > { %15685 = vst [vmem:[#allocation78_spill] sm:$0xff] %v10315_v47  ;;  %7934 = vmatmul.msk.f32.gmra.mxu0 %vm2358_vm6, %v2331_v54  ;;  %7950 = vmatmul.msk.f32.gmra.mxu3 %vm2358_vm6, %v2347_v2  ;;  %v10323_v17 = vpop.permute.xlu2 %2927  ;;  %v2315_v13 = vsel %vm2283_vm5, %v2282_v61, %v9860_v22  ;;  %v2332_v11 = vsel %vm2316_vm4, %v2299_v52, %v9899_v56  ;;  %v15702_v54 = vld [vmem:[#allocation37_spill] sm:$0xff]  ;;  %v15705_v56 = vld [vmem:[#allocation94_spill] sm:$0xff]  ;;  %v2661_v39 = vld [vmem:[#allocation3 + $0x15e] sm:$0xff] }
 0x3b6   : > { %15688 = vst [vmem:[#allocation15_spill] sm:$0xff] %v10323_v17  ;;  %v2348_v5 = vsel %vm2316_vm4, %v2315_v13, %v10146_v34  ;;  %v2102_v2 = vsel %vm307_vm0, %v8128_v53, %v15702_v54  ;;  %v2659_v34 = vld [vmem:[#allocation3 + $0x146] sm:$0xff]  ;;  %v2136_v20 = vsel %vm2118_vm11, %v2103_v12, %v15715_v4  ;;  %v2662_v1 = vld [vmem:[#allocation3 + $0x16e] sm:$0xff]  ;;  %v15719_v52 = vld [vmem:[#allocation79_spill] sm:$0xff] }
 0x3b7   : > { %v2135_v44 = vsel %vm2118_vm11, %v2102_v2, %v15704_v9  ;;  %v15716_v28 = vld [vmem:[#allocation101_spill] sm:$0xff]  ;;  %v15721_v53 = vld [vmem:[#allocation164_spill] sm:$0xff]  ;;  %v15732_v4 = vld [vmem:[#allocation171_spill] sm:$0xff] }
 0x3b8   : > { %v2168_v48 = vsel %vm2151_vm15, %v2135_v44, %v15705_v56  ;;  %v2169_v63 = vsel %vm2151_vm15, %v2136_v20, %v15716_v28  ;;  %v15724_v56 = vld [vmem:[#allocation32_spill] sm:$0xff]  ;;  %v2574_v40 = vld [vmem:[#allocation3 + $0x48] sm:$0xff]  ;;  %v10715_v15 = vld [vmem:[#allocation3 + $0xf3] sm:$0xff] }
 0x3b9   : > { %3055 = vrot.lane.b32.xlu1 %v2651_v57, %s8289_s11  ;;  %v2201_v45 = vsel %vm2184_vm2, %v2168_v48, %v15706_v3  ;;  %v15709_v57 = vld [vmem:[#allocation140_spill] sm:$0xff]  ;;  %v15726_v3 = vld [vmem:[#allocation69_spill] sm:$0xff] }
 0x3ba   : > { %3065 = vrot.lane.b32.xlu0 %v2656_v55, %s8289_s11  ;;  %v2234_v30 = vsel %vm2217_vm1, %v2201_v45, %v15708_v42  ;;  %v15727_v42 = vld [vmem:[#allocation105_spill] sm:$0xff] }
 0x3bb   : > { %v10351_v35 = vpop.permute.xlu1 %2907  ;;  %3063 = vrot.lane.b32.xlu2 %v2655_v24, %s8289_s11  ;;  %v2267_v37 = vsel %vm2250_vm3, %v2234_v30, %v15709_v57  ;;  %v15728_v57 = vld [vmem:[#allocation36_spill] sm:$0xff] }
 0x3bc   : > { %15700 = vst [vmem:[#allocation53_spill] sm:$0xff] %v10351_v35  ;;  %v10358_v16 = vpop.permute.xlu0 %2917  ;;  %v2300_v10 = vsel %vm2283_vm5, %v2267_v37, %v15710_v36  ;;  %v15729_v37 = vld [vmem:[#allocation122_spill] sm:$0xff] }
 0x3bd   : > { %15701 = vst [vmem:[#allocation21_spill] sm:$0xff] %v10358_v16  ;;  %7935 = vmatmul.msk.f32.gmra.mxu0 %vm2358_vm6, %v2332_v11  ;;  %7951 = vmatmul.msk.f32.gmra.mxu3 %vm2358_vm6, %v2348_v5  ;;  %v10364_v22 = vpop.permute.xlu2 %2933  ;;  %v2333_v55 = vsel %vm2316_vm4, %v2300_v10, %v9987_v49  ;;  %v2202_v49 = vsel %vm2184_vm2, %v2169_v63, %v15717_v59  ;;  %v15720_v11 = vld [vmem:[#allocation147_spill] sm:$0xff]  ;;  %v2575_v10 = vld [vmem:[#allocation3 + $0x50] sm:$0xff]  ;;  %v15735_v59 = vld [vmem:[#allocation41_spill] sm:$0xff] }
 0x3be   : > { %15703 = vst [vmem:[#allocation65_spill] sm:$0xff] %v10364_v22  ;;  %v2235_v13 = vsel %vm2217_vm1, %v2202_v49, %v15719_v52  ;;  %v15737_v52 = vld [vmem:[#allocation81_spill] sm:$0xff]  ;;  %v2597_v22 = vld [vmem:[#allocation3 + $0x158] sm:$0xff] }
 0x3bf   : > { %v2268_v5 = vsel %vm2250_vm3, %v2235_v13, %v15720_v11  ;;  %v2663_v11 = vld [vmem:[#allocation3 + $0x176] sm:$0xff]  ;;  %v10694_v16 = vld [vmem:[#allocation3 + $0xcb] sm:$0xff] }
 0x3c0   : > { %v2301_v54 = vsel %vm2283_vm5, %v2268_v5, %v15721_v53  ;;  %v15738_v5 = vld [vmem:[#allocation96_spill] sm:$0xff] }
 0x3c1   : > { %3061 = vrot.lane.b32.xlu1 %v2654_v58, %s8289_s11  ;;  %v2334_v9 = vsel %vm2316_vm4, %v2301_v54, %v10036_v8  ;;  %v8130_v58 = vld [vmem:[#allocation2 + $0x10a] sm:$0xff] }
 0x3c2   : > { %3071 = vrot.lane.b32.xlu0 %v2659_v34, %s8289_s11  ;;  %v2104_v48 = vsel %vm307_vm0, %v8130_v58, %v15724_v56  ;;  %v15739_v54 = vld [vmem:[#allocation35_spill] sm:$0xff] }
 0x3c3   : > { %v10382_v43 = vpop.permute.xlu1 %2913  ;;  %3069 = vrot.lane.b32.xlu2 %v2658_v26, %s8289_s11  ;;  %v10400_v61 = vpop.f32.mrf.mxu0  ;;  %v2137_v45 = vsel %vm2118_vm11, %v2104_v48, %v15726_v3  ;;  %v2660_v26 = vld [vmem:[#allocation3 + $0x156] sm:$0xff] }
 0x3c4   : > { %15711 = vst [vmem:[#allocation51_spill] sm:$0xff] %v10382_v43  ;;  %v10387_v23 = vpop.permute.xlu0 %2923  ;;  %v2170_v30 = vsel %vm2151_vm15, %v2137_v45, %v15727_v42  ;;  %v2578_v56 = vld [vmem:[#allocation3 + $0x78] sm:$0xff]  ;;  %v15741_v48 = vld [vmem:[#allocation142_spill] sm:$0xff]  ;;  %v2577_v45 = vld [vmem:[#allocation3 + $0x68] sm:$0xff] }
 0x3c5   : > { %15712 = vst [vmem:[#allocation71_spill] sm:$0xff] %v10387_v23  ;;  %7936 = vmatmul.msk.f32.gmra.mxu0 %vm2358_vm6, %v2333_v55  ;;  %v10392_v24 = vpop.permute.xlu2 %2939  ;;  %v2203_v8 = vsel %vm2184_vm2, %v2170_v30, %v15728_v57  ;;  %v15730_v55 = vld [vmem:[#allocation152_spill] sm:$0xff]  ;;  %v15743_v42 = vld [vmem:[#allocation10_spill] sm:$0xff] }
 0x3c6   : > { %15714 = vst [vmem:[#allocation44_spill] sm:$0xff] %v10392_v24  ;;  %v2236_v36 = vsel %vm2217_vm1, %v2203_v8, %v15729_v37  ;;  %v2697_v23 = vld [vmem:[#allocation3 + $0x53] sm:$0xff] }
 0x3c7   : > { %15718 = vst [vmem:[#allocation75_spill] sm:$0xff] %v10400_v61  ;;  %v2269_v41 = vsel %vm2250_vm3, %v2236_v36, %v15730_v55  ;;  %v8132_v36 = vld [vmem:[#allocation2 + $0x122] sm:$0xff] }
 0x3c8   : > { %v2302_v20 = vsel %vm2283_vm5, %v2269_v41, %v15732_v4 }
 0x3c9   : > { %3067 = vrot.lane.b32.xlu1 %v2657_v62, %s8289_s11  ;;  %v2335_v28 = vsel %vm2316_vm4, %v2302_v20, %v9929_v27  ;;  %v15749_v20 = vld [vmem:[#allocation103_spill] sm:$0xff] }
 0x3ca   : > { %3077 = vrot.lane.b32.xlu0 %v2662_v1, %s8289_s11  ;;  %v8131_v1 = vld [vmem:[#allocation2 + $0x112] sm:$0xff] }
 0x3cb   : > { %v10410_v2 = vpop.permute.xlu1 %2919  ;;  %3075 = vrot.lane.b32.xlu2 %v2661_v39, %s8289_s11  ;;  %v2105_v49 = vsel %vm307_vm0, %v8131_v1, %v15735_v59  ;;  %v15750_v1 = vld [vmem:[#allocation117_spill] sm:$0xff] }
 0x3cc   : > { %15722 = vst [vmem:[#allocation131_spill] sm:$0xff] %v10410_v2  ;;  %v10415_v44 = vpop.permute.xlu0 %2929  ;;  %v2138_v13 = vsel %vm2118_vm11, %v2105_v49, %v15737_v52  ;;  %v15751_v49 = vld [vmem:[#allocation130_spill] sm:$0xff] }
 0x3cd   : > { %15723 = vst [vmem:[#allocation139_spill] sm:$0xff] %v10415_v44  ;;  %7937 = vmatmul.msk.f32.gmra.mxu0 %vm2358_vm6, %v2334_v9  ;;  %v10420_v34 = vpop.permute.xlu2 %2945  ;;  %v2171_v53 = vsel %vm2151_vm15, %v2138_v13, %v15738_v5  ;;  %v15740_v9 = vld [vmem:[#allocation126_spill] sm:$0xff]  ;;  %v2581_v13 = vld [vmem:[#allocation3 + $0x98] sm:$0xff] }
 0x3ce   : > { %15725 = vst [vmem:[#allocation148_spill] sm:$0xff] %v10420_v34  ;;  %v2204_v27 = vsel %vm2184_vm2, %v2171_v53, %v15739_v54  ;;  %v2580_v53 = vld [vmem:[#allocation3 + $0x90] sm:$0xff] }
 0x3cf   : > { %v2237_v58 = vsel %vm2217_vm1, %v2204_v27, %v15740_v9  ;;  %v15754_v27 = vld [vmem:[#allocation166_spill] sm:$0xff] }
 0x3d0   : > { %v2270_v3 = vsel %vm2250_vm3, %v2237_v58, %v15741_v48  ;;  %v2704_v2 = vld [vmem:[#allocation3 + $0xab] sm:$0xff] }
 0x3d1   : > { %3073 = vrot.lane.b32.xlu1 %v2660_v26, %s8289_s11  ;;  %v2303_v30 = vsel %vm2283_vm5, %v2270_v3, %v15743_v42  ;;  %v8133_v3 = vld [vmem:[#allocation2 + $0x12a] sm:$0xff] }
 0x3d2   : > { %v10433_v12 = vpop.f32.mrf.mxu0  ;;  %3147 = vrot.lane.b32.xlu0 %v2575_v10, %s8290_s12  ;;  %v2336_v8 = vsel %vm2316_vm4, %v2303_v30, %v10015_v31  ;;  %v15746_v10 = vld [vmem:[#allocation23_spill] sm:$0xff]  ;;  %v2576_v31 = vld [vmem:[#allocation3 + $0x60] sm:$0xff] }
 0x3d3   : > { %15731 = vst [vmem:[#allocation159_spill] sm:$0xff] %v10433_v12  ;;  %v10438_v62 = vpop.permute.xlu1 %2925  ;;  %3145 = vrot.lane.b32.xlu2 %v2574_v40, %s8290_s12  ;;  %v2106_v55 = vsel %vm307_vm0, %v8132_v36, %v15746_v10  ;;  %v15748_v40 = vld [vmem:[#allocation86_spill] sm:$0xff]  ;;  %v15760_v10 = vld [vmem:[#allocation108_spill] sm:$0xff]  ;;  %v6055_v47 = vmul.f32 %v10433_v12, %v10433_v12  ;;  %v5986_v19 = vsel %vm307_vm0, %v10433_v12, 0.0 }
 0x3d4   : > { %15733 = vst [vmem:[#allocation18_spill] sm:$0xff] %v10438_v62  ;;  %v10443_v63 = vpop.permute.xlu0 %2935  ;;  %v2139_v4 = vsel %vm2118_vm11, %v2106_v55, %v15748_v40  ;;  %v15761_v40 = vld [vmem:[#allocation118_spill] sm:$0xff] }
 0x3d5   : > { %15734 = vst [vmem:[#allocation58_spill] sm:$0xff] %v10443_v63  ;;  %7938 = vmatmul.msk.f32.gmra.mxu0 %vm2358_vm6, %v2335_v28  ;;  %v10448_v39 = vpop.permute.xlu2 %2951  ;;  %v2172_v28 = vsel %vm2151_vm15, %v2139_v4, %v15749_v20  ;;  %v15762_v20 = vld [vmem:[#allocation124_spill] sm:$0xff]  ;;  %v6088_v24 = vsel %vm307_vm0, %v6055_v47, 0.0 }
 0x3d6   : > { %15736 = vst [vmem:[#allocation97_spill] sm:$0xff] %v10448_v39  ;;  %v2205_v59 = vsel %vm2184_vm2, %v2172_v28, %v15750_v1  ;;  %v2584_v1 = vld [vmem:[#allocation3 + $0xc0] sm:$0xff] }
 0x3d7   : > { %v2238_v52 = vsel %vm2217_vm1, %v2205_v59, %v15751_v49  ;;  %v15763_v59 = vld [vmem:[#allocation155_spill] sm:$0xff]  ;;  %v2583_v49 = vld [vmem:[#allocation3 + $0xb0] sm:$0xff] }
 0x3d9   : > { %3079 = vrot.lane.b32.xlu1 %v2663_v11, %s8289_s11  ;;  %v15752_v11 = vld [vmem:[#allocation150_spill] sm:$0xff] }
 0x3da   : > { %v10461_v26 = vpop.f32.mrf.mxu0  ;;  %3153 = vrot.lane.b32.xlu0 %v2578_v56, %s8290_s12  ;;  %v2271_v5 = vsel %vm2250_vm3, %v2238_v52, %v15752_v11 }
 0x3db   : > { %15742 = vst [vmem:[#allocation115_spill] sm:$0xff] %v10461_v26  ;;  %v10466_v57 = vpop.permute.xlu1 %2931  ;;  %3151 = vrot.lane.b32.xlu2 %v2577_v45, %s8290_s12  ;;  %v2304_v9 = vsel %vm2283_vm5, %v2271_v5, %v15754_v27  ;;  %v15757_v45 = vld [vmem:[#allocation38_spill] sm:$0xff] }
 0x3dc   : > { %15744 = vst [vmem:[#allocation60_spill] sm:$0xff] %v10466_v57  ;;  %v10471_v37 = vpop.permute.xlu0 %2941  ;;  %v2337_v56 = vsel %vm2316_vm4, %v2304_v9, %v10074_v6  ;;  %v2107_v42 = vsel %vm307_vm0, %v8133_v3, %v15757_v45  ;;  %v2579_v6 = vld [vmem:[#allocation3 + $0x80] sm:$0xff]  ;;  %v8134_v9 = vld [vmem:[#allocation2 + $0x13a] sm:$0xff] }
 0x3dd   : > { %15745 = vst [vmem:[#allocation143_spill] sm:$0xff] %v10471_v37  ;;  %7939 = vmatmul.msk.f32.gmra.mxu0 %vm2358_vm6, %v2336_v8  ;;  %v10476_v41 = vpop.permute.xlu2 %3021  ;;  %v15759_v8 = vld [vmem:[#allocation73_spill] sm:$0xff] }
 0x3de   : > { %15747 = vst [vmem:[#allocation163_spill] sm:$0xff] %v10476_v41  ;;  %v2140_v36 = vsel %vm2118_vm11, %v2107_v42, %v15759_v8  ;;  %v15769_v42 = vld [vmem:[#allocation84_spill] sm:$0xff] }
 0x3df   : > { %v2173_v55 = vsel %vm2151_vm15, %v2140_v36, %v15760_v10  ;;  %v15770_v36 = vld [vmem:[#allocation99_spill] sm:$0xff]  ;;  %v11131_v41 = vld [vmem:[#allocation3 + $0x146] sm:$0xff] }
 0x3e0   : > { %v2206_v4 = vsel %vm2184_vm2, %v2173_v55, %v15761_v40  ;;  %v15771_v55 = vld [vmem:[#allocation45_spill] sm:$0xff] }
 0x3e1   : > { %3149 = vrot.lane.b32.xlu1 %v2576_v31, %s8290_s12  ;;  %v2239_v28 = vsel %vm2217_vm1, %v2206_v4, %v15762_v20  ;;  %v15772_v4 = vld [vmem:[#allocation128_spill] sm:$0xff] }
 0x3e2   : > { %v10489_v54 = vpop.f32.mrf.mxu0  ;;  %3159 = vrot.lane.b32.xlu0 %v2581_v13, %s8290_s12  ;;  %v2272_v31 = vsel %vm2250_vm3, %v2239_v28, %v15763_v59  ;;  %v15765_v13 = vld [vmem:[#allocation174_spill] sm:$0xff]  ;;  %v2587_v20 = vld [vmem:[#allocation3 + $0xe0] sm:$0xff]  ;;  %v15773_v28 = vld [vmem:[#allocation145_spill] sm:$0xff] }
 0x3e3   : > { %15753 = vst [vmem:[#allocation25_spill] sm:$0xff] %v10489_v54  ;;  %v10494_v58 = vpop.permute.xlu1 %2937  ;;  %3157 = vrot.lane.b32.xlu2 %v2580_v53, %s8290_s12  ;;  %v2305_v11 = vsel %vm2283_vm5, %v2272_v31, %v15765_v13  ;;  %v2586_v59 = vld [vmem:[#allocation3 + $0xd8] sm:$0xff]  ;;  %v5990_v47 = vsel %vm307_vm0, %v10489_v54, 0.0 }
 0x3e4   : > { %15755 = vst [vmem:[#allocation33_spill] sm:$0xff] %v10494_v58  ;;  %v10499_v48 = vpop.permute.xlu0 %2947  ;;  %v2338_v53 = vsel %vm2316_vm4, %v2305_v11, %v9955_v33  ;;  %v2582_v33 = vld [vmem:[#allocation3 + $0xa8] sm:$0xff]  ;;  %v10788_v58 = vld [vmem:[#allocation3 + $0xfb] sm:$0xff] }
 0x3e5   : > { %15756 = vst [vmem:[#allocation68_spill] sm:$0xff] %v10499_v48  ;;  %7940 = vmatmul.msk.f32.gmra.mxu0 %vm2358_vm6, %v2337_v56  ;;  %v10504_v30 = vpop.permute.xlu2 %3027  ;;  %v15767_v56 = vld [vmem:[#allocation46_spill] sm:$0xff] }
 0x3e6   : > { %15758 = vst [vmem:[#allocation89_spill] sm:$0xff] %v10504_v30  ;;  %v2108_v3 = vsel %vm307_vm0, %v8134_v9, %v15767_v56  ;;  %v15777_v9 = vld [vmem:[#allocation27_spill] sm:$0xff] }
 0x3e7   : > { %v2141_v8 = vsel %vm2118_vm11, %v2108_v3, %v15769_v42  ;;  %v10713_v48 = vld [vmem:[#allocation3 + $0xb3] sm:$0xff] }
 0x3e8   : > { %v2174_v10 = vsel %vm2151_vm15, %v2141_v8, %v15770_v36  ;;  %v303_v8 = vld [vmem:[%s9699_s23 + $0xe0] sm:$0xff]  ;;  %v15779_v36 = vld [vmem:[#allocation87_spill] sm:$0xff] }
 0x3e9   : > { %3155 = vrot.lane.b32.xlu1 %v2579_v6, %s8290_s12  ;;  %v2207_v40 = vsel %vm2184_vm2, %v2174_v10, %v15771_v55  ;;  %768 = vst.msk [vmem:[#allocation4 + $0x169] sm:$0xff] %vm307_vm0, %v303_v8  ;;  %vm638_vm10 = vcmp.gt.f32.partialorder %v303_v8, 0.0 }
 0x3ea   : > { %v10517_v52 = vpop.f32.mrf.mxu0  ;;  %3165 = vrot.lane.b32.xlu0 %v2584_v1, %s8290_s12  ;;  %v2240_v6 = vsel %vm2217_vm1, %v2207_v40, %v15772_v4  ;;  %v670_v40 = vmul.f32 0.01, %v303_v8  ;;  %v15781_v4 = vld [vmem:[#allocation106_spill] sm:$0xff] }
 0x3eb   : > { %15764 = vst [vmem:[#allocation92_spill] sm:$0xff] %v10517_v52  ;;  %v10522_v5 = vpop.permute.xlu1 %2943  ;;  %3163 = vrot.lane.b32.xlu2 %v2583_v49, %s8290_s12  ;;  %v2273_v1 = vsel %vm2250_vm3, %v2240_v6, %v15773_v28  ;;  %v15775_v49 = vld [vmem:[#allocation43_spill] sm:$0xff] }
 0x3ec   : > { %15766 = vst [vmem:[#allocation109_spill] sm:$0xff] %v10522_v5  ;;  %v10527_v27 = vpop.permute.xlu0 %3017  ;;  %v2306_v13 = vsel %vm2283_vm5, %v2273_v1, %v15775_v49  ;;  %v702_v28 = vsel %vm638_vm10, %v303_v8, %v670_v40  ;;  %v2589_v40 = vld [vmem:[#allocation3 + $0xf8] sm:$0xff]  ;;  %v5984_v5 = vsel %vm307_vm0, %v10400_v61, 0.0 }
 0x3ed   : > { %7941 = vmatmul.msk.f32.gmra.mxu0 %vm2358_vm6, %v2338_v53  ;;  %v10532_v45 = vpop.permute.xlu2 %3033  ;;  %v8135_v53 = vld [vmem:[#allocation2 + $0x142] sm:$0xff]  ;;  %v2339_v3 = vsel %vm2316_vm4, %v2306_v13, %v10041_v46  ;;  %v2585_v13 = vld [vmem:[#allocation3 + $0xc8] sm:$0xff]  ;;  %735 = vst.msk [vmem:[#allocation3 + $0x19b] sm:$0xff] %vm307_vm0, %v702_v28 }
 0x3ee   : > { %15768 = vst [vmem:[#allocation20_spill] sm:$0xff] %v10532_v45  ;;  %v2109_v56 = vsel %vm307_vm0, %v8135_v53, %v15777_v9  ;;  %v15783_v9 = vld [vmem:[#allocation132_spill] sm:$0xff] }
 0x3ef   : > { %v2142_v10 = vsel %vm2118_vm11, %v2109_v56, %v15779_v36  ;;  %v15784_v36 = vld [vmem:[#allocation153_spill] sm:$0xff] }
 0x3f0   : > { %v2175_v6 = vsel %vm2151_vm15, %v2142_v10, %v15781_v4 }
 0x3f1   : > { %3161 = vrot.lane.b32.xlu1 %v2582_v33, %s8290_s12  ;;  %v301_v33 = vld [vmem:[%s9699_s23 + $0xd0] sm:$0xff] }
 0x3f2   : > { %v10545_v31 = vpop.f32.mrf.mxu0  ;;  %3171 = vrot.lane.b32.xlu0 %v2587_v20, %s8290_s12  ;;  %v302_v20 = vld [vmem:[%s9699_s23 + $0xd8] sm:$0xff]  ;;  %v668_v46 = vmul.f32 0.01, %v301_v33  ;;  %766 = vst.msk [vmem:[#allocation4 + $0x151] sm:$0xff] %vm307_vm0, %v301_v33  ;;  %vm636_vm12 = vcmp.gt.f32.partialorder %v301_v33, 0.0 }
 0x3f3   : > { %15774 = vst [vmem:[#allocation40_spill] sm:$0xff] %v10545_v31  ;;  %v10550_v11 = vpop.permute.xlu1 %2949  ;;  %3169 = vrot.lane.b32.xlu2 %v2586_v59, %s8290_s12  ;;  %vm637_vm13 = vcmp.gt.f32.partialorder %v302_v20, 0.0  ;;  %v669_v1 = vmul.f32 0.01, %v302_v20  ;;  %v15782_v59 = vld [vmem:[#allocation34_spill] sm:$0xff] }
 0x3f4   : > { %15776 = vst [vmem:[#allocation121_spill] sm:$0xff] %v10550_v11  ;;  %v10557_v42 = vpop.permute.xlu0 %3023  ;;  %v2208_v49 = vsel %vm2184_vm2, %v2175_v6, %v15782_v59  ;;  %v700_v53 = vsel %vm636_vm12, %v301_v33, %v668_v46  ;;  %v15786_v33 = vld [vmem:[#allocation169_spill] sm:$0xff]  ;;  %v2692_v63 = vld [vmem:[#allocation3 + $0x198] sm:$0xff] }
 0x3f5   : > { %15778 = vst [vmem:[#allocation134_spill] sm:$0xff] %v10557_v42  ;;  %7942 = vmatmul.msk.f32.gmra.mxu0 %vm2358_vm6, %v2339_v3  ;;  %v10563_v55 = vpop.permute.xlu2 %3039  ;;  %v2241_v56 = vsel %vm2217_vm1, %v2208_v49, %v15783_v9  ;;  %v2590_v3 = vld [vmem:[#allocation3 + $0x108] sm:$0xff]  ;;  %v701_v8 = vsel %vm637_vm13, %v302_v20, %v669_v1  ;;  %v305_v1 = vld [vmem:[%s9699_s23 + $0xf0] sm:$0xff]  ;;  %v304_v9 = vld [vmem:[%s9699_s23 + $0xe8] sm:$0xff] }
 0x3f6   : > { %15780 = vst [vmem:[#allocation137_spill] sm:$0xff] %v10563_v55  ;;  %v2274_v10 = vsel %vm2250_vm3, %v2241_v56, %v15784_v36  ;;  %v306_v59 = vld [vmem:[%s9699_s23 + $0xf8] sm:$0xff]  ;;  %vm640_vm14 = vcmp.gt.f32.partialorder %v305_v1, 0.0  ;;  %vm639_vm8 = vcmp.gt.f32.partialorder %v304_v9, 0.0  ;;  %v6053_v55 = vmul.f32 %v10372_v51, %v10372_v51  ;;  %v11048_v42 = vld [vmem:[#allocation3 + $0xb6] sm:$0xff] }
 0x3f7   : > { %767 = vst.msk [vmem:[#allocation4 + $0x159] sm:$0xff] %vm307_vm0, %v302_v20  ;;  %v2307_v6 = vsel %vm2283_vm5, %v2274_v10, %v15786_v33  ;;  %vm641_vm7 = vcmp.gt.f32.partialorder %v306_v59, 0.0  ;;  %v2593_v36 = vld [vmem:[#allocation3 + $0x128] sm:$0xff] }
 0x3f8   : > { %733 = vst.msk [vmem:[#allocation3 + $0x183] sm:$0xff] %vm307_vm0, %v700_v53  ;;  %v2340_v20 = vsel %vm2316_vm4, %v2307_v6, %v10102_v60  ;;  %v673_v53 = vmul.f32 0.01, %v306_v59  ;;  %v671_v60 = vmul.f32 0.01, %v304_v9 }
 0x3f9   : > { %3167 = vrot.lane.b32.xlu1 %v2585_v13, %s8290_s12  ;;  %734 = vst.msk [vmem:[#allocation3 + $0x18b] sm:$0xff] %vm307_vm0, %v701_v8  ;;  %v672_v13 = vmul.f32 0.01, %v305_v1  ;;  %v2588_v8 = vld [vmem:[#allocation3 + $0xf0] sm:$0xff] }
 0x3fa   : > { %v10581_v4 = vpop.f32.mrf.mxu0  ;;  %3177 = vrot.lane.b32.xlu0 %v2590_v3, %s8290_s12  ;;  %770 = vst.msk [vmem:[#allocation4 + $0x181] sm:$0xff] %vm307_vm0, %v305_v1  ;;  %v705_v3 = vsel %vm641_vm7, %v306_v59, %v673_v53  ;;  %v703_v10 = vsel %vm639_vm8, %v304_v9, %v671_v60  ;;  %v2595_v53 = vld [vmem:[#allocation3 + $0x140] sm:$0xff]  ;;  %vm438_vm8 = vcmask 58368  }
 0x3fb   : > { %15785 = vst [vmem:[#allocation156_spill] sm:$0xff] %v10581_v4  ;;  %v10587_v46 = vpop.permute.xlu1 %3019  ;;  %3175 = vrot.lane.b32.xlu2 %v2589_v40, %s8290_s12  ;;  %v704_v56 = vsel %vm640_vm14, %v305_v1, %v672_v13  ;;  %v2592_v40 = vld [vmem:[#allocation3 + $0x120] sm:$0xff]  ;;  %v2596_v13 = vld [vmem:[#allocation3 + $0x150] sm:$0xff] }
 0x3fc   : > { %15787 = vst [vmem:[#allocation167_spill] sm:$0xff] %v10587_v46  ;;  %v10592_v28 = vpop.permute.xlu0 %3029  ;;  %v2771_v46 = vld [vmem:[#allocation3 + $0x108] sm:$0xff] }
 0x3fd   : > { %15788 = vst [vmem:[#allocation172_spill] sm:$0xff] %v10592_v28  ;;  %7943 = vmatmul.msk.f32.gmra.mxu0 %vm2358_vm6, %v2340_v20  ;;  %v10597_v49 = vpop.permute.xlu2 %3045 }
 0x3fe   : > { %15789 = vst [vmem:[#allocation13_spill] sm:$0xff] %v10597_v49  ;;  %v2703_v49 = vld [vmem:[#allocation3 + $0x9b] sm:$0xff] }
 0x3ff   : > { %771 = vst.msk [vmem:[#allocation4 + $0x189] sm:$0xff] %vm307_vm0, %v306_v59  ;;  %v2591_v59 = vld [vmem:[#allocation3 + $0x110] sm:$0xff]  ;;  %v2690_v44 = vld [vmem:[#allocation3 + $0x180] sm:$0xff] }
 0x400   : > { %769 = vst.msk [vmem:[#allocation4 + $0x171] sm:$0xff] %vm307_vm0, %v304_v9  ;;  %v2691_v57 = vld [vmem:[#allocation3 + $0x188] sm:$0xff] }
 0x401   : > { %737 = vst.msk [vmem:[#allocation3 + $0x1b3] sm:$0xff] %vm307_vm0, %v704_v56  ;;  %3173 = vrot.lane.b32.xlu1 %v2588_v8, %s8290_s12  ;;  %v2594_v8 = vld [vmem:[#allocation3 + $0x138] sm:$0xff] }
 0x402   : > { %738 = vst.msk [vmem:[#allocation3 + $0x1bb] sm:$0xff] %vm307_vm0, %v705_v3  ;;  %v10606_v33 = vpop.f32.mrf.mxu0  ;;  %3183 = vrot.lane.b32.xlu0 %v2593_v36, %s8290_s12  ;;  %v2599_v36 = vld [vmem:[#allocation3 + $0x170] sm:$0xff] }
 0x403   : > { %15790 = vst [vmem:[#allocation47_spill] sm:$0xff] %v10606_v33  ;;  %v10610_v6 = vpop.permute.xlu1 %3025  ;;  %3181 = vrot.lane.b32.xlu2 %v2592_v40, %s8290_s12 }
 0x404   : > { %736 = vst.msk [vmem:[#allocation3 + $0x1a3] sm:$0xff] %vm307_vm0, %v703_v10  ;;  %v10613_v20 = vpop.permute.xlu0 %3035  ;;  %v2598_v10 = vld [vmem:[#allocation3 + $0x168] sm:$0xff] }
 0x405   : > { %15791 = vst [vmem:[#allocation76_spill] sm:$0xff] %v10610_v6  ;;  %v10615_v1 = vpop.permute.xlu2 %3051  ;;  %v2730_v6 = vld [vmem:[#allocation3 + $0x66] sm:$0xff] }
 0x406   : > { %15792 = vst [vmem:[#allocation82_spill] sm:$0xff] %v10613_v20  ;;  %v10754_v20 = vld [vmem:[#allocation3 + $0x10b] sm:$0xff] }
 0x407   : > { %15793 = vst [vmem:[#allocation95_spill] sm:$0xff] %v10615_v1  ;;  %v2698_v1 = vld [vmem:[#allocation3 + $0x63] sm:$0xff] }
 0x408   : > { %v10988_v32 = vld [vmem:[#allocation3 + $0x1b3] sm:$0xff] }
 0x409   : > { %3179 = vrot.lane.b32.xlu1 %v2591_v59, %s8290_s12  ;;  %v2695_v17 = vld [vmem:[#allocation3 + $0x1b8] sm:$0xff] }
 0x40a   : > { %v10618_v9 = vpop.f32.mrf.mxu0  ;;  %3189 = vrot.lane.b32.xlu0 %v2596_v13, %s8290_s12 }
 0x40b   : > { %15794 = vst [vmem:[#allocation111_spill] sm:$0xff] %v10618_v9  ;;  %v10621_v56 = vpop.permute.xlu1 %3031  ;;  %3187 = vrot.lane.b32.xlu2 %v2595_v53, %s8290_s12 }
 0x40c   : > { %15795 = vst [vmem:[#allocation113_spill] sm:$0xff] %v10621_v56  ;;  %v10624_v3 = vpop.permute.xlu0 %3041 }
 0x40d   : > { %15796 = vst [vmem:[#allocation50_spill] sm:$0xff] %v10624_v3  ;;  %v10626_v60 = vpop.permute.xlu2 %3057 }
 0x40e   : > { %15797 = vst [vmem:[#allocation70_spill] sm:$0xff] %v10626_v60 }
 0x411   : > { %3185 = vrot.lane.b32.xlu1 %v2594_v8, %s8290_s12 }
 0x412   : > { %v10629_v40 = vpop.f32.mrf.mxu0  ;;  %3195 = vrot.lane.b32.xlu0 %v2599_v36, %s8290_s12 }
 0x413   : > { %15798 = vst [vmem:[#allocation127_spill] sm:$0xff] %v10629_v40  ;;  %v10632_v59 = vpop.permute.xlu1 %3037  ;;  %3193 = vrot.lane.b32.xlu2 %v2598_v10, %s8290_s12 }
 0x414   : > { %15799 = vst [vmem:[#allocation141_spill] sm:$0xff] %v10632_v59  ;;  %v10635_v13 = vpop.permute.xlu0 %3047  ;;  %v10743_v59 = vld [vmem:[#allocation3 + $0xdb] sm:$0xff] }
 0x415   : > { %15800 = vst [vmem:[#allocation158_spill] sm:$0xff] %v10635_v13  ;;  %v10637_v53 = vpop.permute.xlu2 %3063  ;;  %v2700_v13 = vld [vmem:[#allocation3 + $0x7b] sm:$0xff] }
 0x416   : > { %15801 = vst [vmem:[#allocation161_spill] sm:$0xff] %v10637_v53  ;;  %v2694_v53 = vld [vmem:[#allocation3 + $0x1b0] sm:$0xff] }
 0x419   : > { %3191 = vrot.lane.b32.xlu1 %v2597_v22, %s8290_s12 }
 0x41a   : > { %v10640_v60 = vpop.f32.mrf.mxu0  ;;  %3201 = vrot.lane.b32.xlu0 %v2692_v63, %s8290_s12 }
 0x41b   : > { %15802 = vst [vmem:[#allocation176_spill] sm:$0xff] %v10640_v60  ;;  %v10643_v8 = vpop.permute.xlu1 %3043  ;;  %3199 = vrot.lane.b32.xlu2 %v2691_v57, %s8290_s12 }
 0x41c   : > { %15803 = vst [vmem:[#allocation22_spill] sm:$0xff] %v10643_v8  ;;  %v10646_v36 = vpop.permute.xlu0 %3053 }
 0x41d   : > { %15804 = vst [vmem:[#allocation56_spill] sm:$0xff] %v10646_v36  ;;  %v10648_v10 = vpop.permute.xlu2 %3069  ;;  %v2693_v36 = vld [vmem:[#allocation3 + $0x1a0] sm:$0xff] }
 0x41e   : > { %15805 = vst [vmem:[#allocation63_spill] sm:$0xff] %v10648_v10 }
 0x421   : > { %3197 = vrot.lane.b32.xlu1 %v2690_v44, %s8290_s12 }
 0x422   : > { %v10651_v62 = vpop.f32.mrf.mxu0  ;;  %3207 = vrot.lane.b32.xlu0 %v2695_v17, %s8290_s12 }
 0x423   : > { %15806 = vst [vmem:[#allocation88_spill] sm:$0xff] %v10651_v62  ;;  %v10654_v22 = vpop.permute.xlu1 %3049  ;;  %3205 = vrot.lane.b32.xlu2 %v2694_v53, %s8290_s12 }
 0x424   : > { %15807 = vst [vmem:[#allocation100_spill] sm:$0xff] %v10654_v22  ;;  %v10657_v63 = vpop.permute.xlu0 %3059  ;;  %v2701_v22 = vld [vmem:[#allocation3 + $0x83] sm:$0xff] }
 0x425   : > { %15808 = vst [vmem:[#allocation104_spill] sm:$0xff] %v10657_v63  ;;  %v10659_v57 = vpop.permute.xlu2 %3075  ;;  %v2696_v63 = vld [vmem:[#allocation3 + $0x4b] sm:$0xff] }
 0x426   : > { %15809 = vst [vmem:[#allocation28_spill] sm:$0xff] %v10659_v57  ;;  %v10696_v57 = vld [vmem:[#allocation3 + $0xc3] sm:$0xff] }
 0x429   : > { %3203 = vrot.lane.b32.xlu1 %v2693_v36, %s8290_s12 }
 0x42a   : > { %v10662_v7 = vpop.f32.mrf.mxu0  ;;  %3277 = vrot.lane.b32.xlu0 %v2698_v1, %s8291_s13 }
 0x42b   : > { %15810 = vst [vmem:[#allocation49_spill] sm:$0xff] %v10662_v7  ;;  %v10665_v44 = vpop.permute.xlu1 %3055  ;;  %3275 = vrot.lane.b32.xlu2 %v2697_v23, %s8291_s13 }
 0x42c   : > { %15811 = vst [vmem:[#allocation120_spill] sm:$0xff] %v10665_v44  ;;  %v10668_v17 = vpop.permute.xlu0 %3065  ;;  %v2699_v44 = vld [vmem:[#allocation3 + $0x6b] sm:$0xff] }
 0x42d   : > { %15812 = vst [vmem:[#allocation133_spill] sm:$0xff] %v10668_v17  ;;  %v10670_v53 = vpop.permute.xlu2 %3145 }
 0x431   : > { %3273 = vrot.lane.b32.xlu1 %v2696_v63, %s8291_s13 }
 0x432   : > { %v10673_v39 = vpop.f32.mrf.mxu0  ;;  %3283 = vrot.lane.b32.xlu0 %v2701_v22, %s8291_s13 }
 0x433   : > { %15813 = vst [vmem:[#allocation146_spill] sm:$0xff] %v10673_v39  ;;  %v10676_v36 = vpop.permute.xlu1 %3061  ;;  %3281 = vrot.lane.b32.xlu2 %v2700_v13, %s8291_s13 }
 0x434   : > { %15814 = vst [vmem:[#allocation151_spill] sm:$0xff] %v10676_v36  ;;  %v10679_v1 = vpop.permute.xlu0 %3071  ;;  %v2702_v36 = vld [vmem:[#allocation3 + $0x93] sm:$0xff] }
 0x435   : > { %15815 = vst [vmem:[#allocation165_spill] sm:$0xff] %v10679_v1  ;;  %v10681_v23 = vpop.permute.xlu2 %3151 }
 0x436   : > { %15816 = vst [vmem:[#allocation31_spill] sm:$0xff] %v10681_v23 }
 0x439   : > { %3279 = vrot.lane.b32.xlu1 %v2699_v44, %s8291_s13  ;;  %v10699_v44 = vpop.f32.mrf.mxu3 }
 0x43a   : > { %v10684_v11 = vpop.f32.mrf.mxu0  ;;  %3289 = vrot.lane.b32.xlu0 %v2704_v2, %s8291_s13 }
 0x43b   : > { %15817 = vst [vmem:[#allocation39_spill] sm:$0xff] %v10684_v11  ;;  %v10687_v63 = vpop.permute.xlu1 %3067  ;;  %3287 = vrot.lane.b32.xlu2 %v2703_v49, %s8291_s13 }
 0x43c   : > { %15818 = vst [vmem:[#allocation72_spill] sm:$0xff] %v10687_v63  ;;  %v10690_v22 = vpop.permute.xlu0 %3077  ;;  %v10752_v63 = vld [vmem:[#allocation3 + $0x113] sm:$0xff] }
 0x43d   : > { %15819 = vst [vmem:[#allocation91_spill] sm:$0xff] %v10690_v22  ;;  %v10692_v13 = vpop.permute.xlu2 %3157 }
 0x43e   : > { %15820 = vst [vmem:[#allocation93_spill] sm:$0xff] %v10692_v13  ;;  %v10830_v13 = vld [vmem:[#allocation3 + $0x123] sm:$0xff] }
 0x441   : > { %3285 = vrot.lane.b32.xlu1 %v2702_v36, %s8291_s13  ;;  %v10717_v36 = vld [vmem:[#allocation3 + $0xe3] sm:$0xff]  ;;  %v10721_v3 = vpop.f32.mrf.mxu3 }
 0x442   : > { %v10701_v8 = vpop.f32.mrf.mxu0  ;;  %3295 = vrot.lane.b32.xlu0 %v10694_v16, %s8291_s13 }
 0x443   : > { %15821 = vst [vmem:[#allocation110_spill] sm:$0xff] %v10701_v8  ;;  %v10705_v2 = vpop.permute.xlu1 %3073  ;;  %3293 = vrot.lane.b32.xlu2 %v10696_v57, %s8291_s13 }
 0x444   : > { %15822 = vst [vmem:[#allocation24_spill] sm:$0xff] %v10705_v2  ;;  %v10709_v49 = vpop.permute.xlu0 %3147  ;;  %v6054_v2 = vmul.f32 %v10400_v61, %v10400_v61 }
 0x445   : > { %15823 = vst [vmem:[#allocation119_spill] sm:$0xff] %v10709_v49  ;;  %v10711_v22 = vpop.permute.xlu2 %3163 }
 0x446   : > { %15824 = vst [vmem:[#allocation123_spill] sm:$0xff] %v10711_v22  ;;  %v6086_v37 = vsel %vm307_vm0, %v6054_v2, 0.0  ;;  %v6056_v22 = vmul.f32 %v10461_v26, %v10461_v26  ;;  %v6057_v2 = vmul.f32 %v10489_v54, %v10489_v54  ;;  %v6059_v54 = vmul.f32 %v10545_v31, %v10545_v31 }
 0x449   : > { %3291 = vrot.lane.b32.xlu1 %v10713_v48, %s8291_s13 }
 0x44a   : > { %v10723_v34 = vpop.f32.mrf.mxu0  ;;  %3301 = vrot.lane.b32.xlu0 %v10715_v15, %s8291_s13 }
 0x44b   : > { %15825 = vst [vmem:[#allocation136_spill] sm:$0xff] %v10723_v34  ;;  %v10729_v43 = vpop.permute.xlu1 %3079  ;;  %3299 = vrot.lane.b32.xlu2 %v10717_v36, %s8291_s13 }
 0x44c   : > { %15826 = vst [vmem:[#allocation138_spill] sm:$0xff] %v10729_v43  ;;  %v10733_v1 = vpop.permute.xlu0 %3153  ;;  %v5983_v43 = vsel %vm307_vm0, %v10372_v51, 0.0  ;;  %v5988_v51 = vsel %vm307_vm0, %v10461_v26, 0.0  ;;  %v6092_v26 = vsel %vm307_vm0, %v6057_v2, 0.0 }
 0x44d   : > { %15827 = vst [vmem:[#allocation157_spill] sm:$0xff] %v10733_v1  ;;  %v10741_v10 = vpop.permute.xlu2 %3169  ;;  %v5985_v61 = vadd.f32 %v5984_v5, %v5983_v43  ;;  %v6090_v43 = vsel %vm307_vm0, %v6056_v22, 0.0  ;;  %v6058_v5 = vmul.f32 %v10517_v52, %v10517_v52  ;;  %v5992_v22 = vsel %vm307_vm0, %v10517_v52, 0.0 }
 0x44e   : > { %15828 = vst [vmem:[#allocation170_spill] sm:$0xff] %v10741_v10  ;;  %v6085_v10 = vsel %vm307_vm0, %v6053_v55, 0.0 }
 0x44f   : > { %v6087_v12 = vadd.f32 %v6086_v37, %v6085_v10  ;;  %v5987_v35 = vadd.f32 %v5986_v19, %v5985_v61  ;;  %v10777_v61 = vpop.f32.mrf.mxu3 }
 0x451   : > { %3297 = vrot.lane.b32.xlu1 %v10743_v59, %s8291_s13  ;;  %v6089_v37 = vadd.f32 %v6088_v24, %v6087_v12  ;;  %v5989_v19 = vadd.f32 %v5988_v51, %v5987_v35  ;;  %v6094_v35 = vsel %vm307_vm0, %v6058_v5, 0.0  ;;  %v5994_v51 = vsel %vm307_vm0, %v10545_v31, 0.0  ;;  %v10795_v12 = vld [vmem:[#allocation3 + $0x13b] sm:$0xff] }
 0x452   : > { %v10764_v45 = vpop.f32.mrf.mxu0  ;;  %3307 = vrot.lane.b32.xlu0 %v10752_v63, %s8291_s13  ;;  %v6060_v24 = vmul.f32 %v10581_v4, %v10581_v4 }
 0x453   : > { %15829 = vst [vmem:[#allocation175_spill] sm:$0xff] %v10764_v45  ;;  %v10773_v55 = vpop.permute.xlu1 %3149  ;;  %3305 = vrot.lane.b32.xlu2 %v10754_v20, %s8291_s13  ;;  %v6091_v17 = vadd.f32 %v6090_v43, %v6089_v37  ;;  %v5991_v56 = vadd.f32 %v5990_v47, %v5989_v19  ;;  %v5996_v43 = vsel %vm307_vm0, %v10581_v4, 0.0  ;;  %v6061_v47 = vmul.f32 %v10606_v33, %v10606_v33 }
 0x454   : > { %15830 = vst [vmem:[#allocation16_spill] sm:$0xff] %v10773_v55  ;;  %v10779_v10 = vpop.permute.xlu0 %3159  ;;  %v11050_v55 = vld [vmem:[#allocation3 + $0xae] sm:$0xff] }
 0x455   : > { %15831 = vst [vmem:[#allocation52_spill] sm:$0xff] %v10779_v10  ;;  %v10786_v18 = vpop.permute.xlu2 %3175  ;;  %v6093_v2 = vadd.f32 %v6092_v26, %v6091_v17  ;;  %v5993_v52 = vadd.f32 %v5992_v22, %v5991_v56  ;;  %v10797_v10 = vld [vmem:[#allocation3 + $0x12b] sm:$0xff]  ;;  %v6098_v26 = vsel %vm307_vm0, %v6060_v24, 0.0  ;;  %v6062_v56 = vmul.f32 %v10618_v9, %v10618_v9 }
 0x456   : > { %15832 = vst [vmem:[#allocation80_spill] sm:$0xff] %v10786_v18  ;;  %v6096_v18 = vsel %vm307_vm0, %v6059_v54, 0.0  ;;  %v5998_v54 = vsel %vm307_vm0, %v10606_v33, 0.0  ;;  %v6000_v24 = vsel %vm307_vm0, %v10618_v9, 0.0 }
 0x457   : > { %v6095_v5 = vadd.f32 %v6094_v35, %v6093_v2  ;;  %v5995_v37 = vadd.f32 %v5994_v51, %v5993_v52  ;;  %v6100_v51 = vsel %vm307_vm0, %v6061_v47, 0.0  ;;  %v6063_v2 = vmul.f32 %v10629_v40, %v10629_v40  ;;  %v10828_v29 = vpop.f32.mrf.mxu3 }
 0x458   : > { %v6064_v47 = vmul.f32 %v10640_v60, %v10640_v60 }
 0x459   : > { %3303 = vrot.lane.b32.xlu1 %v10788_v58, %s8291_s13  ;;  %v6097_v22 = vadd.f32 %v6096_v18, %v6095_v5  ;;  %v5997_v52 = vadd.f32 %v5996_v43, %v5995_v37  ;;  %v6102_v18 = vsel %vm307_vm0, %v6062_v56, 0.0  ;;  %v6002_v43 = vsel %vm307_vm0, %v10629_v40, 0.0  ;;  %v10837_v5 = vld [vmem:[#allocation3 + $0x15b] sm:$0xff] }
 0x45a   : > { %v10806_v19 = vpop.f32.mrf.mxu0  ;;  %3313 = vrot.lane.b32.xlu0 %v10795_v12, %s8291_s13  ;;  %v6065_v56 = vmul.f32 %v10651_v62, %v10651_v62 }
 0x45b   : > { %15833 = vst [vmem:[#allocation85_spill] sm:$0xff] %v10806_v19  ;;  %v10815_v17 = vpop.permute.xlu1 %3155  ;;  %3311 = vrot.lane.b32.xlu2 %v10797_v10, %s8291_s13  ;;  %v6099_v4 = vadd.f32 %v6098_v26, %v6097_v22  ;;  %v5999_v33 = vadd.f32 %v5998_v54, %v5997_v52  ;;  %v6104_v26 = vsel %vm307_vm0, %v6063_v2, 0.0  ;;  %v6004_v54 = vsel %vm307_vm0, %v10640_v60, 0.0 }
 0x45c   : > { %15834 = vst [vmem:[#allocation98_spill] sm:$0xff] %v10815_v17  ;;  %v10819_v35 = vpop.permute.xlu0 %3165 }
 0x45d   : > { %15835 = vst [vmem:[#allocation112_spill] sm:$0xff] %v10819_v35  ;;  %v10826_v31 = vpop.permute.xlu2 %3181  ;;  %v6101_v37 = vadd.f32 %v6100_v51, %v6099_v4  ;;  %v6001_v9 = vadd.f32 %v6000_v24, %v5999_v33  ;;  %v10839_v35 = vld [vmem:[#allocation3 + $0x153] sm:$0xff]  ;;  %v6106_v4 = vsel %vm307_vm0, %v6064_v47, 0.0  ;;  %v6006_v33 = vsel %vm307_vm0, %v10651_v62, 0.0 }
 0x45e   : > { %15836 = vst [vmem:[#allocation114_spill] sm:$0xff] %v10826_v31  ;;  %v6066_v51 = vmul.f32 %v10662_v7, %v10662_v7  ;;  %v6008_v47 = vsel %vm307_vm0, %v10662_v7, 0.0 }
 0x45f   : > { %v6103_v22 = vadd.f32 %v6102_v18, %v6101_v37  ;;  %v6003_v52 = vadd.f32 %v6002_v43, %v6001_v9  ;;  %v6108_v43 = vsel %vm307_vm0, %v6065_v56, 0.0  ;;  %v6067_v37 = vmul.f32 %v10673_v39, %v10673_v39  ;;  %v10877_v56 = vld [vmem:[#allocation3 + $0x183] sm:$0xff] }
 0x460   : > { %v6110_v28 = vsel %vm307_vm0, %v6066_v51, 0.0  ;;  %v6069_v51 = vmul.f32 %v10701_v8, %v10701_v8 }
 0x461   : > { %3309 = vrot.lane.b32.xlu1 %v10830_v13, %s8291_s13  ;;  %v6105_v2 = vadd.f32 %v6104_v26, %v6103_v22  ;;  %v6005_v9 = vadd.f32 %v6004_v54, %v6003_v52  ;;  %v6010_v26 = vsel %vm307_vm0, %v10673_v39, 0.0  ;;  %v6068_v54 = vmul.f32 %v10684_v11, %v10684_v11  ;;  %v10879_v52 = vpop.f32.mrf.mxu3 }
 0x462   : > { %v10848_v40 = vpop.f32.mrf.mxu0  ;;  %3319 = vrot.lane.b32.xlu0 %v10837_v5, %s8291_s13 }
 0x463   : > { %15837 = vst [vmem:[#allocation55_spill] sm:$0xff] %v10848_v40  ;;  %v10857_v24 = vpop.permute.xlu1 %3161  ;;  %3317 = vrot.lane.b32.xlu2 %v10839_v35, %s8291_s13  ;;  %v6107_v60 = vadd.f32 %v6106_v4, %v6105_v2  ;;  %v6007_v31 = vadd.f32 %v6006_v33, %v6005_v9  ;;  %v6112_v4 = vsel %vm307_vm0, %v6067_v37, 0.0  ;;  %v6012_v33 = vsel %vm307_vm0, %v10684_v11, 0.0 }
 0x464   : > { %15838 = vst [vmem:[#allocation74_spill] sm:$0xff] %v10857_v24  ;;  %v10861_v18 = vpop.permute.xlu0 %3171  ;;  %v10870_v24 = vld [vmem:[#allocation3 + $0x143] sm:$0xff] }
 0x465   : > { %15839 = vst [vmem:[#allocation129_spill] sm:$0xff] %v10861_v18  ;;  %v10868_v62 = vpop.permute.xlu2 %3187  ;;  %v6109_v22 = vadd.f32 %v6108_v43, %v6107_v60  ;;  %v6009_v7 = vadd.f32 %v6008_v47, %v6007_v31  ;;  %v10881_v18 = vld [vmem:[#allocation3 + $0x173] sm:$0xff]  ;;  %v6114_v31 = vsel %vm307_vm0, %v6068_v54, 0.0  ;;  %v6014_v60 = vsel %vm307_vm0, %v10701_v8, 0.0 }
 0x466   : > { %15840 = vst [vmem:[#allocation144_spill] sm:$0xff] %v10868_v62  ;;  %v6070_v43 = vmul.f32 %v10723_v34, %v10723_v34  ;;  %v6016_v54 = vsel %vm307_vm0, %v10723_v34, 0.0  ;;  %v10921_v34 = vld [vmem:[#allocation3 + $0x19b] sm:$0xff] }
 0x467   : > { %v6111_v2 = vadd.f32 %v6110_v28, %v6109_v22  ;;  %v6011_v9 = vadd.f32 %v6010_v26, %v6009_v7  ;;  %v6116_v26 = vsel %vm307_vm0, %v6069_v51, 0.0  ;;  %v6071_v22 = vmul.f32 %v10764_v45, %v10764_v45  ;;  %v10919_v51 = vld [vmem:[#allocation3 + $0x1a3] sm:$0xff] }
 0x468   : > { %v6118_v38 = vsel %vm307_vm0, %v6070_v43, 0.0 }
 0x469   : > { %3315 = vrot.lane.b32.xlu1 %v10870_v24, %s8291_s13  ;;  %v6113_v28 = vadd.f32 %v6112_v4, %v6111_v2  ;;  %v6013_v7 = vadd.f32 %v6012_v33, %v6011_v9  ;;  %v6018_v4 = vsel %vm307_vm0, %v10764_v45, 0.0  ;;  %v6072_v33 = vmul.f32 %v10806_v19, %v10806_v19  ;;  %v10930_v43 = vpop.f32.mrf.mxu3 }
 0x46a   : > { %v10890_v39 = vpop.f32.mrf.mxu0  ;;  %3325 = vrot.lane.b32.xlu0 %v10877_v56, %s8291_s13 }
 0x46b   : > { %15841 = vst [vmem:[#allocation160_spill] sm:$0xff] %v10890_v39  ;;  %v10899_v47 = vpop.permute.xlu1 %3167  ;;  %3323 = vrot.lane.b32.xlu2 %v10881_v18, %s8291_s13  ;;  %v6115_v11 = vadd.f32 %v6114_v31, %v6113_v28  ;;  %v6015_v62 = vadd.f32 %v6014_v60, %v6013_v7  ;;  %v6020_v31 = vsel %vm307_vm0, %v10806_v19, 0.0  ;;  %v6073_v60 = vmul.f32 %v10848_v40, %v10848_v40 }
 0x46c   : > { %15842 = vst [vmem:[#allocation162_spill] sm:$0xff] %v10899_v47  ;;  %v10903_v37 = vpop.permute.xlu0 %3177  ;;  %v10912_v47 = vld [vmem:[#allocation3 + $0x16b] sm:$0xff] }
 0x46d   : > { %15843 = vst [vmem:[#allocation177_spill] sm:$0xff] %v10903_v37  ;;  %v10910_v8 = vpop.permute.xlu2 %3193  ;;  %v6117_v2 = vadd.f32 %v6116_v26, %v6115_v11  ;;  %v6017_v9 = vadd.f32 %v6016_v54, %v6015_v62  ;;  %v6120_v37 = vsel %vm307_vm0, %v6071_v22, 0.0  ;;  %v6122_v62 = vsel %vm307_vm0, %v6072_v33, 0.0 }
 0x46e   : > { %15844 = vst [vmem:[#allocation26_spill] sm:$0xff] %v10910_v8  ;;  %v6022_v11 = vsel %vm307_vm0, %v10848_v40, 0.0  ;;  %v6074_v26 = vmul.f32 %v10890_v39, %v10890_v39  ;;  %v6024_v33 = vsel %vm307_vm0, %v10890_v39, 0.0 }
 0x46f   : > { %v6119_v28 = vadd.f32 %v6118_v38, %v6117_v2  ;;  %v6019_v7 = vadd.f32 %v6018_v4, %v6017_v9  ;;  %v6124_v2 = vsel %vm307_vm0, %v6073_v60, 0.0 }
 0x470   : > { %v6126_v30 = vsel %vm307_vm0, %v6074_v26, 0.0  ;;  %v6077_v26 = vmul.f32 %v10699_v44, %v10699_v44 }
 0x471   : > { %3321 = vrot.lane.b32.xlu1 %v10912_v47, %s8291_s13  ;;  %v6121_v38 = vadd.f32 %v6120_v37, %v6119_v28  ;;  %v6021_v22 = vadd.f32 %v6020_v31, %v6019_v7  ;;  %v2728_v31 = vld [vmem:[#allocation3 + $0x4e] sm:$0xff]  ;;  %v10959_v7 = vld [vmem:[#allocation3 + $0x1bb] sm:$0xff] }
 0x472   : > { %v10932_v45 = vpop.f32.mrf.mxu0  ;;  %3331 = vrot.lane.b32.xlu0 %v10919_v51, %s8291_s13  ;;  %v6132_v1 = vsel %vm307_vm0, %v6077_v26, 0.0 }
 0x473   : > { %15845 = vst [vmem:[#allocation61_spill] sm:$0xff] %v10932_v45  ;;  %v10941_v54 = vpop.permute.xlu1 %3173  ;;  %3329 = vrot.lane.b32.xlu2 %v10921_v34, %s8291_s13  ;;  %v6075_v9 = vmul.f32 %v10932_v45, %v10932_v45  ;;  %v6123_v8 = vadd.f32 %v6122_v62, %v6121_v38  ;;  %v6023_v17 = vadd.f32 %v6022_v11, %v6021_v22  ;;  %v6026_v37 = vsel %vm307_vm0, %v10932_v45, 0.0 }
 0x474   : > { %15846 = vst [vmem:[#allocation66_spill] sm:$0xff] %v10941_v54  ;;  %v10945_v4 = vpop.permute.xlu0 %3183  ;;  %v10954_v54 = vld [vmem:[#allocation3 + $0x18b] sm:$0xff] }
 0x475   : > { %15847 = vst [vmem:[#allocation90_spill] sm:$0xff] %v10945_v4  ;;  %v10952_v19 = vpop.permute.xlu2 %3199  ;;  %v6125_v28 = vadd.f32 %v6124_v2, %v6123_v8  ;;  %v6025_v60 = vadd.f32 %v6024_v33, %v6023_v17  ;;  %v6128_v4 = vsel %vm307_vm0, %v6075_v9, 0.0  ;;  %v6030_v9 = vsel %vm307_vm0, %v10699_v44, 0.0 }
 0x476   : > { %15848 = vst [vmem:[#allocation102_spill] sm:$0xff] %v10952_v19 }
 0x477   : > { %v6127_v19 = vadd.f32 %v6126_v30, %v6125_v28  ;;  %v6027_v62 = vadd.f32 %v6026_v37, %v6025_v60  ;;  %v10977_v30 = vpop.f32.mrf.mxu3  ;;  %v6078_v37 = vmul.f32 %v10721_v3, %v10721_v3 }
 0x479   : > { %3327 = vrot.lane.b32.xlu1 %v10954_v54, %s8291_s13  ;;  %v6129_v22 = vadd.f32 %v6128_v4, %v6127_v19  ;;  %v6032_v19 = vsel %vm307_vm0, %v10721_v3, 0.0  ;;  %v6079_v4 = vmul.f32 %v10777_v61, %v10777_v61 }
 0x47a   : > { %v10964_v11 = vpop.f32.mrf.mxu0  ;;  %3401 = vrot.lane.b32.xlu0 %v2728_v31, %s8292_s14 }
 0x47b   : > { %15849 = vst [vmem:[#allocation107_spill] sm:$0xff] %v10964_v11  ;;  %v6028_v8 = vsel %vm307_vm0, %v10964_v11, 0.0  ;;  %v6076_v17 = vmul.f32 %v10964_v11, %v10964_v11  ;;  %v10973_v38 = vpop.permute.xlu1 %3179  ;;  %3335 = vrot.lane.b32.xlu2 %v10959_v7, %s8291_s13 }
 0x47c   : > { %15850 = vst [vmem:[#allocation30_spill] sm:$0xff] %v10973_v38  ;;  %v6029_v2 = vadd.f32 %v6028_v8, %v6027_v62  ;;  %v10979_v33 = vpop.permute.xlu0 %3189  ;;  %v2731_v62 = vld [vmem:[#allocation3 + $0x6e] sm:$0xff] }
 0x47d   : > { %15851 = vst [vmem:[#allocation54_spill] sm:$0xff] %v10979_v33  ;;  %v6130_v31 = vsel %vm307_vm0, %v6076_v17, 0.0  ;;  %v10986_v28 = vpop.permute.xlu2 %3205  ;;  %v6134_v17 = vsel %vm307_vm0, %v6078_v37, 0.0 }
 0x47e   : > { %15852 = vst [vmem:[#allocation59_spill] sm:$0xff] %v10986_v28  ;;  %v6031_v60 = vadd.f32 %v6030_v9, %v6029_v2  ;;  %v6131_v38 = vadd.f32 %v6130_v31, %v6129_v22  ;;  %v6034_v2 = vsel %vm307_vm0, %v10777_v61, 0.0  ;;  %v6080_v22 = vmul.f32 %v10828_v29, %v10828_v29 }
 0x47f   : > { %v6136_v31 = vsel %vm307_vm0, %v6079_v4, 0.0  ;;  %v6082_v4 = vmul.f32 %v10930_v43, %v10930_v43 }
 0x480   : > { %v6033_v8 = vadd.f32 %v6032_v19, %v6031_v60  ;;  %v6133_v33 = vadd.f32 %v6132_v1, %v6131_v38  ;;  %v6036_v1 = vsel %vm307_vm0, %v10828_v29, 0.0  ;;  %v6081_v38 = vmul.f32 %v10879_v52, %v10879_v52 }
 0x481   : > { %3333 = vrot.lane.b32.xlu1 %v10988_v32, %s8291_s13  ;;  %v6142_v23 = vsel %vm307_vm0, %v6082_v4, 0.0 }
 0x482   : > { %v6035_v26 = vadd.f32 %v6034_v2, %v6033_v8  ;;  %v6135_v9 = vadd.f32 %v6134_v17, %v6133_v33  ;;  %3407 = vrot.lane.b32.xlu0 %v2731_v62, %s8292_s14  ;;  %v6138_v33 = vsel %vm307_vm0, %v6080_v22, 0.0  ;;  %v6038_v62 = vsel %vm307_vm0, %v10879_v52, 0.0  ;;  %v11020_v17 = vpop.f32.mrf.mxu3 }
 0x483   : > { %v11008_v37 = vpop.permute.xlu1 %3185  ;;  %3405 = vrot.lane.b32.xlu2 %v2730_v6, %s8292_s14  ;;  %v6140_v6 = vsel %vm307_vm0, %v6081_v38, 0.0  ;;  %v6083_v22 = vmul.f32 %v10977_v30, %v10977_v30 }
 0x484   : > { %15853 = vst [vmem:[#allocation135_spill] sm:$0xff] %v11008_v37  ;;  %v6037_v60 = vadd.f32 %v6036_v1, %v6035_v26  ;;  %v6137_v19 = vadd.f32 %v6136_v31, %v6135_v9  ;;  %v11011_v28 = vpop.permute.xlu0 %3195  ;;  %v6040_v26 = vsel %vm307_vm0, %v10930_v43, 0.0  ;;  %v11027_v9 = vld [vmem:[#allocation3 + $0x96] sm:$0xff] }
 0x485   : > { %15854 = vst [vmem:[#allocation149_spill] sm:$0xff] %v11011_v28  ;;  %v11018_v8 = vpop.permute.xlu2 %3275  ;;  %v2733_v28 = vld [vmem:[#allocation3 + $0x86] sm:$0xff] }
 0x486   : > { %15855 = vst [vmem:[#allocation154_spill] sm:$0xff] %v11018_v8  ;;  %v6039_v2 = vadd.f32 %v6038_v62, %v6037_v60  ;;  %v6139_v37 = vadd.f32 %v6138_v33, %v6137_v19  ;;  %v6042_v60 = vsel %vm307_vm0, %v10977_v30, 0.0  ;;  %v6084_v19 = vmul.f32 %v11020_v17, %v11020_v17  ;;  %v11151_v8 = vld [vmem:[#allocation3 + $0x16e] sm:$0xff] }
 0x487   : > { %v6144_v62 = vsel %vm307_vm0, %v6083_v22, 0.0 }
 0x488   : > { %v6041_v31 = vadd.f32 %v6040_v26, %v6039_v2  ;;  %v6141_v1 = vadd.f32 %v6140_v6, %v6139_v37  ;;  %v6044_v37 = vsel %vm307_vm0, %v11020_v17, 0.0 }
 0x489   : > { %3403 = vrot.lane.b32.xlu1 %v2729_v21, %s8292_s14  ;;  %v6146_v21 = vsel %vm307_vm0, %v6084_v19, 0.0 }
 0x48a   : > { %v6043_v38 = vadd.f32 %v6042_v60, %v6041_v31  ;;  %v6143_v33 = vadd.f32 %v6142_v23, %v6141_v1  ;;  %3413 = vrot.lane.b32.xlu0 %v11027_v9, %s8292_s14  ;;  %v2732_v60 = vld [vmem:[#allocation3 + $0x7e] sm:$0xff] }
 0x48b   : > { %v11040_v2 = vpop.permute.xlu1 %3191  ;;  %3411 = vrot.lane.b32.xlu2 %v2733_v28, %s8292_s14 }
 0x48c   : > { %15856 = vst [vmem:[#allocation168_spill] sm:$0xff] %v11040_v2  ;;  %v6045_v4 = vadd.f32 %v6044_v37, %v6043_v38  ;;  %v6145_v6 = vadd.f32 %v6144_v62, %v6143_v33  ;;  %v11043_v26 = vpop.permute.xlu0 %3201  ;;  %v11067_v2 = vld [vmem:[#allocation3 + $0xce] sm:$0xff] }
 0x48d   : > { %15857 = vst [vmem:[#allocation37_spill] sm:$0xff] %v11043_v26  ;;  %v11046_v31 = vpop.permute.xlu2 %3281 }
 0x48e   : > { %15858 = vst [vmem:[#allocation77_spill] sm:$0xff] %v11046_v31  ;;  %v6046_v23 = vrot.slane %v6045_v4, 4  ;;  %v6147_v1 = vadd.f32 %v6146_v21, %v6145_v6  ;;  %v11129_v31 = vld [vmem:[#allocation3 + $0x10e] sm:$0xff] }
 0x490   : > { %v6047_v22 = vadd.f32 %v6046_v23, %v6045_v4  ;;  %v6148_v14 = vrot.slane %v6147_v1, 4  ;;  %v11063_v23 = vld [vmem:[#allocation3 + $0x9e] sm:$0xff] }
 0x491   : > { %3409 = vrot.lane.b32.xlu1 %v2732_v60, %s8292_s14  ;;  %v11065_v60 = vld [vmem:[#allocation3 + $0xde] sm:$0xff] }
 0x492   : > { %v6048_v28 = vrot.slane %v6047_v22, 2  ;;  %v6149_v38 = vadd.f32 %v6148_v14, %v6147_v1  ;;  %3419 = vrot.lane.b32.xlu0 %v11048_v42, %s8292_s14 }
 0x493   : > { %v11055_v33 = vpop.permute.xlu1 %3197  ;;  %3417 = vrot.lane.b32.xlu2 %v11050_v55, %s8292_s14 }
 0x494   : > { %15859 = vst [vmem:[#allocation94_spill] sm:$0xff] %v11055_v33  ;;  %v6049_v19 = vadd.f32 %v6048_v28, %v6047_v22  ;;  %v6150_v62 = vrot.slane %v6149_v38, 2  ;;  %v11059_v37 = vpop.permute.xlu0 %3207  ;;  %v11091_v33 = vld [vmem:[#allocation3 + $0xf6] sm:$0xff] }
 0x495   : > { %15860 = vst [vmem:[#allocation29_spill] sm:$0xff] %v11059_v37  ;;  %v11061_v4 = vpop.permute.xlu2 %3287  ;;  %v11089_v37 = vld [vmem:[#allocation3 + $0xfe] sm:$0xff] }
 0x496   : > { %15861 = vst [vmem:[#allocation125_spill] sm:$0xff] %v11061_v4  ;;  %v6050_v6 = vrot.slane %v6049_v19, 1  ;;  %v6151_v21 = vadd.f32 %v6150_v62, %v6149_v38  ;;  %v11115_v4 = vld [vmem:[#allocation3 + $0x116] sm:$0xff] }
 0x498   : > { %v6051_v14 = vadd.f32 %v6050_v6, %v6049_v19  ;;  %v6152_v1 = vrot.slane %v6151_v21, 1 }
 0x499   : > { %3415 = vrot.lane.b32.xlu1 %v11063_v23, %s8292_s14 }
 0x49a   : > { %v11071_v26 = vmul.f32 0.00390625, %v6051_v14  ;;  %v6153_v22 = vadd.f32 %v6152_v1, %v6151_v21  ;;  %3425 = vrot.lane.b32.xlu0 %v11065_v60, %s8292_s14  ;;  %v11087_v1 = vld [vmem:[#allocation3 + $0xc6] sm:$0xff] }
 0x49b   : > { %v11075_v28 = vpop.permute.xlu1 %3203  ;;  %3423 = vrot.lane.b32.xlu2 %v11067_v2, %s8292_s14 }
 0x49c   : > { %15862 = vst [vmem:[#allocation140_spill] sm:$0xff] %v11071_v26  ;;  %v6154_v38 = vmul.f32 0.00390625, %v6153_v22  ;;  %v6155_v19 = vmul.f32 %v11071_v26, %v11071_v26  ;;  %v11083_v6 = vpop.permute.xlu0 %3277  ;;  %v11113_v22 = vld [vmem:[#allocation3 + $0x126] sm:$0xff]  ;;  %v6183_v49 = vsub.f32 %v10777_v61, %v11071_v26 }
 0x49d   : > { %15863 = vst [vmem:[#allocation173_spill] sm:$0xff] %v11075_v28  ;;  %v11085_v14 = vpop.permute.xlu2 %3293 }
 0x49e   : > { %15864 = vst [vmem:[#allocation19_spill] sm:$0xff] %v11083_v6  ;;  %v6156_v21 = vsub.f32 %v6154_v38, %v6155_v19 }
 0x49f   : > { %15865 = vst [vmem:[#allocation83_spill] sm:$0xff] %v11085_v14  ;;  %v11111_v14 = vld [vmem:[#allocation3 + $0xe6] sm:$0xff] }
 0x4a0   : > { %v6189_v28 = vadd.f32 1e-05, %v6156_v21 }
 0x4a1   : > { %3421 = vrot.lane.b32.xlu1 %v11087_v1, %s8292_s14 }
 0x4a2   : > { %8100 = vrsqrt.f32 %v6189_v28  ;;  %3431 = vrot.lane.b32.xlu0 %v11089_v37, %s8292_s14  ;;  %vm6196_vm10 = vweird.f32 %v6189_v28 }
 0x4a3   : > { %v11103_v62 = vpop.permute.xlu1 %3273  ;;  %3429 = vrot.lane.b32.xlu2 %v11091_v33, %s8292_s14 }
 0x4a4   : > { %15866 = vst [vmem:[#allocation101_spill] sm:$0xff] %v11103_v62  ;;  %v11107_v21 = vpop.permute.xlu0 %3283 }
 0x4a5   : > { %15867 = vst [vmem:[#allocation116_spill] sm:$0xff] %v11107_v21  ;;  %v11109_v11 = vpop.permute.xlu2 %3299 }
 0x4a6   : > { %15868 = vst [vmem:[#allocation79_spill] sm:$0xff] %v11109_v11 }
 0x4a8   : > { %v8101_v40 = vpop.eup %8100 }
 0x4a9   : > { %v6191_v38 = vmul.f32 %v8101_v40, %v6189_v28  ;;  %3427 = vrot.lane.b32.xlu1 %v11111_v14, %s8292_s14  ;;  %vm6197_vm9 = vweird.f32 %v8101_v40  ;;  %v6184_v28 = vsub.f32 %v10828_v29, %v11071_v26 }
 0x4aa   : > { %3437 = vrot.lane.b32.xlu0 %v11113_v22, %s8292_s14  ;;  %vm6198_vm12 = vmor %vm6196_vm10, %vm6197_vm9 }
 0x4ab   : > { %v6192_v19 = vmul.f32 %v8101_v40, %v6191_v38  ;;  %v11121_v45 = vpop.permute.xlu1 %3279  ;;  %3435 = vrot.lane.b32.xlu2 %v11115_v4, %s8292_s14 }
 0x4ac   : > { %15869 = vst [vmem:[#allocation147_spill] sm:$0xff] %v11121_v45  ;;  %v11125_v39 = vpop.permute.xlu0 %3289 }
 0x4ad   : > { %15870 = vst [vmem:[#allocation164_spill] sm:$0xff] %v11125_v39  ;;  %v6193_v11 = vmul.f32 0.5, %v6192_v19  ;;  %v11127_v21 = vpop.permute.xlu2 %3305 }
 0x4ae   : > { %15871 = vst [vmem:[#allocation32_spill] sm:$0xff] %v11127_v21  ;;  %v11147_v21 = vld [vmem:[#allocation3 + $0x12e] sm:$0xff] }
 0x4af   : > { %v6194_v6 = vsub.f32 1.5, %v6193_v11 }
 0x4b1   : > { %3433 = vrot.lane.b32.xlu1 %v11129_v31, %s8292_s14  ;;  %v6195_v38 = vmul.f32 %v8101_v40, %v6194_v6  ;;  %v6181_v6 = vsub.f32 %v10699_v44, %v11071_v26  ;;  %v6187_v44 = vsub.f32 %v10977_v30, %v11071_v26 }
 0x4b2   : > { %3443 = vrot.lane.b32.xlu0 %v11131_v41, %s8292_s14 }
 0x4b3   : > { %v11139_v45 = vpop.permute.xlu1 %3285  ;;  %3441 = vrot.lane.b32.xlu2 %v11133_v0, %s8292_s14  ;;  %v11149_v39 = vsel %vm6198_vm12, %v8101_v40, %v6195_v38  ;;  %v6185_v40 = vsub.f32 %v10879_v52, %v11071_v26  ;;  %v6186_v38 = vsub.f32 %v10930_v43, %v11071_v26 }
 0x4b4   : > { %15872 = vst [vmem:[#allocation69_spill] sm:$0xff] %v11139_v45  ;;  %v11143_v19 = vpop.permute.xlu0 %3295  ;;  %v6182_v45 = vsub.f32 %v10721_v3, %v11071_v26  ;;  %v6188_v3 = vsub.f32 %v11020_v17, %v11071_v26  ;;  %v11174_v61 = vmul.f32 %v11149_v39, %v6181_v6  ;;  %v11180_v52 = vmul.f32 %v11149_v39, %v6183_v49  ;;  %v11243_v26 = vld [vmem:[#allocation3 + $0x19e] sm:$0xff] }
 0x4b5   : > { %15873 = vst [vmem:[#allocation105_spill] sm:$0xff] %v11143_v19  ;;  %v11145_v11 = vpop.permute.xlu2 %3311  ;;  %v11183_v43 = vmul.f32 %v11149_v39, %v6184_v28  ;;  %v11188_v30 = vmul.f32 %v11149_v39, %v6185_v40  ;;  %v11191_v17 = vmul.f32 %v11149_v39, %v6186_v38  ;;  %v11194_v6 = vmul.f32 %v11149_v39, %v6187_v44  ;;  %v11207_v40 = vld [vmem:[#allocation3 + $0x156] sm:$0xff]  ;;  %v11211_v38 = vld [vmem:[#allocation3 + $0x186] sm:$0xff] }
 0x4b6   : > { %15874 = vst [vmem:[#allocation36_spill] sm:$0xff] %v11145_v11  ;;  %v11161_v11 = vld [vmem:[#allocation3 + $0x15e] sm:$0xff]  ;;  %v11177_v29 = vmul.f32 %v11149_v39, %v6182_v45  ;;  %v11197_v45 = vmul.f32 %v11149_v39, %v6188_v3  ;;  %v2764_v19 = vld [vmem:[#allocation3 + $0xb0] sm:$0xff] }
 0x4b7   : > { %15875 = vst [vmem:[#allocation122_spill] sm:$0xff] %v11149_v39 }
 0x4b8   : > { %15876 = vst [vmem:[#allocation152_spill] sm:$0xff] %v11174_v61 }
 0x4b9   : > { %3439 = vrot.lane.b32.xlu1 %v11147_v21, %s8292_s14  ;;  %15877 = vst [vmem:[#allocation171_spill] sm:$0xff] %v11177_v29 }
 0x4ba   : > { %15878 = vst [vmem:[#allocation41_spill] sm:$0xff] %v11180_v52  ;;  %3449 = vrot.lane.b32.xlu0 %v11151_v8, %s8292_s14  ;;  %v11229_v52 = vld [vmem:[#allocation3 + $0x1a6] sm:$0xff] }
 0x4bb   : > { %15879 = vst [vmem:[#allocation81_spill] sm:$0xff] %v11183_v43  ;;  %v11199_v49 = vpop.permute.xlu1 %3291  ;;  %3447 = vrot.lane.b32.xlu2 %v11161_v11, %s8292_s14 }
 0x4bc   : > { %15880 = vst [vmem:[#allocation96_spill] sm:$0xff] %v11188_v30  ;;  %v11203_v28 = vpop.permute.xlu0 %3301  ;;  %v11209_v30 = vld [vmem:[#allocation3 + $0x18e] sm:$0xff] }
 0x4bd   : > { %15881 = vst [vmem:[#allocation35_spill] sm:$0xff] %v11191_v17  ;;  %v11205_v43 = vpop.permute.xlu2 %3317  ;;  %v11227_v17 = vld [vmem:[#allocation3 + $0x1b6] sm:$0xff] }
 0x4be   : > { %15882 = vst [vmem:[#allocation126_spill] sm:$0xff] %v11194_v6  ;;  %v11225_v6 = vld [vmem:[#allocation3 + $0x176] sm:$0xff] }
 0x4bf   : > { %15883 = vst [vmem:[#allocation142_spill] sm:$0xff] %v11197_v45 }
 0x4c0   : > { %15884 = vst [vmem:[#allocation10_spill] sm:$0xff] %v11199_v49 }
 0x4c1   : > { %15885 = vst [vmem:[#allocation23_spill] sm:$0xff] %v11203_v28  ;;  %3445 = vrot.lane.b32.xlu1 %v11207_v40, %s8292_s14 }
 0x4c2   : > { %15886 = vst [vmem:[#allocation86_spill] sm:$0xff] %v11205_v43  ;;  %3455 = vrot.lane.b32.xlu0 %v11209_v30, %s8292_s14  ;;  %v2762_v43 = vld [vmem:[#allocation3 + $0x98] sm:$0xff] }
 0x4c3   : > { %v11217_v44 = vpop.permute.xlu1 %3297  ;;  %3453 = vrot.lane.b32.xlu2 %v11211_v38, %s8292_s14 }
 0x4c4   : > { %15887 = vst [vmem:[#allocation103_spill] sm:$0xff] %v11217_v44  ;;  %v11221_v3 = vpop.permute.xlu0 %3307 }
 0x4c5   : > { %15888 = vst [vmem:[#allocation117_spill] sm:$0xff] %v11221_v3  ;;  %v11223_v45 = vpop.permute.xlu2 %3323  ;;  %v2761_v3 = vld [vmem:[#allocation3 + $0x90] sm:$0xff] }
 0x4c6   : > { %15889 = vst [vmem:[#allocation130_spill] sm:$0xff] %v11223_v45 }
 0x4c9   : > { %3451 = vrot.lane.b32.xlu1 %v11225_v6, %s8292_s14 }
 0x4ca   : > { %3461 = vrot.lane.b32.xlu0 %v11227_v17, %s8292_s14 }
 0x4cb   : > { %v11235_v29 = vpop.permute.xlu1 %3303  ;;  %3459 = vrot.lane.b32.xlu2 %v11229_v52, %s8292_s14 }
 0x4cc   : > { %15890 = vst [vmem:[#allocation150_spill] sm:$0xff] %v11235_v29  ;;  %v11239_v61 = vpop.permute.xlu0 %3313 }
 0x4cd   : > { %15891 = vst [vmem:[#allocation166_spill] sm:$0xff] %v11239_v61  ;;  %v11241_v39 = vpop.permute.xlu2 %3329  ;;  %v11255_v61 = vld [vmem:[#allocation3 + $0x1be] sm:$0xff] }
 0x4ce   : > { %15892 = vst [vmem:[#allocation38_spill] sm:$0xff] %v11241_v39  ;;  %v2765_v39 = vld [vmem:[#allocation3 + $0xc0] sm:$0xff] }
 0x4d1   : > { %3457 = vrot.lane.b32.xlu1 %v11243_v26, %s8292_s14 }
 0x4d2   : > { %3531 = vrot.lane.b32.xlu0 %v2762_v43, %s8293_s15 }
 0x4d3   : > { %v11248_v28 = vpop.permute.xlu1 %3309  ;;  %3529 = vrot.lane.b32.xlu2 %v2761_v3, %s8293_s15 }
 0x4d4   : > { %15893 = vst [vmem:[#allocation73_spill] sm:$0xff] %v11248_v28  ;;  %v11251_v29 = vpop.permute.xlu0 %3319  ;;  %v2768_v28 = vld [vmem:[#allocation3 + $0xe0] sm:$0xff] }
 0x4d5   : > { %15894 = vst [vmem:[#allocation108_spill] sm:$0xff] %v11251_v29  ;;  %v11253_v44 = vpop.permute.xlu2 %3335  ;;  %v2763_v29 = vld [vmem:[#allocation3 + $0xa8] sm:$0xff] }
 0x4d6   : > { %15895 = vst [vmem:[#allocation118_spill] sm:$0xff] %v11253_v44  ;;  %v2767_v44 = vld [vmem:[#allocation3 + $0xd8] sm:$0xff] }
 0x4d9   : > { %3463 = vrot.lane.b32.xlu1 %v11255_v61, %s8292_s14 }
 0x4da   : > { %3537 = vrot.lane.b32.xlu0 %v2765_v39, %s8293_s15 }
 0x4db   : > { %v11260_v45 = vpop.permute.xlu1 %3315  ;;  %3535 = vrot.lane.b32.xlu2 %v2764_v19, %s8293_s15  ;;  %v2766_v19 = vld [vmem:[#allocation3 + $0xc8] sm:$0xff] }
 0x4dc   : > { %15896 = vst [vmem:[#allocation124_spill] sm:$0xff] %v11260_v45  ;;  %v11263_v43 = vpop.permute.xlu0 %3325 }
 0x4dd   : > { %15897 = vst [vmem:[#allocation155_spill] sm:$0xff] %v11263_v43  ;;  %v11265_v3 = vpop.permute.xlu2 %3405  ;;  %v2770_v43 = vld [vmem:[#allocation3 + $0xf8] sm:$0xff] }
 0x4de   : > { %15898 = vst [vmem:[#allocation174_spill] sm:$0xff] %v11265_v3 }
 0x4e1   : > { %3533 = vrot.lane.b32.xlu1 %v2763_v29, %s8293_s15 }
 0x4e2   : > { %3543 = vrot.lane.b32.xlu0 %v2768_v28, %s8293_s15 }
 0x4e3   : > { %v11269_v49 = vpop.permute.xlu1 %3321  ;;  %3541 = vrot.lane.b32.xlu2 %v2767_v44, %s8293_s15  ;;  %v2769_v44 = vld [vmem:[#allocation3 + $0xf0] sm:$0xff] }
 0x4e4   : > { %15899 = vst [vmem:[#allocation46_spill] sm:$0xff] %v11269_v49  ;;  %v11272_v39 = vpop.permute.xlu0 %3331  ;;  %v2774_v49 = vld [vmem:[#allocation3 + $0x128] sm:$0xff] }
 0x4e5   : > { %15900 = vst [vmem:[#allocation84_spill] sm:$0xff] %v11272_v39  ;;  %v11274_v45 = vpop.permute.xlu2 %3411  ;;  %v2773_v39 = vld [vmem:[#allocation3 + $0x120] sm:$0xff] }
 0x4e6   : > { %15901 = vst [vmem:[#allocation99_spill] sm:$0xff] %v11274_v45 }
 0x4e9   : > { %3539 = vrot.lane.b32.xlu1 %v2766_v19, %s8293_s15 }
 0x4ea   : > { %3549 = vrot.lane.b32.xlu0 %v2771_v46, %s8293_s15 }
 0x4eb   : > { %v11278_v3 = vpop.permute.xlu1 %3327  ;;  %3547 = vrot.lane.b32.xlu2 %v2770_v43, %s8293_s15  ;;  %v2772_v43 = vld [vmem:[#allocation3 + $0x110] sm:$0xff] }
 0x4ec   : > { %15902 = vst [vmem:[#allocation45_spill] sm:$0xff] %v11278_v3  ;;  %v11281_v29 = vpop.permute.xlu0 %3401  ;;  %v2777_v3 = vld [vmem:[#allocation3 + $0x150] sm:$0xff] }
 0x4ed   : > { %v11283_v28 = vpop.permute.xlu2 %3417 }
 0x4ee   : > { %15903 = vst [vmem:[#allocation128_spill] sm:$0xff] %v11283_v28 }
 0x4f1   : > { %3545 = vrot.lane.b32.xlu1 %v2769_v44, %s8293_s15 }
 0x4f2   : > { %3555 = vrot.lane.b32.xlu0 %v2774_v49, %s8293_s15 }
 0x4f3   : > { %v11287_v45 = vpop.permute.xlu1 %3333  ;;  %3553 = vrot.lane.b32.xlu2 %v2773_v39, %s8293_s15  ;;  %v2775_v39 = vld [vmem:[#allocation3 + $0x138] sm:$0xff] }
 0x4f4   : > { %15904 = vst [vmem:[#allocation145_spill] sm:$0xff] %v11287_v45  ;;  %v11290_v46 = vpop.permute.xlu0 %3407  ;;  %v2780_v45 = vld [vmem:[#allocation3 + $0x170] sm:$0xff] }
 0x4f5   : > { %15905 = vst [vmem:[#allocation43_spill] sm:$0xff] %v11290_v46  ;;  %v11292_v19 = vpop.permute.xlu2 %3423  ;;  %v2779_v46 = vld [vmem:[#allocation3 + $0x168] sm:$0xff] }
 0x4f6   : > { %15906 = vst [vmem:[#allocation27_spill] sm:$0xff] %v11292_v19 }
 0x4f9   : > { %3551 = vrot.lane.b32.xlu1 %v2772_v43, %s8293_s15 }
 0x4fa   : > { %3561 = vrot.lane.b32.xlu0 %v2777_v3, %s8293_s15 }
 0x4fb   : > { %v11296_v28 = vpop.permute.xlu1 %3403  ;;  %3559 = vrot.lane.b32.xlu2 %v2776_v50, %s8293_s15  ;;  %v2778_v50 = vld [vmem:[#allocation3 + $0x158] sm:$0xff] }
 0x4fc   : > { %15907 = vst [vmem:[#allocation87_spill] sm:$0xff] %v11296_v28  ;;  %v11299_v49 = vpop.permute.xlu0 %3413  ;;  %v2783_v28 = vld [vmem:[#allocation3 + $0x198] sm:$0xff] }
 0x4fd   : > { %15908 = vst [vmem:[#allocation106_spill] sm:$0xff] %v11299_v49  ;;  %v11301_v44 = vpop.permute.xlu2 %3429  ;;  %v2782_v49 = vld [vmem:[#allocation3 + $0x188] sm:$0xff] }
 0x4fe   : > { %15909 = vst [vmem:[#allocation34_spill] sm:$0xff] %v11301_v44 }
 0x501   : > { %3557 = vrot.lane.b32.xlu1 %v2775_v39, %s8293_s15 }
 0x502   : > { %3567 = vrot.lane.b32.xlu0 %v2780_v45, %s8293_s15 }
 0x503   : > { %v11305_v19 = vpop.permute.xlu1 %3409  ;;  %3565 = vrot.lane.b32.xlu2 %v2779_v46, %s8293_s15  ;;  %v2781_v46 = vld [vmem:[#allocation3 + $0x180] sm:$0xff] }
 0x504   : > { %15910 = vst [vmem:[#allocation132_spill] sm:$0xff] %v11305_v19  ;;  %v11308_v3 = vpop.permute.xlu0 %3419  ;;  %v2786_v19 = vld [vmem:[#allocation3 + $0x1b8] sm:$0xff] }
 0x505   : > { %15911 = vst [vmem:[#allocation153_spill] sm:$0xff] %v11308_v3  ;;  %v11310_v43 = vpop.permute.xlu2 %3435  ;;  %v2785_v3 = vld [vmem:[#allocation3 + $0x1b0] sm:$0xff] }
 0x506   : > { %15912 = vst [vmem:[#allocation169_spill] sm:$0xff] %v11310_v43 }
 0x509   : > { %3563 = vrot.lane.b32.xlu1 %v2778_v50, %s8293_s15 }
 0x50a   : > { %3573 = vrot.lane.b32.xlu0 %v2783_v28, %s8293_s15 }
 0x50b   : > { %v11314_v44 = vpop.permute.xlu1 %3415  ;;  %3571 = vrot.lane.b32.xlu2 %v2782_v49, %s8293_s15  ;;  %v2784_v49 = vld [vmem:[#allocation3 + $0x1a0] sm:$0xff] }
 0x50c   : > { %15913 = vst [vmem:[#allocation178_spill] sm:$0xff] %v11314_v44  ;;  %v11317_v45 = vpop.permute.xlu0 %3425  ;;  %v2789_v44 = vld [vmem:[#allocation3 + $0x1e0] sm:$0xff] }
 0x50d   : > { %15914 = vst [vmem:[#allocation179_spill] sm:$0xff] %v11317_v45  ;;  %v11319_v39 = vpop.permute.xlu2 %3441  ;;  %v2788_v45 = vld [vmem:[#allocation3 + $0x1d0] sm:$0xff] }
 0x50e   : > { %15915 = vst [vmem:[#allocation180_spill] sm:$0xff] %v11319_v39 }
 0x511   : > { %3569 = vrot.lane.b32.xlu1 %v2781_v46, %s8293_s15 }
 0x512   : > { %3579 = vrot.lane.b32.xlu0 %v2786_v19, %s8293_s15 }
 0x513   : > { %v11323_v43 = vpop.permute.xlu1 %3421  ;;  %3577 = vrot.lane.b32.xlu2 %v2785_v3, %s8293_s15  ;;  %v2787_v3 = vld [vmem:[#allocation3 + $0x1c8] sm:$0xff] }
 0x514   : > { %15916 = vst [vmem:[#allocation181_spill] sm:$0xff] %v11323_v43  ;;  %v11326_v28 = vpop.permute.xlu0 %3431  ;;  %v2792_v43 = vld [vmem:[#allocation3 + $0x200] sm:$0xff] }
 0x515   : > { %15917 = vst [vmem:[#allocation182_spill] sm:$0xff] %v11326_v28  ;;  %v11328_v50 = vpop.permute.xlu2 %3447  ;;  %v2791_v28 = vld [vmem:[#allocation3 + $0x1f8] sm:$0xff] }
 0x516   : > { %15918 = vst [vmem:[#allocation183_spill] sm:$0xff] %v11328_v50 }
 0x519   : > { %3575 = vrot.lane.b32.xlu1 %v2784_v49, %s8293_s15 }
 0x51a   : > { %3585 = vrot.lane.b32.xlu0 %v2789_v44, %s8293_s15 }
 0x51b   : > { %v11332_v39 = vpop.permute.xlu1 %3427  ;;  %3583 = vrot.lane.b32.xlu2 %v2788_v45, %s8293_s15  ;;  %v2790_v45 = vld [vmem:[#allocation3 + $0x1e8] sm:$0xff] }
 0x51c   : > { %15919 = vst [vmem:[#allocation184_spill] sm:$0xff] %v11332_v39  ;;  %v11335_v19 = vpop.permute.xlu0 %3437  ;;  %v11348_v39 = vld [vmem:[#allocation3 + $0xab] sm:$0xff] }
 0x51d   : > { %15920 = vst [vmem:[#allocation185_spill] sm:$0xff] %v11335_v19  ;;  %v11337_v46 = vpop.permute.xlu2 %3453  ;;  %v11350_v19 = vld [vmem:[#allocation3 + $0x9b] sm:$0xff] }
 0x521   : > { %3581 = vrot.lane.b32.xlu1 %v2787_v3, %s8293_s15 }
 0x522   : > { %3591 = vrot.lane.b32.xlu0 %v2792_v43, %s8293_s15 }
 0x523   : > { %v11341_v50 = vpop.permute.xlu1 %3433  ;;  %3589 = vrot.lane.b32.xlu2 %v2791_v28, %s8293_s15 }
 0x524   : > { %15921 = vst [vmem:[#allocation186_spill] sm:$0xff] %v11341_v50  ;;  %v11344_v44 = vpop.permute.xlu0 %3443 }
 0x525   : > { %15922 = vst [vmem:[#allocation187_spill] sm:$0xff] %v11344_v44  ;;  %v11346_v49 = vpop.permute.xlu2 %3459  ;;  %v11363_v44 = vld [vmem:[#allocation3 + $0x93] sm:$0xff] }
 0x526   : > { %15923 = vst [vmem:[#allocation188_spill] sm:$0xff] %v11346_v49 }
 0x529   : > { %3587 = vrot.lane.b32.xlu1 %v2790_v45, %s8293_s15 }
 0x52a   : > { %3661 = vrot.lane.b32.xlu0 %v11348_v39, %s15924_s6 }
 0x52b   : > { %v11355_v3 = vpop.permute.xlu1 %3439  ;;  %3659 = vrot.lane.b32.xlu2 %v11350_v19, %s15924_s6 }
 0x52c   : > { %15925 = vst [vmem:[#allocation189_spill] sm:$0xff] %v11355_v3  ;;  %v11359_v43 = vpop.permute.xlu0 %3449 }
 0x52d   : > { %v11361_v28 = vpop.permute.xlu2 %3529 }
 0x531   : > { %3657 = vrot.lane.b32.xlu1 %v11363_v44, %s15924_s6 }
 0x532   : > { %3667 = vrot.lane.b32.xlu0 %v10694_v16, %s15924_s6 }
 0x533   : > { %v11369_v45 = vpop.permute.xlu1 %3445  ;;  %3665 = vrot.lane.b32.xlu2 %v10696_v57, %s15924_s6 }
 0x534   : > { %15926 = vst [vmem:[#allocation190_spill] sm:$0xff] %v11369_v45  ;;  %v11373_v3 = vpop.permute.xlu0 %3455 }
 0x535   : > { %v11375_v50 = vpop.permute.xlu2 %3535 }
 0x539   : > { %3663 = vrot.lane.b32.xlu1 %v10713_v48, %s15924_s6 }
 0x53a   : > { %3673 = vrot.lane.b32.xlu0 %v10715_v15, %s15924_s6 }
 0x53b   : > { %v11381_v49 = vpop.permute.xlu1 %3451  ;;  %3671 = vrot.lane.b32.xlu2 %v10717_v36, %s15924_s6 }
 0x53c   : > { %v11385_v16 = vpop.permute.xlu0 %3461 }
 0x53d   : > { %v11387_v45 = vpop.permute.xlu2 %3541 }
 0x541   : > { %3669 = vrot.lane.b32.xlu1 %v10743_v59, %s15924_s6 }
 0x542   : > { %3679 = vrot.lane.b32.xlu0 %v10752_v63, %s15924_s6 }
 0x543   : > { %v11393_v57 = vpop.permute.xlu1 %3457  ;;  %3677 = vrot.lane.b32.xlu2 %v10754_v20, %s15924_s6 }
 0x544   : > { %v11397_v15 = vpop.permute.xlu0 %3531 }
 0x545   : > { %v11399_v48 = vpop.permute.xlu2 %3547 }
 0x549   : > { %3675 = vrot.lane.b32.xlu1 %v10788_v58, %s15924_s6 }
 0x54a   : > { %3685 = vrot.lane.b32.xlu0 %v10795_v12, %s15924_s6 }
 0x54b   : > { %v11405_v36 = vpop.permute.xlu1 %3463  ;;  %3683 = vrot.lane.b32.xlu2 %v10797_v10, %s15924_s6 }
 0x54c   : > { %15927 = vst [vmem:[#allocation191_spill] sm:$0xff] %v11405_v36  ;;  %v11409_v59 = vpop.permute.xlu0 %3537  ;;  %v2824_v36 = vld [vmem:[#allocation3 + $0x203] sm:$0xff] }
 0x54d   : > { %v11411_v63 = vpop.permute.xlu2 %3553 }
 0x551   : > { %3681 = vrot.lane.b32.xlu1 %v10830_v13, %s15924_s6 }
 0x552   : > { %3691 = vrot.lane.b32.xlu0 %v10837_v5, %s15924_s6 }
 0x553   : > { %v11417_v20 = vpop.permute.xlu1 %3533  ;;  %3689 = vrot.lane.b32.xlu2 %v10839_v35, %s15924_s6 }
 0x554   : > { %v11421_v58 = vpop.permute.xlu0 %3543 }
 0x555   : > { %v11423_v12 = vpop.permute.xlu2 %3559 }
 0x556   : > { %15928 = vst [vmem:[#allocation192_spill] sm:$0xff] %v11423_v12  ;;  %v2821_v12 = vld [vmem:[#allocation3 + $0x1e3] sm:$0xff] }
 0x559   : > { %3687 = vrot.lane.b32.xlu1 %v10870_v24, %s15924_s6 }
 0x55a   : > { %3697 = vrot.lane.b32.xlu0 %v10877_v56, %s15924_s6 }
 0x55b   : > { %v11429_v10 = vpop.permute.xlu1 %3539  ;;  %3695 = vrot.lane.b32.xlu2 %v10881_v18, %s15924_s6  ;;  %v2819_v18 = vld [vmem:[#allocation3 + $0x1cb] sm:$0xff] }
 0x55c   : > { %v11433_v13 = vpop.permute.xlu0 %3549 }
 0x55d   : > { %v11435_v5 = vpop.permute.xlu2 %3565 }
 0x55e   : > { %15929 = vst [vmem:[#allocation193_spill] sm:$0xff] %v11435_v5 }
 0x561   : > { %3693 = vrot.lane.b32.xlu1 %v10912_v47, %s15924_s6 }
 0x562   : > { %3703 = vrot.lane.b32.xlu0 %v10919_v51, %s15924_s6 }
 0x563   : > { %v11441_v35 = vpop.permute.xlu1 %3545  ;;  %3701 = vrot.lane.b32.xlu2 %v10921_v34, %s15924_s6  ;;  %v2822_v34 = vld [vmem:[#allocation3 + $0x1eb] sm:$0xff] }
 0x564   : > { %v11445_v24 = vpop.permute.xlu0 %3555 }
 0x565   : > { %v11447_v56 = vpop.permute.xlu2 %3571 }
 0x566   : > { %15930 = vst [vmem:[#allocation194_spill] sm:$0xff] %v11447_v56 }
 0x569   : > { %3699 = vrot.lane.b32.xlu1 %v10954_v54, %s15924_s6 }
 0x56a   : > { %3709 = vrot.lane.b32.xlu0 %v2819_v18, %s15924_s6 }
 0x56b   : > { %v11452_v5 = vpop.permute.xlu1 %3551  ;;  %3707 = vrot.lane.b32.xlu2 %v10959_v7, %s15924_s6  ;;  %v2820_v7 = vld [vmem:[#allocation3 + $0x1d3] sm:$0xff] }
 0x56c   : > { %v11456_v47 = vpop.permute.xlu0 %3561 }
 0x56d   : > { %15931 = vst [vmem:[#allocation195_spill] sm:$0xff] %v11456_v47  ;;  %v11458_v51 = vpop.permute.xlu2 %3577 }
 0x571   : > { %3705 = vrot.lane.b32.xlu1 %v10988_v32, %s15924_s6 }
 0x572   : > { %3715 = vrot.lane.b32.xlu0 %v2822_v34, %s15924_s6 }
 0x573   : > { %v11463_v56 = vpop.permute.xlu1 %3557  ;;  %3713 = vrot.lane.b32.xlu2 %v2821_v12, %s15924_s6  ;;  %v2823_v12 = vld [vmem:[#allocation3 + $0x1fb] sm:$0xff] }
 0x574   : > { %15932 = vst [vmem:[#allocation196_spill] sm:$0xff] %v11463_v56  ;;  %v11466_v54 = vpop.permute.xlu0 %3567 }
 0x575   : > { %15933 = vst [vmem:[#allocation197_spill] sm:$0xff] %v11466_v54  ;;  %v11468_v18 = vpop.permute.xlu2 %3583 }
 0x579   : > { %3711 = vrot.lane.b32.xlu1 %v2820_v7, %s15924_s6 }
 0x57a   : > { %3785 = vrot.lane.b32.xlu0 %v11027_v9, %s8295_s17 }
 0x57b   : > { %v11473_v47 = vpop.permute.xlu1 %3563  ;;  %3719 = vrot.lane.b32.xlu2 %v2824_v36, %s15924_s6 }
 0x57c   : > { %15934 = vst [vmem:[#allocation198_spill] sm:$0xff] %v11473_v47  ;;  %v11476_v32 = vpop.permute.xlu0 %3573 }
 0x57d   : > { %15935 = vst [vmem:[#allocation199_spill] sm:$0xff] %v11476_v32  ;;  %v11478_v34 = vpop.permute.xlu2 %3589 }
 0x57e   : > { %15936 = vst [vmem:[#allocation200_spill] sm:$0xff] %v11478_v34 }
 0x581   : > { %3717 = vrot.lane.b32.xlu1 %v2823_v12, %s15924_s6 }
 0x582   : > { %3791 = vrot.lane.b32.xlu0 %v11048_v42, %s8295_s17 }
 0x583   : > { %v11483_v54 = vpop.permute.xlu1 %3569  ;;  %3789 = vrot.lane.b32.xlu2 %v11050_v55, %s8295_s17 }
 0x584   : > { %15937 = vst [vmem:[#allocation201_spill] sm:$0xff] %v11483_v54  ;;  %v11487_v9 = vpop.permute.xlu0 %3579  ;;  %v4141_v54 = vld [vmem:[%s15208_s3 + $0x20] sm:$0xff] }
 0x585   : > { %v11489_v7 = vpop.permute.xlu2 %3659 }
 0x589   : > { %3787 = vrot.lane.b32.xlu1 %v11063_v23, %s8295_s17 }
 0x58a   : > { %3797 = vrot.lane.b32.xlu0 %v11065_v60, %s8295_s17 }
 0x58b   : > { %v11495_v36 = vpop.permute.xlu1 %3575  ;;  %3795 = vrot.lane.b32.xlu2 %v11067_v2, %s8295_s17 }
 0x58c   : > { %15938 = vst [vmem:[#allocation202_spill] sm:$0xff] %v11495_v36  ;;  %v11499_v42 = vpop.permute.xlu0 %3585  ;;  %v2851_v36 = vld [vmem:[#allocation3 + $0x1ce] sm:$0xff] }
 0x58d   : > { %v11501_v12 = vpop.permute.xlu2 %3665 }
 0x591   : > { %3793 = vrot.lane.b32.xlu1 %v11087_v1, %s8295_s17 }
 0x592   : > { %3803 = vrot.lane.b32.xlu0 %v11089_v37, %s8295_s17 }
 0x593   : > { %v11507_v55 = vpop.permute.xlu1 %3581  ;;  %3801 = vrot.lane.b32.xlu2 %v11091_v33, %s8295_s17 }
 0x594   : > { %v11511_v23 = vpop.permute.xlu0 %3591 }
 0x595   : > { %15939 = vst [vmem:[#allocation203_spill] sm:$0xff] %v11511_v23  ;;  %v11513_v60 = vpop.permute.xlu2 %3671 }
 0x599   : > { %3799 = vrot.lane.b32.xlu1 %v11111_v14, %s8295_s17 }
 0x59a   : > { %3809 = vrot.lane.b32.xlu0 %v11113_v22, %s8295_s17 }
 0x59b   : > { %v11519_v2 = vpop.permute.xlu1 %3587  ;;  %3807 = vrot.lane.b32.xlu2 %v11115_v4, %s8295_s17 }
 0x59c   : > { %v11523_v37 = vpop.permute.xlu0 %3661 }
 0x59d   : > { %v11525_v1 = vpop.permute.xlu2 %3677 }
 0x5a1   : > { %3805 = vrot.lane.b32.xlu1 %v11129_v31, %s8295_s17 }
 0x5a2   : > { %3815 = vrot.lane.b32.xlu0 %v11131_v41, %s8295_s17 }
 0x5a3   : > { %v11531_v33 = vpop.permute.xlu1 %3657  ;;  %3813 = vrot.lane.b32.xlu2 %v11133_v0, %s8295_s17 }
 0x5a4   : > { %v11535_v14 = vpop.permute.xlu0 %3667 }
 0x5a5   : > { %v11537_v22 = vpop.permute.xlu2 %3683 }
 0x5a9   : > { %3811 = vrot.lane.b32.xlu1 %v11147_v21, %s8295_s17 }
 0x5aa   : > { %3821 = vrot.lane.b32.xlu0 %v11151_v8, %s8295_s17 }
 0x5ab   : > { %v11543_v4 = vpop.permute.xlu1 %3663  ;;  %3819 = vrot.lane.b32.xlu2 %v11161_v11, %s8295_s17 }
 0x5ac   : > { %v11547_v41 = vpop.permute.xlu0 %3673 }
 0x5ad   : > { %v11549_v31 = vpop.permute.xlu2 %3689 }
 0x5ae   : > { %15940 = vst [vmem:[#allocation204_spill] sm:$0xff] %v11549_v31 }
 0x5b1   : > { %3817 = vrot.lane.b32.xlu1 %v11207_v40, %s8295_s17 }
 0x5b2   : > { %3827 = vrot.lane.b32.xlu0 %v11209_v30, %s8295_s17 }
 0x5b3   : > { %v11555_v0 = vpop.permute.xlu1 %3669  ;;  %3825 = vrot.lane.b32.xlu2 %v11211_v38, %s8295_s17  ;;  %v2852_v38 = vld [vmem:[#allocation3 + $0x1d6] sm:$0xff] }
 0x5b4   : > { %v11559_v8 = vpop.permute.xlu0 %3679 }
 0x5b5   : > { %v11561_v21 = vpop.permute.xlu2 %3695 }
 0x5b6   : > { %15941 = vst [vmem:[#allocation205_spill] sm:$0xff] %v11561_v21 }
 0x5b9   : > { %3823 = vrot.lane.b32.xlu1 %v11225_v6, %s8295_s17  ;;  %v4145_v6 = vld [vmem:[%s15208_s3 + $0x40] sm:$0xff] }
 0x5ba   : > { %3833 = vrot.lane.b32.xlu0 %v11227_v17, %s8295_s17  ;;  %4249 = vmatpush.msra.mxu1 %v4145_v6 }
 0x5bb   : > { %v11567_v11 = vpop.permute.xlu1 %3675  ;;  %3831 = vrot.lane.b32.xlu2 %v11229_v52, %s8295_s17  ;;  %8033 = vmatpush.msrb.mxu3 %v4145_v6  ;;  %v2854_v6 = vld [vmem:[#allocation3 + $0x1ee] sm:$0xff] }
 0x5bc   : > { %v11571_v30 = vpop.permute.xlu0 %3685 }
 0x5bd   : > { %15942 = vst [vmem:[#allocation206_spill] sm:$0xff] %v11571_v30  ;;  %v11573_v40 = vpop.permute.xlu2 %3701 }
 0x5be   : > { %15943 = vst [vmem:[#allocation207_spill] sm:$0xff] %v11573_v40  ;;  %v4144_v40 = vld [vmem:[%s15208_s3 + $0x38] sm:$0xff] }
 0x5bf   : > { %4250 = vmatpush.msra.mxu1 %v4144_v40  ;;  %8034 = vmatpush.msrb.mxu3 %v4144_v40 }
 0x5c1   : > { %3829 = vrot.lane.b32.xlu1 %v11243_v26, %s8295_s17  ;;  %v4143_v26 = vld [vmem:[%s15208_s3 + $0x30] sm:$0xff] }
 0x5c2   : > { %3839 = vrot.lane.b32.xlu0 %v2852_v38, %s8295_s17  ;;  %v4142_v38 = vld [vmem:[%s15208_s3 + $0x28] sm:$0xff]  ;;  %4251 = vmatpush.msra.mxu1 %v4143_v26 }
 0x5c3   : > { %v11581_v17 = vpop.permute.xlu1 %3681  ;;  %3837 = vrot.lane.b32.xlu2 %v2851_v36, %s8295_s17  ;;  %v2855_v36 = vld [vmem:[#allocation3 + $0x1fe] sm:$0xff]  ;;  %8035 = vmatpush.msrb.mxu3 %v4143_v26  ;;  %v4140_v26 = vld [vmem:[%s15208_s3 + $0x18] sm:$0xff] }
 0x5c4   : > { %v11584_v52 = vpop.permute.xlu0 %3691  ;;  %4252 = vmatpush.msra.mxu1 %v4142_v38 }
 0x5c5   : > { %15944 = vst [vmem:[#allocation208_spill] sm:$0xff] %v11584_v52  ;;  %v11592_v32 = vpop.permute.xlu2 %3707  ;;  %8036 = vmatpush.msrb.mxu3 %v4142_v38  ;;  %v2853_v38 = vld [vmem:[#allocation3 + $0x1e6] sm:$0xff] }
 0x5c6   : > { %4253 = vmatpush.msra.mxu1 %v4141_v54 }
 0x5c7   : > { %8037 = vmatpush.msrb.mxu3 %v4141_v54  ;;  %v4137_v54 = vld [vmem:[%s15208_s3] sm:$0xff] }
 0x5c8   : > { %4254 = vmatpush.msra.mxu1 %v4140_v26 }
 0x5c9   : > { %3835 = vrot.lane.b32.xlu1 %v11255_v61, %s8295_s17  ;;  %v4139_v61 = vld [vmem:[%s15208_s3 + $0x10] sm:$0xff]  ;;  %8038 = vmatpush.msrb.mxu3 %v4140_v26 }
 0x5ca   : > { %3845 = vrot.lane.b32.xlu0 %v2855_v36, %s8295_s17  ;;  %v4138_v36 = vld [vmem:[%s15208_s3 + $0x8] sm:$0xff]  ;;  %4255 = vmatpush.msra.mxu1 %v4139_v61 }
 0x5cb   : > { %v11603_v40 = vpop.permute.xlu1 %3687  ;;  %3843 = vrot.lane.b32.xlu2 %v2854_v6, %s8295_s17  ;;  %v4389_v6 = vld [vmem:[#allocation3 + $0x23] sm:$0xff]  ;;  %8039 = vmatpush.msrb.mxu3 %v4139_v61 }
 0x5cc   : > { %15945 = vst [vmem:[#allocation209_spill] sm:$0xff] %v11603_v40  ;;  %v11606_v21 = vpop.permute.xlu0 %3697  ;;  %4256 = vmatpush.msra.mxu1 %v4138_v36  ;;  %v2856_v61 = vld [vmem:[#allocation3 + $0x206] sm:$0xff]  ;;  %v4391_v40 = vld [vmem:[#allocation3 + $0x3b] sm:$0xff] }
 0x5cd   : > { %15946 = vst [vmem:[#allocation210_spill] sm:$0xff] %v11606_v21  ;;  %v11614_v52 = vpop.permute.xlu2 %3713  ;;  %v4388_v21 = vld [vmem:[#allocation3 + $0x1b] sm:$0xff]  ;;  %8040 = vmatpush.msrb.mxu3 %v4138_v36 }
 0x5ce   : > { %4257 = vmatpush.msra.mxu1 %v4137_v54 }
 0x5cf   : > { %8041 = vmatpush.msrb.mxu3 %v4137_v54  ;;  %v4394_v54 = vld [vmem:[#allocation3 + $0x63] sm:$0xff] }
 0x5d1   : > { %3841 = vrot.lane.b32.xlu1 %v2853_v38, %s8295_s17  ;;  %v4392_v38 = vld [vmem:[#allocation3 + $0x4b] sm:$0xff] }
 0x5d2   : > { %4647 = vrot.lane.b32.xlu0 %v4389_v6, %s8288_s30  ;;  %v4390_v6 = vld [vmem:[#allocation3 + $0x33] sm:$0xff] }
 0x5d3   : > { %v11624_v47 = vpop.permute.xlu1 %3693  ;;  %4645 = vrot.lane.b32.xlu2 %v4388_v21, %s8288_s30 }
 0x5d4   : > { %15947 = vst [vmem:[#allocation211_spill] sm:$0xff] %v11624_v47  ;;  %v11627_v26 = vpop.permute.xlu0 %3703  ;;  %v2568_v47 = vld [vmem:[#allocation3] sm:$0xff] }
 0x5d5   : > { %15948 = vst [vmem:[#allocation212_spill] sm:$0xff] %v11627_v26  ;;  %v11629_v31 = vpop.permute.xlu2 %3719  ;;  %v4395_v26 = vld [vmem:[#allocation3 + $0x6b] sm:$0xff] }
 0x5d6   : > { %15949 = vst [vmem:[#allocation213_spill] sm:$0xff] %v11629_v31 }
 0x5d9   : > { %3847 = vrot.lane.b32.xlu1 %v2856_v61, %s8295_s17 }
 0x5da   : > { %4653 = vrot.lane.b32.xlu0 %v4392_v38, %s8288_s30 }
 0x5db   : > { %v11633_v23 = vpop.permute.xlu1 %3699  ;;  %4651 = vrot.lane.b32.xlu2 %v4391_v40, %s8288_s30  ;;  %v3881_v40 = vsel %vm307_vm0, %v2568_v47, %v10223_v25 }
 0x5dc   : > { %15950 = vst [vmem:[#allocation214_spill] sm:$0xff] %v11633_v23  ;;  %v11636_v36 = vpop.permute.xlu0 %3709  ;;  %v4393_v23 = vld [vmem:[#allocation3 + $0x53] sm:$0xff]  ;;  %v3913_v30 = vsel %vm2118_vm11, %v3881_v40, %v10527_v27  ;;  %v4396_v40 = vld [vmem:[#allocation3 + $0x7b] sm:$0xff] }
 0x5dd   : > { %v11638_v21 = vpop.permute.xlu2 %3789 }
 0x5e1   : > { %4649 = vrot.lane.b32.xlu1 %v4390_v6, %s8288_s30  ;;  %v3945_v6 = vsel %vm2151_vm15, %v3913_v30, %v10670_v53 }
 0x5e2   : > { %4659 = vrot.lane.b32.xlu0 %v4395_v26, %s8288_s30  ;;  %v4397_v26 = vld [vmem:[#allocation3 + $0x83] sm:$0xff]  ;;  %v3977_v34 = vsel %vm2184_vm2, %v3945_v6, %v11103_v62  ;;  %v4403_v62 = vld [vmem:[#allocation3 + $0xcb] sm:$0xff] }
 0x5e3   : > { %v11642_v31 = vpop.permute.xlu1 %3705  ;;  %4657 = vrot.lane.b32.xlu2 %v4394_v54, %s8288_s30  ;;  %v4009_v54 = vsel %vm2217_vm1, %v3977_v34, %v11281_v29  ;;  %v4401_v29 = vld [vmem:[#allocation3 + $0xb3] sm:$0xff] }
 0x5e4   : > { %v11645_v61 = vpop.permute.xlu0 %3715  ;;  %v4041_v25 = vsel %vm2250_vm3, %v4009_v54, %v11361_v28  ;;  %v15953_v54 = vld [vmem:[#allocation167_spill] sm:$0xff] }
 0x5e5   : > { %v11647_v38 = vpop.permute.xlu2 %3795  ;;  %v4073_v27 = vsel %vm2283_vm5, %v4041_v25, %v11531_v33  ;;  %v15952_v33 = vld [vmem:[#allocation12_spill] sm:$0xff] }
 0x5e9   : > { %4655 = vrot.lane.b32.xlu1 %v4393_v23, %s8288_s30 }
 0x5ea   : > { %4665 = vrot.lane.b32.xlu0 %v11363_v44, %s8288_s30  ;;  %v2569_v44 = vld [vmem:[#allocation3 + $0x8] sm:$0xff] }
 0x5eb   : > { %v11664_v47 = vpop.permute.xlu1 %3711  ;;  %4663 = vrot.lane.b32.xlu2 %v4397_v26, %s8288_s30  ;;  %v3882_v6 = vsel %vm307_vm0, %v2569_v44, %v15952_v33  ;;  %v2570_v44 = vld [vmem:[#allocation3 + $0x18] sm:$0xff] }
 0x5ec   : > { %v3786_v53 = vpop.permute.xlu0 %3785  ;;  %v3914_v25 = vsel %vm2118_vm11, %v3882_v6, %v15953_v54 }
 0x5ed   : > { %v11669_v30 = vpop.permute.xlu2 %3801  ;;  %v4105_v23 = vsel %vm2316_vm4, %v4073_v27, %v3786_v53  ;;  %v15954_v27 = vld [vmem:[#allocation119_spill] sm:$0xff] }
 0x5ee   : > { %7952 = vmatmul.msk.f32.vlgmr.msra.gmra.mxu1 %vm2358_vm6, %v4105_v23  ;;  %v3946_v53 = vsel %vm2151_vm15, %v3914_v25, %v15954_v27  ;;  %v4404_v23 = vld [vmem:[#allocation3 + $0xdb] sm:$0xff] }
 0x5f1   : > { %4661 = vrot.lane.b32.xlu1 %v4396_v40, %s8288_s30  ;;  %v15955_v40 = vld [vmem:[#allocation154_spill] sm:$0xff] }
 0x5f2   : > { %4671 = vrot.lane.b32.xlu0 %v4401_v29, %s8288_s30  ;;  %v3978_v29 = vsel %vm2184_vm2, %v3946_v53, %v15955_v40  ;;  %v15961_v40 = vld [vmem:[#allocation174_spill] sm:$0xff] }
 0x5f3   : > { %v11675_v28 = vpop.permute.xlu1 %3717  ;;  %4669 = vrot.lane.b32.xlu2 %v11348_v39, %s8288_s30 }
 0x5f4   : > { %15951 = vst [vmem:[#allocation215_spill] sm:$0xff] %v11675_v28  ;;  %v3792_v34 = vpop.permute.xlu0 %3791  ;;  %v15956_v28 = vld [vmem:[#allocation87_spill] sm:$0xff] }
 0x5f5   : > { %v11681_v26 = vpop.permute.xlu2 %3807  ;;  %v4010_v39 = vsel %vm2217_vm1, %v3978_v29, %v15956_v28  ;;  %v15957_v28 = vld [vmem:[#allocation64_spill] sm:$0xff] }
 0x5f6   : > { %v4042_v33 = vsel %vm2250_vm3, %v4010_v39, %v11397_v15  ;;  %v3883_v53 = vsel %vm307_vm0, %v2570_v44, %v15957_v28  ;;  %v15958_v15 = vld [vmem:[#allocation163_spill] sm:$0xff]  ;;  %v4402_v29 = vld [vmem:[#allocation3 + $0xc3] sm:$0xff] }
 0x5f7   : > { %v4074_v6 = vsel %vm2283_vm5, %v4042_v33, %v11489_v7  ;;  %v15959_v39 = vld [vmem:[#allocation16_spill] sm:$0xff] }
 0x5f8   : > { %v4407_v33 = vld [vmem:[#allocation3 + $0xfb] sm:$0xff] }
 0x5f9   : > { %4667 = vrot.lane.b32.xlu1 %v11350_v19, %s8288_s30  ;;  %v2571_v44 = vld [vmem:[#allocation3 + $0x20] sm:$0xff] }
 0x5fa   : > { %4677 = vrot.lane.b32.xlu0 %v4404_v23, %s8288_s30  ;;  %v3915_v23 = vsel %vm2118_vm11, %v3883_v53, %v15958_v15 }
 0x5fb   : > { %v3788_v54 = vpop.permute.xlu1 %3787  ;;  %4675 = vrot.lane.b32.xlu2 %v4403_v62, %s8288_s30  ;;  %v3947_v7 = vsel %vm2151_vm15, %v3915_v23, %v15959_v39  ;;  %v15960_v62 = vld [vmem:[#allocation19_spill] sm:$0xff] }
 0x5fc   : > { %v4106_v25 = vsel %vm2316_vm4, %v4074_v6, %v3788_v54  ;;  %v11700_v27 = vpop.permute.xlu0 %3797  ;;  %v3979_v6 = vsel %vm2184_vm2, %v3947_v7, %v15960_v62  ;;  %v4406_v54 = vld [vmem:[#allocation3 + $0xf3] sm:$0xff]  ;;  %v4405_v7 = vld [vmem:[#allocation3 + $0xe3] sm:$0xff] }
 0x5fd   : > { %7953 = vmatmul.msk.f32.gmra.mxu1 %vm2358_vm6, %v4106_v25  ;;  %v11705_v19 = vpop.permute.xlu2 %3813  ;;  %v4011_v56 = vsel %vm2217_vm1, %v3979_v6, %v15961_v40  ;;  %v15962_v40 = vld [vmem:[#allocation62_spill] sm:$0xff]  ;;  %v4410_v6 = vld [vmem:[#allocation3 + $0x123] sm:$0xff] }
 0x5fe   : > { %v4043_v25 = vsel %vm2250_vm3, %v4011_v56, %v11417_v20  ;;  %v15963_v20 = vld [vmem:[#allocation134_spill] sm:$0xff] }
 0x5ff   : > { %v4075_v28 = vsel %vm2283_vm5, %v4043_v25, %v11523_v37  ;;  %v15964_v37 = vld [vmem:[#allocation31_spill] sm:$0xff] }
 0x600   : > { %v4107_v15 = vsel %vm2316_vm4, %v4075_v28, %v11638_v21  ;;  %v4409_v25 = vld [vmem:[#allocation3 + $0x113] sm:$0xff] }
 0x601   : > { %4673 = vrot.lane.b32.xlu1 %v4402_v29, %s8288_s30  ;;  %v3884_v29 = vsel %vm307_vm0, %v2571_v44, %v15962_v40  ;;  %v15966_v28 = vld [vmem:[#allocation43_spill] sm:$0xff]  ;;  %v2572_v44 = vld [vmem:[#allocation3 + $0x30] sm:$0xff] }
 0x602   : > { %4683 = vrot.lane.b32.xlu0 %v4407_v33, %s8288_s30  ;;  %v3916_v56 = vsel %vm2118_vm11, %v3884_v29, %v15963_v20 }
 0x603   : > { %v3794_v53 = vpop.permute.xlu1 %3793  ;;  %4681 = vrot.lane.b32.xlu2 %v4406_v54, %s8288_s30  ;;  %v3948_v33 = vsel %vm2151_vm15, %v3916_v56, %v15964_v37  ;;  %v15965_v54 = vld [vmem:[#allocation147_spill] sm:$0xff]  ;;  %v15967_v37 = vld [vmem:[#allocation57_spill] sm:$0xff] }
 0x604   : > { %v11724_v23 = vpop.permute.xlu0 %3803  ;;  %v3980_v21 = vsel %vm2184_vm2, %v3948_v33, %v15965_v54 }
 0x605   : > { %7954 = vmatmul.msk.f32.gmra.mxu1 %vm2358_vm6, %v4107_v15  ;;  %v11729_v39 = vpop.permute.xlu2 %3819  ;;  %v4012_v62 = vsel %vm2217_vm1, %v3980_v21, %v15966_v28  ;;  %v4413_v28 = vld [vmem:[#allocation3 + $0x143] sm:$0xff] }
 0x606   : > { %v4044_v15 = vsel %vm2250_vm3, %v4012_v62, %v11375_v50  ;;  %v15969_v50 = vld [vmem:[#allocation76_spill] sm:$0xff] }
 0x607   : > { %v4076_v40 = vsel %vm2283_vm5, %v4044_v15, %v11543_v4  ;;  %v15970_v4 = vld [vmem:[#allocation157_spill] sm:$0xff]  ;;  %v4412_v15 = vld [vmem:[#allocation3 + $0x13b] sm:$0xff] }
 0x608   : > { %v4108_v20 = vsel %vm2316_vm4, %v4076_v40, %v3792_v34  ;;  %v15972_v40 = vld [vmem:[#allocation132_spill] sm:$0xff] }
 0x609   : > { %4679 = vrot.lane.b32.xlu1 %v4405_v7, %s8288_s30  ;;  %v3885_v7 = vsel %vm307_vm0, %v2572_v44, %v15967_v37  ;;  %v2573_v44 = vld [vmem:[#allocation3 + $0x38] sm:$0xff] }
 0x60a   : > { %4689 = vrot.lane.b32.xlu0 %v4410_v6, %s8288_s30  ;;  %v3917_v62 = vsel %vm2118_vm11, %v3885_v7, %v15969_v50  ;;  %v4408_v6 = vld [vmem:[#allocation3 + $0x10b] sm:$0xff] }
 0x60b   : > { %v11745_v29 = vpop.permute.xlu1 %3799  ;;  %4687 = vrot.lane.b32.xlu2 %v4409_v25, %s8288_s30  ;;  %v3949_v21 = vsel %vm2151_vm15, %v3917_v62, %v15970_v4  ;;  %v15971_v25 = vld [vmem:[#allocation77_spill] sm:$0xff]  ;;  %v15973_v4 = vld [vmem:[#allocation48_spill] sm:$0xff] }
 0x60c   : > { %v11749_v56 = vpop.permute.xlu0 %3809  ;;  %v3981_v34 = vsel %vm2184_vm2, %v3949_v21, %v15971_v25 }
 0x60d   : > { %7955 = vmatmul.msk.f32.gmra.mxu1 %vm2358_vm6, %v4108_v20  ;;  %v11754_v33 = vpop.permute.xlu2 %3825  ;;  %v4013_v54 = vsel %vm2217_vm1, %v3981_v34, %v15972_v40  ;;  %v4416_v40 = vld [vmem:[#allocation3 + $0x16b] sm:$0xff] }
 0x60e   : > { %15968 = vst [vmem:[#allocation12_spill] sm:$0xff] %v11754_v33  ;;  %v4045_v20 = vsel %vm2250_vm3, %v4013_v54, %v11409_v59  ;;  %v15975_v59 = vld [vmem:[#allocation89_spill] sm:$0xff]  ;;  %v15992_v33 = vld [vmem:[#allocation46_spill] sm:$0xff] }
 0x60f   : > { %v4077_v37 = vsel %vm2283_vm5, %v4045_v20, %v11501_v12  ;;  %v15976_v12 = vld [vmem:[#allocation98_spill] sm:$0xff]  ;;  %v4415_v20 = vld [vmem:[#allocation3 + $0x15b] sm:$0xff] }
 0x610   : > { %v4109_v50 = vsel %vm2316_vm4, %v4077_v37, %v3794_v53  ;;  %v15978_v37 = vld [vmem:[#allocation99_spill] sm:$0xff] }
 0x611   : > { %4685 = vrot.lane.b32.xlu1 %v4408_v6, %s8288_s30  ;;  %v3886_v6 = vsel %vm307_vm0, %v2573_v44, %v15973_v4 }
 0x612   : > { %4695 = vrot.lane.b32.xlu0 %v4413_v28, %s8288_s30  ;;  %v3918_v54 = vsel %vm2118_vm11, %v3886_v6, %v15975_v59  ;;  %v4411_v28 = vld [vmem:[#allocation3 + $0x12b] sm:$0xff] }
 0x613   : > { %v11770_v7 = vpop.permute.xlu1 %3805  ;;  %4693 = vrot.lane.b32.xlu2 %v4412_v15, %s8288_s30  ;;  %v3950_v34 = vsel %vm2151_vm15, %v3918_v54, %v15976_v12  ;;  %v15977_v15 = vld [vmem:[#allocation116_spill] sm:$0xff]  ;;  %v8136_v54 = vld [vmem:[#allocation3 + $0x48] sm:$0xff]  ;;  %v15979_v12 = vld [vmem:[#allocation42_spill] sm:$0xff] }
 0x614   : > { %v11774_v62 = vpop.permute.xlu0 %3815  ;;  %v3982_v53 = vsel %vm2184_vm2, %v3950_v34, %v15977_v15  ;;  %v4414_v34 = vld [vmem:[#allocation3 + $0x153] sm:$0xff] }
 0x615   : > { %7956 = vmatmul.msk.f32.gmra.mxu1 %vm2358_vm6, %v4109_v50  ;;  %v11779_v21 = vpop.permute.xlu2 %3831  ;;  %v4014_v25 = vsel %vm2217_vm1, %v3982_v53, %v15978_v37  ;;  %v15982_v37 = vld [vmem:[#allocation69_spill] sm:$0xff] }
 0x616   : > { %15974 = vst [vmem:[#allocation167_spill] sm:$0xff] %v11779_v21  ;;  %v4046_v44 = vsel %vm2250_vm3, %v4014_v25, %v11429_v10  ;;  %v15980_v25 = vld [vmem:[#allocation172_spill] sm:$0xff] }
 0x617   : > { %v4078_v50 = vsel %vm2283_vm5, %v4046_v44, %v11535_v14  ;;  %v4418_v44 = vld [vmem:[#allocation3 + $0x183] sm:$0xff] }
 0x618   : > { %v4110_v6 = vsel %vm2316_vm4, %v4078_v50, %v11647_v38  ;;  %v15983_v50 = vld [vmem:[#allocation106_spill] sm:$0xff] }
 0x619   : > { %4691 = vrot.lane.b32.xlu1 %v4411_v28, %s8288_s30  ;;  %v3887_v28 = vsel %vm307_vm0, %v8136_v54, %v15979_v12 }
 0x61a   : > { %4701 = vrot.lane.b32.xlu0 %v4416_v40, %s8288_s30  ;;  %v3919_v14 = vsel %vm2118_vm11, %v3887_v28, %v15980_v25  ;;  %v15981_v40 = vld [vmem:[#allocation93_spill] sm:$0xff] }
 0x61b   : > { %v11795_v4 = vpop.permute.xlu1 %3811  ;;  %4699 = vrot.lane.b32.xlu2 %v4415_v20, %s8288_s30  ;;  %v3951_v53 = vsel %vm2151_vm15, %v3919_v14, %v15981_v40  ;;  %v4419_v20 = vld [vmem:[#allocation3 + $0x18b] sm:$0xff] }
 0x61c   : > { %v11800_v59 = vpop.permute.xlu0 %3821  ;;  %v3983_v38 = vsel %vm2184_vm2, %v3951_v53, %v15982_v37  ;;  %v8137_v14 = vld [vmem:[#allocation3 + $0x50] sm:$0xff]  ;;  %v15986_v53 = vld [vmem:[#allocation33_spill] sm:$0xff] }
 0x61d   : > { %7957 = vmatmul.msk.f32.gmra.mxu1 %vm2358_vm6, %v4110_v6  ;;  %v11805_v10 = vpop.permute.xlu2 %3837  ;;  %v4015_v15 = vsel %vm2217_vm1, %v3983_v38, %v15983_v50  ;;  %v15985_v40 = vld [vmem:[#allocation14_spill] sm:$0xff]  ;;  %v15988_v50 = vld [vmem:[#allocation133_spill] sm:$0xff] }
 0x61e   : > { %v4047_v6 = vsel %vm2250_vm3, %v4015_v15, %v11387_v45  ;;  %v8138_v15 = vld [vmem:[#allocation3 + $0x120] sm:$0xff]  ;;  %v4422_v37 = vld [vmem:[#allocation3 + $0x35] sm:$0xff] }
 0x61f   : > { %v4079_v54 = vsel %vm2283_vm5, %v4047_v6, %v11555_v0  ;;  %v3905_v0 = vsel %vm307_vm0, %v8138_v15, %v15986_v53  ;;  %v15989_v6 = vld [vmem:[#allocation52_spill] sm:$0xff]  ;;  %v15993_v53 = vld [vmem:[#allocation178_spill] sm:$0xff] }
 0x620   : > { %v4111_v28 = vsel %vm2316_vm4, %v4079_v54, %v11700_v27  ;;  %v3937_v27 = vsel %vm2118_vm11, %v3905_v0, %v15988_v50 }
 0x621   : > { %4697 = vrot.lane.b32.xlu1 %v4414_v34, %s8288_s30  ;;  %v3888_v34 = vsel %vm307_vm0, %v8137_v14, %v15985_v40  ;;  %v15990_v14 = vld [vmem:[#allocation26_spill] sm:$0xff]  ;;  %v15991_v40 = vld [vmem:[#allocation125_spill] sm:$0xff] }
 0x622   : > { %4707 = vrot.lane.b32.xlu0 %v4419_v20, %s8288_s30  ;;  %v15987_v20 = vld [vmem:[#allocation113_spill] sm:$0xff] }
 0x623   : > { %v11821_v12 = vpop.permute.xlu1 %3817  ;;  %4705 = vrot.lane.b32.xlu2 %v4418_v44, %s8288_s30  ;;  %v3920_v38 = vsel %vm2118_vm11, %v3888_v34, %v15987_v20  ;;  %v4417_v44 = vld [vmem:[#allocation3 + $0x173] sm:$0xff] }
 0x624   : > { %v11826_v25 = vpop.permute.xlu0 %3827  ;;  %v3952_v54 = vsel %vm2151_vm15, %v3920_v38, %v15989_v6  ;;  %v15994_v6 = vld [vmem:[#allocation9_spill] sm:$0xff] }
 0x625   : > { %15984 = vst [vmem:[#allocation119_spill] sm:$0xff] %v11826_v25  ;;  %7958 = vmatmul.msk.f32.gmra.mxu1 %vm2358_vm6, %v4111_v28  ;;  %v11831_v45 = vpop.permute.xlu2 %3843  ;;  %v3969_v28 = vsel %vm2151_vm15, %v3937_v27, %v15990_v14  ;;  %v3984_v21 = vsel %vm2184_vm2, %v3952_v54, %v15991_v40  ;;  %v4421_v25 = vld [vmem:[#allocation3 + $0x25] sm:$0xff]  ;;  %v4420_v14 = vld [vmem:[#allocation3 + $0x1d] sm:$0xff] }
 0x626   : > { %v4001_v15 = vsel %vm2184_vm2, %v3969_v28, %v15992_v33  ;;  %v4016_v34 = vsel %vm2217_vm1, %v3984_v21, %v15993_v53  ;;  %v15995_v54 = vld [vmem:[#allocation20_spill] sm:$0xff]  ;;  %v11877_v28 = vld [vmem:[#allocation3 + $0x55] sm:$0xff] }
 0x627   : > { %v4033_v0 = vsel %vm2217_vm1, %v4001_v15, %v11359_v43  ;;  %v4048_v20 = vsel %vm2250_vm3, %v4016_v34, %v11421_v58  ;;  %v8139_v58 = vld [vmem:[#allocation3 + $0x60] sm:$0xff]  ;;  %v11881_v34 = vld [vmem:[#allocation3 + $0x4d] sm:$0xff] }
 0x628   : > { %v4065_v38 = vsel %vm2250_vm3, %v4033_v0, %v11458_v51  ;;  %v4080_v50 = vsel %vm2283_vm5, %v4048_v20, %v11513_v60  ;;  %v15997_v15 = vld [vmem:[#allocation164_spill] sm:$0xff] }
 0x629   : > { %4703 = vrot.lane.b32.xlu1 %v4417_v44, %s8288_s30  ;;  %v4097_v21 = vsel %vm2283_vm5, %v4065_v38, %v11642_v31  ;;  %v4112_v43 = vsel %vm2316_vm4, %v4080_v50, %v11745_v29  ;;  %v15996_v31 = vld [vmem:[#allocation74_spill] sm:$0xff]  ;;  %v15998_v0 = vld [vmem:[#allocation128_spill] sm:$0xff] }
 0x62a   : > { %4777 = vrot.lane.b32.xlu0 %v4422_v37, %s8289_s11  ;;  %v3889_v37 = vsel %vm307_vm0, %v8139_v58, %v15994_v6  ;;  %v8140_v58 = vld [vmem:[#allocation3 + $0x68] sm:$0xff]  ;;  %v16071_v33 = vld [vmem:[#allocation80_spill] sm:$0xff] }
 0x62b   : > { %v11859_v27 = vpop.permute.xlu1 %3823  ;;  %4775 = vrot.lane.b32.xlu2 %v4421_v25, %s8289_s11  ;;  %v3921_v25 = vsel %vm2118_vm11, %v3889_v37, %v15995_v54  ;;  %v15999_v6 = vld [vmem:[#allocation53_spill] sm:$0xff] }
 0x62c   : > { %v3834_v44 = vpop.permute.xlu0 %3833  ;;  %v3953_v29 = vsel %vm2151_vm15, %v3921_v25, %v15996_v31  ;;  %v8141_v37 = vld [vmem:[#allocation3 + $0x128] sm:$0xff]  ;;  %v16001_v25 = vld [vmem:[#allocation82_spill] sm:$0xff]  ;;  %v16002_v31 = vld [vmem:[#allocation72_spill] sm:$0xff] }
 0x62d   : > { %7959 = vmatmul.msk.f32.gmra.mxu1 %vm2358_vm6, %v4112_v43  ;;  %v4129_v51 = vsel %vm2316_vm4, %v4097_v21, %v3834_v44  ;;  %v11870_v60 = vpop.permute.xlu2 %4645  ;;  %v3985_v53 = vsel %vm2184_vm2, %v3953_v29, %v15997_v15  ;;  %v4423_v29 = vld [vmem:[#allocation3 + $0x3d] sm:$0xff] }
 0x62e   : > { %7976 = vmatmul.msk.f32.vlgmr.msrb.gmra.mxu3 %vm2358_vm6, %v4129_v51  ;;  %v4017_v20 = vsel %vm2217_vm1, %v3985_v53, %v15998_v0  ;;  %v16000_v51 = vld [vmem:[#allocation44_spill] sm:$0xff]  ;;  %v16003_v53 = vld [vmem:[#allocation123_spill] sm:$0xff] }
 0x62f   : > { %v4049_v38 = vsel %vm2250_vm3, %v4017_v20, %v11441_v35  ;;  %v3890_v35 = vsel %vm307_vm0, %v8140_v58, %v15999_v6  ;;  %v3906_v54 = vsel %vm307_vm0, %v8141_v37, %v16000_v51  ;;  %v16004_v20 = vld [vmem:[#allocation149_spill] sm:$0xff]  ;;  %v16005_v58 = vld [vmem:[#allocation10_spill] sm:$0xff]  ;;  %v4375_v15 = vld [vmem:[#allocation3 + $0xf9] sm:$0xff] }
 0x630   : > { %v4081_v50 = vsel %vm2283_vm5, %v4049_v38, %v11547_v41  ;;  %v16006_v6 = vld [vmem:[#allocation130_spill] sm:$0xff]  ;;  %v4378_v40 = vld [vmem:[#allocation3 + $0x121] sm:$0xff] }
 0x631   : > { %4773 = vrot.lane.b32.xlu1 %v4420_v14, %s8289_s11  ;;  %v4113_v43 = vsel %vm2316_vm4, %v4081_v50, %v11669_v30  ;;  %v3922_v14 = vsel %vm2118_vm11, %v3890_v35, %v16001_v25  ;;  %v3938_v30 = vsel %vm2118_vm11, %v3906_v54, %v16002_v31  ;;  %v11915_v50 = vld [vmem:[#allocation3 + $0x7d] sm:$0xff]  ;;  %v11921_v51 = vld [vmem:[#allocation3 + $0x6d] sm:$0xff] }
 0x632   : > { %4783 = vrot.lane.b32.xlu0 %v11877_v28, %s8289_s11  ;;  %v3954_v0 = vsel %vm2151_vm15, %v3922_v14, %v16003_v53  ;;  %v3970_v38 = vsel %vm2151_vm15, %v3938_v30, %v16004_v20  ;;  %v16007_v35 = vld [vmem:[#allocation153_spill] sm:$0xff] }
 0x633   : > { %v11892_v21 = vpop.permute.xlu1 %3829  ;;  %4781 = vrot.lane.b32.xlu2 %v11881_v34, %s8289_s11  ;;  %v4002_v37 = vsel %vm2184_vm2, %v3970_v38, %v16006_v6  ;;  %v16008_v20 = vld [vmem:[#allocation17_spill] sm:$0xff]  ;;  %v12214_v6 = vld [vmem:[#allocation3 + $0x115] sm:$0xff] }
 0x634   : > { %v11898_v44 = vpop.permute.xlu0 %3839  ;;  %v4034_v25 = vsel %vm2217_vm1, %v4002_v37, %v11381_v49 }
 0x635   : > { %7960 = vmatmul.msk.f32.gmra.mxu1 %vm2358_vm6, %v4113_v43  ;;  %v11905_v41 = vpop.permute.xlu2 %4651  ;;  %v3986_v43 = vsel %vm2184_vm2, %v3954_v0, %v16005_v58  ;;  %v4066_v31 = vsel %vm2250_vm3, %v4034_v25, %v11487_v9  ;;  %v8142_v9 = vld [vmem:[#allocation3 + $0x78] sm:$0xff] }
 0x636   : > { %v4018_v54 = vsel %vm2217_vm1, %v3986_v43, %v16007_v35  ;;  %v4098_v53 = vsel %vm2283_vm5, %v4066_v31, %v11592_v32  ;;  %v3891_v38 = vsel %vm307_vm0, %v8142_v9, %v16008_v20  ;;  %v8143_v43 = vld [vmem:[#allocation3 + $0x138] sm:$0xff]  ;;  %v16010_v35 = vld [vmem:[#allocation141_spill] sm:$0xff]  ;;  %v16012_v31 = vld [vmem:[#allocation112_spill] sm:$0xff] }
 0x637   : > { %v4050_v14 = vsel %vm2250_vm3, %v4018_v54, %v11399_v48  ;;  %v16011_v54 = vld [vmem:[#allocation63_spill] sm:$0xff] }
 0x638   : > { %v4082_v30 = vsel %vm2283_vm5, %v4050_v14, %v11567_v11  ;;  %v16009_v11 = vld [vmem:[#allocation143_spill] sm:$0xff]  ;;  %v11957_v14 = vld [vmem:[#allocation3 + $0x65] sm:$0xff] }
 0x639   : > { %4779 = vrot.lane.b32.xlu1 %v4423_v29, %s8289_s11  ;;  %v4114_v49 = vsel %vm2316_vm4, %v4082_v30, %v11724_v23  ;;  %v3907_v37 = vsel %vm307_vm0, %v8143_v43, %v16009_v11  ;;  %v3923_v23 = vsel %vm2118_vm11, %v3891_v38, %v16010_v35  ;;  %v11963_v9 = vld [vmem:[#allocation3 + $0x9d] sm:$0xff]  ;;  %v11969_v38 = vld [vmem:[#allocation3 + $0x95] sm:$0xff]  ;;  %v16016_v11 = vld [vmem:[#allocation181_spill] sm:$0xff] }
 0x63a   : > { %4789 = vrot.lane.b32.xlu0 %v11915_v50, %s8289_s11  ;;  %v3939_v25 = vsel %vm2118_vm11, %v3907_v37, %v16011_v54  ;;  %v3955_v30 = vsel %vm2151_vm15, %v3923_v23, %v16012_v31  ;;  %v16015_v20 = vld [vmem:[#allocation155_spill] sm:$0xff] }
 0x63b   : > { %v3836_v0 = vpop.permute.xlu1 %3835  ;;  %4787 = vrot.lane.b32.xlu2 %v11921_v51, %s8289_s11 }
 0x63c   : > { %v4130_v48 = vsel %vm2316_vm4, %v4098_v53, %v3836_v0  ;;  %v11943_v29 = vpop.permute.xlu0 %3845  ;;  %v16013_v53 = vld [vmem:[#allocation94_spill] sm:$0xff] }
 0x63d   : > { %7961 = vmatmul.msk.f32.gmra.mxu1 %vm2358_vm6, %v4114_v49  ;;  %7977 = vmatmul.msk.f32.gmra.mxu3 %vm2358_vm6, %v4130_v48  ;;  %v11951_v32 = vpop.permute.xlu2 %4657  ;;  %v3971_v0 = vsel %vm2151_vm15, %v3939_v25, %v16013_v53  ;;  %v16014_v49 = vld [vmem:[#allocation83_spill] sm:$0xff]  ;;  %v8144_v53 = vld [vmem:[#allocation3 + $0x80] sm:$0xff] }
 0x63e   : > { %v3987_v48 = vsel %vm2184_vm2, %v3955_v30, %v16014_v49  ;;  %v4003_v43 = vsel %vm2184_vm2, %v3971_v0, %v16015_v20  ;;  %v16017_v0 = vld [vmem:[#allocation78_spill] sm:$0xff] }
 0x63f   : > { %v4019_v37 = vsel %vm2217_vm1, %v3987_v48, %v16016_v11  ;;  %v4035_v35 = vsel %vm2217_vm1, %v4003_v43, %v11337_v46  ;;  %v3892_v48 = vsel %vm307_vm0, %v8144_v53, %v16017_v0  ;;  %v16018_v43 = vld [vmem:[#allocation109_spill] sm:$0xff] }
 0x640   : > { %v4051_v23 = vsel %vm2250_vm3, %v4019_v37, %v11433_v13  ;;  %v4067_v54 = vsel %vm2250_vm3, %v4035_v35, %v11507_v55  ;;  %v12013_v0 = vld [vmem:[#allocation3 + $0xc5] sm:$0xff] }
 0x641   : > { %4785 = vrot.lane.b32.xlu1 %v11957_v14, %s8289_s11  ;;  %v4083_v25 = vsel %vm2283_vm5, %v4051_v23, %v11525_v1  ;;  %v4099_v31 = vsel %vm2283_vm5, %v4067_v54, %v11636_v36  ;;  %v8145_v1 = vld [vmem:[#allocation3 + $0x140] sm:$0xff]  ;;  %v16022_v54 = vld [vmem:[#allocation162_spill] sm:$0xff] }
 0x642   : > { %4795 = vrot.lane.b32.xlu0 %v11963_v9, %s8289_s11  ;;  %v4115_v46 = vsel %vm2316_vm4, %v4083_v25, %v11770_v7  ;;  %v4131_v13 = vsel %vm2316_vm4, %v4099_v31, %v11805_v10  ;;  %v3908_v36 = vsel %vm307_vm0, %v8145_v1, %v16018_v43  ;;  %v16020_v7 = vld [vmem:[#allocation137_spill] sm:$0xff]  ;;  %v16023_v31 = vld [vmem:[#allocation102_spill] sm:$0xff] }
 0x643   : > { %v3842_v30 = vpop.permute.xlu1 %3841  ;;  %4793 = vrot.lane.b32.xlu2 %v11969_v38, %s8289_s11  ;;  %v3924_v37 = vsel %vm2118_vm11, %v3892_v48, %v16020_v7  ;;  %v16021_v10 = vld [vmem:[#allocation165_spill] sm:$0xff]  ;;  %v12019_v48 = vld [vmem:[#allocation3 + $0xb5] sm:$0xff] }
 0x644   : > { %v11993_v55 = vpop.permute.xlu0 %4647  ;;  %v3940_v35 = vsel %vm2118_vm11, %v3908_v36, %v16021_v10  ;;  %v12007_v23 = vld [vmem:[#allocation3 + $0x85] sm:$0xff]  ;;  %v3956_v25 = vsel %vm2151_vm15, %v3924_v37, %v16022_v54  ;;  %v16026_v7 = vld [vmem:[#allocation27_spill] sm:$0xff] }
 0x645   : > { %7962 = vmatmul.msk.f32.gmra.mxu1 %vm2358_vm6, %v4115_v46  ;;  %7978 = vmatmul.msk.f32.gmra.mxu3 %vm2358_vm6, %v4131_v13  ;;  %v12001_v11 = vpop.permute.xlu2 %4663  ;;  %v3972_v53 = vsel %vm2151_vm15, %v3940_v35, %v16023_v31  ;;  %v16024_v46 = vld [vmem:[#allocation105_spill] sm:$0xff] }
 0x646   : > { %16019 = vst [vmem:[#allocation87_spill] sm:$0xff] %v12001_v11  ;;  %v3988_v13 = vsel %vm2184_vm2, %v3956_v25, %v16024_v46  ;;  %v16025_v1 = vld [vmem:[#allocation45_spill] sm:$0xff]  ;;  %v4366_v46 = vld [vmem:[#allocation3 + $0x91] sm:$0xff] }
 0x647   : > { %v4004_v43 = vsel %vm2184_vm2, %v3972_v53, %v16025_v1  ;;  %v4020_v36 = vsel %vm2217_vm1, %v3988_v13, %v16026_v7  ;;  %v8146_v53 = vld [vmem:[#allocation3 + $0x90] sm:$0xff]  ;;  %v16027_v13 = vld [vmem:[#allocation51_spill] sm:$0xff]  ;;  %v16028_v7 = vld [vmem:[#allocation148_spill] sm:$0xff] }
 0x648   : > { %v4036_v10 = vsel %vm2217_vm1, %v4004_v43, %v11373_v3  ;;  %v4052_v37 = vsel %vm2250_vm3, %v4020_v36, %v11452_v5  ;;  %v8147_v43 = vld [vmem:[#allocation3 + $0x150] sm:$0xff] }
 0x649   : > { %4791 = vrot.lane.b32.xlu1 %v12007_v23, %s8289_s11  ;;  %v4068_v35 = vsel %vm2250_vm3, %v4036_v10, %v11468_v18  ;;  %v4084_v54 = vsel %vm2283_vm5, %v4052_v37, %v11559_v8  ;;  %v3893_v8 = vsel %vm307_vm0, %v8146_v53, %v16027_v13  ;;  %v16033_v53 = vld [vmem:[#allocation37_spill] sm:$0xff] }
 0x64a   : > { %4801 = vrot.lane.b32.xlu0 %v12013_v0, %s8289_s11  ;;  %v4100_v25 = vsel %vm2283_vm5, %v4068_v35, %v11664_v47  ;;  %v4116_v3 = vsel %vm2316_vm4, %v4084_v54, %v11681_v26  ;;  %v3909_v47 = vsel %vm307_vm0, %v8147_v43, %v16028_v7  ;;  %v16030_v26 = vld [vmem:[#allocation50_spill] sm:$0xff]  ;;  %v12065_v43 = vld [vmem:[#allocation3 + $0xe5] sm:$0xff] }
 0x64b   : > { %v12037_v31 = vpop.permute.xlu1 %3847  ;;  %4799 = vrot.lane.b32.xlu2 %v12019_v48, %s8289_s11  ;;  %v4132_v5 = vsel %vm2316_vm4, %v4100_v25, %v11898_v44  ;;  %v3925_v10 = vsel %vm2118_vm11, %v3893_v8, %v16030_v26  ;;  %v16031_v44 = vld [vmem:[#allocation24_spill] sm:$0xff]  ;;  %v12059_v35 = vld [vmem:[#allocation3 + $0xad] sm:$0xff]  ;;  %v16036_v26 = vld [vmem:[#allocation179_spill] sm:$0xff] }
 0x64c   : > { %v12045_v18 = vpop.permute.xlu0 %4653  ;;  %v3941_v37 = vsel %vm2118_vm11, %v3909_v47, %v16031_v44  ;;  %v16032_v54 = vld [vmem:[#allocation170_spill] sm:$0xff]  ;;  %v12071_v8 = vld [vmem:[#allocation3 + $0xdd] sm:$0xff] }
 0x64d   : > { %7963 = vmatmul.msk.f32.gmra.mxu1 %vm2358_vm6, %v4116_v3  ;;  %7979 = vmatmul.msk.f32.gmra.mxu3 %vm2358_vm6, %v4132_v5  ;;  %v12053_v36 = vpop.permute.xlu2 %4669  ;;  %v3957_v25 = vsel %vm2151_vm15, %v3925_v10, %v16032_v54  ;;  %v3973_v13 = vsel %vm2151_vm15, %v3941_v37, %v16033_v53  ;;  %v16034_v3 = vld [vmem:[#allocation103_spill] sm:$0xff]  ;;  %v16035_v7 = vld [vmem:[#allocation38_spill] sm:$0xff] }
 0x64e   : > { %16029 = vst [vmem:[#allocation64_spill] sm:$0xff] %v12053_v36  ;;  %v3989_v5 = vsel %vm2184_vm2, %v3957_v25, %v16034_v3  ;;  %v4005_v1 = vsel %vm2184_vm2, %v3973_v13, %v16035_v7  ;;  %v16038_v13 = vld [vmem:[#allocation8_spill] sm:$0xff]  ;;  %v16109_v3 = vld [vmem:[#allocation73_spill] sm:$0xff] }
 0x64f   : > { %v4021_v47 = vsel %vm2217_vm1, %v3989_v5, %v16036_v26  ;;  %v4037_v44 = vsel %vm2217_vm1, %v4005_v1, %v11393_v57  ;;  %v8148_v1 = vld [vmem:[#allocation3 + $0x98] sm:$0xff]  ;;  %v16039_v26 = vld [vmem:[#allocation68_spill] sm:$0xff]  ;;  %v4363_v36 = vld [vmem:[#allocation3 + $0x69] sm:$0xff] }
 0x650   : > { %v4053_v10 = vsel %vm2250_vm3, %v4021_v47, %v11411_v63  ;;  %v4069_v37 = vsel %vm2250_vm3, %v4037_v44, %v11499_v42  ;;  %v3894_v5 = vsel %vm307_vm0, %v8148_v1, %v16038_v13  ;;  %v16041_v44 = vld [vmem:[#allocation22_spill] sm:$0xff]  ;;  %v16044_v1 = vld [vmem:[#allocation173_spill] sm:$0xff] }
 0x651   : > { %4797 = vrot.lane.b32.xlu1 %v12059_v35, %s8289_s11  ;;  %v4085_v54 = vsel %vm2283_vm5, %v4053_v10, %v11581_v17  ;;  %v4101_v25 = vsel %vm2283_vm5, %v4069_v37, %v11614_v52  ;;  %v8149_v17 = vld [vmem:[#allocation3 + $0x158] sm:$0xff]  ;;  %v12110_v37 = vld [vmem:[#allocation3 + $0xcd] sm:$0xff] }
 0x652   : > { %4807 = vrot.lane.b32.xlu0 %v12065_v43, %s8289_s11  ;;  %v4117_v57 = vsel %vm2316_vm4, %v4085_v54, %v11749_v56  ;;  %v4133_v63 = vsel %vm2316_vm4, %v4101_v25, %v3842_v30  ;;  %v3910_v52 = vsel %vm307_vm0, %v8149_v17, %v16039_v26  ;;  %v3926_v56 = vsel %vm2118_vm11, %v3894_v5, %v16041_v44  ;;  %v16042_v30 = vld [vmem:[#allocation28_spill] sm:$0xff]  ;;  %v16043_v54 = vld [vmem:[#allocation129_spill] sm:$0xff] }
 0x653   : > { %v12089_v53 = vpop.permute.xlu1 %4649  ;;  %4805 = vrot.lane.b32.xlu2 %v12071_v8, %s8289_s11  ;;  %v3942_v10 = vsel %vm2118_vm11, %v3910_v52, %v16042_v30  ;;  %v3958_v25 = vsel %vm2151_vm15, %v3926_v56, %v16043_v54  ;;  %v12116_v17 = vld [vmem:[#allocation3 + $0x10d] sm:$0xff]  ;;  %v16046_v26 = vld [vmem:[#allocation84_spill] sm:$0xff] }
 0x654   : > { %v12096_v42 = vpop.permute.xlu0 %4659  ;;  %v3974_v13 = vsel %vm2151_vm15, %v3942_v10, %v16044_v1  ;;  %v12122_v5 = vld [vmem:[#allocation3 + $0xfd] sm:$0xff] }
 0x655   : > { %16037 = vst [vmem:[#allocation163_spill] sm:$0xff] %v12096_v42  ;;  %7964 = vmatmul.msk.f32.gmra.mxu1 %vm2358_vm6, %v4117_v57  ;;  %7980 = vmatmul.msk.f32.gmra.mxu3 %vm2358_vm6, %v4133_v63  ;;  %v12104_v47 = vpop.permute.xlu2 %4675  ;;  %v16045_v57 = vld [vmem:[#allocation79_spill] sm:$0xff]  ;;  %v4006_v7 = vsel %vm2184_vm2, %v3974_v13, %v16046_v26  ;;  %v16047_v44 = vld [vmem:[#allocation184_spill] sm:$0xff]  ;;  %v16050_v13 = vld [vmem:[#allocation21_spill] sm:$0xff] }
 0x656   : > { %16040 = vst [vmem:[#allocation16_spill] sm:$0xff] %v12104_v47  ;;  %v3990_v63 = vsel %vm2184_vm2, %v3958_v25, %v16045_v57  ;;  %v16048_v30 = vld [vmem:[#allocation188_spill] sm:$0xff]  ;;  %v16098_v57 = vld [vmem:[#allocation117_spill] sm:$0xff] }
 0x657   : > { %v4022_v52 = vsel %vm2217_vm1, %v3990_v63, %v16047_v44  ;;  %v4038_v20 = vsel %vm2217_vm1, %v4006_v7, %v16048_v30  ;;  %v8150_v7 = vld [vmem:[#allocation3 + $0xa8] sm:$0xff] }
 0x658   : > { %v4054_v56 = vsel %vm2250_vm3, %v4022_v52, %v11445_v24  ;;  %v4070_v10 = vsel %vm2250_vm3, %v4038_v20, %v11519_v2  ;;  %v8151_v63 = vld [vmem:[#allocation3 + $0x168] sm:$0xff] }
 0x659   : > { %4803 = vrot.lane.b32.xlu1 %v12110_v37, %s8289_s11  ;;  %v4086_v54 = vsel %vm2283_vm5, %v4054_v56, %v11537_v22  ;;  %v4102_v25 = vsel %vm2283_vm5, %v4070_v10, %v11645_v61  ;;  %v3895_v22 = vsel %vm307_vm0, %v8150_v7, %v16050_v13  ;;  %v16051_v44 = vld [vmem:[#allocation121_spill] sm:$0xff]  ;;  %v12162_v10 = vld [vmem:[#allocation3 + $0xf5] sm:$0xff] }
 0x65a   : > { %4813 = vrot.lane.b32.xlu0 %v12116_v17, %s8289_s11  ;;  %v4118_v24 = vsel %vm2316_vm4, %v4086_v54, %v11795_v4  ;;  %v4134_v2 = vsel %vm2316_vm4, %v4102_v25, %v11831_v45  ;;  %v3911_v61 = vsel %vm307_vm0, %v8151_v63, %v16051_v44  ;;  %v16053_v4 = vld [vmem:[#allocation13_spill] sm:$0xff]  ;;  %v16054_v45 = vld [vmem:[#allocation91_spill] sm:$0xff]  ;;  %v16055_v54 = vld [vmem:[#allocation66_spill] sm:$0xff] }
 0x65b   : > { %v12140_v1 = vpop.permute.xlu1 %4655  ;;  %4811 = vrot.lane.b32.xlu2 %v12122_v5, %s8289_s11  ;;  %v3927_v30 = vsel %vm2118_vm11, %v3895_v22, %v16053_v4  ;;  %v3943_v56 = vsel %vm2118_vm11, %v3911_v61, %v16054_v45  ;;  %v16056_v7 = vld [vmem:[#allocation59_spill] sm:$0xff]  ;;  %v12168_v63 = vld [vmem:[#allocation3 + $0x12d] sm:$0xff]  ;;  %v12174_v22 = vld [vmem:[#allocation3 + $0x125] sm:$0xff] }
 0x65c   : > { %v12148_v20 = vpop.permute.xlu0 %4665  ;;  %v3959_v25 = vsel %vm2151_vm15, %v3927_v30, %v16055_v54  ;;  %v3975_v13 = vsel %vm2151_vm15, %v3943_v56, %v16056_v7  ;;  %v16058_v44 = vld [vmem:[#allocation145_spill] sm:$0xff]  ;;  %v16059_v4 = vld [vmem:[#allocation34_spill] sm:$0xff]  ;;  %v16060_v30 = vld [vmem:[#allocation196_spill] sm:$0xff] }
 0x65d   : > { %16049 = vst [vmem:[#allocation174_spill] sm:$0xff] %v12148_v20  ;;  %7965 = vmatmul.msk.f32.gmra.mxu1 %vm2358_vm6, %v4118_v24  ;;  %7981 = vmatmul.msk.f32.gmra.mxu3 %vm2358_vm6, %v4134_v2  ;;  %v12156_v52 = vpop.permute.xlu2 %4681  ;;  %v16057_v24 = vld [vmem:[#allocation23_spill] sm:$0xff]  ;;  %v4007_v26 = vsel %vm2184_vm2, %v3975_v13, %v16058_v44  ;;  %v16061_v54 = vld [vmem:[#allocation200_spill] sm:$0xff]  ;;  %v16062_v7 = vld [vmem:[#allocation206_spill] sm:$0xff] }
 0x65e   : > { %16052 = vst [vmem:[#allocation62_spill] sm:$0xff] %v12156_v52  ;;  %v3991_v2 = vsel %vm2184_vm2, %v3959_v25, %v16057_v24  ;;  %v4039_v45 = vsel %vm2217_vm1, %v4007_v26, %v11385_v16  ;;  %v16063_v44 = vld [vmem:[#allocation215_spill] sm:$0xff]  ;;  %v16097_v24 = vld [vmem:[#allocation30_spill] sm:$0xff] }
 0x65f   : > { %v4023_v61 = vsel %vm2217_vm1, %v3991_v2, %v16059_v4  ;;  %v4071_v25 = vsel %vm2250_vm3, %v4039_v45, %v16061_v54  ;;  %v8152_v45 = vld [vmem:[#allocation3 + $0xb0] sm:$0xff]  ;;  %v4372_v20 = vld [vmem:[#allocation3 + $0xd9] sm:$0xff] }
 0x660   : > { %v4055_v56 = vsel %vm2250_vm3, %v4023_v61, %v16060_v30  ;;  %v4103_v2 = vsel %vm2283_vm5, %v4071_v25, %v16063_v44  ;;  %v16066_v30 = vld [vmem:[#allocation131_spill] sm:$0xff]  ;;  %v8153_v54 = vld [vmem:[#allocation3 + $0x170] sm:$0xff] }
 0x661   : > { %4809 = vrot.lane.b32.xlu1 %v12162_v10, %s8289_s11  ;;  %v4087_v13 = vsel %vm2283_vm5, %v4055_v56, %v16062_v7  ;;  %v4135_v26 = vsel %vm2316_vm4, %v4103_v2, %v11943_v29  ;;  %v3896_v56 = vsel %vm307_vm0, %v8152_v45, %v16066_v30  ;;  %v16067_v7 = vld [vmem:[#allocation97_spill] sm:$0xff]  ;;  %v16070_v29 = vld [vmem:[#allocation138_spill] sm:$0xff] }
 0x662   : > { %4819 = vrot.lane.b32.xlu0 %v12168_v63, %s8289_s11  ;;  %v4119_v16 = vsel %vm2316_vm4, %v4087_v13, %v11705_v19  ;;  %v3912_v44 = vsel %vm307_vm0, %v8153_v54, %v16067_v7  ;;  %v16069_v19 = vld [vmem:[#allocation158_spill] sm:$0xff]  ;;  %v16072_v30 = vld [vmem:[#allocation29_spill] sm:$0xff] }
 0x663   : > { %v12192_v4 = vpop.permute.xlu1 %4661  ;;  %4817 = vrot.lane.b32.xlu2 %v12174_v22, %s8289_s11  ;;  %v3928_v13 = vsel %vm2118_vm11, %v3896_v56, %v16069_v19  ;;  %v3944_v2 = vsel %vm2118_vm11, %v3912_v44, %v16070_v29  ;;  %v12220_v7 = vld [vmem:[#allocation3 + $0x155] sm:$0xff]  ;;  %v12226_v56 = vld [vmem:[#allocation3 + $0x145] sm:$0xff] }
 0x664   : > { %16064 = vst [vmem:[#allocation134_spill] sm:$0xff] %v12192_v4  ;;  %v12200_v61 = vpop.permute.xlu0 %4671  ;;  %v3960_v45 = vsel %vm2151_vm15, %v3928_v13, %v16071_v33  ;;  %v3976_v54 = vsel %vm2151_vm15, %v3944_v2, %v16072_v30  ;;  %v16075_v19 = vld [vmem:[#allocation182_spill] sm:$0xff]  ;;  %v16076_v29 = vld [vmem:[#allocation191_spill] sm:$0xff]  ;;  %v16077_v33 = vld [vmem:[#allocation192_spill] sm:$0xff] }
 0x665   : > { %16065 = vst [vmem:[#allocation31_spill] sm:$0xff] %v12200_v61  ;;  %7966 = vmatmul.msk.f32.gmra.mxu1 %vm2358_vm6, %v4119_v16  ;;  %7982 = vmatmul.msk.f32.gmra.mxu3 %vm2358_vm6, %v4135_v26  ;;  %v12208_v25 = vpop.permute.xlu2 %4687  ;;  %v16073_v16 = vld [vmem:[#allocation150_spill] sm:$0xff]  ;;  %v16078_v2 = vld [vmem:[#allocation203_spill] sm:$0xff]  ;;  %v16079_v30 = vld [vmem:[#allocation209_spill] sm:$0xff] }
 0x666   : > { %16068 = vst [vmem:[#allocation43_spill] sm:$0xff] %v12208_v25  ;;  %v3992_v26 = vsel %vm2184_vm2, %v3960_v45, %v16073_v16  ;;  %v16074_v25 = vld [vmem:[#allocation118_spill] sm:$0xff]  ;;  %v16096_v16 = vld [vmem:[#allocation95_spill] sm:$0xff] }
 0x667   : > { %v4008_v52 = vsel %vm2184_vm2, %v3976_v54, %v16074_v25  ;;  %v4024_v44 = vsel %vm2217_vm1, %v3992_v26, %v16075_v19  ;;  %v16080_v25 = vld [vmem:[#allocation213_spill] sm:$0xff] }
 0x668   : > { %v4040_v47 = vsel %vm2217_vm1, %v4008_v52, %v16076_v29  ;;  %v4056_v13 = vsel %vm2250_vm3, %v4024_v44, %v16077_v33  ;;  %v8154_v29 = vld [vmem:[#allocation3 + $0xc0] sm:$0xff]  ;;  %v16083_v33 = vld [vmem:[#allocation67_spill] sm:$0xff] }
 0x669   : > { %4815 = vrot.lane.b32.xlu1 %v12214_v6, %s8289_s11  ;;  %v4072_v45 = vsel %vm2250_vm3, %v4040_v47, %v16078_v2  ;;  %v4088_v54 = vsel %vm2283_vm5, %v4056_v13, %v16079_v30  ;;  %v3897_v13 = vsel %vm307_vm0, %v8154_v29, %v16083_v33  ;;  %v16085_v2 = vld [vmem:[#allocation100_spill] sm:$0xff] }
 0x66a   : > { %4825 = vrot.lane.b32.xlu0 %v12220_v7, %s8289_s11  ;;  %v4104_v26 = vsel %vm2283_vm5, %v4072_v45, %v16080_v25  ;;  %v4120_v52 = vsel %vm2316_vm4, %v4088_v54, %v11774_v62  ;;  %v3929_v45 = vsel %vm2118_vm11, %v3897_v13, %v16085_v2  ;;  %v12262_v30 = vld [vmem:[#allocation3 + $0x13d] sm:$0xff]  ;;  %v16086_v62 = vld [vmem:[#allocation177_spill] sm:$0xff]  ;;  %v12266_v54 = vld [vmem:[#allocation3 + $0x175] sm:$0xff] }
 0x66b   : > { %v12244_v19 = vpop.permute.xlu1 %4667  ;;  %4823 = vrot.lane.b32.xlu2 %v12226_v56, %s8289_s11  ;;  %v4136_v47 = vsel %vm2316_vm4, %v4104_v26, %v12037_v31  ;;  %v3961_v31 = vsel %vm2151_vm15, %v3929_v45, %v16086_v62  ;;  %v16087_v26 = vld [vmem:[#allocation32_spill] sm:$0xff]  ;;  %v12270_v29 = vpop.f32.mrf.mxu1  ;;  %v16090_v13 = vld [vmem:[#allocation195_spill] sm:$0xff] }
 0x66c   : > { %16081 = vst [vmem:[#allocation57_spill] sm:$0xff] %v12244_v19  ;;  %v12252_v44 = vpop.permute.xlu0 %4677  ;;  %v16091_v45 = vld [vmem:[#allocation204_spill] sm:$0xff] }
 0x66d   : > { %16082 = vst [vmem:[#allocation76_spill] sm:$0xff] %v12252_v44  ;;  %7967 = vmatmul.msk.f32.gmra.mxu1 %vm2358_vm6, %v4120_v52  ;;  %7983 = vmatmul.msk.f32.gmra.mxu3 %vm2358_vm6, %v4136_v47  ;;  %v12258_v25 = vpop.permute.xlu2 %4693  ;;  %v3993_v44 = vsel %vm2184_vm2, %v3961_v31, %v16087_v26  ;;  %v12272_v52 = vld [vmem:[#allocation3 + $0x16d] sm:$0xff]  ;;  %v16094_v26 = vld [vmem:[#allocation71_spill] sm:$0xff] }
 0x66e   : > { %16084 = vst [vmem:[#allocation157_spill] sm:$0xff] %v12258_v25  ;;  %v16089_v47 = vld [vmem:[#allocation186_spill] sm:$0xff]  ;;  %v8155_v25 = vld [vmem:[#allocation3 + $0xc8] sm:$0xff] }
 0x66f   : > { %16088 = vst [vmem:[#allocation132_spill] sm:$0xff] %v12270_v29  ;;  %v4025_v33 = vsel %vm2217_vm1, %v3993_v44, %v16089_v47 }
 0x670   : > { %v4057_v2 = vsel %vm2250_vm3, %v4025_v33, %v16090_v13  ;;  %v3898_v33 = vsel %vm307_vm0, %v8155_v25, %v16094_v26  ;;  %v4360_v26 = vld [vmem:[#allocation3 + $0x49] sm:$0xff] }
 0x671   : > { %4821 = vrot.lane.b32.xlu1 %v12262_v30, %s8289_s11  ;;  %v4089_v62 = vsel %vm2283_vm5, %v4057_v2, %v16091_v45  ;;  %v3930_v2 = vsel %vm2118_vm11, %v3898_v33, %v16096_v16  ;;  %v12299_v45 = vld [vmem:[#allocation3 + $0x15d] sm:$0xff] }
 0x672   : > { %4831 = vrot.lane.b32.xlu0 %v12266_v54, %s8289_s11  ;;  %v4121_v44 = vsel %vm2316_vm4, %v4089_v62, %v11821_v12  ;;  %v12305_v62 = vld [vmem:[#allocation3 + $0x18d] sm:$0xff] }
 0x673   : > { %v12284_v31 = vpop.permute.xlu1 %4673  ;;  %4829 = vrot.lane.b32.xlu2 %v12272_v52, %s8289_s11 }
 0x674   : > { %16092 = vst [vmem:[#allocation48_spill] sm:$0xff] %v12284_v31  ;;  %v12290_v47 = vpop.permute.xlu0 %4683  ;;  %v3962_v31 = vsel %vm2151_vm15, %v3930_v2, %v16097_v24  ;;  %v16102_v24 = vld [vmem:[#allocation208_spill] sm:$0xff] }
 0x675   : > { %16093 = vst [vmem:[#allocation89_spill] sm:$0xff] %v12290_v47  ;;  %7968 = vmatmul.msk.f32.gmra.mxu1 %vm2358_vm6, %v4121_v44  ;;  %v12295_v13 = vpop.permute.xlu2 %4699  ;;  %v3994_v12 = vsel %vm2184_vm2, %v3962_v31, %v16098_v57  ;;  %v16099_v47 = vld [vmem:[#allocation169_spill] sm:$0xff]  ;;  %v16100_v44 = vld [vmem:[#allocation198_spill] sm:$0xff] }
 0x676   : > { %16095 = vst [vmem:[#allocation98_spill] sm:$0xff] %v12295_v13  ;;  %v4026_v25 = vsel %vm2217_vm1, %v3994_v12, %v16099_v47  ;;  %v8156_v13 = vld [vmem:[#allocation3 + $0xd8] sm:$0xff]  ;;  %v16105_v57 = vld [vmem:[#allocation18_spill] sm:$0xff] }
 0x677   : > { %v4058_v16 = vsel %vm2250_vm3, %v4026_v25, %v16100_v44  ;;  %v3899_v25 = vsel %vm307_vm0, %v8156_v13, %v16105_v57  ;;  %v16107_v44 = vld [vmem:[#allocation56_spill] sm:$0xff]  ;;  %v16111_v57 = vld [vmem:[#allocation193_spill] sm:$0xff] }
 0x678   : > { %v4090_v2 = vsel %vm2283_vm5, %v4058_v16, %v16102_v24  ;;  %v3931_v16 = vsel %vm2118_vm11, %v3899_v25, %v16107_v44  ;;  %v12333_v24 = vld [vmem:[#allocation3 + $0x185] sm:$0xff]  ;;  %v16113_v44 = vld [vmem:[#allocation211_spill] sm:$0xff] }
 0x679   : > { %4827 = vrot.lane.b32.xlu1 %v12299_v45, %s8289_s11  ;;  %v4122_v47 = vsel %vm2316_vm4, %v4090_v2, %v11729_v39  ;;  %v16110_v2 = vld [vmem:[#allocation185_spill] sm:$0xff] }
 0x67a   : > { %v12313_v33 = vpop.f32.mrf.mxu1  ;;  %4901 = vrot.lane.b32.xlu0 %v4360_v26, %s8290_s12 }
 0x67b   : > { %16101 = vst [vmem:[#allocation99_spill] sm:$0xff] %v12313_v33  ;;  %v12318_v31 = vpop.permute.xlu1 %4679  ;;  %4835 = vrot.lane.b32.xlu2 %v12305_v62, %s8289_s11 }
 0x67c   : > { %16103 = vst [vmem:[#allocation42_spill] sm:$0xff] %v12318_v31  ;;  %v12324_v12 = vpop.permute.xlu0 %4689  ;;  %v16108_v31 = vld [vmem:[#allocation114_spill] sm:$0xff] }
 0x67d   : > { %16104 = vst [vmem:[#allocation172_spill] sm:$0xff] %v12324_v12  ;;  %7969 = vmatmul.msk.f32.gmra.mxu1 %vm2358_vm6, %v4122_v47  ;;  %v12329_v26 = vpop.permute.xlu2 %4705  ;;  %v3963_v61 = vsel %vm2151_vm15, %v3931_v16, %v16108_v31  ;;  %v4362_v47 = vld [vmem:[#allocation3 + $0x61] sm:$0xff] }
 0x67e   : > { %16106 = vst [vmem:[#allocation93_spill] sm:$0xff] %v12329_v26  ;;  %v3995_v39 = vsel %vm2184_vm2, %v3963_v61, %v16109_v3  ;;  %v16116_v26 = vld [vmem:[#allocation15_spill] sm:$0xff] }
 0x67f   : > { %v4027_v12 = vsel %vm2217_vm1, %v3995_v39, %v16110_v2  ;;  %v8157_v2 = vld [vmem:[#allocation3 + $0xe0] sm:$0xff] }
 0x680   : > { %v4059_v13 = vsel %vm2250_vm3, %v4027_v12, %v16111_v57  ;;  %v3900_v12 = vsel %vm307_vm0, %v8157_v2, %v16116_v26  ;;  %v16121_v26 = vld [vmem:[#allocation197_spill] sm:$0xff] }
 0x681   : > { %4833 = vrot.lane.b32.xlu1 %v12333_v24, %s8289_s11  ;;  %v4091_v31 = vsel %vm2283_vm5, %v4059_v13, %v16113_v44  ;;  %v16118_v44 = vld [vmem:[#allocation90_spill] sm:$0xff]  ;;  %v4365_v2 = vld [vmem:[#allocation3 + $0x81] sm:$0xff] }
 0x682   : > { %v12345_v25 = vpop.f32.mrf.mxu1  ;;  %4907 = vrot.lane.b32.xlu0 %v4363_v36, %s8290_s12  ;;  %v4123_v61 = vsel %vm2316_vm4, %v4091_v31, %v11800_v59  ;;  %v16117_v36 = vld [vmem:[#allocation120_spill] sm:$0xff]  ;;  %v4361_v59 = vld [vmem:[#allocation3 + $0x51] sm:$0xff]  ;;  %v16120_v31 = vld [vmem:[#allocation189_spill] sm:$0xff] }
 0x683   : > { %16112 = vst [vmem:[#allocation106_spill] sm:$0xff] %v12345_v25  ;;  %v12350_v16 = vpop.permute.xlu1 %4685  ;;  %4905 = vrot.lane.b32.xlu2 %v4362_v47, %s8290_s12  ;;  %v3932_v13 = vsel %vm2118_vm11, %v3900_v12, %v16117_v36  ;;  %v16119_v47 = vld [vmem:[#allocation36_spill] sm:$0xff]  ;;  %v16123_v12 = vld [vmem:[#allocation205_spill] sm:$0xff] }
 0x684   : > { %16114 = vst [vmem:[#allocation14_spill] sm:$0xff] %v12350_v16  ;;  %v12355_v39 = vpop.permute.xlu0 %4695  ;;  %v3964_v16 = vsel %vm2151_vm15, %v3932_v13, %v16118_v44  ;;  %v8158_v44 = vld [vmem:[#allocation3 + $0xf0] sm:$0xff] }
 0x685   : > { %16115 = vst [vmem:[#allocation33_spill] sm:$0xff] %v12355_v39  ;;  %7970 = vmatmul.msk.f32.gmra.mxu1 %vm2358_vm6, %v4123_v61  ;;  %v12360_v57 = vpop.permute.xlu2 %4775  ;;  %v3996_v3 = vsel %vm2184_vm2, %v3964_v16, %v16119_v47  ;;  %v4369_v47 = vld [vmem:[#allocation3 + $0xb1] sm:$0xff] }
 0x686   : > { %v4028_v39 = vsel %vm2217_vm1, %v3996_v3, %v16120_v31 }
 0x687   : > { %v4060_v61 = vsel %vm2250_vm3, %v4028_v39, %v16121_v26 }
 0x688   : > { %v4092_v36 = vsel %vm2283_vm5, %v4060_v61, %v16123_v12  ;;  %v16128_v61 = vld [vmem:[#allocation135_spill] sm:$0xff] }
 0x689   : > { %4903 = vrot.lane.b32.xlu1 %v4361_v59, %s8290_s12  ;;  %v4124_v3 = vsel %vm2316_vm4, %v4092_v36, %v11859_v27  ;;  %v16126_v59 = vld [vmem:[#allocation139_spill] sm:$0xff]  ;;  %v16130_v36 = vld [vmem:[#allocation180_spill] sm:$0xff] }
 0x68a   : > { %v12373_v19 = vpop.f32.mrf.mxu1  ;;  %4913 = vrot.lane.b32.xlu0 %v4366_v46, %s8290_s12  ;;  %v3901_v39 = vsel %vm307_vm0, %v8158_v44, %v16126_v59  ;;  %v16127_v46 = vld [vmem:[#allocation70_spill] sm:$0xff]  ;;  %v4364_v27 = vld [vmem:[#allocation3 + $0x79] sm:$0xff]  ;;  %v16131_v44 = vld [vmem:[#allocation201_spill] sm:$0xff] }
 0x68b   : > { %16122 = vst [vmem:[#allocation113_spill] sm:$0xff] %v12373_v19  ;;  %v12378_v13 = vpop.permute.xlu1 %4691  ;;  %4911 = vrot.lane.b32.xlu2 %v4365_v2, %s8290_s12  ;;  %v3933_v26 = vsel %vm2118_vm11, %v3901_v39, %v16127_v46  ;;  %v16129_v2 = vld [vmem:[#allocation166_spill] sm:$0xff]  ;;  %v6237_v42 = vsel %vm307_vm0, %v12373_v19, 0.0 }
 0x68c   : > { %16124 = vst [vmem:[#allocation133_spill] sm:$0xff] %v12378_v13  ;;  %v12383_v16 = vpop.permute.xlu0 %4701  ;;  %v3965_v12 = vsel %vm2151_vm15, %v3933_v26, %v16128_v61  ;;  %v4368_v59 = vld [vmem:[#allocation3 + $0xa9] sm:$0xff]  ;;  %v16135_v61 = vld [vmem:[#allocation12_spill] sm:$0xff] }
 0x68d   : > { %16125 = vst [vmem:[#allocation52_spill] sm:$0xff] %v12383_v16  ;;  %7971 = vmatmul.msk.f32.gmra.mxu1 %vm2358_vm6, %v4124_v3  ;;  %v12388_v31 = vpop.permute.xlu2 %4781  ;;  %v3997_v13 = vsel %vm2184_vm2, %v3965_v12, %v16129_v2  ;;  %v16133_v39 = vld [vmem:[#allocation210_spill] sm:$0xff] }
 0x68e   : > { %v4029_v16 = vsel %vm2217_vm1, %v3997_v13, %v16130_v36  ;;  %v16137_v36 = vld [vmem:[#allocation60_spill] sm:$0xff] }
 0x68f   : > { %v4061_v3 = vsel %vm2250_vm3, %v4029_v16, %v16131_v44 }
 0x690   : > { %v4093_v46 = vsel %vm2283_vm5, %v4061_v3, %v16133_v39  ;;  %v16140_v39 = vld [vmem:[#allocation144_spill] sm:$0xff] }
 0x691   : > { %4909 = vrot.lane.b32.xlu1 %v4364_v27, %s8290_s12  ;;  %v4125_v13 = vsel %vm2316_vm4, %v4093_v46, %v16135_v61  ;;  %v8159_v27 = vld [vmem:[#allocation3 + $0xf8] sm:$0xff] }
 0x692   : > { %v12401_v49 = vpop.f32.mrf.mxu1  ;;  %4919 = vrot.lane.b32.xlu0 %v4369_v47, %s8290_s12  ;;  %v3902_v16 = vsel %vm307_vm0, %v8159_v27, %v16137_v36  ;;  %v16139_v47 = vld [vmem:[#allocation104_spill] sm:$0xff]  ;;  %v16142_v61 = vld [vmem:[#allocation187_spill] sm:$0xff]  ;;  %v16143_v27 = vld [vmem:[#allocation194_spill] sm:$0xff] }
 0x693   : > { %16132 = vst [vmem:[#allocation26_spill] sm:$0xff] %v12401_v49  ;;  %v12406_v26 = vpop.permute.xlu1 %4697  ;;  %4917 = vrot.lane.b32.xlu2 %v4368_v59, %s8290_s12  ;;  %v3934_v3 = vsel %vm2118_vm11, %v3902_v16, %v16139_v47  ;;  %v16141_v59 = vld [vmem:[#allocation124_spill] sm:$0xff]  ;;  %v4371_v36 = vld [vmem:[#allocation3 + $0xc9] sm:$0xff] }
 0x694   : > { %16134 = vst [vmem:[#allocation178_spill] sm:$0xff] %v12406_v26  ;;  %v12411_v12 = vpop.permute.xlu0 %4707  ;;  %v3966_v26 = vsel %vm2151_vm15, %v3934_v3, %v16140_v39  ;;  %v4367_v46 = vld [vmem:[#allocation3 + $0x99] sm:$0xff]  ;;  %v16145_v16 = vld [vmem:[#allocation214_spill] sm:$0xff] }
 0x695   : > { %16136 = vst [vmem:[#allocation9_spill] sm:$0xff] %v12411_v12  ;;  %7972 = vmatmul.msk.f32.gmra.mxu1 %vm2358_vm6, %v4125_v13  ;;  %v12416_v44 = vpop.permute.xlu2 %4787  ;;  %v3998_v2 = vsel %vm2184_vm2, %v3966_v26, %v16141_v59  ;;  %v16147_v26 = vld [vmem:[#allocation119_spill] sm:$0xff] }
 0x696   : > { %16138 = vst [vmem:[#allocation20_spill] sm:$0xff] %v12416_v44  ;;  %v4030_v12 = vsel %vm2217_vm1, %v3998_v2, %v16142_v61  ;;  %v16148_v61 = vld [vmem:[#allocation65_spill] sm:$0xff] }
 0x697   : > { %v4062_v13 = vsel %vm2250_vm3, %v4030_v12, %v16143_v27 }
 0x698   : > { %v4094_v47 = vsel %vm2283_vm5, %v4062_v13, %v16145_v16  ;;  %v16151_v16 = vld [vmem:[#allocation54_spill] sm:$0xff] }
 0x699   : > { %4915 = vrot.lane.b32.xlu1 %v4367_v46, %s8290_s12  ;;  %v4126_v2 = vsel %vm2316_vm4, %v4094_v47, %v16147_v26  ;;  %v8160_v46 = vld [vmem:[#allocation3 + $0x108] sm:$0xff]  ;;  %v16153_v26 = vld [vmem:[#allocation190_spill] sm:$0xff] }
 0x69a   : > { %v12429_v58 = vpop.f32.mrf.mxu1  ;;  %4925 = vrot.lane.b32.xlu0 %v4372_v20, %s8290_s12  ;;  %v3903_v12 = vsel %vm307_vm0, %v8160_v46, %v16148_v61  ;;  %v16150_v20 = vld [vmem:[#allocation151_spill] sm:$0xff]  ;;  %v4370_v47 = vld [vmem:[#allocation3 + $0xc1] sm:$0xff] }
 0x69b   : > { %16144 = vst [vmem:[#allocation74_spill] sm:$0xff] %v12429_v58  ;;  %v12434_v3 = vpop.permute.xlu1 %4703  ;;  %4923 = vrot.lane.b32.xlu2 %v4371_v36, %s8290_s12  ;;  %v3935_v13 = vsel %vm2118_vm11, %v3903_v12, %v16150_v20  ;;  %v16152_v36 = vld [vmem:[#allocation86_spill] sm:$0xff]  ;;  %v16154_v46 = vld [vmem:[#allocation199_spill] sm:$0xff] }
 0x69c   : > { %16146 = vst [vmem:[#allocation128_spill] sm:$0xff] %v12434_v3  ;;  %v12439_v39 = vpop.permute.xlu0 %4777  ;;  %v3967_v3 = vsel %vm2151_vm15, %v3935_v13, %v16151_v16  ;;  %v4374_v61 = vld [vmem:[#allocation3 + $0xf1] sm:$0xff] }
 0x69d   : > { %7973 = vmatmul.msk.f32.gmra.mxu1 %vm2358_vm6, %v4126_v2  ;;  %v12444_v27 = vpop.permute.xlu2 %4793  ;;  %v3999_v59 = vsel %vm2184_vm2, %v3967_v3, %v16152_v36  ;;  %v16156_v12 = vld [vmem:[#allocation207_spill] sm:$0xff]  ;;  %v8161_v16 = vld [vmem:[#allocation3 + $0x110] sm:$0xff] }
 0x69e   : > { %16149 = vst [vmem:[#allocation53_spill] sm:$0xff] %v12444_v27  ;;  %v4031_v11 = vsel %vm2217_vm1, %v3999_v59, %v16153_v26 }
 0x69f   : > { %v4063_v2 = vsel %vm2250_vm3, %v4031_v11, %v16154_v46 }
 0x6a0   : > { %v4095_v20 = vsel %vm2283_vm5, %v4063_v2, %v16156_v12  ;;  %v16160_v2 = vld [vmem:[#allocation168_spill] sm:$0xff] }
 0x6a1   : > { %4921 = vrot.lane.b32.xlu1 %v4370_v47, %s8290_s12  ;;  %v4127_v59 = vsel %vm2316_vm4, %v4095_v20, %v11892_v21  ;;  %v16157_v47 = vld [vmem:[#allocation58_spill] sm:$0xff]  ;;  %v4373_v21 = vld [vmem:[#allocation3 + $0xe1] sm:$0xff]  ;;  %v16162_v20 = vld [vmem:[#allocation183_spill] sm:$0xff] }
 0x6a2   : > { %v12457_v27 = vpop.f32.mrf.mxu1  ;;  %4931 = vrot.lane.b32.xlu0 %v4375_v15, %s8290_s12  ;;  %v3904_v11 = vsel %vm307_vm0, %v8161_v16, %v16157_v47  ;;  %v16159_v15 = vld [vmem:[#allocation161_spill] sm:$0xff]  ;;  %v16163_v16 = vld [vmem:[#allocation202_spill] sm:$0xff] }
 0x6a3   : > { %16155 = vst [vmem:[#allocation44_spill] sm:$0xff] %v12457_v27  ;;  %v12462_v13 = vpop.permute.xlu1 %4773  ;;  %4929 = vrot.lane.b32.xlu2 %v4374_v61, %s8290_s12  ;;  %v3936_v46 = vsel %vm2118_vm11, %v3904_v11, %v16159_v15  ;;  %v16161_v61 = vld [vmem:[#allocation108_spill] sm:$0xff]  ;;  %v4377_v47 = vld [vmem:[#allocation3 + $0x111] sm:$0xff] }
 0x6a4   : > { %v12467_v3 = vpop.permute.xlu0 %4783  ;;  %v3968_v12 = vsel %vm2151_vm15, %v3936_v46, %v16160_v2  ;;  %v16165_v11 = vld [vmem:[#allocation212_spill] sm:$0xff]  ;;  %v16166_v2 = vld [vmem:[#allocation167_spill] sm:$0xff] }
 0x6a5   : > { %7974 = vmatmul.msk.f32.gmra.mxu1 %vm2358_vm6, %v4127_v59  ;;  %v12472_v26 = vpop.permute.xlu2 %4799  ;;  %v4000_v36 = vsel %vm2184_vm2, %v3968_v12, %v16161_v61 }
 0x6a6   : > { %16158 = vst [vmem:[#allocation82_spill] sm:$0xff] %v12472_v26  ;;  %v4032_v4 = vsel %vm2217_vm1, %v4000_v36, %v16162_v20  ;;  %v4381_v20 = vld [vmem:[#allocation3 + $0x141] sm:$0xff] }
 0x6a7   : > { %v4064_v59 = vsel %vm2250_vm3, %v4032_v4, %v16163_v16 }
 0x6a8   : > { %v4096_v15 = vsel %vm2283_vm5, %v4064_v59, %v16165_v11 }
 0x6a9   : > { %4927 = vrot.lane.b32.xlu1 %v4373_v21, %s8290_s12  ;;  %v4128_v36 = vsel %vm2316_vm4, %v4096_v15, %v16166_v2  ;;  %v4376_v21 = vld [vmem:[#allocation3 + $0x109] sm:$0xff] }
 0x6aa   : > { %v12485_v26 = vpop.f32.mrf.mxu1  ;;  %4937 = vrot.lane.b32.xlu0 %v4378_v40, %s8290_s12  ;;  %v4380_v40 = vld [vmem:[#allocation3 + $0x139] sm:$0xff]  ;;  %v4379_v15 = vld [vmem:[#allocation3 + $0x129] sm:$0xff] }
 0x6ab   : > { %16164 = vst [vmem:[#allocation72_spill] sm:$0xff] %v12485_v26  ;;  %v12490_v46 = vpop.permute.xlu1 %4779  ;;  %4935 = vrot.lane.b32.xlu2 %v4377_v47, %s8290_s12  ;;  %v4384_v2 = vld [vmem:[#allocation3 + $0x169] sm:$0xff] }
 0x6ac   : > { %v12495_v12 = vpop.permute.xlu0 %4789 }
 0x6ad   : > { %16167 = vst [vmem:[#allocation123_spill] sm:$0xff] %v12495_v12  ;;  %7975 = vmatmul.msk.f32.gmra.mxu1 %vm2358_vm6, %v4128_v36  ;;  %v12498_v4 = vpop.permute.xlu2 %4805  ;;  %v4383_v36 = vld [vmem:[#allocation3 + $0x159] sm:$0xff] }
 0x6ae   : > { %16168 = vst [vmem:[#allocation149_spill] sm:$0xff] %v12498_v4  ;;  %v4382_v4 = vld [vmem:[#allocation3 + $0x151] sm:$0xff] }
 0x6b1   : > { %4933 = vrot.lane.b32.xlu1 %v4376_v21, %s8290_s12 }
 0x6b2   : > { %v12501_v16 = vpop.f32.mrf.mxu1  ;;  %4943 = vrot.lane.b32.xlu0 %v4381_v20, %s8290_s12 }
 0x6b3   : > { %16169 = vst [vmem:[#allocation153_spill] sm:$0xff] %v12501_v16  ;;  %v12504_v59 = vpop.permute.xlu1 %4785  ;;  %4941 = vrot.lane.b32.xlu2 %v4380_v40, %s8290_s12 }
 0x6b4   : > { %v12507_v47 = vpop.permute.xlu0 %4795 }
 0x6b5   : > { %16170 = vst [vmem:[#allocation17_spill] sm:$0xff] %v12507_v47  ;;  %v12509_v11 = vpop.permute.xlu2 %4811  ;;  %v4387_v47 = vld [vmem:[#allocation3 + $0x189] sm:$0xff] }
 0x6b6   : > { %16171 = vst [vmem:[#allocation143_spill] sm:$0xff] %v12509_v11  ;;  %v4386_v11 = vld [vmem:[#allocation3 + $0x181] sm:$0xff] }
 0x6b9   : > { %4939 = vrot.lane.b32.xlu1 %v4379_v15, %s8290_s12 }
 0x6ba   : > { %v12512_v61 = vpop.f32.mrf.mxu1  ;;  %4949 = vrot.lane.b32.xlu0 %v4384_v2, %s8290_s12 }
 0x6bb   : > { %16172 = vst [vmem:[#allocation141_spill] sm:$0xff] %v12512_v61  ;;  %v12515_v21 = vpop.permute.xlu1 %4791  ;;  %4947 = vrot.lane.b32.xlu2 %v4383_v36, %s8290_s12 }
 0x6bc   : > { %16173 = vst [vmem:[#allocation63_spill] sm:$0xff] %v12515_v21  ;;  %v12518_v20 = vpop.permute.xlu0 %4801  ;;  %v4385_v21 = vld [vmem:[#allocation3 + $0x171] sm:$0xff] }
 0x6bd   : > { %16174 = vst [vmem:[#allocation112_spill] sm:$0xff] %v12518_v20  ;;  %v12520_v40 = vpop.permute.xlu2 %4817  ;;  %v4482_v20 = vld [vmem:[#allocation3 + $0x1b1] sm:$0xff] }
 0x6be   : > { %16175 = vst [vmem:[#allocation94_spill] sm:$0xff] %v12520_v40  ;;  %v4481_v40 = vld [vmem:[#allocation3 + $0x1a1] sm:$0xff] }
 0x6c1   : > { %4945 = vrot.lane.b32.xlu1 %v4382_v4, %s8290_s12 }
 0x6c2   : > { %v12523_v12 = vpop.f32.mrf.mxu1  ;;  %4955 = vrot.lane.b32.xlu0 %v4387_v47, %s8290_s12 }
 0x6c3   : > { %16176 = vst [vmem:[#allocation181_spill] sm:$0xff] %v12523_v12  ;;  %v12526_v15 = vpop.permute.xlu1 %4797  ;;  %4953 = vrot.lane.b32.xlu2 %v4386_v11, %s8290_s12 }
 0x6c4   : > { %16177 = vst [vmem:[#allocation78_spill] sm:$0xff] %v12526_v15  ;;  %v12529_v2 = vpop.permute.xlu0 %4807  ;;  %v6305_v15 = vmul.f32 %v12373_v19, %v12373_v19 }
 0x6c5   : > { %16178 = vst [vmem:[#allocation109_spill] sm:$0xff] %v12529_v2  ;;  %v12531_v36 = vpop.permute.xlu2 %4823  ;;  %v4480_v2 = vld [vmem:[#allocation3 + $0x199] sm:$0xff] }
 0x6c6   : > { %16179 = vst [vmem:[#allocation137_spill] sm:$0xff] %v12531_v36 }
 0x6c9   : > { %4951 = vrot.lane.b32.xlu1 %v4385_v21, %s8290_s12 }
 0x6ca   : > { %v12534_v44 = vpop.f32.mrf.mxu1  ;;  %4961 = vrot.lane.b32.xlu0 %v4482_v20, %s8290_s12 }
 0x6cb   : > { %16180 = vst [vmem:[#allocation165_spill] sm:$0xff] %v12534_v44  ;;  %v12537_v4 = vpop.permute.xlu1 %4803  ;;  %4959 = vrot.lane.b32.xlu2 %v4481_v40, %s8290_s12 }
 0x6cc   : > { %16181 = vst [vmem:[#allocation162_spill] sm:$0xff] %v12537_v4  ;;  %v12540_v47 = vpop.permute.xlu0 %4813 }
 0x6cd   : > { %16182 = vst [vmem:[#allocation102_spill] sm:$0xff] %v12540_v47  ;;  %v12542_v11 = vpop.permute.xlu2 %4829  ;;  %v4483_v47 = vld [vmem:[#allocation3 + $0x1b9] sm:$0xff] }
 0x6ce   : > { %16183 = vst [vmem:[#allocation27_spill] sm:$0xff] %v12542_v11 }
 0x6d1   : > { %4957 = vrot.lane.b32.xlu1 %v4480_v2, %s8290_s12 }
 0x6d2   : > { %v12545_v36 = vpop.f32.mrf.mxu1  ;;  %5031 = vrot.lane.b32.xlu0 %v11877_v28, %s8292_s14 }
 0x6d3   : > { %16184 = vst [vmem:[#allocation51_spill] sm:$0xff] %v12545_v36  ;;  %v12549_v21 = vpop.permute.xlu1 %4809  ;;  %5029 = vrot.lane.b32.xlu2 %v11881_v34, %s8292_s14 }
 0x6d4   : > { %16185 = vst [vmem:[#allocation148_spill] sm:$0xff] %v12549_v21  ;;  %v12553_v20 = vpop.permute.xlu0 %4819  ;;  %v6304_v21 = vmul.f32 %v12345_v25, %v12345_v25 }
 0x6d5   : > { %16186 = vst [vmem:[#allocation50_spill] sm:$0xff] %v12553_v20  ;;  %v12555_v40 = vpop.permute.xlu2 %4835 }
 0x6d6   : > { %16187 = vst [vmem:[#allocation24_spill] sm:$0xff] %v12555_v40 }
 0x6d9   : > { %4963 = vrot.lane.b32.xlu1 %v4483_v47, %s8290_s12 }
 0x6da   : > { %v12558_v11 = vpop.f32.mrf.mxu1  ;;  %5037 = vrot.lane.b32.xlu0 %v11915_v50, %s8292_s14 }
 0x6db   : > { %16188 = vst [vmem:[#allocation170_spill] sm:$0xff] %v12558_v11  ;;  %v12562_v2 = vpop.permute.xlu1 %4815  ;;  %5035 = vrot.lane.b32.xlu2 %v11921_v51, %s8292_s14 }
 0x6dc   : > { %16189 = vst [vmem:[#allocation37_spill] sm:$0xff] %v12562_v2  ;;  %v12566_v28 = vpop.permute.xlu0 %4825 }
 0x6dd   : > { %16190 = vst [vmem:[#allocation179_spill] sm:$0xff] %v12566_v28  ;;  %v12568_v34 = vpop.permute.xlu2 %4905  ;;  %v6233_v28 = vsel %vm307_vm0, %v12313_v33, 0.0 }
 0x6e1   : > { %5033 = vrot.lane.b32.xlu1 %v11957_v14, %s8292_s14 }
 0x6e2   : > { %v12572_v40 = vpop.f32.mrf.mxu1  ;;  %5043 = vrot.lane.b32.xlu0 %v11963_v9, %s8292_s14 }
 0x6e3   : > { %16191 = vst [vmem:[#allocation8_spill] sm:$0xff] %v12572_v40  ;;  %v12576_v47 = vpop.permute.xlu1 %4821  ;;  %5041 = vrot.lane.b32.xlu2 %v11969_v38, %s8292_s14 }
 0x6e4   : > { %16192 = vst [vmem:[#allocation68_spill] sm:$0xff] %v12576_v47  ;;  %v12580_v50 = vpop.permute.xlu0 %4831  ;;  %v6232_v47 = vsel %vm307_vm0, %v12270_v29, 0.0 }
 0x6e5   : > { %16193 = vst [vmem:[#allocation22_spill] sm:$0xff] %v12580_v50  ;;  %v12582_v51 = vpop.permute.xlu2 %4911  ;;  %v12598_v50 = vpop.f32.mrf.mxu3 }
 0x6e9   : > { %5039 = vrot.lane.b32.xlu1 %v12007_v23, %s8292_s14 }
 0x6ea   : > { %v12586_v20 = vpop.f32.mrf.mxu1  ;;  %5049 = vrot.lane.b32.xlu0 %v12013_v0, %s8292_s14 }
 0x6eb   : > { %v12590_v14 = vpop.permute.xlu1 %4827  ;;  %5047 = vrot.lane.b32.xlu2 %v12019_v48, %s8292_s14 }
 0x6ec   : > { %16194 = vst [vmem:[#allocation28_spill] sm:$0xff] %v12590_v14  ;;  %v12594_v9 = vpop.permute.xlu0 %4901 }
 0x6ed   : > { %v12596_v38 = vpop.permute.xlu2 %4917  ;;  %v12616_v2 = vpop.f32.mrf.mxu3 }
 0x6ee   : > { %16195 = vst [vmem:[#allocation129_spill] sm:$0xff] %v12596_v38 }
 0x6f1   : > { %5045 = vrot.lane.b32.xlu1 %v12059_v35, %s8292_s14 }
 0x6f2   : > { %v12602_v23 = vpop.f32.mrf.mxu1  ;;  %5055 = vrot.lane.b32.xlu0 %v12065_v43, %s8292_s14  ;;  %v6303_v43 = vmul.f32 %v12313_v33, %v12313_v33  ;;  %v6337_v33 = vsel %vm307_vm0, %v6304_v21, 0.0  ;;  %v6239_v21 = vsel %vm307_vm0, %v12401_v49, 0.0 }
 0x6f3   : > { %v12606_v0 = vpop.permute.xlu1 %4833  ;;  %5053 = vrot.lane.b32.xlu2 %v12071_v8, %s8292_s14 }
 0x6f4   : > { %16196 = vst [vmem:[#allocation173_spill] sm:$0xff] %v12606_v0  ;;  %v12610_v48 = vpop.permute.xlu0 %4907  ;;  %v6335_v4 = vsel %vm307_vm0, %v6303_v43, 0.0 }
 0x6f5   : > { %v12612_v14 = vpop.permute.xlu2 %4923 }
 0x6f6   : > { %16197 = vst [vmem:[#allocation184_spill] sm:$0xff] %v12612_v14  ;;  %v6234_v14 = vadd.f32 %v6233_v28, %v6232_v47  ;;  %v6339_v28 = vsel %vm307_vm0, %v6305_v15, 0.0  ;;  %v6307_v47 = vmul.f32 %v12429_v58, %v12429_v58  ;;  %v6241_v15 = vsel %vm307_vm0, %v12429_v58, 0.0 }
 0x6f7   : > { %v6245_v58 = vsel %vm307_vm0, %v12485_v26, 0.0 }
 0x6f9   : > { %5051 = vrot.lane.b32.xlu1 %v12110_v37, %s8292_s14  ;;  %v6302_v37 = vmul.f32 %v12270_v29, %v12270_v29 }
 0x6fa   : > { %v12618_v35 = vpop.f32.mrf.mxu1  ;;  %5061 = vrot.lane.b32.xlu0 %v12116_v17, %s8292_s14 }
 0x6fb   : > { %16198 = vst [vmem:[#allocation188_spill] sm:$0xff] %v12618_v35  ;;  %v12624_v0 = vpop.permute.xlu1 %4903  ;;  %5059 = vrot.lane.b32.xlu2 %v12122_v5, %s8292_s14  ;;  %v6235_v5 = vsel %vm307_vm0, %v12345_v25, 0.0  ;;  %v6334_v38 = vsel %vm307_vm0, %v6302_v37, 0.0 }
 0x6fc   : > { %v12628_v8 = vpop.permute.xlu0 %4913  ;;  %v6336_v43 = vadd.f32 %v6335_v4, %v6334_v38  ;;  %v6236_v29 = vadd.f32 %v6235_v5, %v6234_v14  ;;  %v12666_v14 = vpop.f32.mrf.mxu3  ;;  %v6308_v5 = vmul.f32 %v12457_v27, %v12457_v27 }
 0x6fd   : > { %16199 = vst [vmem:[#allocation21_spill] sm:$0xff] %v12628_v8  ;;  %v12636_v17 = vpop.permute.xlu2 %4929 }
 0x6fe   : > { %16200 = vst [vmem:[#allocation121_spill] sm:$0xff] %v12636_v17  ;;  %v6306_v17 = vmul.f32 %v12401_v49, %v12401_v49  ;;  %v6238_v4 = vadd.f32 %v6237_v42, %v6236_v29  ;;  %v6243_v42 = vsel %vm307_vm0, %v12457_v27, 0.0  ;;  %v6309_v29 = vmul.f32 %v12485_v26, %v12485_v26 }
 0x700   : > { %v6240_v8 = vadd.f32 %v6239_v21, %v6238_v4 }
 0x701   : > { %5057 = vrot.lane.b32.xlu1 %v12162_v10, %s8292_s14  ;;  %v6338_v10 = vadd.f32 %v6337_v33, %v6336_v43  ;;  %v6345_v43 = vsel %vm307_vm0, %v6308_v5, 0.0 }
 0x702   : > { %v12653_v25 = vpop.f32.mrf.mxu1  ;;  %5067 = vrot.lane.b32.xlu0 %v12168_v63, %s8292_s14  ;;  %v6341_v63 = vsel %vm307_vm0, %v6306_v17, 0.0  ;;  %v6242_v17 = vadd.f32 %v6241_v15, %v6240_v8  ;;  %v6247_v8 = vsel %vm307_vm0, %v12501_v16, 0.0 }
 0x703   : > { %v12662_v37 = vpop.permute.xlu1 %4909  ;;  %5065 = vrot.lane.b32.xlu2 %v12174_v22, %s8292_s14  ;;  %v6340_v19 = vadd.f32 %v6339_v28, %v6338_v10  ;;  %v6343_v22 = vsel %vm307_vm0, %v6307_v47, 0.0  ;;  %v6311_v10 = vmul.f32 %v12512_v61, %v12512_v61 }
 0x704   : > { %v12668_v38 = vpop.permute.xlu0 %4919  ;;  %v6244_v21 = vadd.f32 %v6243_v42, %v6242_v17  ;;  %v12711_v17 = vpop.f32.mrf.mxu3 }
 0x705   : > { %16201 = vst [vmem:[#allocation13_spill] sm:$0xff] %v12668_v38  ;;  %v12675_v49 = vpop.permute.xlu2 %4935  ;;  %v6342_v33 = vadd.f32 %v6341_v63, %v6340_v19  ;;  %v6347_v19 = vsel %vm307_vm0, %v6309_v29, 0.0 }
 0x706   : > { %16202 = vst [vmem:[#allocation91_spill] sm:$0xff] %v12675_v49  ;;  %v6310_v49 = vmul.f32 %v12501_v16, %v12501_v16  ;;  %v6246_v63 = vadd.f32 %v6245_v58, %v6244_v21  ;;  %v6251_v58 = vsel %vm307_vm0, %v12523_v12, 0.0  ;;  %v12822_v16 = vld [vmem:[#allocation3 + $0x1a5] sm:$0xff] }
 0x707   : > { %v6344_v28 = vadd.f32 %v6343_v22, %v6342_v33  ;;  %v6312_v22 = vmul.f32 %v12523_v12, %v12523_v12 }
 0x708   : > { %v6349_v5 = vsel %vm307_vm0, %v6310_v49, 0.0  ;;  %v6248_v33 = vadd.f32 %v6247_v8, %v6246_v63  ;;  %v6313_v49 = vmul.f32 %v12534_v44, %v12534_v44 }
 0x709   : > { %5063 = vrot.lane.b32.xlu1 %v12214_v6, %s8292_s14  ;;  %v6346_v6 = vadd.f32 %v6345_v43, %v6344_v28  ;;  %v6353_v21 = vsel %vm307_vm0, %v6312_v22, 0.0 }
 0x70a   : > { %v12689_v47 = vpop.f32.mrf.mxu1  ;;  %5073 = vrot.lane.b32.xlu0 %v12220_v7, %s8292_s14  ;;  %v6249_v7 = vsel %vm307_vm0, %v12512_v61, 0.0  ;;  %v6253_v61 = vsel %vm307_vm0, %v12534_v44, 0.0  ;;  %v6355_v63 = vsel %vm307_vm0, %v6313_v49, 0.0 }
 0x70b   : > { %v12698_v4 = vpop.permute.xlu1 %4915  ;;  %5071 = vrot.lane.b32.xlu2 %v12226_v56, %s8292_s14  ;;  %v6348_v29 = vadd.f32 %v6347_v19, %v6346_v6  ;;  %v6351_v56 = vsel %vm307_vm0, %v6311_v10, 0.0  ;;  %v6250_v28 = vadd.f32 %v6249_v7, %v6248_v33  ;;  %v6314_v19 = vmul.f32 %v12545_v36, %v12545_v36 }
 0x70c   : > { %16203 = vst [vmem:[#allocation66_spill] sm:$0xff] %v12698_v4  ;;  %v12702_v15 = vpop.permute.xlu0 %4925  ;;  %v6315_v7 = vmul.f32 %v12558_v11, %v12558_v11  ;;  %v6269_v27 = vsel %vm307_vm0, %v12689_v47, 0.0 }
 0x70d   : > { %16204 = vst [vmem:[#allocation59_spill] sm:$0xff] %v12702_v15  ;;  %v12709_v42 = vpop.permute.xlu2 %4941  ;;  %v6350_v43 = vadd.f32 %v6349_v5, %v6348_v29  ;;  %v6252_v10 = vadd.f32 %v6251_v58, %v6250_v28  ;;  %v6255_v5 = vsel %vm307_vm0, %v12545_v36, 0.0  ;;  %v6316_v58 = vmul.f32 %v12572_v40, %v12572_v40 }
 0x70e   : > { %16205 = vst [vmem:[#allocation34_spill] sm:$0xff] %v12709_v42  ;;  %v6359_v36 = vsel %vm307_vm0, %v6315_v7, 0.0  ;;  %v4517_v42 = vld [vmem:[#allocation3 + $0x79] sm:$0xff] }
 0x70f   : > { %v6352_v8 = vadd.f32 %v6351_v56, %v6350_v43  ;;  %v6254_v29 = vadd.f32 %v6253_v61, %v6252_v10  ;;  %v6357_v56 = vsel %vm307_vm0, %v6314_v19, 0.0  ;;  %v6317_v61 = vmul.f32 %v12586_v20, %v12586_v20 }
 0x711   : > { %5069 = vrot.lane.b32.xlu1 %v12262_v30, %s8292_s14  ;;  %v6354_v30 = vadd.f32 %v6353_v21, %v6352_v8  ;;  %v6256_v28 = vadd.f32 %v6255_v5, %v6254_v29  ;;  %v12752_v21 = vld [vmem:[#allocation3 + $0x19d] sm:$0xff]  ;;  %v12754_v8 = vpop.f32.mrf.mxu3  ;;  %v6318_v5 = vmul.f32 %v12602_v23, %v12602_v23 }
 0x712   : > { %v12725_v6 = vpop.f32.mrf.mxu1  ;;  %5079 = vrot.lane.b32.xlu0 %v12266_v54, %s8292_s14  ;;  %v6257_v54 = vsel %vm307_vm0, %v12558_v11, 0.0  ;;  %v6361_v11 = vsel %vm307_vm0, %v6316_v58, 0.0  ;;  %v6319_v58 = vmul.f32 %v12618_v35, %v12618_v35 }
 0x713   : > { %v12734_v22 = vpop.permute.xlu1 %4921  ;;  %5077 = vrot.lane.b32.xlu2 %v12272_v52, %s8292_s14  ;;  %v6356_v43 = vadd.f32 %v6355_v63, %v6354_v30  ;;  %v6259_v52 = vsel %vm307_vm0, %v12572_v40, 0.0  ;;  %v6258_v10 = vadd.f32 %v6257_v54, %v6256_v28  ;;  %v6261_v63 = vsel %vm307_vm0, %v12586_v20, 0.0 }
 0x714   : > { %16206 = vst [vmem:[#allocation196_spill] sm:$0xff] %v12734_v22  ;;  %v12738_v33 = vpop.permute.xlu0 %4931  ;;  %v6263_v54 = vsel %vm307_vm0, %v12602_v23, 0.0  ;;  %v6367_v44 = vsel %vm307_vm0, %v6319_v58, 0.0  ;;  %v4555_v22 = vld [vmem:[#allocation3 + $0xc3] sm:$0xff] }
 0x715   : > { %16207 = vst [vmem:[#allocation200_spill] sm:$0xff] %v12738_v33  ;;  %v12745_v49 = vpop.permute.xlu2 %4947  ;;  %v6358_v19 = vadd.f32 %v6357_v56, %v6356_v43  ;;  %v6260_v30 = vadd.f32 %v6259_v52, %v6258_v10  ;;  %v6363_v56 = vsel %vm307_vm0, %v6317_v61, 0.0  ;;  %v6365_v52 = vsel %vm307_vm0, %v6318_v5, 0.0 }
 0x716   : > { %16208 = vst [vmem:[#allocation206_spill] sm:$0xff] %v12745_v49  ;;  %v6265_v61 = vsel %vm307_vm0, %v12618_v35, 0.0 }
 0x717   : > { %v6360_v7 = vadd.f32 %v6359_v36, %v6358_v19  ;;  %v6262_v36 = vadd.f32 %v6261_v63, %v6260_v30  ;;  %v6320_v19 = vmul.f32 %v12653_v25, %v12653_v25  ;;  %v4515_v63 = vld [vmem:[#allocation3 + $0x1bd] sm:$0xff]  ;;  %v12790_v30 = vld [vmem:[#allocation3 + $0x1b5] sm:$0xff] }
 0x718   : > { %16212 = vst [vmem:[#allocation158_spill] sm:$0xff] %v12790_v30 }
 0x719   : > { %5075 = vrot.lane.b32.xlu1 %v12299_v45, %s8292_s14  ;;  %v6362_v45 = vadd.f32 %v6361_v11, %v6360_v7  ;;  %v6264_v12 = vadd.f32 %v6263_v54, %v6262_v36  ;;  %v6321_v11 = vmul.f32 %v12689_v47, %v12689_v47  ;;  %v6369_v35 = vsel %vm307_vm0, %v6320_v19, 0.0  ;;  %v12799_v54 = vpop.f32.mrf.mxu3 }
 0x71a   : > { %v12763_v29 = vpop.f32.mrf.mxu1  ;;  %5085 = vrot.lane.b32.xlu0 %v12752_v21, %s8292_s14 }
 0x71b   : > { %v12772_v43 = vpop.permute.xlu1 %4927  ;;  %5083 = vrot.lane.b32.xlu2 %v12305_v62, %s8292_s14  ;;  %v6364_v40 = vadd.f32 %v6363_v56, %v6362_v45  ;;  %v6267_v62 = vsel %vm307_vm0, %v12653_v25, 0.0  ;;  %v6266_v7 = vadd.f32 %v6265_v61, %v6264_v12  ;;  %v6322_v56 = vmul.f32 %v12725_v6, %v12725_v6 }
 0x71c   : > { %16209 = vst [vmem:[#allocation215_spill] sm:$0xff] %v12772_v43  ;;  %v12776_v28 = vpop.permute.xlu0 %4937  ;;  %v6371_v12 = vsel %vm307_vm0, %v6321_v11, 0.0  ;;  %v6273_v11 = vsel %vm307_vm0, %v12763_v29, 0.0  ;;  %v4550_v43 = vld [vmem:[#allocation3 + $0x83] sm:$0xff] }
 0x71d   : > { %16210 = vst [vmem:[#allocation131_spill] sm:$0xff] %v12776_v28  ;;  %v12783_v10 = vpop.permute.xlu2 %4953  ;;  %v6366_v5 = vadd.f32 %v6365_v52, %v6364_v40  ;;  %v6268_v45 = vadd.f32 %v6267_v62, %v6266_v7  ;;  %v6271_v40 = vsel %vm307_vm0, %v12725_v6, 0.0  ;;  %v6323_v52 = vmul.f32 %v12763_v29, %v12763_v29  ;;  %v4521_v28 = vld [vmem:[#allocation3 + $0xa9] sm:$0xff] }
 0x71e   : > { %16211 = vst [vmem:[#allocation97_spill] sm:$0xff] %v12783_v10  ;;  %v6373_v62 = vsel %vm307_vm0, %v6322_v56, 0.0 }
 0x71f   : > { %v6368_v58 = vadd.f32 %v6367_v44, %v6366_v5  ;;  %v6270_v44 = vadd.f32 %v6269_v27, %v6268_v45  ;;  %v6375_v49 = vsel %vm307_vm0, %v6323_v52, 0.0  ;;  %v4518_v45 = vld [vmem:[#allocation3 + $0x81] sm:$0xff] }
 0x721   : > { %5081 = vrot.lane.b32.xlu1 %v12333_v24, %s8292_s14  ;;  %v6370_v24 = vadd.f32 %v6369_v35, %v6368_v58  ;;  %v6272_v26 = vadd.f32 %v6271_v40, %v6270_v44  ;;  %v4519_v35 = vld [vmem:[#allocation3 + $0x91] sm:$0xff]  ;;  %v6326_v40 = vmul.f32 %v12598_v50, %v12598_v50  ;;  %v12842_v44 = vpop.f32.mrf.mxu3 }
 0x722   : > { %v12801_v36 = vpop.f32.mrf.mxu1  ;;  %5091 = vrot.lane.b32.xlu0 %v4515_v63, %s8292_s14  ;;  %v6291_v33 = vsel %vm307_vm0, %v12842_v44, 0.0 }
 0x723   : > { %v12809_v61 = vpop.permute.xlu1 %4933  ;;  %5089 = vrot.lane.b32.xlu2 %v12790_v30, %s8292_s14  ;;  %v6324_v63 = vmul.f32 %v12801_v36, %v12801_v36  ;;  %v6372_v7 = vadd.f32 %v6371_v12, %v6370_v24  ;;  %v6275_v27 = vsel %vm307_vm0, %v12801_v36, 0.0  ;;  %v6274_v56 = vadd.f32 %v6273_v11, %v6272_v26  ;;  %v16253_v30 = vld [vmem:[#allocation160_spill] sm:$0xff] }
 0x724   : > { %16213 = vst [vmem:[#allocation138_spill] sm:$0xff] %v12809_v61  ;;  %v12813_v19 = vpop.permute.xlu0 %4943 }
 0x725   : > { %16214 = vst [vmem:[#allocation80_spill] sm:$0xff] %v12813_v19  ;;  %v12820_v5 = vpop.permute.xlu2 %4959  ;;  %v6374_v58 = vadd.f32 %v6373_v62, %v6372_v7  ;;  %v6377_v19 = vsel %vm307_vm0, %v6324_v63, 0.0  ;;  %v6279_v63 = vsel %vm307_vm0, %v12598_v50, 0.0  ;;  %v6327_v7 = vmul.f32 %v12616_v2, %v12616_v2 }
 0x726   : > { %16215 = vst [vmem:[#allocation29_spill] sm:$0xff] %v12820_v5  ;;  %v6276_v5 = vadd.f32 %v6275_v27, %v6274_v56 }
 0x727   : > { %v6376_v10 = vadd.f32 %v6375_v49, %v6374_v58 }
 0x729   : > { %5087 = vrot.lane.b32.xlu1 %v12822_v16, %s8292_s14  ;;  %v6378_v49 = vadd.f32 %v6377_v19, %v6376_v10  ;;  %v6281_v10 = vsel %vm307_vm0, %v12616_v2, 0.0  ;;  %v6328_v19 = vmul.f32 %v12666_v14, %v12666_v14 }
 0x72a   : > { %v12830_v12 = vpop.f32.mrf.mxu1  ;;  %5161 = vrot.lane.b32.xlu0 %v4519_v35, %s8293_s15 }
 0x72b   : > { %v6277_v52 = vsel %vm307_vm0, %v12830_v12, 0.0  ;;  %v6325_v26 = vmul.f32 %v12830_v12, %v12830_v12  ;;  %v12839_v24 = vpop.permute.xlu1 %4939  ;;  %5159 = vrot.lane.b32.xlu2 %v4518_v45, %s8293_s15  ;;  %v6381_v45 = vsel %vm307_vm0, %v6326_v40, 0.0 }
 0x72c   : > { %16216 = vst [vmem:[#allocation182_spill] sm:$0xff] %v12839_v24  ;;  %v6278_v62 = vadd.f32 %v6277_v52, %v6276_v5  ;;  %v12844_v11 = vpop.permute.xlu0 %4949  ;;  %v4522_v5 = vld [vmem:[#allocation3 + $0xb1] sm:$0xff] }
 0x72d   : > { %16217 = vst [vmem:[#allocation191_spill] sm:$0xff] %v12844_v11  ;;  %v6379_v27 = vsel %vm307_vm0, %v6325_v26, 0.0  ;;  %v12851_v35 = vpop.permute.xlu2 %5029  ;;  %v6383_v11 = vsel %vm307_vm0, %v6327_v7, 0.0  ;;  %v6283_v26 = vsel %vm307_vm0, %v12666_v14, 0.0  ;;  %v6330_v7 = vmul.f32 %v12754_v8, %v12754_v8 }
 0x72e   : > { %v6280_v58 = vadd.f32 %v6279_v63, %v6278_v62  ;;  %v6380_v56 = vadd.f32 %v6379_v27, %v6378_v49  ;;  %v6329_v49 = vmul.f32 %v12711_v17, %v12711_v17  ;;  %v6385_v63 = vsel %vm307_vm0, %v6328_v19, 0.0 }
 0x72f   : > { %v6285_v27 = vsel %vm307_vm0, %v12711_v17, 0.0 }
 0x730   : > { %v6282_v52 = vadd.f32 %v6281_v10, %v6280_v58  ;;  %v6382_v24 = vadd.f32 %v6381_v45, %v6380_v56 }
 0x731   : > { %5157 = vrot.lane.b32.xlu1 %v4517_v42, %s8293_s15  ;;  %v6387_v42 = vsel %vm307_vm0, %v6329_v49, 0.0  ;;  %v6332_v49 = vmul.f32 %v12842_v44, %v12842_v44 }
 0x732   : > { %v6284_v40 = vadd.f32 %v6283_v26, %v6282_v52  ;;  %v6384_v62 = vadd.f32 %v6383_v11, %v6382_v24  ;;  %5167 = vrot.lane.b32.xlu0 %v4522_v5, %s8293_s15  ;;  %v6287_v24 = vsel %vm307_vm0, %v12754_v8, 0.0  ;;  %v6331_v11 = vmul.f32 %v12799_v54, %v12799_v54  ;;  %v12882_v5 = vpop.f32.mrf.mxu3 }
 0x733   : > { %v12870_v58 = vpop.permute.xlu1 %4945  ;;  %5165 = vrot.lane.b32.xlu2 %v4521_v28, %s8293_s15  ;;  %v6389_v28 = vsel %vm307_vm0, %v6330_v7, 0.0 }
 0x734   : > { %16218 = vst [vmem:[#allocation192_spill] sm:$0xff] %v12870_v58  ;;  %v6286_v56 = vadd.f32 %v6285_v27, %v6284_v40  ;;  %v6386_v45 = vadd.f32 %v6385_v63, %v6384_v62  ;;  %v12873_v10 = vpop.permute.xlu0 %4955  ;;  %v4520_v58 = vld [vmem:[#allocation3 + $0x99] sm:$0xff]  ;;  %v6289_v40 = vsel %vm307_vm0, %v12799_v54, 0.0  ;;  %v6391_v61 = vsel %vm307_vm0, %v6331_v11, 0.0 }
 0x735   : > { %16219 = vst [vmem:[#allocation203_spill] sm:$0xff] %v12873_v10  ;;  %v12880_v19 = vpop.permute.xlu2 %5035  ;;  %v4581_v62 = vld [vmem:[#allocation3 + $0x7d] sm:$0xff] }
 0x736   : > { %v6288_v52 = vadd.f32 %v6287_v24, %v6286_v56  ;;  %v6388_v26 = vadd.f32 %v6387_v42, %v6386_v45  ;;  %v4549_v10 = vld [vmem:[#allocation3 + $0x7b] sm:$0xff]  ;;  %v6333_v56 = vmul.f32 %v12882_v5, %v12882_v5  ;;  %v6393_v42 = vsel %vm307_vm0, %v6332_v49, 0.0 }
 0x737   : > { %v6293_v24 = vsel %vm307_vm0, %v12882_v5, 0.0 }
 0x738   : > { %v6290_v63 = vadd.f32 %v6289_v40, %v6288_v52  ;;  %v6390_v27 = vadd.f32 %v6389_v28, %v6388_v26  ;;  %v6395_v40 = vsel %vm307_vm0, %v6333_v56, 0.0 }
 0x739   : > { %5163 = vrot.lane.b32.xlu1 %v4520_v58, %s8293_s15 }
 0x73a   : > { %v6292_v7 = vadd.f32 %v6291_v33, %v6290_v63  ;;  %v6392_v45 = vadd.f32 %v6391_v61, %v6390_v27  ;;  %5413 = vrot.lane.b32.xlu0 %v4581_v62, %s8295_s17  ;;  %v4523_v62 = vld [vmem:[#allocation3 + $0xc1] sm:$0xff] }
 0x73b   : > { %v12899_v52 = vpop.permute.xlu1 %4951  ;;  %5285 = vrot.lane.b32.xlu2 %v4549_v10, %s15924_s6  ;;  %v4582_v63 = vld [vmem:[#allocation3 + $0x85] sm:$0xff] }
 0x73c   : > { %16220 = vst [vmem:[#allocation209_spill] sm:$0xff] %v12899_v52  ;;  %v6294_v11 = vadd.f32 %v6293_v24, %v6292_v7  ;;  %v6394_v26 = vadd.f32 %v6393_v42, %v6392_v45  ;;  %v12902_v28 = vpop.permute.xlu0 %4961 }
 0x73d   : > { %16221 = vst [vmem:[#allocation213_spill] sm:$0xff] %v12902_v28  ;;  %v12905_v58 = vpop.permute.xlu2 %5041  ;;  %v4583_v28 = vld [vmem:[#allocation3 + $0x95] sm:$0xff] }
 0x73e   : > { %16222 = vst [vmem:[#allocation67_spill] sm:$0xff] %v12905_v58  ;;  %v6295_v33 = vrot.slane %v6294_v11, 4  ;;  %v6396_v61 = vadd.f32 %v6395_v40, %v6394_v26  ;;  %v4524_v26 = vld [vmem:[#allocation3 + $0xc9] sm:$0xff]  ;;  %v4525_v40 = vld [vmem:[#allocation3 + $0xd9] sm:$0xff] }
 0x740   : > { %v6296_v49 = vadd.f32 %v6295_v33, %v6294_v11  ;;  %v6397_v27 = vrot.slane %v6396_v61, 4 }
 0x741   : > { %5169 = vrot.lane.b32.xlu1 %v4523_v62, %s8293_s15 }
 0x742   : > { %v6297_v52 = vrot.slane %v6296_v49, 2  ;;  %v6398_v15 = vadd.f32 %v6397_v27, %v6396_v61  ;;  %5415 = vrot.lane.b32.xlu0 %v4582_v63, %s8295_s17 }
 0x743   : > { %v12909_v10 = vpop.permute.xlu1 %4957  ;;  %5287 = vrot.lane.b32.xlu2 %v4550_v43, %s15924_s6 }
 0x744   : > { %16223 = vst [vmem:[#allocation100_spill] sm:$0xff] %v12909_v10  ;;  %v6298_v56 = vadd.f32 %v6297_v52, %v6296_v49  ;;  %v6399_v7 = vrot.slane %v6398_v15, 2  ;;  %v12912_v45 = vpop.permute.xlu0 %5031 }
 0x745   : > { %v12914_v42 = vpop.permute.xlu2 %5047 }
 0x746   : > { %16224 = vst [vmem:[#allocation177_spill] sm:$0xff] %v12914_v42  ;;  %v6299_v24 = vrot.slane %v6298_v56, 1  ;;  %v6400_v11 = vadd.f32 %v6399_v7, %v6398_v15  ;;  %v4527_v42 = vld [vmem:[#allocation3 + $0xf1] sm:$0xff] }
 0x748   : > { %v6300_v33 = vadd.f32 %v6299_v24, %v6298_v56  ;;  %v6401_v62 = vrot.slane %v6400_v11, 1  ;;  %v4551_v24 = vld [vmem:[#allocation3 + $0x93] sm:$0xff] }
 0x749   : > { %5171 = vrot.lane.b32.xlu1 %v4524_v26, %s8293_s15 }
 0x74a   : > { %v12917_v61 = vmul.f32 0.00390625, %v6300_v33  ;;  %v6402_v63 = vadd.f32 %v6401_v62, %v6400_v11  ;;  %5173 = vrot.lane.b32.xlu0 %v4525_v40, %s8293_s15  ;;  %v4526_v11 = vld [vmem:[#allocation3 + $0xe1] sm:$0xff] }
 0x74b   : > { %v12920_v43 = vpop.permute.xlu1 %4963  ;;  %5417 = vrot.lane.b32.xlu2 %v4583_v28, %s8295_s17  ;;  %v4584_v40 = vld [vmem:[#allocation3 + $0x9d] sm:$0xff]  ;;  %v4585_v28 = vld [vmem:[#allocation3 + $0xad] sm:$0xff] }
 0x74c   : > { %16225 = vst [vmem:[#allocation186_spill] sm:$0xff] %v12917_v61  ;;  %v6403_v52 = vmul.f32 0.00390625, %v6402_v63  ;;  %v6404_v15 = vmul.f32 %v12917_v61, %v12917_v61  ;;  %v6429_v49 = vsub.f32 %v12830_v12, %v12917_v61  ;;  %v12927_v27 = vpop.permute.xlu0 %5037 }
 0x74d   : > { %16226 = vst [vmem:[#allocation195_spill] sm:$0xff] %v12920_v43  ;;  %v12929_v56 = vpop.permute.xlu2 %5053 }
 0x74e   : > { %16227 = vst [vmem:[#allocation204_spill] sm:$0xff] %v12929_v56  ;;  %v6405_v7 = vsub.f32 %v6403_v52, %v6404_v15  ;;  %v4552_v15 = vld [vmem:[#allocation3 + $0x9b] sm:$0xff] }
 0x750   : > { %v6438_v26 = vadd.f32 1e-05, %v6405_v7  ;;  %v4554_v7 = vld [vmem:[#allocation3 + $0xb3] sm:$0xff] }
 0x751   : > { %5289 = vrot.lane.b32.xlu1 %v4551_v24, %s15924_s6 }
 0x752   : > { %8102 = vrsqrt.f32 %v6438_v26  ;;  %5175 = vrot.lane.b32.xlu0 %v4526_v11, %s8293_s15  ;;  %vm6445_vm14 = vweird.f32 %v6438_v26 }
 0x753   : > { %v12939_v62 = vpop.permute.xlu1 %5033  ;;  %5419 = vrot.lane.b32.xlu2 %v4584_v40, %s8295_s17 }
 0x754   : > { %v12942_v63 = vpop.permute.xlu0 %5043 }
 0x755   : > { %16228 = vst [vmem:[#allocation71_spill] sm:$0xff] %v12942_v63  ;;  %v12944_v52 = vpop.permute.xlu2 %5059 }
 0x756   : > { %16229 = vst [vmem:[#allocation95_spill] sm:$0xff] %v12944_v52  ;;  %v4553_v52 = vld [vmem:[#allocation3 + $0xab] sm:$0xff] }
 0x758   : > { %v8103_v24 = vpop.eup %8102 }
 0x759   : > { %v6440_v43 = vmul.f32 %v8103_v24, %v6438_v26  ;;  %5291 = vrot.lane.b32.xlu1 %v4552_v15, %s15924_s6  ;;  %vm6446_vm13 = vweird.f32 %v8103_v24  ;;  %v16234_v15 = vld [vmem:[#allocation107_spill] sm:$0xff] }
 0x75a   : > { %5295 = vrot.lane.b32.xlu0 %v4554_v7, %s15924_s6  ;;  %vm6447_vm7 = vmor %vm6445_vm14, %vm6446_vm13  ;;  %v16235_v7 = vld [vmem:[#allocation140_spill] sm:$0xff] }
 0x75b   : > { %v6441_v11 = vmul.f32 %v8103_v24, %v6440_v43  ;;  %v12948_v12 = vpop.permute.xlu1 %5039  ;;  %5421 = vrot.lane.b32.xlu2 %v4585_v28, %s8295_s17 }
 0x75c   : > { %v12951_v33 = vpop.permute.xlu0 %5049 }
 0x75d   : > { %16230 = vst [vmem:[#allocation30_spill] sm:$0xff] %v12951_v33  ;;  %v6442_v40 = vmul.f32 0.5, %v6441_v11  ;;  %v12953_v10 = vpop.permute.xlu2 %5065  ;;  %v16236_v11 = vsub.f32 %v16234_v15, %v16235_v7  ;;  %v4586_v15 = vld [vmem:[#allocation3 + $0xb5] sm:$0xff] }
 0x75e   : > { %16231 = vst [vmem:[#allocation169_spill] sm:$0xff] %v12953_v10 }
 0x75f   : > { %v6443_v56 = vsub.f32 1.5, %v6442_v40  ;;  %v16237_v40 = vld [vmem:[#allocation122_spill] sm:$0xff] }
 0x760   : > { %v6223_v10 = vmul.f32 %v16237_v40, %v16236_v11  ;;  %v16244_v11 = vld [vmem:[#allocation85_spill] sm:$0xff] }
 0x761   : > { %v6444_v38 = vmul.f32 %v8103_v24, %v6443_v56  ;;  %5293 = vrot.lane.b32.xlu1 %v4553_v52, %s15924_s6  ;;  %v16240_v52 = vld [vmem:[#allocation39_spill] sm:$0xff]  ;;  %v6176_v4 = vsub.f32 %v16244_v11, %v16235_v7  ;;  %v6435_v11 = vsub.f32 %v12799_v54, %v12917_v61 }
 0x762   : > { %5297 = vrot.lane.b32.xlu0 %v4555_v22, %s15924_s6  ;;  %v6172_v22 = vsub.f32 %v16240_v52, %v16235_v7  ;;  %v6424_v52 = vsub.f32 %v12653_v25, %v12917_v61  ;;  %v6434_v25 = vsub.f32 %v12754_v8, %v12917_v61 }
 0x763   : > { %v12957_v43 = vsel %vm6447_vm7, %v8103_v24, %v6444_v38  ;;  %v12959_v28 = vpop.permute.xlu1 %5045  ;;  %5177 = vrot.lane.b32.xlu2 %v4527_v42, %s8293_s15  ;;  %v16241_v38 = vld [vmem:[#allocation110_spill] sm:$0xff] }
 0x764   : > { %16232 = vst [vmem:[#allocation198_spill] sm:$0xff] %v12957_v43  ;;  %v6472_v33 = vmul.f32 %v12957_v43, %v6429_v49  ;;  %v12967_v56 = vpop.permute.xlu0 %5055  ;;  %v6173_v24 = vsub.f32 %v16241_v38, %v16235_v7  ;;  %v6421_v49 = vsub.f32 %v12586_v20, %v12917_v61  ;;  %v6425_v38 = vsub.f32 %v12689_v47, %v12917_v61  ;;  %v4528_v20 = vld [vmem:[#allocation3 + $0xf9] sm:$0xff] }
 0x765   : > { %16233 = vst [vmem:[#allocation208_spill] sm:$0xff] %v12959_v28  ;;  %v12969_v26 = vpop.permute.xlu2 %5071  ;;  %v16242_v28 = vld [vmem:[#allocation175_spill] sm:$0xff]  ;;  %v6436_v47 = vsub.f32 %v12842_v44, %v12917_v61  ;;  %v6477_v54 = vmul.f32 %v12957_v43, %v6434_v25  ;;  %v16247_v25 = vsub.f32 %v12725_v6, %v12917_v61 }
 0x766   : > { %16238 = vst [vmem:[#allocation18_spill] sm:$0xff] %v12967_v56  ;;  %v6175_v42 = vsub.f32 %v16242_v28, %v16235_v7  ;;  %v12977_v63 = vadd.f32 %v6472_v33, %v6223_v10  ;;  %v4556_v56 = vld [vmem:[#allocation3 + $0xcb] sm:$0xff]  ;;  %v6430_v10 = vsub.f32 %v12598_v50, %v12917_v61  ;;  %v6431_v33 = vsub.f32 %v12616_v2, %v12917_v61 }
 0x767   : > { %16239 = vst [vmem:[#allocation56_spill] sm:$0xff] %v12969_v26  ;;  %v6422_v26 = vsub.f32 %v12602_v23, %v12917_v61  ;;  %v6432_v28 = vsub.f32 %v12666_v14, %v12917_v61  ;;  %v6433_v23 = vsub.f32 %v12711_v17, %v12917_v61  ;;  %v6437_v2 = vsub.f32 %v12882_v5, %v12917_v61 }
 0x768   : > { %16243 = vst [vmem:[#allocation114_spill] sm:$0xff] %v12977_v63  ;;  %v6473_v50 = vmul.f32 %v12957_v43, %v6430_v10  ;;  %v6474_v14 = vmul.f32 %v12957_v43, %v6431_v33  ;;  %v6478_v63 = vmul.f32 %v12957_v43, %v6435_v11  ;;  %v6479_v44 = vmul.f32 %v12957_v43, %v6436_v47 }
 0x769   : > { %5423 = vrot.lane.b32.xlu1 %v4586_v15, %s8295_s17  ;;  %v6475_v17 = vmul.f32 %v12957_v43, %v6432_v28  ;;  %v6476_v8 = vmul.f32 %v12957_v43, %v6433_v23  ;;  %v6464_v5 = vmul.f32 %v12957_v43, %v6421_v49  ;;  %v6465_v10 = vmul.f32 %v12957_v43, %v6422_v26 }
 0x76a   : > { %5299 = vrot.lane.b32.xlu0 %v4556_v56, %s15924_s6  ;;  %v6467_v33 = vmul.f32 %v12957_v43, %v6424_v52  ;;  %v6480_v56 = vmul.f32 %v12957_v43, %v6437_v2  ;;  %v6468_v23 = vmul.f32 %v12957_v43, %v6425_v38  ;;  %v6469_v11 = vmul.f32 %v12957_v43, %v16247_v25 }
 0x76b   : > { %v13014_v15 = vpop.permute.xlu1 %5051  ;;  %5179 = vrot.lane.b32.xlu2 %v4528_v20, %s8293_s15  ;;  %v16248_v20 = vsub.f32 %v12763_v29, %v12917_v61  ;;  %v16249_v26 = vsub.f32 %v12801_v36, %v12917_v61  ;;  %v6215_v2 = vmul.f32 %v16237_v40, %v6172_v22  ;;  %v6216_v38 = vmul.f32 %v16237_v40, %v6173_v24  ;;  %v4589_v61 = vld [vmem:[#allocation3 + $0xdd] sm:$0xff] }
 0x76c   : > { %16245 = vst [vmem:[#allocation185_spill] sm:$0xff] %v13014_v15  ;;  %v13021_v28 = vpop.permute.xlu0 %5061  ;;  %v6218_v6 = vmul.f32 %v16237_v40, %v6175_v42  ;;  %v6219_v25 = vmul.f32 %v16237_v40, %v6176_v4  ;;  %v16251_v15 = vld [vmem:[#allocation55_spill] sm:$0xff]  ;;  %v16254_v36 = vsub.f32 %v16253_v30, %v16235_v7 }
 0x76d   : > { %16246 = vst [vmem:[#allocation193_spill] sm:$0xff] %v13021_v28  ;;  %v6470_v49 = vmul.f32 %v12957_v43, %v16248_v20  ;;  %v6471_v52 = vmul.f32 %v12957_v43, %v16249_v26  ;;  %v13036_v47 = vpop.permute.xlu2 %5077  ;;  %v4587_v28 = vld [vmem:[#allocation3 + $0xc5] sm:$0xff]  ;;  %v16252_v29 = vsub.f32 %v16251_v15, %v16235_v7  ;;  %v13054_v42 = vadd.f32 %v6464_v5, %v6215_v2  ;;  %v4557_v15 = vld [vmem:[#allocation3 + $0xdb] sm:$0xff] }
 0x76e   : > { %16250 = vst [vmem:[#allocation211_spill] sm:$0xff] %v13036_v47  ;;  %v6221_v26 = vmul.f32 %v16237_v40, %v16254_v36  ;;  %v16255_v43 = vld [vmem:[#allocation61_spill] sm:$0xff]  ;;  %v13056_v47 = vadd.f32 %v6465_v10, %v6216_v38  ;;  %v13058_v4 = vadd.f32 %v6467_v33, %v6218_v6  ;;  %v13060_v58 = vadd.f32 %v6468_v23, %v6219_v25  ;;  %v16262_v5 = vld [vmem:[#allocation171_spill] sm:$0xff]  ;;  %v16274_v25 = vld [vmem:[#allocation142_spill] sm:$0xff] }
 0x76f   : > { %v6220_v20 = vmul.f32 %v16237_v40, %v16252_v29  ;;  %v16256_v22 = vsub.f32 %v16255_v43, %v16235_v7  ;;  %v16260_v43 = vld [vmem:[#allocation152_spill] sm:$0xff]  ;;  %v13073_v2 = vadd.f32 %v6474_v14, %v16262_v5  ;;  %v16264_v10 = vld [vmem:[#allocation41_spill] sm:$0xff]  ;;  %v13092_v14 = vadd.f32 %v6480_v56, %v16274_v25  ;;  %v5773_v5 = vld [vmem:[%s15209_s4 + $0x40] sm:$0xff] }
 0x770   : > { %16257 = vst [vmem:[#allocation15_spill] sm:$0xff] %v13058_v4  ;;  %v13064_v30 = vadd.f32 %v6470_v49, %v6221_v26  ;;  %v13076_v33 = vadd.f32 %v6475_v17, %v16264_v10  ;;  %v16266_v38 = vld [vmem:[#allocation81_spill] sm:$0xff]  ;;  %5877 = vmatpush.msra.mxu2 %v5773_v5  ;;  %8042 = vmatpush.msra.mxu3 %v5773_v5  ;;  %v4530_v25 = vld [vmem:[#allocation3 + $0x111] sm:$0xff] }
 0x771   : > { %v6222_v24 = vmul.f32 %v16237_v40, %v16256_v22  ;;  %v13062_v29 = vadd.f32 %v6469_v11, %v6220_v20  ;;  %5425 = vrot.lane.b32.xlu1 %v4587_v28, %s8295_s17  ;;  %v13070_v22 = vadd.f32 %v6473_v50, %v16260_v43  ;;  %16263 = vst [vmem:[#allocation197_spill] sm:$0xff] %v13073_v2  ;;  %v16268_v11 = vld [vmem:[#allocation96_spill] sm:$0xff]  ;;  %v16272_v28 = vld [vmem:[#allocation126_spill] sm:$0xff]  ;;  %v5768_v5 = vld [vmem:[%s15209_s4 + $0x18] sm:$0xff] }
 0x772   : > { %16258 = vst [vmem:[#allocation120_spill] sm:$0xff] %v13064_v30  ;;  %v13079_v23 = vadd.f32 %v6476_v8, %v16266_v38  ;;  %5429 = vrot.lane.b32.xlu0 %v4589_v61, %s8295_s17  ;;  %v13083_v49 = vadd.f32 %v6477_v54, %v16268_v11  ;;  %v13089_v50 = vadd.f32 %v6479_v44, %v16272_v28  ;;  %v4588_v61 = vld [vmem:[#allocation3 + $0xcd] sm:$0xff]  ;;  %v4590_v54 = vld [vmem:[#allocation3 + $0xe5] sm:$0xff]  ;;  %v4533_v2 = vld [vmem:[#allocation3 + $0x139] sm:$0xff] }
 0x773   : > { %v13066_v36 = vadd.f32 %v6471_v52, %v6222_v24  ;;  %16261 = vst [vmem:[#allocation189_spill] sm:$0xff] %v13070_v22  ;;  %v16270_v52 = vld [vmem:[#allocation35_spill] sm:$0xff]  ;;  %v13094_v20 = vpop.permute.xlu1 %5057  ;;  %5301 = vrot.lane.b32.xlu2 %v4557_v15, %s15924_s6  ;;  %v4558_v26 = vld [vmem:[#allocation3 + $0xe3] sm:$0xff]  ;;  %v4564_v22 = vld [vmem:[#allocation3 + $0x12b] sm:$0xff] }
 0x774   : > { %16265 = vst [vmem:[#allocation205_spill] sm:$0xff] %v13076_v33  ;;  %v13086_v6 = vadd.f32 %v6478_v63, %v16270_v52  ;;  %v13097_v17 = vpop.permute.xlu0 %5067  ;;  %v4529_v24 = vld [vmem:[#allocation3 + $0x109] sm:$0xff]  ;;  %v4591_v15 = vld [vmem:[#allocation3 + $0xf5] sm:$0xff]  ;;  %v5771_v52 = vld [vmem:[%s15209_s4 + $0x30] sm:$0xff] }
 0x775   : > { %16259 = vst [vmem:[#allocation90_spill] sm:$0xff] %v13066_v36  ;;  %v13099_v8 = vpop.permute.xlu2 %5083  ;;  %v4559_v43 = vld [vmem:[#allocation3 + $0xf3] sm:$0xff]  ;;  %v5772_v11 = vld [vmem:[%s15209_s4 + $0x38] sm:$0xff] }
 0x776   : > { %16267 = vst [vmem:[#allocation139_spill] sm:$0xff] %v13079_v23  ;;  %5878 = vmatpush.msra.mxu2 %v5772_v11  ;;  %8043 = vmatpush.msra.mxu3 %v5772_v11  ;;  %v5767_v11 = vld [vmem:[%s15209_s4 + $0x10] sm:$0xff] }
 0x777   : > { %16269 = vst [vmem:[#allocation70_spill] sm:$0xff] %v13083_v49  ;;  %v4595_v36 = vld [vmem:[#allocation3 + $0x125] sm:$0xff] }
 0x778   : > { %16271 = vst [vmem:[#allocation135_spill] sm:$0xff] %v13086_v6  ;;  %5879 = vmatpush.msra.mxu2 %v5771_v52  ;;  %8044 = vmatpush.msra.mxu3 %v5771_v52  ;;  %v4356_v6 = vld [vmem:[#allocation3 + $0x19] sm:$0xff] }
 0x779   : > { %16273 = vst [vmem:[#allocation180_spill] sm:$0xff] %v13089_v50  ;;  %5427 = vrot.lane.b32.xlu1 %v4588_v61, %s8295_s17  ;;  %v5770_v61 = vld [vmem:[%s15209_s4 + $0x28] sm:$0xff] }
 0x77a   : > { %16275 = vst [vmem:[#allocation201_spill] sm:$0xff] %v13092_v14  ;;  %5431 = vrot.lane.b32.xlu0 %v4590_v54, %s8295_s17  ;;  %v4531_v54 = vld [vmem:[#allocation3 + $0x121] sm:$0xff]  ;;  %5880 = vmatpush.msra.mxu2 %v5770_v61 }
 0x77b   : > { %v13103_v63 = vpop.permute.xlu1 %5063  ;;  %5303 = vrot.lane.b32.xlu2 %v4558_v26, %s15924_s6  ;;  %v4592_v26 = vld [vmem:[#allocation3 + $0xfd] sm:$0xff]  ;;  %8045 = vmatpush.msra.mxu3 %v5770_v61 }
 0x77c   : > { %v13106_v44 = vpop.permute.xlu0 %5073  ;;  %v5766_v61 = vld [vmem:[%s15209_s4 + $0x8] sm:$0xff]  ;;  %v4563_v14 = vld [vmem:[#allocation3 + $0x123] sm:$0xff] }
 0x77d   : > { %v13108_v56 = vpop.permute.xlu2 %5089 }
 0x781   : > { %5181 = vrot.lane.b32.xlu1 %v4529_v24, %s8293_s15  ;;  %v5769_v24 = vld [vmem:[%s15209_s4 + $0x20] sm:$0xff] }
 0x782   : > { %5433 = vrot.lane.b32.xlu0 %v4591_v15, %s8295_s17  ;;  %5881 = vmatpush.msra.mxu2 %v5769_v24 }
 0x783   : > { %v13115_v10 = vpop.permute.xlu1 %5069  ;;  %5305 = vrot.lane.b32.xlu2 %v4559_v43, %s15924_s6  ;;  %8046 = vmatpush.msra.mxu3 %v5769_v24  ;;  %v5765_v24 = vld [vmem:[%s15209_s4] sm:$0xff] }
 0x784   : > { %v13118_v38 = vpop.permute.xlu0 %5079  ;;  %5882 = vmatpush.msra.mxu2 %v5768_v5 }
 0x785   : > { %v13126_v28 = vpop.permute.xlu2 %5159  ;;  %8047 = vmatpush.msra.mxu3 %v5768_v5 }
 0x786   : > { %5883 = vmatpush.msra.mxu2 %v5767_v11 }
 0x787   : > { %8048 = vmatpush.msra.mxu3 %v5767_v11  ;;  %v4561_v11 = vld [vmem:[#allocation3 + $0x10b] sm:$0xff] }
 0x788   : > { %5884 = vmatpush.msra.mxu2 %v5766_v61 }
 0x789   : > { %5183 = vrot.lane.b32.xlu1 %v4530_v25, %s8293_s15  ;;  %v4560_v25 = vld [vmem:[#allocation3 + $0xfb] sm:$0xff]  ;;  %8049 = vmatpush.msra.mxu3 %v5766_v61 }
 0x78a   : > { %5185 = vrot.lane.b32.xlu0 %v4531_v54, %s8293_s15  ;;  %v4532_v54 = vld [vmem:[#allocation3 + $0x129] sm:$0xff]  ;;  %5885 = vmatpush.msra.mxu2 %v5765_v24 }
 0x78b   : > { %v13136_v15 = vpop.permute.xlu1 %5075  ;;  %5435 = vrot.lane.b32.xlu2 %v4592_v26, %s8295_s17  ;;  %v4593_v26 = vld [vmem:[#allocation3 + $0x10d] sm:$0xff]  ;;  %8050 = vmatpush.msra.mxu3 %v5765_v24  ;;  %v5509_v24 = vsel %vm307_vm0, %v4356_v6, %v11870_v60  ;;  %v4565_v60 = vld [vmem:[#allocation3 + $0x13b] sm:$0xff] }
 0x78c   : > { %v13139_v43 = vpop.permute.xlu0 %5085  ;;  %v4534_v6 = vld [vmem:[#allocation3 + $0x141] sm:$0xff] }
 0x78d   : > { %v13147_v52 = vpop.permute.xlu2 %5165 }
 0x791   : > { %5307 = vrot.lane.b32.xlu1 %v4560_v25, %s15924_s6  ;;  %v4594_v25 = vld [vmem:[#allocation3 + $0x115] sm:$0xff] }
 0x792   : > { %5187 = vrot.lane.b32.xlu0 %v4532_v54, %s8293_s15 }
 0x793   : > { %v13157_v50 = vpop.permute.xlu1 %5081  ;;  %5437 = vrot.lane.b32.xlu2 %v4593_v26, %s8295_s17  ;;  %v4562_v26 = vld [vmem:[#allocation3 + $0x113] sm:$0xff] }
 0x794   : > { %v13160_v5 = vpop.permute.xlu0 %5091 }
 0x795   : > { %v5286_v23 = vpop.permute.xlu2 %5285 }
 0x799   : > { %5309 = vrot.lane.b32.xlu1 %v4561_v11, %s15924_s6 }
 0x79a   : > { %5313 = vrot.lane.b32.xlu0 %v4563_v14, %s15924_s6  ;;  %v5541_v14 = vsel %vm2118_vm11, %v5509_v24, %v12462_v13  ;;  %v4357_v13 = vld [vmem:[#allocation3 + $0x21] sm:$0xff] }
 0x79b   : > { %v13164_v49 = vpop.permute.xlu1 %5087  ;;  %5439 = vrot.lane.b32.xlu2 %v4594_v25, %s8295_s17  ;;  %v5573_v25 = vsel %vm2151_vm15, %v5541_v14, %v12594_v9 }
 0x79c   : > { %v13167_v61 = vpop.permute.xlu0 %5161 }
 0x79d   : > { %v5288_v54 = vpop.permute.xlu2 %5287 }
 0x7a1   : > { %5311 = vrot.lane.b32.xlu1 %v4562_v26, %s15924_s6  ;;  %v16276_v26 = vld [vmem:[#allocation101_spill] sm:$0xff] }
 0x7a2   : > { %5315 = vrot.lane.b32.xlu0 %v4564_v22, %s15924_s6  ;;  %v5605_v4 = vsel %vm2184_vm2, %v5573_v25, %v16276_v26  ;;  %v4596_v26 = vld [vmem:[#allocation3 + $0x12d] sm:$0xff] }
 0x7a3   : > { %v5158_v11 = vpop.permute.xlu1 %5157  ;;  %5189 = vrot.lane.b32.xlu2 %v4533_v2, %s8293_s15  ;;  %v5637_v22 = vsel %vm2217_vm1, %v5605_v4, %v12851_v35  ;;  %v5510_v2 = vsel %vm307_vm0, %v4357_v13, %v11993_v55 }
 0x7a4   : > { %v13178_v33 = vpop.permute.xlu0 %5167  ;;  %v5669_v24 = vsel %vm2250_vm3, %v5637_v22, %v5158_v11  ;;  %v5542_v35 = vsel %vm2118_vm11, %v5510_v2, %v12360_v57  ;;  %v4566_v22 = vld [vmem:[#allocation3 + $0x143] sm:$0xff] }
 0x7a5   : > { %v13180_v30 = vpop.permute.xlu2 %5417  ;;  %v5701_v25 = vsel %vm2283_vm5, %v5669_v24, %v5286_v23 }
 0x7a9   : > { %5441 = vrot.lane.b32.xlu1 %v4595_v36, %s8295_s17  ;;  %v5574_v36 = vsel %vm2151_vm15, %v5542_v35, %v12624_v0  ;;  %v4541_v35 = vld [vmem:[#allocation3 + $0x199] sm:$0xff] }
 0x7aa   : > { %5317 = vrot.lane.b32.xlu0 %v4565_v60, %s15924_s6  ;;  %v4598_v60 = vld [vmem:[#allocation3 + $0x145] sm:$0xff] }
 0x7ab   : > { %v13189_v9 = vpop.permute.xlu1 %5163  ;;  %5191 = vrot.lane.b32.xlu2 %v4534_v6, %s8293_s15  ;;  %v16277_v6 = vld [vmem:[#allocation154_spill] sm:$0xff] }
 0x7ac   : > { %v5414_v14 = vpop.permute.xlu0 %5413  ;;  %v5606_v55 = vsel %vm2184_vm2, %v5574_v36, %v16277_v6  ;;  %v4535_v6 = vld [vmem:[#allocation3 + $0x151] sm:$0xff] }
 0x7ad   : > { %v13197_v4 = vpop.permute.xlu2 %5419  ;;  %v5733_v11 = vsel %vm2316_vm4, %v5701_v25, %v5414_v14  ;;  %v5638_v57 = vsel %vm2217_vm1, %v5606_v55, %v12912_v45  ;;  %v4597_v25 = vld [vmem:[#allocation3 + $0x13d] sm:$0xff]  ;;  %v4567_v45 = vld [vmem:[#allocation3 + $0x153] sm:$0xff] }
 0x7ae   : > { %7984 = vmatmul.msk.f32.vlgmr.msra.gmra.mxu2 %vm2358_vm6, %v5733_v11  ;;  %v5670_v23 = vsel %vm2250_vm3, %v5638_v57, %v13126_v28  ;;  %v4358_v11 = vld [vmem:[#allocation3 + $0x31] sm:$0xff]  ;;  %v4359_v57 = vld [vmem:[#allocation3 + $0x39] sm:$0xff] }
 0x7af   : > { %v5702_v0 = vsel %vm2283_vm5, %v5670_v23, %v5288_v54  ;;  %v5511_v54 = vsel %vm307_vm0, %v4358_v11, %v12089_v53  ;;  %v4599_v55 = vld [vmem:[#allocation3 + $0x155] sm:$0xff] }
 0x7b0   : > { %v16278_v23 = vld [vmem:[#allocation19_spill] sm:$0xff] }
 0x7b1   : > { %5443 = vrot.lane.b32.xlu1 %v4596_v26, %s8295_s17  ;;  %v5543_v26 = vsel %vm2118_vm11, %v5511_v54, %v12439_v39  ;;  %v4568_v11 = vld [vmem:[#allocation3 + $0x15b] sm:$0xff] }
 0x7b2   : > { %5447 = vrot.lane.b32.xlu0 %v4598_v60, %s8295_s17  ;;  %v16279_v54 = vld [vmem:[#allocation147_spill] sm:$0xff] }
 0x7b3   : > { %v13211_v13 = vpop.permute.xlu1 %5169  ;;  %5319 = vrot.lane.b32.xlu2 %v4566_v22, %s15924_s6  ;;  %v5575_v22 = vsel %vm2151_vm15, %v5543_v26, %v12568_v34  ;;  %v5512_v34 = vsel %vm307_vm0, %v4359_v57, %v11905_v41  ;;  %v4542_v41 = vld [vmem:[#allocation3 + $0x1a1] sm:$0xff] }
 0x7b4   : > { %v5416_v24 = vpop.permute.xlu0 %5415 }
 0x7b5   : > { %v13215_v2 = vpop.permute.xlu2 %5421  ;;  %v5734_v14 = vsel %vm2316_vm4, %v5702_v0, %v5416_v24  ;;  %v5607_v0 = vsel %vm2184_vm2, %v5575_v22, %v16278_v23 }
 0x7b6   : > { %7985 = vmatmul.msk.f32.gmra.mxu2 %vm2358_vm6, %v5734_v14  ;;  %v5639_v53 = vsel %vm2217_vm1, %v5607_v0, %v12939_v62 }
 0x7b7   : > { %v5671_v39 = vsel %vm2250_vm3, %v5639_v53, %v13167_v61  ;;  %v4536_v53 = vld [vmem:[#allocation3 + $0x159] sm:$0xff] }
 0x7b9   : > { %5445 = vrot.lane.b32.xlu1 %v4597_v25, %s8295_s17 }
 0x7ba   : > { %5321 = vrot.lane.b32.xlu0 %v4567_v45, %s15924_s6  ;;  %v5544_v45 = vsel %vm2118_vm11, %v5512_v34, %v12490_v46 }
 0x7bb   : > { %v13221_v28 = vpop.permute.xlu1 %5171  ;;  %5205 = vrot.lane.b32.xlu2 %v4541_v35, %s8293_s15  ;;  %v5576_v61 = vsel %vm2151_vm15, %v5544_v45, %v12610_v48  ;;  %v4573_v35 = vld [vmem:[#allocation3 + $0x19b] sm:$0xff]  ;;  %v8162_v48 = vld [vmem:[#allocation3 + $0x49] sm:$0xff] }
 0x7bc   : > { %v13226_v36 = vpop.permute.xlu0 %5173  ;;  %v5608_v26 = vsel %vm2184_vm2, %v5576_v61, %v16279_v54  ;;  %v4543_v54 = vld [vmem:[#allocation3 + $0x1b1] sm:$0xff] }
 0x7bd   : > { %v13230_v60 = vpop.permute.xlu2 %5177  ;;  %v5640_v46 = vsel %vm2217_vm1, %v5608_v26, %v12880_v19 }
 0x7c1   : > { %5193 = vrot.lane.b32.xlu1 %v4535_v6, %s8293_s15  ;;  %v5513_v6 = vsel %vm307_vm0, %v8162_v48, %v12045_v18 }
 0x7c2   : > { %5461 = vrot.lane.b32.xlu0 %v12752_v21, %s8295_s17  ;;  %v5545_v23 = vsel %vm2118_vm11, %v5513_v6, %v12388_v31  ;;  %v16282_v6 = vld [vmem:[#allocation21_spill] sm:$0xff] }
 0x7c3   : > { %v5290_v24 = vpop.permute.xlu1 %5289  ;;  %5449 = vrot.lane.b32.xlu2 %v4599_v55, %s8295_s17 }
 0x7c4   : > { %v5703_v14 = vsel %vm2283_vm5, %v5671_v39, %v5290_v24  ;;  %v13247_v25 = vpop.permute.xlu0 %5175  ;;  %v4600_v39 = vld [vmem:[#allocation3 + $0x15d] sm:$0xff]  ;;  %v16280_v24 = vld [vmem:[#allocation77_spill] sm:$0xff] }
 0x7c5   : > { %v5735_v62 = vsel %vm2316_vm4, %v5703_v14, %v13180_v30  ;;  %v13253_v21 = vpop.permute.xlu2 %5179  ;;  %v5672_v30 = vsel %vm2250_vm3, %v5640_v46, %v13189_v9  ;;  %v5577_v9 = vsel %vm2151_vm15, %v5545_v23, %v12662_v37  ;;  %v4537_v23 = vld [vmem:[#allocation3 + $0x169] sm:$0xff] }
 0x7c6   : > { %7986 = vmatmul.msk.f32.gmra.mxu2 %vm2358_vm6, %v5735_v62  ;;  %v5609_v18 = vsel %vm2184_vm2, %v5577_v9, %v16280_v24  ;;  %v16284_v9 = vld [vmem:[#allocation67_spill] sm:$0xff]  ;;  %v8165_v24 = vld [vmem:[#allocation3 + $0x69] sm:$0xff] }
 0x7c7   : > { %v5641_v31 = vsel %vm2217_vm1, %v5609_v18, %v12927_v27  ;;  %v16286_v18 = vld [vmem:[#allocation163_spill] sm:$0xff] }
 0x7c8   : > { %v5673_v37 = vsel %vm2250_vm3, %v5641_v31, %v13147_v52  ;;  %v4569_v52 = vld [vmem:[#allocation3 + $0x16b] sm:$0xff]  ;;  %v5516_v31 = vsel %vm307_vm0, %v8165_v24, %v16286_v18 }
 0x7c9   : > { %5333 = vrot.lane.b32.xlu1 %v4573_v35, %s15924_s6 }
 0x7ca   : > { %5323 = vrot.lane.b32.xlu0 %v4568_v11, %s15924_s6  ;;  %v16281_v11 = vld [vmem:[#allocation116_spill] sm:$0xff] }
 0x7cb   : > { %v5292_v22 = vpop.permute.xlu1 %5291  ;;  %5207 = vrot.lane.b32.xlu2 %v4542_v41, %s8293_s15 }
 0x7cc   : > { %v5704_v55 = vsel %vm2283_vm5, %v5672_v30, %v5292_v22  ;;  %v5296_v57 = vpop.permute.xlu0 %5295 }
 0x7cd   : > { %v5736_v19 = vsel %vm2316_vm4, %v5704_v55, %v13197_v4  ;;  %v13274_v0 = vpop.permute.xlu2 %5301  ;;  %v8163_v4 = vld [vmem:[#allocation3 + $0x51] sm:$0xff] }
 0x7ce   : > { %7987 = vmatmul.msk.f32.gmra.mxu2 %vm2358_vm6, %v5736_v19  ;;  %v5514_v34 = vsel %vm307_vm0, %v8163_v4, %v12140_v1  ;;  %v4574_v1 = vld [vmem:[#allocation3 + $0x1a3] sm:$0xff]  ;;  %v4601_v19 = vld [vmem:[#allocation3 + $0x16d] sm:$0xff] }
 0x7cf   : > { %v5546_v45 = vsel %vm2118_vm11, %v5514_v34, %v12467_v3 }
 0x7d0   : > { %v5578_v27 = vsel %vm2151_vm15, %v5546_v45, %v12582_v51 }
 0x7d1   : > { %5195 = vrot.lane.b32.xlu1 %v4536_v53, %s8293_s15  ;;  %v5610_v41 = vsel %vm2184_vm2, %v5578_v27, %v16281_v11  ;;  %v16288_v27 = vld [vmem:[#allocation66_spill] sm:$0xff]  ;;  %v16289_v11 = vld [vmem:[#allocation125_spill] sm:$0xff] }
 0x7d2   : > { %5463 = vrot.lane.b32.xlu0 %v12822_v16, %s8295_s17  ;;  %v5642_v3 = vsel %vm2217_vm1, %v5610_v41, %v12948_v12  ;;  %v4544_v41 = vld [vmem:[#allocation3 + $0x1b9] sm:$0xff] }
 0x7d3   : > { %v5294_v14 = vpop.permute.xlu1 %5293  ;;  %5451 = vrot.lane.b32.xlu2 %v4600_v39, %s8295_s17  ;;  %v5674_v51 = vsel %vm2250_vm3, %v5642_v3, %v13178_v33  ;;  %v16285_v39 = vld [vmem:[#allocation158_spill] sm:$0xff] }
 0x7d4   : > { %v5705_v62 = vsel %vm2283_vm5, %v5673_v37, %v5294_v14  ;;  %v5298_v61 = vpop.permute.xlu0 %5297  ;;  %v5706_v46 = vsel %vm2283_vm5, %v5674_v51, %v5296_v57  ;;  %v16287_v37 = vld [vmem:[#allocation20_spill] sm:$0xff] }
 0x7d5   : > { %v5737_v16 = vsel %vm2316_vm4, %v5705_v62, %v13215_v2  ;;  %v13298_v35 = vpop.permute.xlu2 %5303  ;;  %v8164_v2 = vld [vmem:[#allocation3 + $0x61] sm:$0xff]  ;;  %v5548_v14 = vsel %vm2118_vm11, %v5516_v31, %v16287_v37 }
 0x7d6   : > { %7988 = vmatmul.msk.f32.gmra.mxu2 %vm2358_vm6, %v5737_v16  ;;  %v5515_v26 = vsel %vm307_vm0, %v8164_v2, %v11951_v32  ;;  %v16283_v32 = vld [vmem:[#allocation69_spill] sm:$0xff] }
 0x7d7   : > { %v5547_v22 = vsel %vm2118_vm11, %v5515_v26, %v12504_v59 }
 0x7d8   : > { %v5579_v33 = vsel %vm2151_vm15, %v5547_v22, %v16282_v6 }
 0x7d9   : > { %5335 = vrot.lane.b32.xlu1 %v4574_v1, %s15924_s6  ;;  %v5611_v57 = vsel %vm2184_vm2, %v5579_v33, %v16283_v32  ;;  %v4575_v1 = vld [vmem:[#allocation3 + $0x1b3] sm:$0xff] }
 0x7da   : > { %5325 = vrot.lane.b32.xlu0 %v4569_v52, %s15924_s6  ;;  %v5643_v53 = vsel %vm2217_vm1, %v5611_v57, %v16284_v9  ;;  %v4570_v52 = vld [vmem:[#allocation3 + $0x173] sm:$0xff] }
 0x7db   : > { %v5424_v30 = vpop.permute.xlu1 %5423  ;;  %5209 = vrot.lane.b32.xlu2 %v4543_v54, %s8293_s15  ;;  %v5675_v59 = vsel %vm2250_vm3, %v5643_v53, %v13211_v13  ;;  %v5580_v13 = vsel %vm2151_vm15, %v5548_v14, %v16288_v27  ;;  %v16290_v54 = vld [vmem:[#allocation71_spill] sm:$0xff]  ;;  %v16294_v53 = vld [vmem:[#allocation164_spill] sm:$0xff] }
 0x7dc   : > { %v5738_v12 = vsel %vm2316_vm4, %v5706_v46, %v5424_v30  ;;  %v5300_v48 = vpop.permute.xlu0 %5299  ;;  %v5707_v4 = vsel %vm2283_vm5, %v5675_v59, %v5298_v61  ;;  %v5612_v61 = vsel %vm2184_vm2, %v5580_v13, %v16289_v11  ;;  %v8166_v46 = vld [vmem:[#allocation3 + $0x79] sm:$0xff]  ;;  %v16291_v30 = vld [vmem:[#allocation134_spill] sm:$0xff] }
 0x7dd   : > { %v13318_v55 = vpop.permute.xlu2 %5305  ;;  %v5644_v3 = vsel %vm2217_vm1, %v5612_v61, %v16290_v54  ;;  %v5517_v22 = vsel %vm307_vm0, %v8166_v46, %v16291_v30  ;;  %v16292_v33 = vld [vmem:[#allocation123_spill] sm:$0xff]  ;;  %v4545_v54 = vld [vmem:[#allocation3 + $0x1c9] sm:$0xff] }
 0x7de   : > { %7989 = vmatmul.msk.f32.gmra.mxu2 %vm2358_vm6, %v5738_v12  ;;  %v5676_v51 = vsel %vm2250_vm3, %v5644_v3, %v13221_v28  ;;  %v16293_v28 = vld [vmem:[#allocation129_spill] sm:$0xff]  ;;  %v4602_v9 = vld [vmem:[#allocation3 + $0x175] sm:$0xff] }
 0x7df   : > { %v5708_v2 = vsel %vm2283_vm5, %v5676_v51, %v5300_v48  ;;  %v4538_v48 = vld [vmem:[#allocation3 + $0x171] sm:$0xff]  ;;  %v4576_v61 = vld [vmem:[#allocation3 + $0x1bb] sm:$0xff] }
 0x7e0   : > { %v16297_v27 = vld [vmem:[#allocation63_spill] sm:$0xff]  ;;  %v16299_v3 = vld [vmem:[#allocation10_spill] sm:$0xff] }
 0x7e1   : > { %5197 = vrot.lane.b32.xlu1 %v4537_v23, %s8293_s15  ;;  %v5549_v23 = vsel %vm2118_vm11, %v5517_v22, %v16292_v33  ;;  %v8168_v46 = vld [vmem:[#allocation3 + $0x91] sm:$0xff] }
 0x7e2   : > { %5465 = vrot.lane.b32.xlu0 %v16285_v39, %s8295_s17  ;;  %v5581_v57 = vsel %vm2151_vm15, %v5549_v23, %v16293_v28  ;;  %v16295_v39 = vld [vmem:[#allocation208_spill] sm:$0xff]  ;;  %v16301_v30 = vld [vmem:[#allocation174_spill] sm:$0xff]  ;;  %v16302_v23 = vld [vmem:[#allocation53_spill] sm:$0xff] }
 0x7e3   : > { %v5426_v34 = vpop.permute.xlu1 %5425  ;;  %5453 = vrot.lane.b32.xlu2 %v4601_v19, %s8295_s17  ;;  %v4608_v19 = vld [vmem:[#allocation3 + $0x1bd] sm:$0xff]  ;;  %v5613_v59 = vsel %vm2184_vm2, %v5581_v57, %v16294_v53  ;;  %v5519_v22 = vsel %vm307_vm0, %v8168_v46, %v16301_v30  ;;  %v4609_v53 = vld [vmem:[#allocation3 + $0x1cd] sm:$0xff] }
 0x7e4   : > { %v5739_v45 = vsel %vm2316_vm4, %v5707_v4, %v5426_v34  ;;  %v5430_v62 = vpop.permute.xlu0 %5429  ;;  %v5645_v24 = vsel %vm2217_vm1, %v5613_v59, %v16295_v39  ;;  %v8167_v4 = vld [vmem:[#allocation3 + $0x81] sm:$0xff]  ;;  %v16296_v34 = vld [vmem:[#allocation87_spill] sm:$0xff]  ;;  %v5551_v28 = vsel %vm2118_vm11, %v5519_v22, %v16302_v23  ;;  %v8170_v30 = vld [vmem:[#allocation3 + $0xa9] sm:$0xff] }
 0x7e5   : > { %v13339_v16 = vpop.permute.xlu2 %5435  ;;  %v5677_v18 = vsel %vm2250_vm3, %v5645_v24, %v13226_v36  ;;  %v5518_v37 = vsel %vm307_vm0, %v8167_v4, %v16296_v34  ;;  %v16298_v36 = vld [vmem:[#allocation13_spill] sm:$0xff]  ;;  %v16304_v39 = vld [vmem:[#allocation83_spill] sm:$0xff]  ;;  %v16312_v23 = vld [vmem:[#allocation78_spill] sm:$0xff] }
 0x7e6   : > { %7990 = vmatmul.msk.f32.gmra.mxu2 %vm2358_vm6, %v5739_v45  ;;  %v5709_v14 = vsel %vm2283_vm5, %v5677_v18, %v13274_v0  ;;  %v5550_v13 = vsel %vm2118_vm11, %v5518_v37, %v16297_v27  ;;  %v16300_v0 = vld [vmem:[#allocation177_spill] sm:$0xff]  ;;  %v8169_v24 = vld [vmem:[#allocation3 + $0x99] sm:$0xff]  ;;  %v4546_v46 = vld [vmem:[#allocation3 + $0x1d1] sm:$0xff] }
 0x7e7   : > { %v5582_v11 = vsel %vm2151_vm15, %v5550_v13, %v16298_v36  ;;  %v4603_v59 = vld [vmem:[#allocation3 + $0x185] sm:$0xff] }
 0x7e8   : > { %v5614_v51 = vsel %vm2184_vm2, %v5582_v11, %v16299_v3  ;;  %v16305_v18 = vld [vmem:[#allocation57_spill] sm:$0xff] }
 0x7e9   : > { %5337 = vrot.lane.b32.xlu1 %v4575_v1, %s15924_s6  ;;  %v5741_v1 = vsel %vm2316_vm4, %v5709_v14, %v5430_v62  ;;  %v5520_v4 = vsel %vm307_vm0, %v8169_v24, %v16305_v18  ;;  %v16307_v37 = vld [vmem:[#allocation17_spill] sm:$0xff]  ;;  %v4610_v24 = vld [vmem:[#allocation3 + $0x1d5] sm:$0xff]  ;;  %v16315_v18 = vld [vmem:[#allocation204_spill] sm:$0xff] }
 0x7ea   : > { %5327 = vrot.lane.b32.xlu0 %v4570_v52, %s15924_s6  ;;  %v5552_v14 = vsel %vm2118_vm11, %v5520_v4, %v16307_v37  ;;  %v4577_v3 = vld [vmem:[#allocation3 + $0x1cb] sm:$0xff] }
 0x7eb   : > { %v5428_v26 = vpop.permute.xlu1 %5427  ;;  %5211 = vrot.lane.b32.xlu2 %v4544_v41, %s8293_s15  ;;  %v4571_v41 = vld [vmem:[#allocation3 + $0x183] sm:$0xff]  ;;  %v8171_v37 = vld [vmem:[#allocation3 + $0xb1] sm:$0xff] }
 0x7ec   : > { %v5740_v12 = vsel %vm2316_vm4, %v5708_v2, %v5428_v26  ;;  %v5432_v6 = vpop.permute.xlu0 %5431  ;;  %v5646_v2 = vsel %vm2217_vm1, %v5614_v51, %v16300_v0  ;;  %v16309_v51 = vld [vmem:[#allocation105_spill] sm:$0xff] }
 0x7ed   : > { %v13357_v32 = vpop.permute.xlu2 %5437  ;;  %v5678_v62 = vsel %vm2250_vm3, %v5646_v2, %v13247_v25  ;;  %v16303_v25 = vld [vmem:[#allocation196_spill] sm:$0xff]  ;;  %v4572_v0 = vld [vmem:[#allocation3 + $0x18b] sm:$0xff] }
 0x7ee   : > { %7991 = vmatmul.msk.f32.gmra.mxu2 %vm2358_vm6, %v5740_v12  ;;  %v5710_v12 = vsel %vm2283_vm5, %v5678_v62, %v13298_v35  ;;  %v16310_v2 = vld [vmem:[#allocation185_spill] sm:$0xff] }
 0x7ef   : > { %v5742_v57 = vsel %vm2316_vm4, %v5710_v12, %v5432_v6  ;;  %v16306_v6 = vld [vmem:[#allocation30_spill] sm:$0xff] }
 0x7f1   : > { %5199 = vrot.lane.b32.xlu1 %v4538_v48, %s8293_s15 }
 0x7f2   : > { %5467 = vrot.lane.b32.xlu0 %v4608_v19, %s8295_s17  ;;  %v5583_v19 = vsel %vm2151_vm15, %v5551_v28, %v16303_v25  ;;  %v16313_v25 = vld [vmem:[#allocation59_spill] sm:$0xff] }
 0x7f3   : > { %v13370_v31 = vpop.permute.xlu1 %5181  ;;  %5455 = vrot.lane.b32.xlu2 %v4602_v9, %s8295_s17  ;;  %v4539_v9 = vld [vmem:[#allocation3 + $0x181] sm:$0xff]  ;;  %v5615_v35 = vsel %vm2184_vm2, %v5583_v19, %v16304_v39  ;;  %v16314_v39 = vld [vmem:[#allocation103_spill] sm:$0xff] }
 0x7f4   : > { %v5434_v45 = vpop.permute.xlu0 %5433  ;;  %v5647_v34 = vsel %vm2217_vm1, %v5615_v35, %v16306_v6  ;;  %v4604_v6 = vld [vmem:[#allocation3 + $0x18d] sm:$0xff] }
 0x7f5   : > { %v13380_v52 = vpop.permute.xlu2 %5439  ;;  %v5679_v27 = vsel %vm2250_vm3, %v5647_v34, %v13230_v60 }
 0x7f6   : > { %7992 = vmatmul.msk.f32.gmra.mxu2 %vm2358_vm6, %v5741_v1  ;;  %v16308_v1 = vld [vmem:[#allocation184_spill] sm:$0xff]  ;;  %v5711_v11 = vsel %vm2283_vm5, %v5679_v27, %v13318_v55 }
 0x7f7   : > { %v5584_v36 = vsel %vm2151_vm15, %v5552_v14, %v16308_v1 }
 0x7f8   : > { %v5616_v60 = vsel %vm2184_vm2, %v5584_v36, %v16309_v51  ;;  %v4578_v51 = vld [vmem:[#allocation3 + $0x1d3] sm:$0xff] }
 0x7f9   : > { %5339 = vrot.lane.b32.xlu1 %v4576_v61, %s15924_s6  ;;  %v5648_v62 = vsel %vm2217_vm1, %v5616_v60, %v16310_v2  ;;  %v16319_v60 = vld [vmem:[#allocation79_spill] sm:$0xff] }
 0x7fa   : > { %5329 = vrot.lane.b32.xlu0 %v4571_v41, %s15924_s6  ;;  %v5743_v41 = vsel %vm2316_vm4, %v5711_v11, %v5434_v45  ;;  %v5680_v55 = vsel %vm2250_vm3, %v5648_v62, %v13253_v21  ;;  %v16311_v45 = vld [vmem:[#allocation64_spill] sm:$0xff]  ;;  %v16318_v11 = vld [vmem:[#allocation215_spill] sm:$0xff] }
 0x7fb   : > { %v13393_v26 = vpop.permute.xlu1 %5183  ;;  %5213 = vrot.lane.b32.xlu2 %v4545_v54, %s8293_s15  ;;  %v5521_v22 = vsel %vm307_vm0, %v8170_v30, %v16311_v45  ;;  %v4611_v62 = vld [vmem:[#allocation3 + $0x1e5] sm:$0xff] }
 0x7fc   : > { %v13400_v33 = vpop.permute.xlu0 %5185  ;;  %v5553_v28 = vsel %vm2118_vm11, %v5521_v22, %v16312_v23  ;;  %v4579_v30 = vld [vmem:[#allocation3 + $0x1e3] sm:$0xff] }
 0x7fd   : > { %v13405_v48 = vpop.permute.xlu2 %5189  ;;  %v5585_v19 = vsel %vm2151_vm15, %v5553_v28, %v16313_v25  ;;  %v16321_v23 = vld [vmem:[#allocation48_spill] sm:$0xff] }
 0x7fe   : > { %7993 = vmatmul.msk.f32.gmra.mxu2 %vm2358_vm6, %v5742_v57  ;;  %v5617_v35 = vsel %vm2184_vm2, %v5585_v19, %v16314_v39  ;;  %v16322_v25 = vld [vmem:[#allocation112_spill] sm:$0xff] }
 0x7ff   : > { %v5649_v4 = vsel %vm2217_vm1, %v5617_v35, %v16315_v18  ;;  %v4547_v39 = vld [vmem:[#allocation3 + $0x1e1] sm:$0xff]  ;;  %v4612_v35 = vld [vmem:[#allocation3 + $0x1ed] sm:$0xff]  ;;  %v16324_v18 = vld [vmem:[#allocation23_spill] sm:$0xff] }
 0x800   : > { %v5681_v34 = vsel %vm2250_vm3, %v5649_v4, %v13370_v31 }
 0x801   : > { %5201 = vrot.lane.b32.xlu1 %v4539_v9, %s8293_s15 }
 0x802   : > { %5469 = vrot.lane.b32.xlu0 %v4609_v53, %s8295_s17 }
 0x803   : > { %v5308_v13 = vpop.permute.xlu1 %5307  ;;  %5457 = vrot.lane.b32.xlu2 %v4603_v59, %s8295_s17  ;;  %v4540_v59 = vld [vmem:[#allocation3 + $0x189] sm:$0xff] }
 0x804   : > { %v13427_v61 = vpop.permute.xlu0 %5187  ;;  %v5712_v12 = vsel %vm2283_vm5, %v5680_v55, %v5308_v13  ;;  %v16317_v13 = vld [vmem:[#allocation82_spill] sm:$0xff] }
 0x805   : > { %v13430_v54 = vpop.permute.xlu2 %5191  ;;  %v5744_v9 = vsel %vm2316_vm4, %v5712_v12, %v13339_v16  ;;  %v16316_v16 = vld [vmem:[#allocation31_spill] sm:$0xff]  ;;  %v8172_v12 = vld [vmem:[#allocation3 + $0xc1] sm:$0xff] }
 0x806   : > { %7994 = vmatmul.msk.f32.gmra.mxu2 %vm2358_vm6, %v5743_v41  ;;  %v5522_v14 = vsel %vm307_vm0, %v8171_v37, %v16316_v16  ;;  %v5523_v28 = vsel %vm307_vm0, %v8172_v12, %v16321_v23  ;;  %v8173_v16 = vld [vmem:[#allocation3 + $0xc9] sm:$0xff] }
 0x807   : > { %v5554_v1 = vsel %vm2118_vm11, %v5522_v14, %v16317_v13  ;;  %v5555_v19 = vsel %vm2118_vm11, %v5523_v28, %v16322_v25  ;;  %v16325_v14 = vld [vmem:[#allocation16_spill] sm:$0xff]  ;;  %v16331_v23 = vld [vmem:[#allocation149_spill] sm:$0xff] }
 0x808   : > { %v5586_v41 = vsel %vm2151_vm15, %v5554_v1, %v16318_v11 }
 0x809   : > { %5341 = vrot.lane.b32.xlu1 %v4577_v3, %s15924_s6 }
 0x80a   : > { %5331 = vrot.lane.b32.xlu0 %v4572_v0, %s15924_s6  ;;  %v5618_v0 = vsel %vm2184_vm2, %v5586_v41, %v16319_v60  ;;  %v16327_v41 = vld [vmem:[#allocation200_spill] sm:$0xff] }
 0x80b   : > { %v5310_v57 = vpop.permute.xlu1 %5309  ;;  %5215 = vrot.lane.b32.xlu2 %v4546_v46, %s8293_s15  ;;  %v16320_v46 = vld [vmem:[#allocation18_spill] sm:$0xff] }
 0x80c   : > { %v5314_v21 = vpop.permute.xlu0 %5313  ;;  %v5713_v27 = vsel %vm2283_vm5, %v5681_v34, %v5310_v57  ;;  %v5650_v55 = vsel %vm2217_vm1, %v5618_v0, %v16320_v46  ;;  %v16329_v0 = vld [vmem:[#allocation95_spill] sm:$0xff] }
 0x80d   : > { %v13451_v53 = vpop.permute.xlu2 %5319  ;;  %v5745_v3 = vsel %vm2316_vm4, %v5713_v27, %v13357_v32  ;;  %v5682_v45 = vsel %vm2250_vm3, %v5650_v55, %v13393_v26  ;;  %v5524_v27 = vsel %vm307_vm0, %v8173_v16, %v16325_v14 }
 0x80e   : > { %7995 = vmatmul.msk.f32.gmra.mxu2 %vm2358_vm6, %v5744_v9  ;;  %v16323_v9 = vld [vmem:[#allocation121_spill] sm:$0xff] }
 0x811   : > { %5203 = vrot.lane.b32.xlu1 %v4540_v59, %s8293_s15  ;;  %v5587_v59 = vsel %vm2151_vm15, %v5555_v19, %v16323_v9  ;;  %v16332_v19 = vld [vmem:[#allocation138_spill] sm:$0xff] }
 0x812   : > { %5471 = vrot.lane.b32.xlu0 %v4610_v24, %s8295_s17  ;;  %v4580_v24 = vld [vmem:[#allocation3 + $0x1eb] sm:$0xff]  ;;  %v5619_v4 = vsel %vm2184_vm2, %v5587_v59, %v16324_v18 }
 0x813   : > { %v5312_v36 = vpop.permute.xlu1 %5311  ;;  %5459 = vrot.lane.b32.xlu2 %v4604_v6, %s8295_s17  ;;  %v5651_v34 = vsel %vm2217_vm1, %v5619_v4, %v13094_v20  ;;  %v16334_v59 = vld [vmem:[#allocation193_spill] sm:$0xff] }
 0x814   : > { %v5316_v31 = vpop.permute.xlu0 %5315  ;;  %v5714_v32 = vsel %vm2283_vm5, %v5682_v45, %v5312_v36  ;;  %v16326_v36 = vld [vmem:[#allocation162_spill] sm:$0xff]  ;;  %v16330_v45 = vld [vmem:[#allocation76_spill] sm:$0xff]  ;;  %v16335_v18 = vld [vmem:[#allocation157_spill] sm:$0xff] }
 0x815   : > { %v13475_v2 = vpop.permute.xlu2 %5205  ;;  %v5746_v26 = vsel %vm2316_vm4, %v5714_v32, %v13380_v52  ;;  %v5683_v52 = vsel %vm2250_vm3, %v5651_v34, %v13400_v33  ;;  %v5556_v11 = vsel %vm2118_vm11, %v5524_v27, %v16326_v36  ;;  %v4548_v33 = vld [vmem:[#allocation3 + $0x1e9] sm:$0xff]  ;;  %v8176_v34 = vld [vmem:[#allocation3 + $0xe1] sm:$0xff] }
 0x816   : > { %7996 = vmatmul.msk.f32.gmra.mxu2 %vm2358_vm6, %v5745_v3  ;;  %v5715_v13 = vsel %vm2283_vm5, %v5683_v52, %v5314_v21  ;;  %v5588_v3 = vsel %vm2151_vm15, %v5556_v11, %v16327_v41  ;;  %v16336_v52 = vld [vmem:[#allocation42_spill] sm:$0xff]  ;;  %v16337_v27 = vld [vmem:[#allocation109_spill] sm:$0xff]  ;;  %v16338_v36 = vld [vmem:[#allocation68_spill] sm:$0xff] }
 0x817   : > { %v16339_v41 = vld [vmem:[#allocation91_spill] sm:$0xff] }
 0x819   : > { %5343 = vrot.lane.b32.xlu1 %v4578_v51, %s15924_s6  ;;  %v16328_v51 = vld [vmem:[#allocation150_spill] sm:$0xff] }
 0x81a   : > { %5473 = vrot.lane.b32.xlu0 %v4611_v62, %s8295_s17  ;;  %v5620_v60 = vsel %vm2184_vm2, %v5588_v3, %v16328_v51 }
 0x81b   : > { %v5442_v22 = vpop.permute.xlu1 %5441  ;;  %5345 = vrot.lane.b32.xlu2 %v4579_v30, %s15924_s6  ;;  %v5652_v21 = vsel %vm2217_vm1, %v5620_v60, %v16329_v0  ;;  %v8174_v30 = vld [vmem:[#allocation3 + $0xd9] sm:$0xff]  ;;  %v16341_v0 = vld [vmem:[#allocation62_spill] sm:$0xff] }
 0x81c   : > { %v5318_v57 = vpop.permute.xlu0 %5317  ;;  %v5747_v20 = vsel %vm2316_vm4, %v5715_v13, %v5442_v22  ;;  %v5684_v62 = vsel %vm2250_vm3, %v5652_v21, %v13427_v61  ;;  %v5525_v32 = vsel %vm307_vm0, %v8174_v30, %v16330_v45  ;;  %v16333_v61 = vld [vmem:[#allocation32_spill] sm:$0xff]  ;;  %v16343_v45 = vld [vmem:[#allocation46_spill] sm:$0xff] }
 0x81d   : > { %v13497_v6 = vpop.permute.xlu2 %5449  ;;  %v5716_v22 = vsel %vm2283_vm5, %v5684_v62, %v5316_v31  ;;  %v5557_v28 = vsel %vm2118_vm11, %v5525_v32, %v16331_v23  ;;  %v16342_v62 = vld [vmem:[#allocation148_spill] sm:$0xff]  ;;  %v16344_v32 = vld [vmem:[#allocation117_spill] sm:$0xff]  ;;  %v16345_v23 = vld [vmem:[#allocation131_spill] sm:$0xff] }
 0x81e   : > { %7997 = vmatmul.msk.f32.gmra.mxu2 %vm2358_vm6, %v5746_v26  ;;  %v5589_v26 = vsel %vm2151_vm15, %v5557_v28, %v16332_v19 }
 0x81f   : > { %v5621_v9 = vsel %vm2184_vm2, %v5589_v26, %v16333_v61 }
 0x821   : > { %5217 = vrot.lane.b32.xlu1 %v4547_v39, %s8293_s15  ;;  %v5653_v39 = vsel %vm2217_vm1, %v5621_v9, %v16334_v59 }
 0x822   : > { %5475 = vrot.lane.b32.xlu0 %v4612_v35, %s8295_s17  ;;  %v5685_v31 = vsel %vm2250_vm3, %v5653_v39, %v13405_v48 }
 0x823   : > { %v5444_v37 = vpop.permute.xlu1 %5443  ;;  %5347 = vrot.lane.b32.xlu2 %v4580_v24, %s15924_s6  ;;  %v8175_v24 = vld [vmem:[#allocation3 + $0x139] sm:$0xff]  ;;  %v5717_v16 = vsel %vm2283_vm5, %v5685_v31, %v5318_v57  ;;  %v8177_v57 = vld [vmem:[#allocation3 + $0xf1] sm:$0xff] }
 0x824   : > { %v5448_v1 = vpop.permute.xlu0 %5447  ;;  %v5748_v25 = vsel %vm2316_vm4, %v5716_v22, %v5444_v37  ;;  %v5533_v4 = vsel %vm307_vm0, %v8175_v24, %v16335_v18  ;;  %v5526_v37 = vsel %vm307_vm0, %v8176_v34, %v16336_v52  ;;  %v5527_v21 = vsel %vm307_vm0, %v8177_v57, %v16341_v0  ;;  %v16347_v18 = vld [vmem:[#allocation73_spill] sm:$0xff] }
 0x825   : > { %v13521_v46 = vpop.permute.xlu2 %5207  ;;  %v5558_v13 = vsel %vm2118_vm11, %v5526_v37, %v16337_v27  ;;  %v5565_v11 = vsel %vm2118_vm11, %v5533_v4, %v16338_v36  ;;  %v5559_v30 = vsel %vm2118_vm11, %v5527_v21, %v16342_v62  ;;  %v16348_v52 = vld [vmem:[#allocation169_spill] sm:$0xff]  ;;  %v8178_v37 = vld [vmem:[#allocation3 + $0xf9] sm:$0xff] }
 0x826   : > { %7998 = vmatmul.msk.f32.gmra.mxu2 %vm2358_vm6, %v5747_v20  ;;  %v5590_v3 = vsel %vm2151_vm15, %v5558_v13, %v16339_v41  ;;  %v5591_v28 = vsel %vm2151_vm15, %v5559_v30, %v16345_v23  ;;  %v16350_v13 = vld [vmem:[#allocation143_spill] sm:$0xff]  ;;  %v16353_v57 = vld [vmem:[#allocation137_spill] sm:$0xff]  ;;  %v16354_v21 = vld [vmem:[#allocation36_spill] sm:$0xff] }
 0x827   : > { %v5622_v22 = vsel %vm2184_vm2, %v5590_v3, %v16344_v32  ;;  %v5623_v4 = vsel %vm2184_vm2, %v5591_v28, %v16347_v18  ;;  %v8179_v3 = vld [vmem:[#allocation3 + $0x141] sm:$0xff] }
 0x828   : > { %v5654_v26 = vsel %vm2217_vm1, %v5622_v22, %v13103_v63  ;;  %v16356_v22 = vld [vmem:[#allocation130_spill] sm:$0xff] }
 0x829   : > { %5219 = vrot.lane.b32.xlu1 %v4548_v33, %s8293_s15  ;;  %v16340_v33 = vld [vmem:[#allocation191_spill] sm:$0xff]  ;;  %v5686_v61 = vsel %vm2250_vm3, %v5654_v26, %v13430_v54  ;;  %v5655_v54 = vsel %vm2217_vm1, %v5623_v4, %v16348_v52  ;;  %v16360_v52 = vld [vmem:[#allocation166_spill] sm:$0xff] }
 0x82a   : > { %v5597_v51 = vsel %vm2151_vm15, %v5565_v11, %v16340_v33  ;;  %v5718_v39 = vsel %vm2283_vm5, %v5686_v61, %v13451_v53  ;;  %v16352_v33 = vld [vmem:[#allocation33_spill] sm:$0xff] }
 0x82b   : > { %v5446_v55 = vpop.permute.xlu1 %5445  ;;  %v5750_v63 = vsel %vm2316_vm4, %v5718_v39, %v5448_v1  ;;  %v16351_v1 = vld [vmem:[#allocation182_spill] sm:$0xff] }
 0x82c   : > { %v5322_v12 = vpop.permute.xlu0 %5321  ;;  %v5749_v48 = vsel %vm2316_vm4, %v5717_v16, %v5446_v55  ;;  %v5629_v55 = vsel %vm2184_vm2, %v5597_v51, %v16343_v45  ;;  %v16349_v16 = vld [vmem:[#allocation89_spill] sm:$0xff]  ;;  %v16357_v39 = vld [vmem:[#allocation14_spill] sm:$0xff] }
 0x82d   : > { %v5452_v20 = vpop.permute.xlu2 %5451  ;;  %v5528_v27 = vsel %vm307_vm0, %v8178_v37, %v16349_v16  ;;  %v16355_v45 = vld [vmem:[#allocation209_spill] sm:$0xff]  ;;  %v8181_v16 = vld [vmem:[#allocation3 + $0x151] sm:$0xff] }
 0x82e   : > { %7999 = vmatmul.msk.f32.gmra.mxu2 %vm2358_vm6, %v5748_v25  ;;  %v16346_v25 = vld [vmem:[#allocation211_spill] sm:$0xff]  ;;  %v5560_v36 = vsel %vm2118_vm11, %v5528_v27, %v16350_v13  ;;  %v16361_v27 = vld [vmem:[#allocation178_spill] sm:$0xff] }
 0x82f   : > { %v5661_v19 = vsel %vm2217_vm1, %v5629_v55, %v16346_v25  ;;  %v5592_v11 = vsel %vm2151_vm15, %v5560_v36, %v16351_v1  ;;  %v5535_v13 = vsel %vm307_vm0, %v8181_v16, %v16361_v27  ;;  %v16373_v16 = vld [vmem:[#allocation45_spill] sm:$0xff] }
 0x830   : > { %v5693_v9 = vsel %vm2250_vm3, %v5661_v19, %v13475_v2  ;;  %v5624_v62 = vsel %vm2184_vm2, %v5592_v11, %v16354_v21  ;;  %v16362_v11 = vld [vmem:[#allocation179_spill] sm:$0xff] }
 0x831   : > { %v13553_v60 = vpop.f32.mrf.mxu2 }
 0x833   : > { %v5194_v35 = vpop.permute.xlu1 %5193 }
 0x834   : > { %v5462_v14 = vpop.permute.xlu0 %5461  ;;  %v5687_v2 = vsel %vm2250_vm3, %v5655_v54, %v5194_v35  ;;  %v5534_v35 = vsel %vm307_vm0, %v8179_v3, %v16352_v33  ;;  %v16363_v3 = vld [vmem:[#allocation97_spill] sm:$0xff] }
 0x835   : > { %v5210_v53 = vpop.permute.xlu2 %5209  ;;  %v5566_v0 = vsel %vm2118_vm11, %v5534_v35, %v16353_v57 }
 0x836   : > { %8000 = vmatmul.msk.f32.gmra.mxu2 %vm2358_vm6, %v5749_v48  ;;  %v5719_v48 = vsel %vm2283_vm5, %v5687_v2, %v5322_v12  ;;  %v5598_v55 = vsel %vm2151_vm15, %v5566_v0, %v16355_v45  ;;  %v5656_v12 = vsel %vm2217_vm1, %v5624_v62, %v13097_v17 }
 0x837   : > { %v5751_v30 = vsel %vm2316_vm4, %v5719_v48, %v13497_v6  ;;  %v5630_v23 = vsel %vm2184_vm2, %v5598_v55, %v16356_v22  ;;  %v5567_v48 = vsel %vm2118_vm11, %v5535_v13, %v16362_v11  ;;  %v8182_v55 = vld [vmem:[#allocation3 + $0x111] sm:$0xff] }
 0x838   : > { %v5662_v19 = vsel %vm2217_vm1, %v5630_v23, %v13118_v38  ;;  %v5599_v33 = vsel %vm2151_vm15, %v5567_v48, %v16363_v3  ;;  %v8184_v3 = vld [vmem:[#allocation3 + $0x121] sm:$0xff] }
 0x839   : > { %v5694_v26 = vsel %vm2250_vm3, %v5662_v19, %v13521_v46  ;;  %v16359_v46 = vld [vmem:[#allocation34_spill] sm:$0xff] }
 0x83b   : > { %v5334_v59 = vpop.permute.xlu1 %5333 }
 0x83c   : > { %v5725_v31 = vsel %vm2283_vm5, %v5693_v9, %v5334_v59  ;;  %v5324_v24 = vpop.permute.xlu0 %5323  ;;  %v8180_v59 = vld [vmem:[#allocation3 + $0x109] sm:$0xff] }
 0x83d   : > { %v5757_v34 = vsel %vm2316_vm4, %v5725_v31, %v5462_v14  ;;  %v13589_v14 = vpop.f32.mrf.mxu2  ;;  %v5454_v28 = vpop.permute.xlu2 %5453  ;;  %v5529_v31 = vsel %vm307_vm0, %v8180_v59, %v16357_v39  ;;  %v8183_v39 = vld [vmem:[#allocation3 + $0x159] sm:$0xff] }
 0x83e   : > { %8001 = vmatmul.msk.f32.gmra.mxu2 %vm2358_vm6, %v5750_v63  ;;  %8008 = vmatmul.msk.f32.vlgmr.msra.gmra.mxu3 %vm2358_vm6, %v5757_v34  ;;  %v16358_v34 = vld [vmem:[#allocation102_spill] sm:$0xff] }
 0x83f   : > { %v5561_v38 = vsel %vm2118_vm11, %v5529_v31, %v16358_v34  ;;  %v16370_v31 = vld [vmem:[#allocation98_spill] sm:$0xff] }
 0x843   : > { %v5196_v41 = vpop.permute.xlu1 %5195 }
 0x844   : > { %v5464_v51 = vpop.permute.xlu0 %5463  ;;  %v5688_v32 = vsel %vm2250_vm3, %v5656_v12, %v5196_v41  ;;  %v16365_v12 = vld [vmem:[#allocation43_spill] sm:$0xff] }
 0x845   : > { %v5720_v6 = vsel %vm2283_vm5, %v5688_v32, %v5324_v24  ;;  %v5593_v24 = vsel %vm2151_vm15, %v5561_v38, %v16359_v46  ;;  %v5212_v2 = vpop.permute.xlu2 %5211  ;;  %v5530_v32 = vsel %vm307_vm0, %v8182_v55, %v16365_v12  ;;  %v16371_v38 = vld [vmem:[#allocation28_spill] sm:$0xff] }
 0x846   : > { %8002 = vmatmul.msk.f32.gmra.mxu2 %vm2358_vm6, %v5751_v30  ;;  %v5752_v18 = vsel %vm2316_vm4, %v5720_v6, %v5452_v20  ;;  %v5625_v54 = vsel %vm2184_vm2, %v5593_v24, %v16360_v52  ;;  %v16367_v6 = vld [vmem:[#allocation80_spill] sm:$0xff]  ;;  %v16372_v52 = vld [vmem:[#allocation203_spill] sm:$0xff] }
 0x847   : > { %v5657_v20 = vsel %vm2217_vm1, %v5625_v54, %v13115_v10  ;;  %v16364_v10 = vld [vmem:[#allocation155_spill] sm:$0xff] }
 0x849   : > { %v13610_v25 = vpop.f32.mrf.mxu2 }
 0x84b   : > { %v5336_v61 = vpop.permute.xlu1 %5335 }
 0x84c   : > { %v5726_v17 = vsel %vm2283_vm5, %v5694_v26, %v5336_v61  ;;  %v5326_v9 = vpop.permute.xlu0 %5325  ;;  %v16368_v26 = vld [vmem:[#allocation124_spill] sm:$0xff] }
 0x84d   : > { %v5758_v4 = vsel %vm2316_vm4, %v5726_v17, %v5464_v51  ;;  %v5631_v51 = vsel %vm2184_vm2, %v5599_v33, %v16364_v10  ;;  %v5456_v22 = vpop.permute.xlu2 %5455  ;;  %v16369_v17 = vld [vmem:[#allocation56_spill] sm:$0xff] }
 0x84e   : > { %8003 = vmatmul.msk.f32.gmra.mxu2 %vm2358_vm6, %v5752_v18  ;;  %8009 = vmatmul.msk.f32.gmra.mxu3 %vm2358_vm6, %v5758_v4  ;;  %v5663_v0 = vsel %vm2217_vm1, %v5631_v51, %v13157_v50  ;;  %v5536_v18 = vsel %vm307_vm0, %v8183_v39, %v16370_v31  ;;  %v16374_v33 = vld [vmem:[#allocation172_spill] sm:$0xff]  ;;  %v16375_v51 = vld [vmem:[#allocation94_spill] sm:$0xff] }
 0x84f   : > { %v5695_v21 = vsel %vm2250_vm3, %v5663_v0, %v5210_v53  ;;  %v5568_v46 = vsel %vm2118_vm11, %v5536_v18, %v16371_v38 }
 0x850   : > { %v5600_v54 = vsel %vm2151_vm15, %v5568_v46, %v16372_v52  ;;  %v8186_v46 = vld [vmem:[#allocation3 + $0x129] sm:$0xff] }
 0x851   : > { %v13628_v63 = vpop.f32.mrf.mxu2  ;;  %v5632_v27 = vsel %vm2184_vm2, %v5600_v54, %v16373_v16  ;;  %v16383_v16 = vld [vmem:[#allocation50_spill] sm:$0xff] }
 0x853   : > { %v5198_v37 = vpop.permute.xlu1 %5197 }
 0x854   : > { %v5689_v36 = vsel %vm2250_vm3, %v5657_v20, %v5198_v37  ;;  %v5466_v1 = vpop.permute.xlu0 %5465 }
 0x855   : > { %v5721_v41 = vsel %vm2283_vm5, %v5689_v36, %v5326_v9  ;;  %v5214_v37 = vpop.permute.xlu2 %5213  ;;  %v5664_v36 = vsel %vm2217_vm1, %v5632_v27, %v13099_v8 }
 0x856   : > { %v5753_v35 = vsel %vm2316_vm4, %v5721_v41, %v5454_v28  ;;  %v16366_v28 = vld [vmem:[#allocation37_spill] sm:$0xff] }
 0x857   : > { %8004 = vmatmul.msk.f32.gmra.mxu2 %vm2358_vm6, %v5753_v35  ;;  %v5562_v19 = vsel %vm2118_vm11, %v5530_v32, %v16366_v28  ;;  %v5531_v35 = vsel %vm307_vm0, %v8184_v3, %v16374_v33  ;;  %v8185_v32 = vld [vmem:[#allocation3 + $0x169] sm:$0xff]  ;;  %v8187_v3 = vld [vmem:[#allocation3 + $0x171] sm:$0xff]  ;;  %v16386_v33 = vld [vmem:[#allocation128_spill] sm:$0xff] }
 0x858   : > { %v5594_v50 = vsel %vm2151_vm15, %v5562_v19, %v16367_v6  ;;  %v5563_v0 = vsel %vm2118_vm11, %v5531_v35, %v16375_v51  ;;  %v16379_v6 = vld [vmem:[#allocation27_spill] sm:$0xff]  ;;  %v5538_v35 = vsel %vm307_vm0, %v8187_v3, %v16386_v33 }
 0x859   : > { %v13646_v57 = vpop.f32.mrf.mxu2  ;;  %v5626_v61 = vsel %vm2184_vm2, %v5594_v50, %v16368_v26 }
 0x85a   : > { %v5658_v9 = vsel %vm2217_vm1, %v5626_v61, %v16369_v17  ;;  %v16380_v61 = vld [vmem:[#allocation100_spill] sm:$0xff] }
 0x85b   : > { %v5338_v62 = vpop.permute.xlu1 %5337 }
 0x85c   : > { %v5727_v30 = vsel %vm2283_vm5, %v5695_v21, %v5338_v62  ;;  %v5328_v45 = vpop.permute.xlu0 %5327  ;;  %v16376_v21 = vld [vmem:[#allocation192_spill] sm:$0xff] }
 0x85d   : > { %v5759_v23 = vsel %vm2316_vm4, %v5727_v30, %v5466_v1  ;;  %v5696_v1 = vsel %vm2250_vm3, %v5664_v36, %v5212_v2  ;;  %v5595_v8 = vsel %vm2151_vm15, %v5563_v0, %v16376_v21  ;;  %v5458_v62 = vpop.permute.xlu2 %5457  ;;  %v16377_v30 = vld [vmem:[#allocation86_spill] sm:$0xff] }
 0x85e   : > { %8010 = vmatmul.msk.f32.gmra.mxu3 %vm2358_vm6, %v5759_v23  ;;  %v16387_v0 = vld [vmem:[#allocation22_spill] sm:$0xff] }
 0x85f   : > { %v5570_v21 = vsel %vm2118_vm11, %v5538_v35, %v16387_v0 }
 0x861   : > { %v13660_v53 = vpop.f32.mrf.mxu2 }
 0x863   : > { %v5200_v59 = vpop.permute.xlu1 %5199 }
 0x864   : > { %v5690_v4 = vsel %vm2250_vm3, %v5658_v9, %v5200_v59  ;;  %v5468_v34 = vpop.permute.xlu0 %5467 }
 0x865   : > { %v5722_v24 = vsel %vm2283_vm5, %v5690_v4, %v5328_v45  ;;  %v5627_v45 = vsel %vm2184_vm2, %v5595_v8, %v16377_v30  ;;  %v5216_v4 = vpop.permute.xlu2 %5215 }
 0x866   : > { %v5754_v20 = vsel %vm2316_vm4, %v5722_v24, %v5456_v22  ;;  %v5659_v55 = vsel %vm2217_vm1, %v5627_v45, %v13106_v44  ;;  %v16378_v22 = vld [vmem:[#allocation52_spill] sm:$0xff]  ;;  %v16381_v44 = vld [vmem:[#allocation38_spill] sm:$0xff]  ;;  %v16382_v24 = vld [vmem:[#allocation133_spill] sm:$0xff] }
 0x867   : > { %8005 = vmatmul.msk.f32.gmra.mxu2 %vm2358_vm6, %v5754_v20  ;;  %v5537_v23 = vsel %vm307_vm0, %v8185_v32, %v16378_v22  ;;  %v5532_v52 = vsel %vm307_vm0, %v8186_v46, %v16382_v24  ;;  %v8189_v24 = vld [vmem:[#allocation3 + $0x189] sm:$0xff] }
 0x868   : > { %v5569_v50 = vsel %vm2118_vm11, %v5537_v23, %v16379_v6  ;;  %v5564_v27 = vsel %vm2118_vm11, %v5532_v52, %v16383_v16  ;;  %v16390_v6 = vld [vmem:[#allocation93_spill] sm:$0xff]  ;;  %v16395_v16 = vld [vmem:[#allocation24_spill] sm:$0xff] }
 0x869   : > { %v13678_v13 = vpop.f32.mrf.mxu2  ;;  %v5601_v17 = vsel %vm2151_vm15, %v5569_v50, %v16380_v61  ;;  %v16391_v61 = vld [vmem:[#allocation173_spill] sm:$0xff] }
 0x86a   : > { %v5633_v59 = vsel %vm2184_vm2, %v5601_v17, %v16381_v44  ;;  %v16392_v44 = vld [vmem:[#allocation213_spill] sm:$0xff] }
 0x86b   : > { %v5340_v11 = vpop.permute.xlu1 %5339  ;;  %v5665_v39 = vsel %vm2217_vm1, %v5633_v59, %v13139_v43  ;;  %v16384_v43 = vld [vmem:[#allocation206_spill] sm:$0xff]  ;;  %v16394_v52 = vld [vmem:[#allocation9_spill] sm:$0xff] }
 0x86c   : > { %v5728_v48 = vsel %vm2283_vm5, %v5696_v1, %v5340_v11  ;;  %v5330_v41 = vpop.permute.xlu0 %5329  ;;  %v5697_v18 = vsel %vm2250_vm3, %v5665_v39, %v5214_v37  ;;  %v5596_v36 = vsel %vm2151_vm15, %v5564_v27, %v16384_v43  ;;  %v16385_v37 = vld [vmem:[#allocation108_spill] sm:$0xff] }
 0x86d   : > { %v5760_v10 = vsel %vm2316_vm4, %v5728_v48, %v5468_v34  ;;  %v5628_v1 = vsel %vm2184_vm2, %v5596_v36, %v16385_v37  ;;  %v16396_v36 = vld [vmem:[#allocation195_spill] sm:$0xff] }
 0x86e   : > { %8011 = vmatmul.msk.f32.gmra.mxu3 %vm2358_vm6, %v5760_v10  ;;  %v5660_v11 = vsel %vm2217_vm1, %v5628_v1, %v13136_v15  ;;  %v16397_v1 = vld [vmem:[#allocation118_spill] sm:$0xff] }
 0x871   : > { %v13692_v2 = vpop.f32.mrf.mxu2 }
 0x873   : > { %v5202_v12 = vpop.permute.xlu1 %5201 }
 0x874   : > { %v5691_v28 = vsel %vm2250_vm3, %v5659_v55, %v5202_v12  ;;  %v5470_v19 = vpop.permute.xlu0 %5469  ;;  %v16389_v55 = vld [vmem:[#allocation84_spill] sm:$0xff] }
 0x875   : > { %v5723_v26 = vsel %vm2283_vm5, %v5691_v28, %v5330_v41  ;;  %v5460_v41 = vpop.permute.xlu2 %5459 }
 0x876   : > { %v5755_v9 = vsel %vm2316_vm4, %v5723_v26, %v5458_v62  ;;  %v16388_v62 = vld [vmem:[#allocation29_spill] sm:$0xff] }
 0x877   : > { %8006 = vmatmul.msk.f32.gmra.mxu2 %vm2358_vm6, %v5755_v9  ;;  %v5602_v30 = vsel %vm2151_vm15, %v5570_v21, %v16388_v62 }
 0x878   : > { %v5634_v12 = vsel %vm2184_vm2, %v5602_v30, %v16389_v55  ;;  %v6615_v55 = vmul.f32 %v13553_v60, %v13553_v60 }
 0x879   : > { %v13712_v31 = vpop.f32.mrf.mxu2  ;;  %v5666_v32 = vsel %vm2217_vm1, %v5634_v12, %v13164_v49  ;;  %v6546_v12 = vsel %vm307_vm0, %v13589_v14, 0.0 }
 0x87a   : > { %v5698_v22 = vsel %vm2250_vm3, %v5666_v32, %v5216_v4  ;;  %v6617_v32 = vmul.f32 %v13610_v25, %v13610_v25 }
 0x87b   : > { %v5342_v34 = vpop.permute.xlu1 %5341 }
 0x87c   : > { %v5729_v38 = vsel %vm2283_vm5, %v5697_v18, %v5342_v34  ;;  %v5332_v20 = vpop.permute.xlu0 %5331  ;;  %v16393_v18 = vld [vmem:[#allocation145_spill] sm:$0xff] }
 0x87d   : > { %v5761_v54 = vsel %vm2316_vm4, %v5729_v38, %v5470_v19  ;;  %v8188_v19 = vld [vmem:[#allocation3 + $0x181] sm:$0xff]  ;;  %v5346_v59 = vpop.permute.xlu2 %5345 }
 0x87e   : > { %8012 = vmatmul.msk.f32.gmra.mxu3 %vm2358_vm6, %v5761_v54  ;;  %v5539_v50 = vsel %vm307_vm0, %v8188_v19, %v16390_v6  ;;  %v5540_v54 = vsel %vm307_vm0, %v8189_v24, %v16394_v52  ;;  %v6548_v19 = vsel %vm307_vm0, %v13610_v25, 0.0  ;;  %v6618_v6 = vmul.f32 %v13628_v63, %v13628_v63 }
 0x87f   : > { %v5571_v17 = vsel %vm2118_vm11, %v5539_v50, %v16391_v61  ;;  %v5572_v27 = vsel %vm2118_vm11, %v5540_v54, %v16395_v16  ;;  %v6650_v61 = vsel %vm307_vm0, %v6617_v32, 0.0  ;;  %v6554_v24 = vsel %vm307_vm0, %v13660_v53, 0.0 }
 0x880   : > { %v5603_v49 = vsel %vm2151_vm15, %v5571_v17, %v16392_v44  ;;  %v5604_v37 = vsel %vm2151_vm15, %v5572_v27, %v16396_v36  ;;  %v6550_v17 = vsel %vm307_vm0, %v13628_v63, 0.0  ;;  %v6619_v44 = vmul.f32 %v13646_v57, %v13646_v57 }
 0x881   : > { %v13730_v10 = vpop.f32.mrf.mxu2  ;;  %v5635_v4 = vsel %vm2184_vm2, %v5603_v49, %v16393_v18  ;;  %v6552_v18 = vsel %vm307_vm0, %v13646_v57, 0.0  ;;  %v6621_v52 = vmul.f32 %v13678_v13, %v13678_v13  ;;  %v6556_v27 = vsel %vm307_vm0, %v13678_v13, 0.0 }
 0x882   : > { %v5667_v34 = vsel %vm2217_vm1, %v5635_v4, %v13108_v56  ;;  %v6620_v4 = vmul.f32 %v13660_v53, %v13660_v53 }
 0x883   : > { %v5204_v48 = vpop.permute.xlu1 %5203 }
 0x884   : > { %v5692_v51 = vsel %vm2250_vm3, %v5660_v11, %v5204_v48  ;;  %v5472_v45 = vpop.permute.xlu0 %5471  ;;  %v5636_v11 = vsel %vm2184_vm2, %v5604_v37, %v16397_v1  ;;  %v6656_v16 = vsel %vm307_vm0, %v6620_v4, 0.0 }
 0x885   : > { %v5724_v8 = vsel %vm2283_vm5, %v5692_v51, %v5332_v20  ;;  %v5348_v48 = vpop.permute.xlu2 %5347 }
 0x886   : > { %v5756_v15 = vsel %vm2316_vm4, %v5724_v8, %v5460_v41  ;;  %v5668_v41 = vsel %vm2217_vm1, %v5636_v11, %v13160_v5  ;;  %v6658_v11 = vsel %vm307_vm0, %v6621_v52, 0.0 }
 0x887   : > { %8007 = vmatmul.msk.f32.gmra.mxu2 %vm2358_vm6, %v5756_v15 }
 0x889   : > { %v13751_v9 = vpop.f32.mrf.mxu2 }
 0x88b   : > { %v5344_v23 = vpop.permute.xlu1 %5343 }
 0x88c   : > { %v5730_v28 = vsel %vm2283_vm5, %v5698_v22, %v5344_v23  ;;  %v5474_v39 = vpop.permute.xlu0 %5473  ;;  %v6545_v23 = vsel %vm307_vm0, %v13553_v60, 0.0 }
 0x88d   : > { %v5762_v26 = vsel %vm2316_vm4, %v5730_v28, %v5472_v45  ;;  %v6616_v45 = vmul.f32 %v13589_v14, %v13589_v14  ;;  %v6547_v50 = vadd.f32 %v6546_v12, %v6545_v23  ;;  %v6562_v23 = vsel %vm307_vm0, %v13730_v10, 0.0 }
 0x88e   : > { %8013 = vmatmul.msk.f32.gmra.mxu3 %vm2358_vm6, %v5762_v26  ;;  %v6647_v26 = vsel %vm307_vm0, %v6615_v55, 0.0 }
 0x88f   : > { %v6648_v28 = vsel %vm307_vm0, %v6616_v45, 0.0  ;;  %v6624_v45 = vmul.f32 %v13730_v10, %v13730_v10 }
 0x890   : > { %v6649_v49 = vadd.f32 %v6648_v28, %v6647_v26  ;;  %v6625_v28 = vmul.f32 %v13751_v9, %v13751_v9  ;;  %v6564_v26 = vsel %vm307_vm0, %v13751_v9, 0.0 }
 0x891   : > { %v13770_v56 = vpop.f32.mrf.mxu2 }
 0x893   : > { %v5218_v38 = vpop.permute.xlu1 %5217 }
 0x894   : > { %v5699_v46 = vsel %vm2250_vm3, %v5667_v34, %v5218_v38  ;;  %v5476_v33 = vpop.permute.xlu0 %5475  ;;  %v6651_v34 = vadd.f32 %v6650_v61, %v6649_v49  ;;  %v6626_v61 = vmul.f32 %v13770_v56, %v13770_v56  ;;  %v6666_v49 = vsel %vm307_vm0, %v6625_v28, 0.0 }
 0x895   : > { %v5731_v20 = vsel %vm2283_vm5, %v5699_v46, %v5346_v59  ;;  %v6549_v59 = vadd.f32 %v6548_v19, %v6547_v50  ;;  %v6654_v46 = vsel %vm307_vm0, %v6619_v44, 0.0  ;;  %v6664_v50 = vsel %vm307_vm0, %v6624_v45, 0.0 }
 0x896   : > { %v5763_v43 = vsel %vm2316_vm4, %v5731_v20, %v5474_v39  ;;  %v6652_v39 = vsel %vm307_vm0, %v6618_v6, 0.0 }
 0x897   : > { %8014 = vmatmul.msk.f32.gmra.mxu3 %vm2358_vm6, %v5763_v43  ;;  %v6551_v38 = vadd.f32 %v6550_v17, %v6549_v59  ;;  %v6653_v54 = vadd.f32 %v6652_v39, %v6651_v34  ;;  %v6622_v43 = vmul.f32 %v13692_v2, %v13692_v2  ;;  %v6566_v59 = vsel %vm307_vm0, %v13770_v56, 0.0 }
 0x899   : > { %v13780_v21 = vpop.f32.mrf.mxu2  ;;  %v6553_v20 = vadd.f32 %v6552_v18, %v6551_v38  ;;  %v6655_v36 = vadd.f32 %v6654_v46, %v6653_v54  ;;  %v6668_v46 = vsel %vm307_vm0, %v6626_v61, 0.0 }
 0x89a   : > { %v6627_v39 = vmul.f32 %v13780_v21, %v13780_v21 }
 0x89b   : > { %v5220_v3 = vpop.permute.xlu1 %5219  ;;  %v6555_v37 = vadd.f32 %v6554_v24, %v6553_v20  ;;  %v6568_v24 = vsel %vm307_vm0, %v13780_v21, 0.0 }
 0x89c   : > { %v5700_v35 = vsel %vm2250_vm3, %v5668_v41, %v5220_v3  ;;  %v6623_v41 = vmul.f32 %v13712_v31, %v13712_v31 }
 0x89d   : > { %v5732_v51 = vsel %vm2283_vm5, %v5700_v35, %v5348_v48  ;;  %v6558_v48 = vsel %vm307_vm0, %v13692_v2, 0.0  ;;  %v6557_v35 = vadd.f32 %v6556_v27, %v6555_v37  ;;  %vm7115_vm5 = vcmask 1046528  }
 0x89e   : > { %v5764_v0 = vsel %vm2316_vm4, %v5732_v51, %v5476_v33  ;;  %v6657_v33 = vadd.f32 %v6656_v16, %v6655_v36  ;;  %v6660_v51 = vsel %vm307_vm0, %v6622_v43, 0.0  ;;  %v6662_v32 = vsel %vm307_vm0, %v6623_v41, 0.0 }
 0x89f   : > { %8015 = vmatmul.msk.f32.gmra.mxu3 %vm2358_vm6, %v5764_v0  ;;  %v6560_v0 = vsel %vm307_vm0, %v13712_v31, 0.0  ;;  %v6559_v12 = vadd.f32 %v6558_v48, %v6557_v35  ;;  %v6670_v16 = vsel %vm307_vm0, %v6627_v39, 0.0  ;;  %vm444_vm4 = vcmask 57344  }
 0x8a0   : > { %v6659_v55 = vadd.f32 %v6658_v11, %v6657_v33  ;;  %vm7260_vm6 = vcmask 1045504  }
 0x8a1   : > { %v13782_v8 = vpop.f32.mrf.mxu2  ;;  %v6561_v6 = vadd.f32 %v6560_v0, %v6559_v12 }
 0x8a2   : > { %v6661_v19 = vadd.f32 %v6660_v51, %v6659_v55  ;;  %v6628_v52 = vmul.f32 %v13782_v8, %v13782_v8  ;;  %v6570_v27 = vsel %vm307_vm0, %v13782_v8, 0.0 }
 0x8a3   : > { %v6563_v44 = vadd.f32 %v6562_v23, %v6561_v6 }
 0x8a4   : > { %v6663_v17 = vadd.f32 %v6662_v32, %v6661_v19  ;;  %v6672_v11 = vsel %vm307_vm0, %v6628_v52, 0.0 }
 0x8a5   : > { %v6565_v34 = vadd.f32 %v6564_v26, %v6563_v44 }
 0x8a6   : > { %v6665_v4 = vadd.f32 %v6664_v50, %v6663_v17 }
 0x8a7   : > { %v6567_v20 = vadd.f32 %v6566_v59, %v6565_v34 }
 0x8a8   : > { %v6667_v54 = vadd.f32 %v6666_v49, %v6665_v4 }
 0x8a9   : > { %v13784_v62 = vpop.f32.mrf.mxu2  ;;  %v6569_v37 = vadd.f32 %v6568_v24, %v6567_v20 }
 0x8aa   : > { %v6629_v43 = vmul.f32 %v13784_v62, %v13784_v62  ;;  %v6669_v36 = vadd.f32 %v6668_v46, %v6667_v54  ;;  %v6572_v48 = vsel %vm307_vm0, %v13784_v62, 0.0 }
 0x8ab   : > { %v6571_v35 = vadd.f32 %v6570_v27, %v6569_v37 }
 0x8ac   : > { %v6671_v33 = vadd.f32 %v6670_v16, %v6669_v36  ;;  %v6674_v51 = vsel %vm307_vm0, %v6629_v43, 0.0 }
 0x8ad   : > { %v6573_v32 = vadd.f32 %v6572_v48, %v6571_v35 }
 0x8ae   : > { %v6673_v12 = vadd.f32 %v6672_v11, %v6671_v33 }
 0x8b0   : > { %v6675_v50 = vadd.f32 %v6674_v51, %v6673_v12 }
 0x8b1   : > { %v13786_v30 = vpop.f32.mrf.mxu2 }
 0x8b2   : > { %v6630_v41 = vmul.f32 %v13786_v30, %v13786_v30  ;;  %v6574_v0 = vsel %vm307_vm0, %v13786_v30, 0.0 }
 0x8b3   : > { %v6575_v26 = vadd.f32 %v6574_v0, %v6573_v32 }
 0x8b4   : > { %v6676_v28 = vsel %vm307_vm0, %v6630_v41, 0.0 }
 0x8b5   : > { %v6677_v49 = vadd.f32 %v6676_v28, %v6675_v50 }
 0x8b9   : > { %v13788_v15 = vpop.f32.mrf.mxu2 }
 0x8ba   : > { %v6631_v45 = vmul.f32 %v13788_v15, %v13788_v15  ;;  %v6576_v19 = vsel %vm307_vm0, %v13788_v15, 0.0 }
 0x8bb   : > { %v6577_v59 = vadd.f32 %v6576_v19, %v6575_v26 }
 0x8bc   : > { %v6678_v61 = vsel %vm307_vm0, %v6631_v45, 0.0 }
 0x8bd   : > { %v6679_v46 = vadd.f32 %v6678_v61, %v6677_v49 }
 0x8c1   : > { %v13790_v5 = vpop.f32.mrf.mxu2  ;;  %v13837_v3 = vpop.f32.mrf.mxu3 }
 0x8c2   : > { %v6632_v6 = vmul.f32 %v13790_v5, %v13790_v5  ;;  %v6578_v17 = vsel %vm307_vm0, %v13790_v5, 0.0  ;;  %v6639_v49 = vmul.f32 %v13837_v3, %v13837_v3 }
 0x8c3   : > { %v6579_v24 = vadd.f32 %v6578_v17, %v6577_v59 }
 0x8c4   : > { %v6680_v39 = vsel %vm307_vm0, %v6632_v6, 0.0 }
 0x8c5   : > { %v6681_v27 = vadd.f32 %v6680_v39, %v6679_v46  ;;  %v6592_v46 = vsel %vm307_vm0, %v13837_v3, 0.0 }
 0x8c9   : > { %v13800_v22 = vpop.f32.mrf.mxu2 }
 0x8ca   : > { %v6633_v44 = vmul.f32 %v13800_v22, %v13800_v22  ;;  %v6580_v4 = vsel %vm307_vm0, %v13800_v22, 0.0 }
 0x8cb   : > { %v6581_v43 = vadd.f32 %v6580_v4, %v6579_v24 }
 0x8cc   : > { %v6682_v52 = vsel %vm307_vm0, %v6633_v44, 0.0 }
 0x8cd   : > { %v6683_v41 = vadd.f32 %v6682_v52, %v6681_v27  ;;  %v6694_v27 = vsel %vm307_vm0, %v6639_v49, 0.0 }
 0x8d1   : > { %v13830_v1 = vpop.f32.mrf.mxu2  ;;  %v13859_v18 = vpop.f32.mrf.mxu3 }
 0x8d2   : > { %v6634_v34 = vmul.f32 %v13830_v1, %v13830_v1  ;;  %v6582_v54 = vsel %vm307_vm0, %v13830_v1, 0.0  ;;  %v6640_v24 = vmul.f32 %v13859_v18, %v13859_v18 }
 0x8d3   : > { %v6583_v33 = vadd.f32 %v6582_v54, %v6581_v43  ;;  %v6594_v43 = vsel %vm307_vm0, %v13859_v18, 0.0 }
 0x8d4   : > { %v6684_v37 = vsel %vm307_vm0, %v6634_v34, 0.0 }
 0x8d5   : > { %v6685_v45 = vadd.f32 %v6684_v37, %v6683_v41 }
 0x8da   : > { %v13861_v38 = vpop.f32.mrf.mxu2 }
 0x8db   : > { %v6635_v20 = vmul.f32 %v13861_v38, %v13861_v38  ;;  %v6584_v11 = vsel %vm307_vm0, %v13861_v38, 0.0 }
 0x8dc   : > { %v6585_v12 = vadd.f32 %v6584_v11, %v6583_v33 }
 0x8dd   : > { %v6686_v35 = vsel %vm307_vm0, %v6635_v20, 0.0 }
 0x8de   : > { %v6687_v19 = vadd.f32 %v6686_v35, %v6685_v45 }
 0x8e1   : > { %v13883_v55 = vpop.f32.mrf.mxu3 }
 0x8e2   : > { %v6641_v41 = vmul.f32 %v13883_v55, %v13883_v55 }
 0x8e4   : > { %v6698_v45 = vsel %vm307_vm0, %v6641_v41, 0.0 }
 0x8ea   : > { %v13885_v23 = vpop.f32.mrf.mxu2 }
 0x8eb   : > { %v6636_v48 = vmul.f32 %v13885_v23, %v13885_v23  ;;  %v6586_v51 = vsel %vm307_vm0, %v13885_v23, 0.0 }
 0x8ec   : > { %v6587_v6 = vadd.f32 %v6586_v51, %v6585_v12  ;;  %v6596_v51 = vsel %vm307_vm0, %v13883_v55, 0.0 }
 0x8ed   : > { %v6688_v32 = vsel %vm307_vm0, %v6636_v48, 0.0  ;;  %v6696_v48 = vsel %vm307_vm0, %v6640_v24, 0.0 }
 0x8ee   : > { %v6689_v61 = vadd.f32 %v6688_v32, %v6687_v19 }
 0x8f1   : > { %v13907_v16 = vpop.f32.mrf.mxu3 }
 0x8f2   : > { %v6642_v12 = vmul.f32 %v13907_v16, %v13907_v16 }
 0x8fa   : > { %v13909_v36 = vpop.f32.mrf.mxu2 }
 0x8fb   : > { %v6637_v0 = vmul.f32 %v13909_v36, %v13909_v36  ;;  %v6588_v28 = vsel %vm307_vm0, %v13909_v36, 0.0 }
 0x8fc   : > { %v6589_v17 = vadd.f32 %v6588_v28, %v6587_v6  ;;  %v6598_v28 = vsel %vm307_vm0, %v13907_v16, 0.0  ;;  %v6700_v6 = vsel %vm307_vm0, %v6642_v12, 0.0 }
 0x8fd   : > { %v6690_v50 = vsel %vm307_vm0, %v6637_v0, 0.0 }
 0x8fe   : > { %v6691_v4 = vadd.f32 %v6690_v50, %v6689_v61 }
 0x901   : > { %v13925_v26 = vpop.f32.mrf.mxu3 }
 0x902   : > { %v6643_v50 = vmul.f32 %v13925_v26, %v13925_v26  ;;  %v6600_v49 = vsel %vm307_vm0, %v13925_v26, 0.0 }
 0x90a   : > { %v13927_v44 = vpop.f32.mrf.mxu2 }
 0x90b   : > { %v6590_v59 = vsel %vm307_vm0, %v13927_v44, 0.0  ;;  %v6638_v39 = vmul.f32 %v13927_v44, %v13927_v44 }
 0x90c   : > { %v6591_v34 = vadd.f32 %v6590_v59, %v6589_v17 }
 0x90d   : > { %v6692_v52 = vsel %vm307_vm0, %v6638_v39, 0.0  ;;  %v6702_v39 = vsel %vm307_vm0, %v6643_v50, 0.0 }
 0x90e   : > { %v6593_v54 = vadd.f32 %v6592_v46, %v6591_v34  ;;  %v6693_v20 = vadd.f32 %v6692_v52, %v6691_v4 }
 0x910   : > { %v6595_v37 = vadd.f32 %v6594_v43, %v6593_v54  ;;  %v6695_v11 = vadd.f32 %v6694_v27, %v6693_v20 }
 0x911   : > { %v13946_v33 = vpop.f32.mrf.mxu3 }
 0x912   : > { %v6697_v35 = vadd.f32 %v6696_v48, %v6695_v11  ;;  %v6597_v0 = vadd.f32 %v6596_v51, %v6595_v37  ;;  %v6644_v4 = vmul.f32 %v13946_v33, %v13946_v33  ;;  %v6602_v24 = vsel %vm307_vm0, %v13946_v33, 0.0 }
 0x914   : > { %v6699_v32 = vadd.f32 %v6698_v45, %v6697_v35  ;;  %v6599_v19 = vadd.f32 %v6598_v28, %v6597_v0  ;;  %v6704_v20 = vsel %vm307_vm0, %v6644_v4, 0.0 }
 0x916   : > { %v6701_v61 = vadd.f32 %v6700_v6, %v6699_v32  ;;  %v6601_v59 = vadd.f32 %v6600_v49, %v6599_v19 }
 0x918   : > { %v6703_v46 = vadd.f32 %v6702_v39, %v6701_v61  ;;  %v6603_v54 = vadd.f32 %v6602_v24, %v6601_v59 }
 0x91a   : > { %v13958_v17 = vpop.f32.mrf.mxu3  ;;  %v6705_v43 = vadd.f32 %v6704_v20, %v6703_v46 }
 0x91b   : > { %v6645_v34 = vmul.f32 %v13958_v17, %v13958_v17  ;;  %v6604_v52 = vsel %vm307_vm0, %v13958_v17, 0.0 }
 0x91c   : > { %v6605_v37 = vadd.f32 %v6604_v52, %v6603_v54 }
 0x91d   : > { %v6706_v27 = vsel %vm307_vm0, %v6645_v34, 0.0 }
 0x91e   : > { %v6707_v35 = vadd.f32 %v6706_v27, %v6705_v43 }
 0x922   : > { %v13973_v11 = vpop.f32.mrf.mxu3 }
 0x923   : > { %v6606_v48 = vsel %vm307_vm0, %v13973_v11, 0.0  ;;  %v6646_v41 = vmul.f32 %v13973_v11, %v13973_v11 }
 0x924   : > { %v6607_v51 = vadd.f32 %v6606_v48, %v6605_v37 }
 0x925   : > { %v6708_v0 = vsel %vm307_vm0, %v6646_v41, 0.0 }
 0x926   : > { %v6608_v45 = vrot.slane %v6607_v51, 4  ;;  %v6709_v12 = vadd.f32 %v6708_v0, %v6707_v35  ;;  %v16398_v0 = vld [vmem:[#allocation186_spill] sm:$0xff] }
 0x928   : > { %v6609_v32 = vadd.f32 %v6608_v45, %v6607_v51  ;;  %v6710_v28 = vrot.slane %v6709_v12, 4  ;;  %v16399_v45 = vld [vmem:[#allocation106_spill] sm:$0xff] }
 0x92a   : > { %v6610_v19 = vrot.slane %v6609_v32, 2  ;;  %v6711_v6 = vadd.f32 %v6710_v28, %v6709_v12  ;;  %v6408_v12 = vsub.f32 %v16399_v45, %v16398_v0  ;;  %v16400_v28 = vld [vmem:[#allocation159_spill] sm:$0xff] }
 0x92c   : > { %v6611_v50 = vadd.f32 %v6610_v19, %v6609_v32  ;;  %v6712_v61 = vrot.slane %v6711_v6, 2  ;;  %v6159_v19 = vsub.f32 %v16400_v28, %v16235_v7  ;;  %v16406_v28 = vld [vmem:[#allocation132_spill] sm:$0xff] }
 0x92e   : > { %v6612_v49 = vrot.slane %v6611_v50, 1  ;;  %v6713_v59 = vadd.f32 %v6712_v61, %v6711_v6  ;;  %v16401_v6 = vld [vmem:[#allocation198_spill] sm:$0xff] }
 0x930   : > { %v6613_v39 = vadd.f32 %v6612_v49, %v6611_v50  ;;  %v6714_v4 = vrot.slane %v6713_v59, 1  ;;  %v6451_v50 = vmul.f32 %v16401_v6, %v6408_v12  ;;  %v16402_v49 = vld [vmem:[#allocation11_spill] sm:$0xff]  ;;  %v6406_v12 = vsub.f32 %v16406_v28, %v16398_v0 }
 0x932   : > { %v13980_v34 = vmul.f32 0.00390625, %v6613_v39  ;;  %v6715_v46 = vadd.f32 %v6714_v4, %v6713_v59  ;;  %v6157_v59 = vsub.f32 %v16402_v49, %v16235_v7  ;;  %v6202_v39 = vmul.f32 %v16237_v40, %v6159_v19  ;;  %v16403_v4 = vld [vmem:[#allocation75_spill] sm:$0xff]  ;;  %v16408_v19 = vld [vmem:[#allocation92_spill] sm:$0xff] }
 0x933   : > { %v6162_v37 = vsub.f32 %v16408_v19, %v16235_v7 }
 0x934   : > { %v6716_v24 = vmul.f32 0.00390625, %v6715_v46  ;;  %v6717_v52 = vmul.f32 %v13980_v34, %v13980_v34  ;;  %v6750_v54 = vsub.f32 %v13973_v11, %v13980_v34  ;;  %v6158_v46 = vsub.f32 %v16403_v4, %v16235_v7  ;;  %v16409_v4 = vld [vmem:[#allocation47_spill] sm:$0xff] }
 0x935   : > { %v6483_v49 = vadd.f32 %v6451_v50, %v6202_v39  ;;  %v6165_v35 = vsub.f32 %v16409_v4, %v16235_v7  ;;  %v6721_v50 = vsub.f32 %v13610_v25, %v13980_v34  ;;  %v6200_v39 = vmul.f32 %v16237_v40, %v6157_v59 }
 0x936   : > { %v6718_v20 = vsub.f32 %v6716_v24, %v6717_v52  ;;  %v16404_v24 = vld [vmem:[#allocation115_spill] sm:$0xff]  ;;  %v6205_v59 = vmul.f32 %v16237_v40, %v6162_v37 }
 0x937   : > { %v6160_v52 = vsub.f32 %v16404_v24, %v16235_v7 }
 0x938   : > { %v6751_v27 = vadd.f32 1e-05, %v6718_v20 }
 0x93a   : > { %8104 = vrsqrt.f32 %v6751_v27  ;;  %vm6758_vm2 = vweird.f32 %v6751_v27 }
 0x940   : > { %v8105_v51 = vpop.eup %8104 }
 0x941   : > { %v6753_v11 = vmul.f32 %v8105_v51, %v6751_v27  ;;  %vm6759_vm1 = vweird.f32 %v8105_v51 }
 0x942   : > { %vm6760_vm3 = vmor %vm6758_vm2, %vm6759_vm1 }
 0x943   : > { %v6754_v32 = vmul.f32 %v8105_v51, %v6753_v11  ;;  %v16405_v11 = vld [vmem:[#allocation25_spill] sm:$0xff] }
 0x944   : > { %v6161_v45 = vsub.f32 %v16405_v11, %v16235_v7  ;;  %v6449_v11 = vmul.f32 %v16401_v6, %v6406_v12  ;;  %v14034_v12 = vld [vmem:[%s8565_s10 + $0x10] sm:$0xff] }
 0x945   : > { %v6755_v61 = vmul.f32 0.5, %v6754_v32  ;;  %v16407_v32 = vld [vmem:[#allocation99_spill] sm:$0xff]  ;;  %16412 = vst [vmem:[#allocation12_spill] sm:$0xff] %v14034_v12 }
 0x946   : > { %v6407_v43 = vsub.f32 %v16407_v32, %v16398_v0  ;;  %v6201_v32 = vmul.f32 %v16237_v40, %v6158_v46  ;;  %v6204_v19 = vmul.f32 %v16237_v40, %v6161_v45  ;;  %v16414_v46 = vld [vmem:[#allocation113_spill] sm:$0xff] }
 0x947   : > { %v6756_v20 = vsub.f32 1.5, %v6755_v61  ;;  %v16410_v61 = vld [vmem:[#allocation74_spill] sm:$0xff] }
 0x948   : > { %v6411_v41 = vsub.f32 %v16410_v61, %v16398_v0  ;;  %v6450_v28 = vmul.f32 %v16401_v6, %v6407_v43  ;;  %v14037_v43 = vadd.f32 %v14034_v12, %v6483_v49  ;;  %v6409_v61 = vsub.f32 %v16414_v46, %v16398_v0 }
 0x949   : > { %v6757_v24 = vmul.f32 %v8105_v51, %v6756_v20 }
 0x94a   : > { %v6454_v27 = vmul.f32 %v16401_v6, %v6411_v41  ;;  %16413 = vst [vmem:[#allocation60_spill] sm:$0xff] %v14037_v43  ;;  %v16416_v41 = vld [vmem:[#allocation153_spill] sm:$0xff]  ;;  %v6482_v48 = vadd.f32 %v6450_v28, %v6201_v32  ;;  %v6745_v32 = vsub.f32 %v13883_v55, %v13980_v34 }
 0x94b   : > { %v14027_v4 = vsel %vm6760_vm3, %v8105_v51, %v6757_v24  ;;  %v16415_v51 = vld [vmem:[#allocation26_spill] sm:$0xff]  ;;  %v6414_v24 = vsub.f32 %v16416_v41, %v16398_v0  ;;  %v16420_v41 = vsub.f32 %v13946_v33, %v13980_v34 }
 0x94c   : > { %v14031_v20 = vmul.f32 %v14027_v4, %v6750_v54  ;;  %v6764_v25 = vmul.f32 %v14027_v4, %v6721_v50  ;;  %v6410_v45 = vsub.f32 %v16415_v51, %v16398_v0  ;;  %v6481_v54 = vadd.f32 %v6449_v11, %v6200_v39 }
 0x94d   : > { %v6452_v50 = vmul.f32 %v16401_v6, %v6409_v61  ;;  %v6457_v46 = vmul.f32 %v16401_v6, %v6414_v24  ;;  %v6719_v51 = vsub.f32 %v13553_v60, %v13980_v34  ;;  %v6486_v12 = vadd.f32 %v6454_v27, %v6205_v59 }
 0x94e   : > { %16411 = vst [vmem:[#allocation210_spill] sm:$0xff] %v14031_v20  ;;  %v6720_v20 = vsub.f32 %v13589_v14, %v13980_v34  ;;  %v6796_v49 = vadd.f32 %v6764_v25, %v14037_v43  ;;  %v6453_v37 = vmul.f32 %v16401_v6, %v6410_v45  ;;  %v6724_v11 = vsub.f32 %v13660_v53, %v13980_v34  ;;  %v14073_v25 = vld [vmem:[%s8565_s10 + $0x8] sm:$0xff] }
 0x94f   : > { %v6743_v14 = vsub.f32 %v13837_v3, %v13980_v34  ;;  %v6744_v39 = vsub.f32 %v13859_v18, %v13980_v34  ;;  %v6746_v60 = vsub.f32 %v13907_v16, %v13980_v34  ;;  %v6762_v27 = vmul.f32 %v14027_v4, %v6719_v51  ;;  %v14079_v18 = vld [vmem:[%s8565_s10] sm:$0xff] }
 0x950   : > { %7505 = vrot.lane.b32.xlu0 %v6796_v49, %s8288_s30  ;;  %v6763_v28 = vmul.f32 %v14027_v4, %v6720_v20  ;;  %v6767_v53 = vmul.f32 %v14027_v4, %v6724_v11  ;;  %v14076_v20 = vadd.f32 %v14073_v25, %v6482_v48  ;;  %v14082_v55 = vadd.f32 %v14079_v18, %v6481_v54  ;;  %v14113_v11 = vld [vmem:[%s8565_s10 + $0x28] sm:$0xff] }
 0x951   : > { %v14070_v3 = vmul.f32 %v14027_v4, %v6743_v14  ;;  %v14085_v59 = vmul.f32 %v14027_v4, %v6744_v39  ;;  %v14088_v16 = vmul.f32 %v14027_v4, %v6745_v32  ;;  %v14091_v61 = vmul.f32 %v14027_v4, %v6746_v60 }
 0x952   : > { %16417 = vst [vmem:[#allocation104_spill] sm:$0xff] %v14076_v20  ;;  %v16419_v45 = vsub.f32 %v13925_v26, %v13980_v34  ;;  %v14103_v24 = vmul.f32 %v14027_v4, %v16420_v41  ;;  %v16421_v54 = vsub.f32 %v13958_v17, %v13980_v34  ;;  %v6795_v51 = vadd.f32 %v6763_v28, %v14076_v20  ;;  %v16426_v41 = vld [vmem:[#allocation165_spill] sm:$0xff] }
 0x953   : > { %16418 = vst [vmem:[#allocation144_spill] sm:$0xff] %v14082_v55  ;;  %v14116_v26 = vadd.f32 %v14113_v11, %v6486_v12  ;;  %v6203_v14 = vmul.f32 %v16237_v40, %v6160_v52  ;;  %v6794_v33 = vadd.f32 %v6762_v27, %v14082_v55  ;;  %v6208_v39 = vmul.f32 %v16237_v40, %v6165_v35  ;;  %v16423_v52 = vld [vmem:[#allocation72_spill] sm:$0xff] }
 0x954   : > { %v14097_v48 = vmul.f32 %v14027_v4, %v16419_v45  ;;  %v14109_v49 = vmul.f32 %v14027_v4, %v16421_v54  ;;  %v6485_v32 = vadd.f32 %v6453_v37, %v6204_v19  ;;  %v6723_v17 = vsub.f32 %v13646_v57, %v13980_v34  ;;  %7503 = vrot.lane.b32.xlu2 %v6795_v51, %s8288_s30  ;;  %v16424_v37 = vld [vmem:[#allocation156_spill] sm:$0xff]  ;;  %v14144_v51 = vld [vmem:[%s8565_s10 + $0x20] sm:$0xff] }
 0x955   : > { %16422 = vst [vmem:[#allocation187_spill] sm:$0xff] %v14116_v26  ;;  %v6799_v28 = vadd.f32 %v6767_v53, %v14116_v26  ;;  %v6484_v60 = vadd.f32 %v6452_v50, %v6203_v14  ;;  %v6722_v12 = vsub.f32 %v13628_v63, %v13980_v34  ;;  %7501 = vrot.lane.b32.xlu1 %v6794_v33, %s8288_s30  ;;  %v16425_v53 = vld [vmem:[#allocation44_spill] sm:$0xff] }
 0x956   : > { %v6413_v27 = vsub.f32 %v16423_v52, %v16398_v0  ;;  %v6489_v35 = vadd.f32 %v6457_v46, %v6208_v39  ;;  %v6727_v19 = vsub.f32 %v13712_v31, %v13980_v34  ;;  %v6766_v57 = vmul.f32 %v14027_v4, %v6723_v17  ;;  %v16428_v33 = vld [vmem:[#allocation40_spill] sm:$0xff]  ;;  %v14155_v52 = vld [vmem:[%s8565_s10 + $0x18] sm:$0xff] }
 0x957   : > { %v6164_v50 = vsub.f32 %v16424_v37, %v16235_v7  ;;  %v6412_v63 = vsub.f32 %v16425_v53, %v16398_v0  ;;  %v6765_v45 = vmul.f32 %v14027_v4, %v6722_v12  ;;  %v6417_v54 = vsub.f32 %v16426_v41, %v16398_v0  ;;  %v16429_v17 = vld [vmem:[#allocation176_spill] sm:$0xff]  ;;  %v14164_v53 = vld [vmem:[%s8565_s10 + $0x40] sm:$0xff] }
 0x958   : > { %7511 = vrot.lane.b32.xlu0 %v6799_v28, %s8288_s30  ;;  %v6456_v46 = vmul.f32 %v16401_v6, %v6413_v27  ;;  %v6770_v31 = vmul.f32 %v14027_v4, %v6727_v19  ;;  %v14147_v14 = vadd.f32 %v14144_v51, %v6485_v32  ;;  %v6163_v39 = vsub.f32 %v16428_v33, %v16235_v7 }
 0x959   : > { %v6168_v28 = vsub.f32 %v16429_v17, %v16235_v7  ;;  %v6455_v12 = vmul.f32 %v16401_v6, %v6412_v63  ;;  %v14158_v37 = vadd.f32 %v14155_v52, %v6484_v60  ;;  %v6207_v27 = vmul.f32 %v16237_v40, %v6164_v50 }
 0x95a   : > { %16427 = vst [vmem:[#allocation194_spill] sm:$0xff] %v14147_v14  ;;  %v6460_v19 = vmul.f32 %v16401_v6, %v6417_v54  ;;  %v6798_v32 = vadd.f32 %v6766_v57, %v14147_v14  ;;  %v14167_v41 = vadd.f32 %v14164_v53, %v6489_v35  ;;  %v6206_v33 = vmul.f32 %v16237_v40, %v6163_v39  ;;  %v16432_v54 = vld [vmem:[#allocation181_spill] sm:$0xff] }
 0x95b   : > { %16430 = vst [vmem:[#allocation214_spill] sm:$0xff] %v14158_v37  ;;  %v6797_v63 = vadd.f32 %v6765_v45, %v14158_v37  ;;  %v6211_v17 = vmul.f32 %v16237_v40, %v6168_v28  ;;  %v6488_v20 = vadd.f32 %v6456_v46, %v6207_v27  ;;  %v6726_v60 = vsub.f32 %v13692_v2, %v13980_v34  ;;  %v14215_v14 = vld [vmem:[%s8565_s10 + $0x58] sm:$0xff] }
 0x95c   : > { %16431 = vst [vmem:[#allocation119_spill] sm:$0xff] %v14167_v41  ;;  %7509 = vrot.lane.b32.xlu2 %v6798_v32, %s8288_s30  ;;  %v6802_v57 = vadd.f32 %v6770_v31, %v14167_v41  ;;  %v6487_v50 = vadd.f32 %v6455_v12, %v6206_v33  ;;  %v6725_v35 = vsub.f32 %v13678_v13, %v13980_v34  ;;  %v16433_v31 = vld [vmem:[#allocation127_spill] sm:$0xff]  ;;  %v16434_v12 = vld [vmem:[#allocation141_spill] sm:$0xff]  ;;  %v16435_v32 = vld [vmem:[#allocation8_spill] sm:$0xff] }
 0x95d   : > { %7507 = vrot.lane.b32.xlu1 %v6797_v63, %s8288_s30  ;;  %v6416_v45 = vsub.f32 %v16432_v54, %v16398_v0  ;;  %v6492_v39 = vadd.f32 %v6460_v19, %v6211_v17  ;;  %v6730_v46 = vsub.f32 %v13770_v56, %v13980_v34  ;;  %v6769_v2 = vmul.f32 %v14027_v4, %v6726_v60  ;;  %v14195_v63 = vld [vmem:[%s8565_s10 + $0x38] sm:$0xff]  ;;  %v16437_v60 = vld [vmem:[#allocation111_spill] sm:$0xff]  ;;  %v16438_v54 = vld [vmem:[#allocation146_spill] sm:$0xff] }
 0x95e   : > { %v6167_v28 = vsub.f32 %v16433_v31, %v16235_v7  ;;  %v6415_v13 = vsub.f32 %v16434_v12, %v16398_v0  ;;  %v6768_v27 = vmul.f32 %v14027_v4, %v6725_v35  ;;  %v6420_v33 = vsub.f32 %v16435_v32, %v16398_v0  ;;  %v14206_v12 = vld [vmem:[%s8565_s10 + $0x30] sm:$0xff] }
 0x95f   : > { %v6459_v19 = vmul.f32 %v16401_v6, %v6416_v45  ;;  %v6773_v56 = vmul.f32 %v14027_v4, %v6730_v46  ;;  %v14198_v17 = vadd.f32 %v14195_v63, %v6488_v20  ;;  %v6171_v31 = vsub.f32 %v16438_v54, %v16235_v7 }
 0x960   : > { %7517 = vrot.lane.b32.xlu0 %v6802_v57, %s8288_s30  ;;  %v6166_v57 = vsub.f32 %v16437_v60, %v16235_v7  ;;  %v6458_v35 = vmul.f32 %v16401_v6, %v6415_v13  ;;  %v14209_v32 = vadd.f32 %v14206_v12, %v6487_v50  ;;  %v6210_v45 = vmul.f32 %v16237_v40, %v6167_v28 }
 0x961   : > { %16436 = vst [vmem:[#allocation65_spill] sm:$0xff] %v14198_v17  ;;  %v6463_v46 = vmul.f32 %v16401_v6, %v6420_v33  ;;  %v6801_v20 = vadd.f32 %v6769_v2, %v14198_v17  ;;  %v14218_v60 = vadd.f32 %v14215_v14, %v6492_v39  ;;  %v6214_v37 = vmul.f32 %v16237_v40, %v6171_v31  ;;  %v16441_v33 = vld [vmem:[#allocation170_spill] sm:$0xff] }
 0x962   : > { %16439 = vst [vmem:[#allocation151_spill] sm:$0xff] %v14209_v32  ;;  %v6209_v54 = vmul.f32 %v16237_v40, %v6166_v57  ;;  %v6800_v13 = vadd.f32 %v6768_v27, %v14209_v32  ;;  %v6491_v41 = vadd.f32 %v6459_v19, %v6210_v45  ;;  %v6729_v50 = vsub.f32 %v13751_v9, %v13980_v34 }
 0x963   : > { %16440 = vst [vmem:[#allocation54_spill] sm:$0xff] %v14218_v60  ;;  %v6805_v2 = vadd.f32 %v6773_v56, %v14218_v60  ;;  %v6728_v39 = vsub.f32 %v13730_v10, %v13980_v34  ;;  %v6419_v27 = vsub.f32 %v16441_v33, %v16398_v0  ;;  %v6495_v57 = vadd.f32 %v6463_v46, %v6214_v37  ;;  %v16442_v56 = vld [vmem:[#allocation49_spill] sm:$0xff]  ;;  %v14246_v46 = vld [vmem:[%s8565_s10 + $0x50] sm:$0xff] }
 0x964   : > { %7515 = vrot.lane.b32.xlu2 %v6801_v20, %s8288_s30  ;;  %v6490_v28 = vadd.f32 %v6458_v35, %v6209_v54  ;;  %v6733_v19 = vsub.f32 %v13784_v62, %v13980_v34  ;;  %v6772_v9 = vmul.f32 %v14027_v4, %v6729_v50  ;;  %v6170_v31 = vsub.f32 %v16442_v56, %v16235_v7  ;;  %v16443_v35 = vld [vmem:[#allocation51_spill] sm:$0xff]  ;;  %v16444_v20 = vld [vmem:[#allocation188_spill] sm:$0xff] }
 0x965   : > { %7513 = vrot.lane.b32.xlu1 %v6800_v13, %s8288_s30  ;;  %v6418_v10 = vsub.f32 %v16443_v35, %v16398_v0  ;;  %v6771_v45 = vmul.f32 %v14027_v4, %v6728_v39  ;;  %v6423_v54 = vsub.f32 %v16444_v20, %v16398_v0  ;;  %v6462_v37 = vmul.f32 %v16401_v6, %v6419_v27  ;;  %v16446_v50 = vld [vmem:[#allocation88_spill] sm:$0xff]  ;;  %v14257_v35 = vld [vmem:[%s8565_s10 + $0x48] sm:$0xff] }
 0x966   : > { %v6776_v62 = vmul.f32 %v14027_v4, %v6733_v19  ;;  %v14249_v13 = vadd.f32 %v14246_v46, %v6491_v41  ;;  %v16447_v33 = vld [vmem:[#allocation136_spill] sm:$0xff]  ;;  %v14260_v0 = vadd.f32 %v14257_v35, %v6490_v28  ;;  %v6213_v27 = vmul.f32 %v16237_v40, %v6170_v31 }
 0x967   : > { %v6174_v56 = vsub.f32 %v16447_v33, %v16235_v7  ;;  %v6461_v39 = vmul.f32 %v16401_v6, %v6418_v10  ;;  %v6466_v19 = vmul.f32 %v16401_v6, %v6423_v54  ;;  %v14266_v20 = vld [vmem:[%s8565_s10 + $0x70] sm:$0xff]  ;;  %v6732_v31 = vsub.f32 %v13782_v8, %v13980_v34 }
 0x968   : > { %7523 = vrot.lane.b32.xlu0 %v6805_v2, %s8288_s30  ;;  %16445 = vst [vmem:[#allocation190_spill] sm:$0xff] %v14249_v13  ;;  %v6169_v2 = vsub.f32 %v16446_v50, %v16235_v7  ;;  %v6804_v41 = vadd.f32 %v6772_v9, %v14249_v13  ;;  %v14269_v50 = vadd.f32 %v14266_v20, %v6495_v57 }
 0x969   : > { %16448 = vst [vmem:[#allocation199_spill] sm:$0xff] %v14260_v0  ;;  %v6803_v10 = vadd.f32 %v6771_v45, %v14260_v0  ;;  %v6217_v33 = vmul.f32 %v16237_v40, %v6174_v56  ;;  %v6494_v28 = vadd.f32 %v6462_v37, %v6213_v27  ;;  %v6731_v57 = vsub.f32 %v13780_v21, %v13980_v34  ;;  %v14294_v21 = vld [vmem:[%s8565_s10 + $0x60] sm:$0xff] }
 0x96a   : > { %16449 = vst [vmem:[#allocation207_spill] sm:$0xff] %v14269_v50  ;;  %v6212_v7 = vmul.f32 %v16237_v40, %v6169_v2  ;;  %v6808_v6 = vadd.f32 %v6776_v62, %v14269_v50  ;;  %v6736_v40 = vsub.f32 %v13790_v5, %v13980_v34  ;;  %v6775_v45 = vmul.f32 %v14027_v4, %v6732_v31  ;;  %v14288_v2 = vld [vmem:[%s8565_s10 + $0x68] sm:$0xff] }
 0x96b   : > { %v6498_v54 = vadd.f32 %v6466_v19, %v6217_v33  ;;  %v6774_v8 = vmul.f32 %v14027_v4, %v6731_v57  ;;  %v14291_v62 = vadd.f32 %v14288_v2, %v6494_v28  ;;  %v6739_v33 = vsub.f32 %v13861_v38, %v13980_v34 }
 0x96c   : > { %7521 = vrot.lane.b32.xlu2 %v6804_v41, %s8288_s30  ;;  %v6493_v9 = vadd.f32 %v6461_v39, %v6212_v7  ;;  %v6779_v37 = vmul.f32 %v14027_v4, %v6736_v40  ;;  %v14301_v39 = vld [vmem:[%s8565_s10 + $0x88] sm:$0xff]  ;;  %v6735_v41 = vsub.f32 %v13788_v15, %v13980_v34 }
 0x96d   : > { %7519 = vrot.lane.b32.xlu1 %v6803_v10, %s8288_s30  ;;  %16450 = vst [vmem:[#allocation58_spill] sm:$0xff] %v14291_v62  ;;  %v6807_v5 = vadd.f32 %v6775_v45, %v14291_v62  ;;  %v14304_v27 = vadd.f32 %v14301_v39, %v6498_v54  ;;  %v6734_v10 = vsub.f32 %v13786_v30, %v13980_v34  ;;  %v14328_v30 = vld [vmem:[%s8565_s10 + $0x78] sm:$0xff]  ;;  %v14336_v54 = vld [vmem:[%s8565_s10 + $0xa0] sm:$0xff] }
 0x96e   : > { %v14297_v56 = vadd.f32 %v14294_v21, %v6493_v9  ;;  %v6778_v28 = vmul.f32 %v14027_v4, %v6735_v41  ;;  %v6782_v15 = vmul.f32 %v14027_v4, %v6739_v33  ;;  %v14332_v57 = vadd.f32 %v14328_v30, %v13054_v42  ;;  %v16468_v62 = vld [vmem:[#allocation205_spill] sm:$0xff] }
 0x96f   : > { %16452 = vst [vmem:[#allocation168_spill] sm:$0xff] %v14304_v27  ;;  %v6811_v7 = vadd.f32 %v6779_v37, %v14304_v27  ;;  %v6777_v31 = vmul.f32 %v14027_v4, %v6734_v10  ;;  %v14340_v40 = vadd.f32 %v14336_v54, %v13062_v29  ;;  %v6737_v42 = vsub.f32 %v13800_v22, %v13980_v34  ;;  %v6827_v29 = vld [vmem:[#allocation4 + $0x8] sm:$0xff] }
 0x970   : > { %7529 = vrot.lane.b32.xlu0 %v6808_v6, %s8288_s30  ;;  %16451 = vst [vmem:[#allocation161_spill] sm:$0xff] %v14297_v56  ;;  %v6806_v19 = vadd.f32 %v6774_v8, %v14297_v56  ;;  %v14321_v6 = vld [vmem:[%s8565_s10 + $0x80] sm:$0xff]  ;;  %v16456_v37 = vmov 0.0   ;;  %v16457_v22 = vsub.f32 %v13927_v44, %v13980_v34  ;;  %v14384_v44 = vld [vmem:[%s8565_s10 + $0xb8] sm:$0xff] }
 0x971   : > { %v14325_v9 = vadd.f32 %v14321_v6, %v13056_v47  ;;  %16454 = vst [vmem:[#allocation202_spill] sm:$0xff] %v14332_v57  ;;  %v6809_v45 = vadd.f32 %v6777_v31, %v14332_v57  ;;  %v6738_v47 = vsub.f32 %v13830_v1, %v13980_v34  ;;  %v6814_v8 = vadd.f32 %v6782_v15, %v14340_v40  ;;  %v16459_v31 = vld [vmem:[#allocation15_spill] sm:$0xff] }
 0x972   : > { %16455 = vst [vmem:[#allocation212_spill] sm:$0xff] %v14340_v40  ;;  %v6780_v1 = vmul.f32 %v14027_v4, %v6737_v42  ;;  %v6785_v41 = vmul.f32 %v14027_v4, %v16457_v22 }
 0x973   : > { %16453 = vst [vmem:[#allocation183_spill] sm:$0xff] %v14325_v9  ;;  %v6810_v38 = vadd.f32 %v6778_v28, %v14325_v9  ;;  %v14373_v28 = vld [vmem:[%s8565_s10 + $0x90] sm:$0xff] }
 0x974   : > { %7527 = vrot.lane.b32.xlu2 %v6807_v5, %s8288_s30  ;;  %445 = vst.msk [vmem:[#allocation4] sm:$0x1] %vm444_vm4, %v16456_v37  ;;  %v6875_v5 = vld [vmem:[#allocation4 + $0x20] sm:$0xff]  ;;  %v14377_v15 = vadd.f32 %v14373_v28, %v16459_v31  ;;  %v14409_v31 = vld [vmem:[#allocation4 + $0x50] sm:$0xff] }
 0x975   : > { %7525 = vrot.lane.b32.xlu1 %v6806_v19, %s8288_s30  ;;  %v6781_v19 = vmul.f32 %v14027_v4, %v6738_v47  ;;  %446 = vst.msk [vmem:[#allocation4 + $0x18] sm:$0x1] %vm444_vm4, %v16456_v37  ;;  %v6923_v33 = vadd.f32 %v6875_v5, %v6827_v29  ;;  %v16466_v9 = vld [vmem:[#allocation120_spill] sm:$0xff] }
 0x976   : > { %447 = vst.msk [vmem:[#allocation4 + $0x30] sm:$0x1] %vm444_vm4, %v16456_v37 }
 0x977   : > { %448 = vst.msk [vmem:[#allocation4 + $0x48] sm:$0x1] %vm444_vm4, %v16456_v37 }
 0x978   : > { %7535 = vrot.lane.b32.xlu0 %v6811_v7, %s8288_s30  ;;  %v14364_v7 = vld [vmem:[%s8565_s10 + $0x98] sm:$0xff]  ;;  %16460 = vst [vmem:[#allocation107_spill] sm:$0xff] %v14377_v15 }
 0x979   : > { %v14368_v10 = vadd.f32 %v14364_v7, %v13060_v58  ;;  %449 = vst.msk [vmem:[#allocation4 + $0x60] sm:$0x1] %vm444_vm4, %v16456_v37 }
 0x97a   : > { %450 = vst.msk [vmem:[#allocation4 + $0x78] sm:$0x1] %vm444_vm4, %v16456_v37 }
 0x97b   : > { %16458 = vst [vmem:[#allocation167_spill] sm:$0xff] %v14368_v10  ;;  %v6813_v47 = vadd.f32 %v6781_v19, %v14368_v10  ;;  %v6826_v29 = vld [vmem:[#allocation4] sm:$0xff]  ;;  %v6740_v19 = vsub.f32 %v13885_v23, %v13980_v34  ;;  %v14437_v10 = vld [vmem:[%s8565_s10 + $0xa8] sm:$0xff] }
 0x97c   : > { %7533 = vrot.lane.b32.xlu2 %v6810_v38, %s8288_s30  ;;  %v14379_v38 = vld [vmem:[#allocation4 + $0x38] sm:$0xff]  ;;  %451 = vst.msk [vmem:[#allocation4 + $0x90] sm:$0x1] %vm444_vm4, %v16456_v37 }
 0x97d   : > { %7531 = vrot.lane.b32.xlu1 %v6809_v45, %s8288_s30  ;;  %v16461_v45 = vld [vmem:[#allocation114_spill] sm:$0xff]  ;;  %v14399_v22 = vadd.f32 %v14379_v38, %v6923_v33  ;;  %452 = vst.msk [vmem:[#allocation4 + $0xa8] sm:$0x1] %vm444_vm4, %v16456_v37  ;;  %v16463_v33 = vsub.f32 %v13909_v36, %v13980_v34 }
 0x97e   : > { %v14388_v58 = vadd.f32 %v14384_v44, %v16461_v45  ;;  %453 = vst.msk [vmem:[#allocation4 + $0xc0] sm:$0x1] %vm444_vm4, %v16456_v37  ;;  %v14427_v34 = vld [vmem:[#allocation4 + $0x48] sm:$0xff] }
 0x97f   : > { %v6784_v45 = vmul.f32 %v14027_v4, %v16463_v33  ;;  %454 = vst.msk [vmem:[#allocation4 + $0xd8] sm:$0x1] %vm444_vm4, %v16456_v37 }
 0x980   : > { %7541 = vrot.lane.b32.xlu0 %v6814_v8, %s8288_s30  ;;  %16462 = vst [vmem:[#allocation140_spill] sm:$0xff] %v14388_v58  ;;  %v6812_v8 = vadd.f32 %v6780_v1, %v14377_v15  ;;  %v6817_v42 = vadd.f32 %v6785_v41, %v14388_v58  ;;  %v6874_v1 = vld [vmem:[#allocation4 + $0x18] sm:$0xff]  ;;  %v6926_v41 = vadd.f32 %v14379_v38, %v6875_v5 }
 0x981   : > { %v6922_v23 = vadd.f32 %v6874_v1, %v6826_v29  ;;  %455 = vst.msk [vmem:[#allocation4 + $0xf0] sm:$0x1] %vm444_vm4, %v16456_v37  ;;  %v16464_v29 = vld [vmem:[#allocation90_spill] sm:$0xff]  ;;  %v14579_v27 = vld [vmem:[#allocation4 + $0x78] sm:$0xff] }
 0x982   : > { %v14424_v5 = vadd.f32 %v14409_v31, %v6926_v41  ;;  %456 = vst.msk [vmem:[#allocation4 + $0x108] sm:$0x1] %vm444_vm4, %v16456_v37 }
 0x983   : > { %457 = vst.msk [vmem:[#allocation4 + $0x120] sm:$0x1] %vm444_vm4, %v16456_v37 }
 0x984   : > { %7539 = vrot.lane.b32.xlu2 %v6813_v47, %s8288_s30  ;;  %v14416_v47 = vld [vmem:[#allocation4 + $0x30] sm:$0xff]  ;;  %458 = vst.msk [vmem:[#allocation4 + $0x138] sm:$0x1] %vm444_vm4, %v16456_v37 }
 0x985   : > { %7537 = vrot.lane.b32.xlu1 %v6812_v8, %s8288_s30  ;;  %v6783_v8 = vmul.f32 %v14027_v4, %v6740_v19  ;;  %v6925_v36 = vadd.f32 %v14416_v47, %v6874_v1  ;;  %v14441_v4 = vadd.f32 %v14437_v10, %v16466_v9  ;;  %v7019_v19 = vadd.f32 %v14416_v47, %v6922_v23  ;;  %v14448_v1 = vld [vmem:[%s8565_s10 + $0xd0] sm:$0xff] }
 0x986   : > { %v14452_v15 = vadd.f32 %v14448_v1, %v16468_v62  ;;  %459 = vst.msk [vmem:[#allocation4 + $0x150] sm:$0x1] %vm444_vm4, %v16456_v37 }
 0x987   : > { %16467 = vst [vmem:[#allocation39_spill] sm:$0xff] %v14441_v4  ;;  %v7116_v41 = vrot.slane %v7019_v19, 1  ;;  %v7261_v13 = vrot.slane %v7019_v19, 2  ;;  %v6815_v62 = vadd.f32 %v6783_v8, %v14441_v4  ;;  %v16478_v4 = vld [vmem:[#allocation135_spill] sm:$0xff] }
 0x988   : > { %7547 = vrot.lane.b32.xlu0 %v6817_v42, %s8288_s30  ;;  %v14430_v42 = vld [vmem:[%s8565_s10 + $0xb0] sm:$0xff]  ;;  %16469 = vst [vmem:[#allocation110_spill] sm:$0xff] %v14452_v15 }
 0x989   : > { %v14434_v33 = vadd.f32 %v14430_v42, %v16464_v29  ;;  %v7022_v29 = vadd.f32 %v14427_v34, %v6925_v36  ;;  %v16470_v36 = vrot.slane %v14399_v22, 1  ;;  %460 = vst.msk [vmem:[#allocation4 + $0x168] sm:$0x1] %vm444_vm4, %v16456_v37 }
 0x98a   : > { %461 = vst.msk [vmem:[#allocation4 + $0x180] sm:$0x1] %vm444_vm4, %v16456_v37 }
 0x98b   : > { %16465 = vst [vmem:[#allocation122_spill] sm:$0xff] %v14434_v33  ;;  %v6816_v23 = vadd.f32 %v6784_v45, %v14434_v33  ;;  %v7121_v57 = vrot.slane %v7022_v29, 1  ;;  %v6820_v45 = vadd.f32 %v14088_v16, %v14452_v15  ;;  %v7118_v58 = vsel %vm7115_vm5, %v7116_v41, %v16470_v36 }
 0x98c   : > { %v7266_v9 = vrot.slane %v7022_v29, 2  ;;  %v7228_v33 = vadd.f32 %v7118_v58, %v7019_v19  ;;  %v16472_v41 = vrot.slane %v14399_v22, 2  ;;  %462 = vst.msk [vmem:[#allocation4 + $0x198] sm:$0x1] %vm444_vm4, %v16456_v37  ;;  %v14489_v19 = vld [vmem:[%s8565_s10 + $0xc8] sm:$0xff] }
 0x98d   : > { %7545 = vrot.lane.b32.xlu2 %v6816_v23, %s8288_s30  ;;  %7543 = vrot.lane.b32.xlu1 %v6815_v62, %s8288_s30  ;;  %v16471_v23 = vrot.slane %v14424_v5, 1  ;;  %464 = vst.msk [vmem:[#allocation4 + $0x29] sm:$0x1] %vm444_vm4, %v16456_v37  ;;  %v16473_v62 = vld [vmem:[#allocation197_spill] sm:$0xff] }
 0x98e   : > { %v7263_v36 = vsel %vm7260_vm6, %v7261_v13, %v16472_v41  ;;  %v14493_v8 = vadd.f32 %v14489_v19, %v16473_v62  ;;  %465 = vst.msk [vmem:[#allocation4 + $0x41] sm:$0x1] %vm444_vm4, %v16456_v37  ;;  %v8217_v62 = vld [vmem:[%s8565_s10 + $0xe8] sm:$0xff] }
 0x98f   : > { %v7123_v16 = vsel %vm7115_vm5, %v7121_v57, %v16471_v23  ;;  %v16475_v57 = vrot.slane %v14424_v5, 2  ;;  %v16476_v23 = vld [vmem:[#allocation189_spill] sm:$0xff]  ;;  %466 = vst.msk [vmem:[#allocation4 + $0x59] sm:$0x1] %vm444_vm4, %v16456_v37  ;;  %v14513_v15 = vadd.f32 %v8217_v62, %v16478_v4  ;;  %v14526_v4 = vld [vmem:[#allocation4 + $0x60] sm:$0xff]  ;;  %v6928_v62 = vadd.f32 %v14427_v34, %v14416_v47 }
 0x990   : > { %7553 = vrot.lane.b32.xlu0 %v6820_v45, %s8288_s30  ;;  %v7230_v58 = vadd.f32 %v7123_v16, %v7022_v29  ;;  %16474 = vst [vmem:[#allocation175_spill] sm:$0xff] %v14493_v8  ;;  %v14501_v45 = vld [vmem:[%s8565_s10 + $0xc0] sm:$0xff]  ;;  %v7373_v29 = vadd.f32 %v7263_v36, %v7228_v33  ;;  %v6819_v16 = vadd.f32 %v14085_v59, %v14493_v8  ;;  %v6884_v36 = vld [vmem:[#allocation4 + $0x68] sm:$0xff] }
 0x991   : > { %v7268_v13 = vsel %vm7260_vm6, %v7266_v9, %v16475_v57  ;;  %v14505_v41 = vadd.f32 %v14501_v45, %v16476_v23  ;;  %16479 = vst [vmem:[#allocation55_spill] sm:$0xff] %v14513_v15  ;;  %v6823_v59 = vadd.f32 %v14103_v24, %v14513_v15  ;;  %v6932_v57 = vadd.f32 %v14409_v31, %v6884_v36  ;;  %v16481_v23 = vld [vmem:[#allocation70_spill] sm:$0xff]  ;;  %v16486_v8 = vld [vmem:[#allocation139_spill] sm:$0xff] }
 0x992   : > { %467 = vst.msk [vmem:[#allocation4 + $0x71] sm:$0x1] %vm444_vm4, %v16456_v37  ;;  %v7375_v33 = vadd.f32 %v7268_v13, %v7230_v58  ;;  %v6931_v58 = vadd.f32 %v14427_v34, %v14526_v4  ;;  %v6929_v24 = vadd.f32 %v14409_v31, %v14379_v38  ;;  %v14538_v13 = vld [vmem:[%s8565_s10 + $0xe0] sm:$0xff]  ;;  %v16484_v38 = vld [vmem:[#allocation201_spill] sm:$0xff]  ;;  %v14573_v34 = vld [vmem:[%s8565_s10 + $0xf0] sm:$0xff] }
 0x993   : > { %16477 = vst [vmem:[#allocation85_spill] sm:$0xff] %v14505_v41  ;;  %v6818_v9 = vadd.f32 %v14070_v3, %v14505_v41  ;;  %v7405_v3 = vmul.f32 0.11111111, %v7373_v29 }
 0x994   : > { %468 = vst.msk [vmem:[#allocation4 + $0x89] sm:$0x1] %vm444_vm4, %v16456_v37  ;;  %v6831_v29 = vld [vmem:[#allocation4 + $0x28] sm:$0x3]  ;;  %v14564_v41 = vmul.f32 0.11111111, %v7375_v33  ;;  %v14566_v17 = vadd.f32 %v6929_v24, %v6884_v36  ;;  %v7025_v24 = vadd.f32 %v6928_v62, %v14526_v4  ;;  %v7028_v0 = vadd.f32 %v14579_v27, %v6931_v58 }
 0x995   : > { %7551 = vrot.lane.b32.xlu2 %v6819_v16, %s8288_s30  ;;  %469 = vst.msk [vmem:[#allocation4 + $0xa1] sm:$0x1] %vm444_vm4, %v16456_v37  ;;  %7549 = vrot.lane.b32.xlu1 %v6818_v9, %s8288_s30  ;;  %v14542_v16 = vadd.f32 %v14538_v13, %v16481_v23  ;;  %v14549_v9 = vld [vmem:[%s8565_s10 + $0xf8] sm:$0xff]  ;;  %v6879_v15 = vld [vmem:[#allocation4 + $0x40] sm:$0x3] }
 0x996   : > { %470 = vst.msk [vmem:[#allocation4 + $0xb9] sm:$0x1] %vm444_vm4, %v16456_v37  ;;  %v14553_v31 = vadd.f32 %v14549_v9, %v16484_v38  ;;  %v16489_v38 = vld [vmem:[#allocation180_spill] sm:$0xff]  ;;  %v6927_v40 = vadd.f32 %v6879_v15, %v6831_v29  ;;  %v6976_v56 = vld [vmem:[#allocation4 + $0x58] sm:$0x3]  ;;  %v14581_v33 = vld [vmem:[#allocation4 + $0x80] sm:$0xff] }
 0x997   : > { %16480 = vst [vmem:[#allocation160_spill] sm:$0xff] %v14538_v13  ;;  %v6822_v47 = vadd.f32 %v14097_v48, %v14542_v16  ;;  %v6834_v15 = vld [vmem:[#allocation4 + $0x40] sm:$0x3]  ;;  %v6882_v29 = vld [vmem:[#allocation4 + $0x58] sm:$0x3]  ;;  %v7271_v55 = vrot.slane %v7025_v24, 2  ;;  %v6935_v43 = vadd.f32 %v14581_v33, %v6884_v36 }
 0x998   : > { %7559 = vrot.lane.b32.xlu0 %v6823_v59, %s8288_s30  ;;  %16482 = vst [vmem:[#allocation61_spill] sm:$0xff] %v14542_v16  ;;  %v14556_v59 = vld [vmem:[%s8565_s10 + $0xd8] sm:$0xff]  ;;  %v7437_v16 = vadd.f32 %v14079_v18, %v7405_v3  ;;  %v7024_v50 = vadd.f32 %v6976_v56, %v6927_v40  ;;  %v6930_v62 = vadd.f32 %v6882_v29, %v6834_v15  ;;  %v7272_v18 = vrot.slane %v14566_v17, 2  ;;  %v16493_v36 = vld [vmem:[#allocation210_spill] sm:$0xff] }
 0x999   : > { %471 = vst.msk [vmem:[#allocation4 + $0xd1] sm:$0x1] %vm444_vm4, %v16456_v37  ;;  %v14560_v23 = vadd.f32 %v14556_v59, %v16486_v8  ;;  %v14577_v8 = vadd.f32 %v14573_v34, %v16489_v38  ;;  %v14591_v38 = vadd.f32 %v14581_v33, %v6932_v57  ;;  %v6979_v32 = vld [vmem:[#allocation4 + $0x70] sm:$0x3]  ;;  %v7131_v3 = vrot.slane %v7028_v0, 1 }
 0x99a   : > { %16483 = vst [vmem:[#allocation152_spill] sm:$0xff] %v14549_v9  ;;  %v7276_v57 = vrot.slane %v7028_v0, 2  ;;  %v7124_v56 = vrot.slane %v7024_v50, 1  ;;  %v7269_v40 = vrot.slane %v7024_v50, 2  ;;  %v7027_v15 = vadd.f32 %v6979_v32, %v6930_v62  ;;  %v6840_v26 = vld [vmem:[#allocation4 + $0x70] sm:$0x3] }
 0x99b   : > { %16485 = vst [vmem:[#allocation171_spill] sm:$0xff] %v14553_v31  ;;  %v6821_v48 = vadd.f32 %v14091_v61, %v14560_v23  ;;  %v7127_v61 = vrot.slane %v14566_v17, 1  ;;  %v15348_v58 = vrot.slane %v14591_v38, 1  ;;  %v7126_v29 = vrot.slane %v7025_v24, 1 }
 0x99c   : > { %16487 = vst [vmem:[#allocation41_spill] sm:$0xff] %v14560_v23  ;;  %v15349_v23 = vrot.slane %v14591_v38, 2  ;;  %v16491_v32 = vrot.slane %v14424_v5, 1  ;;  %v6825_v9 = vadd.f32 %v16493_v36, %v14553_v31  ;;  %v7274_v13 = vrot.slane %v7027_v15, 2 }
 0x99d   : > { %472 = vst.msk [vmem:[#allocation4 + $0xe9] sm:$0x1] %vm444_vm4, %v16456_v37  ;;  %7557 = vrot.lane.b32.xlu2 %v6822_v47, %s8288_s30  ;;  %7555 = vrot.lane.b32.xlu1 %v6821_v48, %s8288_s30  ;;  %v7133_v60 = vsel %vm7115_vm5, %v7131_v3, %v15348_v58  ;;  %v16492_v48 = vrot.slane %v14424_v5, 2  ;;  %v7129_v58 = vrot.slane %v7027_v15, 1  ;;  %v6824_v36 = vadd.f32 %v14109_v49, %v14577_v8 }
 0x99e   : > { %473 = vst.msk [vmem:[#allocation4 + $0x101] sm:$0x1] %vm444_vm4, %v16456_v37  ;;  %v7278_v47 = vsel %vm7260_vm6, %v7276_v57, %v15349_v23  ;;  %v7125_v50 = vsel %vm7115_vm5, %v16491_v32, %v7124_v56  ;;  %v7234_v3 = vadd.f32 %v7133_v60, %v7028_v0  ;;  %v6888_v57 = vld [vmem:[#allocation4 + $0x88] sm:$0x3]  ;;  %v14623_v23 = vld [vmem:[#allocation4 + $0x98] sm:$0xff]  ;;  %v7128_v56 = vsel %vm7115_vm5, %v7126_v29, %v7127_v61 }
 0x99f   : > { %16488 = vst [vmem:[#allocation81_spill] sm:$0xff] %v14573_v34  ;;  %v7270_v62 = vsel %vm7260_vm6, %v16492_v48, %v7269_v40  ;;  %v6985_v32 = vld [vmem:[#allocation4 + $0xa0] sm:$0x3]  ;;  %v7130_v60 = vsel %vm7115_vm5, %v7127_v61, %v7129_v58  ;;  %v7232_v0 = vadd.f32 %v7128_v56, %v7025_v24  ;;  %v7273_v40 = vsel %vm7260_vm6, %v7271_v55, %v7272_v18  ;;  %v6837_v61 = vld [vmem:[#allocation4 + $0x58] sm:$0x3] }
 0x9a0   : > { %16490 = vst [vmem:[#allocation96_spill] sm:$0xff] %v14577_v8  ;;  %7629 = vrot.lane.b32.xlu0 %v7437_v16, %s8289_s11  ;;  %v7231_v16 = vadd.f32 %v7125_v50, %v14424_v5  ;;  %v6936_v48 = vadd.f32 %v6888_v57, %v6840_v26  ;;  %v7379_v15 = vadd.f32 %v7278_v47, %v7234_v3  ;;  %v14640_v50 = vld [vmem:[#allocation4 + $0x90] sm:$0xff] }
 0x9a1   : > { %474 = vst.msk [vmem:[#allocation4 + $0x119] sm:$0x1] %vm444_vm4, %v16456_v37  ;;  %v7032_v29 = vadd.f32 %v14623_v23, %v6935_v43  ;;  %v7233_v24 = vadd.f32 %v7130_v60, %v14566_v17  ;;  %v7275_v55 = vsel %vm7260_vm6, %v7272_v18, %v7274_v13  ;;  %v6934_v49 = vadd.f32 %v14579_v27, %v14526_v4  ;;  %v6885_v58 = vld [vmem:[#allocation4 + $0x70] sm:$0x3]  ;;  %v14651_v60 = vld [vmem:[#allocation4 + $0xa8] sm:$0xff] }
 0x9a2   : > { %475 = vst.msk [vmem:[#allocation4 + $0x131] sm:$0x1] %vm444_vm4, %v16456_v37  ;;  %v7376_v5 = vadd.f32 %v7270_v62, %v7231_v16  ;;  %v7033_v26 = vadd.f32 %v6985_v32, %v6936_v48  ;;  %v7377_v57 = vadd.f32 %v7273_v40, %v7232_v0  ;;  %v16494_v43 = vld [vmem:[#allocation12_spill] sm:$0xff]  ;;  %v7411_v13 = vmul.f32 0.11111111, %v7379_v15 }
 0x9a3   : > { %476 = vst.msk [vmem:[#allocation4 + $0x149] sm:$0x1] %vm444_vm4, %v16456_v37  ;;  %v7137_v47 = vrot.slane %v7032_v29, 1  ;;  %v7282_v3 = vrot.slane %v7032_v29, 2  ;;  %v7439_v16 = vadd.f32 %v16494_v43, %v14564_v41  ;;  %v7031_v18 = vadd.f32 %v14640_v50, %v6934_v49  ;;  %v6982_v0 = vld [vmem:[#allocation4 + $0x88] sm:$0x3] }
 0x9a4   : > { %477 = vst.msk [vmem:[#allocation4 + $0x161] sm:$0x1] %vm444_vm4, %v16456_v37  ;;  %v7408_v62 = vmul.f32 0.11111111, %v7376_v5  ;;  %v7139_v56 = vrot.slane %v7033_v26, 1  ;;  %v7284_v17 = vrot.slane %v7033_v26, 2  ;;  %v6933_v32 = vadd.f32 %v6885_v58, %v6837_v61 }
 0x9a5   : > { %478 = vst.msk [vmem:[#allocation4 + $0x179] sm:$0x1] %vm444_vm4, %v16456_v37  ;;  %7563 = vrot.lane.b32.xlu2 %v6825_v9, %s8288_s30  ;;  %7561 = vrot.lane.b32.xlu1 %v6824_v36, %s8288_s30  ;;  %v14656_v40 = vld [vmem:[#allocation4 + $0xb0] sm:$0xff]  ;;  %v6973_v9 = vld [vmem:[#allocation4 + $0x40] sm:$0x3]  ;;  %v7378_v48 = vadd.f32 %v7275_v55, %v7233_v24  ;;  %v6940_v26 = vadd.f32 %v14640_v50, %v14651_v60  ;;  %v7136_v49 = vrot.slane %v7031_v18, 1 }
 0x9a6   : > { %479 = vst.msk [vmem:[#allocation4 + $0x191] sm:$0x1] %vm444_vm4, %v16456_v37  ;;  %v7440_v4 = vadd.f32 %v14155_v52, %v7408_v62  ;;  %v7140_v41 = vsel %vm7115_vm5, %v7137_v47, %v7139_v56  ;;  %v7285_v5 = vsel %vm7260_vm6, %v7282_v3, %v7284_v17  ;;  %v14662_v43 = vld [vmem:[#allocation4 + $0xc0] sm:$0xff]  ;;  %v7409_v36 = vmul.f32 0.11111111, %v7377_v57  ;;  %v14667_v55 = vld [vmem:[#allocation4 + $0xc8] sm:$0xff] }
 0x9a7   : > { %439 = vst.msk [vmem:[#allocation4 + $0x10] sm:$0x3] %vm438_vm8, %v16456_v37  ;;  %v7237_v15 = vadd.f32 %v7140_v41, %v7032_v29  ;;  %v7281_v61 = vrot.slane %v7031_v18, 2  ;;  %v7030_v62 = vadd.f32 %v6982_v0, %v6933_v32  ;;  %v6941_v24 = vadd.f32 %v14623_v23, %v14656_v40 }
 0x9a8   : > { %463 = vst.msk [vmem:[#allocation4 + $0x11] sm:$0x1] %vm444_vm4, %v16456_v37  ;;  %7635 = vrot.lane.b32.xlu0 %v7440_v4, %s8289_s11  ;;  %v7037_v56 = vadd.f32 %v14662_v43, %v6940_v26  ;;  %v7443_v17 = vadd.f32 %v14206_v12, %v7411_v13  ;;  %v7138_v8 = vsel %vm7115_vm5, %v7136_v49, %v7137_v47  ;;  %v7410_v34 = vmul.f32 0.11111111, %v7378_v48 }
 0x9a9   : > { %443 = vst.msk [vmem:[#allocation4 + $0x1a8] sm:$0x3] %vm438_vm8, %v16456_v37  ;;  %v7382_v31 = vadd.f32 %v7285_v5, %v7237_v15  ;;  %v7236_v57 = vadd.f32 %v7138_v8, %v7031_v18  ;;  %v7134_v29 = vrot.slane %v7030_v62, 1  ;;  %v14674_v32 = vadd.f32 %v14667_v55, %v6941_v24  ;;  %v6988_v24 = vld [vmem:[#allocation4 + $0xb8] sm:$0x3] }
 0x9aa   : > { %480 = vst.msk [vmem:[#allocation4 + $0x1a9] sm:$0x1] %vm444_vm4, %v16456_v37  ;;  %v6876_v37 = vld [vmem:[#allocation4 + $0x28] sm:$0x3]  ;;  %v7146_v0 = vrot.slane %v7037_v56, 1  ;;  %v14678_v12 = vadd.f32 %v14144_v51, %v7409_v36  ;;  %v7291_v13 = vrot.slane %v7037_v56, 2  ;;  %v6938_v48 = vadd.f32 %v14623_v23, %v14581_v33 }
 0x9ab   : > { %v7414_v41 = vmul.f32 0.11111111, %v7382_v31  ;;  %v16495_v47 = vrot.slane %v14591_v38, 1  ;;  %v7279_v18 = vrot.slane %v7030_v62, 2  ;;  %v7147_v31 = vrot.slane %v14674_v32, 1 }
 0x9ac   : > { %v16497_v51 = vrot.slane %v14399_v22, 2  ;;  %v7442_v62 = vadd.f32 %v14113_v11, %v7410_v34  ;;  %v16498_v11 = vrot.slane %v14591_v38, 2  ;;  %v7035_v34 = vadd.f32 %v6938_v48, %v14656_v40 }
 0x9ad   : > { %7633 = vrot.lane.b32.xlu2 %v7439_v16, %s8289_s11  ;;  %v7135_v8 = vsel %vm7115_vm5, %v16495_v47, %v7134_v29  ;;  %v16496_v16 = vrot.slane %v14399_v22, 1  ;;  %v7446_v23 = vadd.f32 %v14257_v35, %v7414_v41  ;;  %v7148_v33 = vsel %vm7115_vm5, %v7146_v0, %v7147_v31  ;;  %v6897_v29 = vld [vmem:[#allocation4 + $0xd0] sm:$0x3] }
 0x9ae   : > { %v14692_v15 = vpop.permute.xlu2 %7503  ;;  %v7280_v35 = vsel %vm7260_vm6, %v16498_v11, %v7279_v18  ;;  %v6937_v41 = vadd.f32 %v14640_v50, %v14579_v27 }
 0x9af   : > { %v6828_v52 = vld [vmem:[#allocation4 + $0x10] sm:$0x3] }
 0x9b0   : > { %v6924_v58 = vadd.f32 %v6876_v37, %v6828_v52  ;;  %v7283_v37 = vsel %vm7260_vm6, %v7281_v61, %v7282_v3  ;;  %v6843_v3 = vld [vmem:[#allocation4 + $0x88] sm:$0x3]  ;;  %v7292_v61 = vrot.slane %v14674_v32, 2  ;;  %7641 = vrot.lane.b32.xlu0 %v7443_v17, %s8289_s11  ;;  %v7034_v27 = vadd.f32 %v6937_v41, %v14651_v60 }
 0x9b1   : > { %v7381_v49 = vadd.f32 %v7283_v37, %v7236_v57  ;;  %v7240_v57 = vadd.f32 %v7148_v33, %v7037_v56  ;;  %v6944_v56 = vadd.f32 %v14667_v55, %v14656_v40 }
 0x9b2   : > { %v7021_v4 = vadd.f32 %v6973_v9, %v6924_v58  ;;  %v6891_v9 = vld [vmem:[#allocation4 + $0xa0] sm:$0x3] }
 0x9b3   : > { %v6939_v37 = vadd.f32 %v6891_v9, %v6843_v3  ;;  %v7413_v0 = vmul.f32 0.11111111, %v7381_v49 }
 0x9b4   : > { %v7119_v52 = vrot.slane %v7021_v4, 1  ;;  %v7264_v26 = vrot.slane %v7021_v4, 2  ;;  %v6849_v4 = vld [vmem:[#allocation4 + $0xb8] sm:$0x3] }
 0x9b5   : > { %v6945_v47 = vadd.f32 %v6897_v29, %v6849_v4  ;;  %7639 = vrot.lane.b32.xlu2 %v7442_v62, %s8289_s11  ;;  %v14727_v4 = vld [vmem:[#allocation4 + $0xd8] sm:$0xff]  ;;  %v6846_v29 = vld [vmem:[#allocation4 + $0xa0] sm:$0x3] }
 0x9b6   : > { %v7120_v5 = vsel %vm7115_vm5, %v16496_v16, %v7119_v52  ;;  %v7265_v36 = vsel %vm7260_vm6, %v16497_v51, %v7264_v26  ;;  %v7235_v52 = vadd.f32 %v7135_v8, %v14591_v38  ;;  %v7036_v26 = vadd.f32 %v6988_v24, %v6939_v37  ;;  %v14714_v8 = vld [vmem:[#allocation4 + $0xe0] sm:$0xff]  ;;  %v14722_v49 = vpop.permute.xlu2 %7509  ;;  %v14731_v37 = vld [vmem:[#allocation4 + $0xf0] sm:$0xff] }
 0x9b7   : > { %v7229_v58 = vadd.f32 %v7120_v5, %v14399_v22  ;;  %v7293_v22 = vsel %vm7260_vm6, %v7291_v13, %v7292_v61  ;;  %v6994_v13 = vld [vmem:[#allocation4 + $0xe8] sm:$0x3]  ;;  %v7142_v16 = vrot.slane %v7035_v34, 1  ;;  %v7287_v38 = vrot.slane %v7035_v34, 2 }
 0x9b8   : > { %v7385_v9 = vadd.f32 %v7293_v22, %v7240_v57  ;;  %v7380_v18 = vadd.f32 %v7280_v35, %v7235_v52  ;;  %v7144_v48 = vrot.slane %v7036_v26, 1  ;;  %v7289_v5 = vrot.slane %v7036_v26, 2  ;;  %v6894_v52 = vld [vmem:[#allocation4 + $0xb8] sm:$0x3]  ;;  %7647 = vrot.lane.b32.xlu0 %v7446_v23, %s8289_s11  ;;  %v14736_v23 = vld [vmem:[#allocation4 + $0x108] sm:$0xff] }
 0x9b9   : > { %v7374_v17 = vadd.f32 %v7265_v36, %v7229_v58  ;;  %v7041_v51 = vadd.f32 %v14714_v8, %v6944_v56  ;;  %v7042_v40 = vadd.f32 %v6994_v13, %v6945_v47  ;;  %v6943_v36 = vadd.f32 %v14662_v43, %v14651_v60  ;;  %v6991_v47 = vld [vmem:[#allocation4 + $0xd0] sm:$0x3]  ;;  %v6902_v13 = vld [vmem:[#allocation4 + $0xf8] sm:$0xff] }
 0x9ba   : > { %v7445_v58 = vadd.f32 %v14164_v53, %v7413_v0  ;;  %v7145_v33 = vsel %vm7115_vm5, %v7142_v16, %v7144_v48  ;;  %v7290_v62 = vsel %vm7260_vm6, %v7287_v38, %v7289_v5  ;;  %v7141_v24 = vrot.slane %v7034_v27, 1 }
 0x9bb   : > { %v7406_v3 = vmul.f32 0.11111111, %v7374_v17  ;;  %v7239_v57 = vadd.f32 %v7145_v33, %v7035_v34  ;;  %v7286_v60 = vrot.slane %v7034_v27, 2  ;;  %v7152_v22 = vrot.slane %v7041_v51, 1  ;;  %v14745_v33 = vld [vmem:[#allocation4 + $0x110] sm:$0xff] }
 0x9bc   : > { %v7143_v53 = vsel %vm7115_vm5, %v7141_v24, %v7142_v16  ;;  %v7154_v17 = vrot.slane %v7042_v40, 1  ;;  %v7297_v11 = vrot.slane %v7041_v51, 2  ;;  %v7299_v35 = vrot.slane %v7042_v40, 2 }
 0x9bd   : > { %v7438_v50 = vadd.f32 %v14073_v25, %v7406_v3  ;;  %v7417_v25 = vmul.f32 0.11111111, %v7385_v9  ;;  %v7384_v41 = vadd.f32 %v7290_v62, %v7239_v57  ;;  %v7238_v0 = vadd.f32 %v7143_v53, %v7034_v27  ;;  %7645 = vrot.lane.b32.xlu2 %v7445_v58, %s8289_s11 }
 0x9be   : > { %v7288_v26 = vsel %vm7260_vm6, %v7286_v60, %v7287_v38  ;;  %v7040_v56 = vadd.f32 %v14727_v4, %v6943_v36  ;;  %v7155_v34 = vsel %vm7115_vm5, %v7152_v22, %v7154_v17  ;;  %v7300_v3 = vsel %vm7260_vm6, %v7297_v11, %v7299_v35  ;;  %v14749_v60 = vpop.permute.xlu2 %7515 }
 0x9bf   : > { %7631 = vrot.lane.b32.xlu1 %v7438_v50, %s8289_s11  ;;  %v6942_v9 = vadd.f32 %v6894_v52, %v6846_v29  ;;  %v6949_v16 = vadd.f32 %v14727_v4, %v14731_v37  ;;  %v7449_v48 = vadd.f32 %v14294_v21, %v7417_v25  ;;  %v7416_v5 = vmul.f32 0.11111111, %v7384_v41  ;;  %v6852_v41 = vld [vmem:[#allocation4 + $0xd0] sm:$0x3] }
 0x9c0   : > { %v7243_v27 = vadd.f32 %v7155_v34, %v7041_v51  ;;  %v7151_v50 = vrot.slane %v7040_v56, 1  ;;  %v7296_v38 = vrot.slane %v7040_v56, 2  ;;  %v6950_v36 = vadd.f32 %v14714_v8, %v6902_v13 }
 0x9c1   : > { %v7039_v40 = vadd.f32 %v6991_v47, %v6942_v9  ;;  %v7046_v62 = vadd.f32 %v14736_v23, %v6949_v16  ;;  %v7412_v24 = vmul.f32 0.11111111, %v7380_v18  ;;  %v7383_v29 = vadd.f32 %v7288_v26, %v7238_v0  ;;  %7653 = vrot.lane.b32.xlu0 %v7449_v48, %s8289_s11  ;;  %v6900_v0 = vld [vmem:[#allocation4 + $0xe8] sm:$0x3]  ;;  %v6997_v9 = vld [vmem:[#allocation4 + $0x100] sm:$0x3] }
 0x9c2   : > { %v7388_v52 = vadd.f32 %v7300_v3, %v7243_v27  ;;  %v7153_v57 = vsel %vm7115_vm5, %v7151_v50, %v7152_v22  ;;  %v7298_v51 = vsel %vm7260_vm6, %v7296_v38, %v7297_v11  ;;  %v14756_v53 = vadd.f32 %v14745_v33, %v6950_v36  ;;  %v14759_v17 = vpop.permute.xlu0 %7505  ;;  %v6906_v38 = vld [vmem:[#allocation4 + $0x118] sm:$0x3] }
 0x9c3   : > { %v7242_v21 = vadd.f32 %v7153_v57, %v7040_v56  ;;  %v7149_v25 = vrot.slane %v7039_v40, 1  ;;  %v7448_v18 = vadd.f32 %v14215_v14, %v7416_v5  ;;  %v7161_v35 = vrot.slane %v7046_v62, 1  ;;  %v14787_v57 = vld [vmem:[#allocation4 + $0x128] sm:$0xff] }
 0x9c4   : > { %v7420_v58 = vmul.f32 0.11111111, %v7388_v52  ;;  %v7444_v11 = vadd.f32 %v14195_v63, %v7412_v24  ;;  %v7415_v26 = vmul.f32 0.11111111, %v7383_v29  ;;  %v7294_v56 = vrot.slane %v7039_v40, 2 }
 0x9c5   : > { %v7387_v22 = vadd.f32 %v7298_v51, %v7242_v21  ;;  %v7150_v47 = vsel %vm7115_vm5, %v7147_v31, %v7149_v25  ;;  %v7306_v34 = vrot.slane %v7046_v62, 2  ;;  %v7307_v3 = vrot.slane %v14756_v53, 2  ;;  %7651 = vrot.lane.b32.xlu2 %v7448_v18, %s8289_s11 }
 0x9c6   : > { %v6947_v14 = vadd.f32 %v14714_v8, %v14667_v55  ;;  %v7452_v16 = vadd.f32 %v14328_v30, %v7420_v58  ;;  %v6948_v48 = vadd.f32 %v6900_v0, %v6852_v41  ;;  %v6946_v5 = vadd.f32 %v14727_v4, %v14662_v43  ;;  %v6858_v8 = vld [vmem:[#allocation4 + $0x100] sm:$0x3]  ;;  %v14782_v29 = vpop.permute.xlu2 %7521  ;;  %v7003_v41 = vld [vmem:[#allocation4 + $0x130] sm:$0x3] }
 0x9c7   : > { %7637 = vrot.lane.b32.xlu1 %v14678_v12, %s8289_s11  ;;  %v7162_v12 = vrot.slane %v14756_v53, 1  ;;  %v7419_v31 = vmul.f32 0.11111111, %v7387_v22  ;;  %v7308_v50 = vsel %vm7260_vm6, %v7306_v34, %v7307_v3  ;;  %v7241_v30 = vadd.f32 %v7150_v47, %v14674_v32  ;;  %v14791_v51 = vpop.permute.xlu1 %7501  ;;  %v6903_v47 = vld [vmem:[#allocation4 + $0x100] sm:$0x3]  ;;  %v14800_v34 = vld [vmem:[#allocation4 + $0x138] sm:$0xff] }
 0x9c8   : > { %v7044_v55 = vadd.f32 %v6947_v14, %v6902_v13  ;;  %v7045_v40 = vadd.f32 %v6997_v9, %v6948_v48  ;;  %v7043_v36 = vadd.f32 %v6946_v5, %v14731_v37  ;;  %v6953_v24 = vadd.f32 %v14745_v33, %v6902_v13 }
 0x9c9   : > { %v7163_v63 = vsel %vm7115_vm5, %v7161_v35, %v7162_v12  ;;  %v7295_v43 = vsel %vm7260_vm6, %v7292_v61, %v7294_v56  ;;  %v7447_v21 = vadd.f32 %v14246_v46, %v7415_v26  ;;  %7659 = vrot.lane.b32.xlu0 %v7452_v16, %s8289_s11  ;;  %v6954_v58 = vadd.f32 %v6906_v38, %v6858_v8  ;;  %v6855_v56 = vld [vmem:[#allocation4 + $0xe8] sm:$0x3]  ;;  %v14807_v8 = vld [vmem:[#allocation4 + $0x140] sm:$0xff] }
 0x9ca   : > { %v7246_v27 = vadd.f32 %v7163_v63, %v7046_v62  ;;  %v7157_v62 = vrot.slane %v7044_v55, 1  ;;  %v7302_v52 = vrot.slane %v7044_v55, 2  ;;  %v7159_v13 = vrot.slane %v7045_v40, 1  ;;  %v14795_v18 = vpop.permute.xlu0 %7511 }
 0x9cb   : > { %v7304_v25 = vrot.slane %v7045_v40, 2  ;;  %v7451_v32 = vadd.f32 %v14266_v20, %v7419_v31  ;;  %v7156_v22 = vrot.slane %v7043_v36, 1  ;;  %v7301_v35 = vrot.slane %v7043_v36, 2  ;;  %v14814_v40 = vld [vmem:[#allocation4 + $0x150] sm:$0xff] }
 0x9cc   : > { %v7391_v4 = vadd.f32 %v7308_v50, %v7246_v27  ;;  %v7386_v0 = vadd.f32 %v7295_v43, %v7241_v30  ;;  %v7050_v26 = vadd.f32 %v14787_v57, %v6953_v24  ;;  %v7051_v48 = vadd.f32 %v7003_v41, %v6954_v58  ;;  %v14805_v27 = vld [vmem:[#allocation4 + $0x120] sm:$0xff]  ;;  %v7000_v50 = vld [vmem:[#allocation4 + $0x118] sm:$0x3] }
 0x9cd   : > { %v7305_v46 = vsel %vm7260_vm6, %v7302_v52, %v7304_v25  ;;  %v7158_v9 = vsel %vm7115_vm5, %v7156_v22, %v7157_v62  ;;  %v7303_v16 = vsel %vm7260_vm6, %v7301_v35, %v7302_v52  ;;  %7657 = vrot.lane.b32.xlu2 %v7451_v32, %s8289_s11  ;;  %v6958_v30 = vadd.f32 %v14805_v27, %v14800_v34  ;;  %v14827_v22 = vld [vmem:[#allocation4 + $0x158] sm:$0xff] }
 0x9ce   : > { %v7423_v61 = vmul.f32 0.11111111, %v7391_v4  ;;  %v7244_v63 = vadd.f32 %v7158_v9, %v7043_v36  ;;  %v7167_v5 = vrot.slane %v7050_v26, 1  ;;  %v7312_v31 = vrot.slane %v7050_v26, 2 }
 0x9cf   : > { %7643 = vrot.lane.b32.xlu1 %v7444_v11, %s8289_s11  ;;  %v7160_v11 = vsel %vm7115_vm5, %v7157_v62, %v7159_v13  ;;  %v7418_v36 = vmul.f32 0.11111111, %v7386_v0  ;;  %v7169_v43 = vrot.slane %v7051_v48, 1  ;;  %v7314_v4 = vrot.slane %v7051_v48, 2  ;;  %v14816_v62 = vpop.permute.xlu2 %7527 }
 0x9d0   : > { %v7455_v14 = vadd.f32 %v14373_v28, %v7423_v61  ;;  %v7245_v20 = vadd.f32 %v7160_v11, %v7044_v55  ;;  %v6952_v28 = vadd.f32 %v14736_v23, %v14731_v37  ;;  %v6951_v55 = vadd.f32 %v6903_v47, %v6855_v56  ;;  %v14822_v37 = vpop.permute.xlu1 %7507 }
 0x9d1   : > { %v7389_v24 = vadd.f32 %v7303_v16, %v7244_v63  ;;  %v6959_v58 = vadd.f32 %v14787_v57, %v14807_v8  ;;  %v7170_v32 = vsel %vm7115_vm5, %v7167_v5, %v7169_v43  ;;  %v7315_v61 = vsel %vm7260_vm6, %v7312_v31, %v7314_v4  ;;  %v7006_v43 = vld [vmem:[#allocation4 + $0x148] sm:$0x3] }
 0x9d2   : > { %v7390_v38 = vadd.f32 %v7305_v46, %v7245_v20  ;;  %v7049_v13 = vadd.f32 %v14805_v27, %v6952_v28  ;;  %v7048_v25 = vadd.f32 %v7000_v50, %v6951_v55  ;;  %7665 = vrot.lane.b32.xlu0 %v7455_v14, %s8289_s11  ;;  %v7055_v35 = vadd.f32 %v14814_v40, %v6958_v30  ;;  %v14831_v0 = vpop.permute.xlu0 %7517 }
 0x9d3   : > { %v7249_v11 = vadd.f32 %v7170_v32, %v7050_v26  ;;  %v7421_v56 = vmul.f32 0.11111111, %v7389_v24  ;;  %v14836_v63 = vadd.f32 %v14827_v22, %v6959_v58 }
 0x9d4   : > { %v7422_v52 = vmul.f32 0.11111111, %v7390_v38  ;;  %v7166_v46 = vrot.slane %v7049_v13, 1  ;;  %v7311_v47 = vrot.slane %v7049_v13, 2  ;;  %v7164_v20 = vrot.slane %v7048_v25, 1 }
 0x9d5   : > { %v7394_v14 = vadd.f32 %v7315_v61, %v7249_v11  ;;  %v7309_v16 = vrot.slane %v7048_v25, 2  ;;  %v7176_v26 = vrot.slane %v7055_v35, 1  ;;  %v6861_v38 = vld [vmem:[#allocation4 + $0x118] sm:$0x3]  ;;  %v7177_v30 = vrot.slane %v14836_v63, 1 }
 0x9d6   : > { %v7454_v41 = vadd.f32 %v14301_v39, %v7422_v52  ;;  %v7168_v9 = vsel %vm7115_vm5, %v7166_v46, %v7167_v5  ;;  %v7313_v50 = vsel %vm7260_vm6, %v7311_v47, %v7312_v31  ;;  %v7165_v39 = vsel %vm7115_vm5, %v7162_v12, %v7164_v20  ;;  %v6915_v47 = vld [vmem:[#allocation4 + $0x160] sm:$0x3]  ;;  %v6864_v20 = vld [vmem:[#allocation4 + $0x130] sm:$0x3] }
 0x9d7   : > { %7649 = vrot.lane.b32.xlu1 %v7447_v21, %s8289_s11  ;;  %v7450_v21 = vadd.f32 %v14288_v2, %v7418_v36  ;;  %v7248_v48 = vadd.f32 %v7168_v9, %v7049_v13  ;;  %v6909_v2 = vld [vmem:[#allocation4 + $0x130] sm:$0x3]  ;;  %v7426_v28 = vmul.f32 0.11111111, %v7394_v14  ;;  %v7247_v55 = vadd.f32 %v7165_v39, %v14756_v53  ;;  %v14851_v4 = vpop.permute.xlu2 %7533  ;;  %v6912_v14 = vld [vmem:[#allocation4 + $0x148] sm:$0x3] }
 0x9d8   : > { %7663 = vrot.lane.b32.xlu2 %v7454_v41, %s8289_s11  ;;  %v7310_v5 = vsel %vm7260_vm6, %v7307_v3, %v7309_v16  ;;  %v7321_v31 = vrot.slane %v7055_v35, 2  ;;  %v7322_v24 = vrot.slane %v14836_v63, 2  ;;  %v6956_v12 = vadd.f32 %v14787_v57, %v14745_v33  ;;  %v14858_v25 = vpop.permute.xlu1 %7513  ;;  %v6867_v41 = vld [vmem:[#allocation4 + $0x148] sm:$0x3]  ;;  %v14871_v39 = vld [vmem:[#allocation4 + $0x170] sm:$0xff] }
 0x9d9   : > { %v7393_v36 = vadd.f32 %v7313_v50, %v7248_v48  ;;  %v7458_v52 = vadd.f32 %v14437_v10, %v7426_v28  ;;  %v7392_v13 = vadd.f32 %v7310_v5, %v7247_v55  ;;  %v7178_v53 = vsel %vm7115_vm5, %v7176_v26, %v7177_v30  ;;  %v7009_v5 = vld [vmem:[#allocation4 + $0x160] sm:$0x3] }
 0x9da   : > { %v6957_v3 = vadd.f32 %v6909_v2, %v6861_v38  ;;  %v7252_v32 = vadd.f32 %v7178_v53, %v7055_v35  ;;  %v7323_v33 = vsel %vm7260_vm6, %v7321_v31, %v7322_v24  ;;  %v14864_v57 = vpop.permute.xlu0 %7523  ;;  %v7053_v10 = vadd.f32 %v6956_v12, %v14807_v8 }
 0x9db   : > { %v7425_v58 = vmul.f32 0.11111111, %v7393_v36  ;;  %7671 = vrot.lane.b32.xlu0 %v7458_v52, %s8289_s11  ;;  %v7453_v11 = vadd.f32 %v14321_v6, %v7421_v56  ;;  %v6955_v35 = vadd.f32 %v14805_v27, %v14736_v23  ;;  %v7424_v9 = vmul.f32 0.11111111, %v7392_v13  ;;  %v14876_v56 = vld [vmem:[#allocation4 + $0x168] sm:$0xff] }
 0x9dc   : > { %v7054_v61 = vadd.f32 %v7006_v43, %v6957_v3  ;;  %v7172_v16 = vrot.slane %v7053_v10, 1  ;;  %v7317_v50 = vrot.slane %v7053_v10, 2  ;;  %v6962_v6 = vadd.f32 %v14827_v22, %v14807_v8 }
 0x9dd   : > { %v7457_v46 = vadd.f32 %v14336_v54, %v7425_v58  ;;  %v7052_v2 = vadd.f32 %v6955_v35, %v14800_v34  ;;  %v7012_v54 = vld [vmem:[#allocation4 + $0x178] sm:$0x3]  ;;  %v6963_v27 = vadd.f32 %v6915_v47, %v6867_v41  ;;  %v6961_v28 = vadd.f32 %v14814_v40, %v14800_v34 }
 0x9de   : > { %v7174_v48 = vrot.slane %v7054_v61, 1  ;;  %v7319_v38 = vrot.slane %v7054_v61, 2  ;;  %v6960_v55 = vadd.f32 %v6912_v14, %v6864_v20  ;;  %v7059_v13 = vadd.f32 %v14871_v39, %v6962_v6  ;;  %v6919_v6 = vld [vmem:[#allocation4 + $0x180] sm:$0xff] }
 0x9df   : > { %7655 = vrot.lane.b32.xlu1 %v7450_v21, %s8289_s11  ;;  %v7397_v21 = vadd.f32 %v7323_v33, %v7252_v32  ;;  %v7171_v43 = vrot.slane %v7052_v2, 1  ;;  %v14884_v8 = vpop.permute.xlu2 %7539  ;;  %v7316_v52 = vrot.slane %v7052_v2, 2  ;;  %v7060_v53 = vadd.f32 %v7012_v54, %v6963_v27 }
 0x9e0   : > { %7669 = vrot.lane.b32.xlu2 %v7457_v46, %s8289_s11  ;;  %v7175_v23 = vsel %vm7115_vm5, %v7172_v16, %v7174_v48  ;;  %v7320_v12 = vsel %vm7260_vm6, %v7317_v50, %v7319_v38  ;;  %v7058_v3 = vadd.f32 %v14876_v56, %v6961_v28  ;;  %v14889_v58 = vpop.permute.xlu1 %7519  ;;  %v7182_v41 = vrot.slane %v7059_v13, 1 }
 0x9e1   : > { %v7429_v26 = vmul.f32 0.11111111, %v7397_v21  ;;  %v7251_v31 = vadd.f32 %v7175_v23, %v7053_v10  ;;  %v7173_v32 = vsel %vm7115_vm5, %v7171_v43, %v7172_v16  ;;  %v7318_v10 = vsel %vm7260_vm6, %v7316_v52, %v7317_v50  ;;  %v7017_v43 = vld [vmem:[#allocation4 + $0x1a0] sm:$0xff] }
 0x9e2   : > { %v7250_v33 = vadd.f32 %v7173_v32, %v7052_v2  ;;  %v14894_v61 = vpop.permute.xlu0 %7529  ;;  %v7456_v46 = vadd.f32 %v14364_v7, %v7424_v9  ;;  %v7184_v35 = vrot.slane %v7060_v53, 1  ;;  %v7327_v47 = vrot.slane %v7059_v13, 2  ;;  %v6920_v7 = vld [vmem:[#allocation4 + $0x188] sm:$0xff]  ;;  %v6870_v52 = vld [vmem:[#allocation4 + $0x160] sm:$0x3] }
 0x9e3   : > { %v7461_v36 = vadd.f32 %v14501_v45, %v7429_v26  ;;  %v7396_v34 = vadd.f32 %v7320_v12, %v7251_v31  ;;  %v7057_v45 = vadd.f32 %v7009_v5, %v6960_v55  ;;  %v7329_v20 = vrot.slane %v7060_v53, 2  ;;  %v7016_v55 = vld [vmem:[#allocation4 + $0x198] sm:$0xff] }
 0x9e4   : > { %v7181_v14 = vrot.slane %v7058_v3, 1  ;;  %v7326_v48 = vrot.slane %v7058_v3, 2  ;;  %v7185_v26 = vsel %vm7115_vm5, %v7182_v41, %v7184_v35  ;;  %v6967_v12 = vadd.f32 %v14876_v56, %v6919_v6 }
 0x9e5   : > { %7677 = vrot.lane.b32.xlu0 %v7461_v36, %s8289_s11  ;;  %v7428_v21 = vmul.f32 0.11111111, %v7396_v34  ;;  %v7179_v38 = vrot.slane %v7057_v45, 1  ;;  %v7324_v2 = vrot.slane %v7057_v45, 2  ;;  %v7255_v50 = vadd.f32 %v7185_v26, %v7059_v13  ;;  %v6918_v13 = vld [vmem:[#allocation4 + $0x178] sm:$0x3] }
 0x9e6   : > { %v7330_v54 = vsel %vm7260_vm6, %v7327_v47, %v7329_v20  ;;  %v7183_v23 = vsel %vm7115_vm5, %v7181_v14, %v7182_v41  ;;  %v7328_v28 = vsel %vm7260_vm6, %v7326_v48, %v7327_v47  ;;  %v6968_v34 = vadd.f32 %v14871_v39, %v6920_v7  ;;  %v7015_v41 = vld [vmem:[#allocation4 + $0x190] sm:$0x3] }
 0x9e7   : > { %7661 = vrot.lane.b32.xlu1 %v7453_v11, %s8289_s11  ;;  %v7395_v11 = vadd.f32 %v7318_v10, %v7250_v33  ;;  %v7460_v16 = vadd.f32 %v14384_v44, %v7428_v21  ;;  %v7254_v27 = vadd.f32 %v7183_v23, %v7058_v3  ;;  %v7180_v44 = vsel %vm7115_vm5, %v7177_v30, %v7179_v38  ;;  %v14906_v5 = vpop.permute.xlu2 %7545  ;;  %v6921_v20 = vld [vmem:[#allocation4 + $0x190] sm:$0x3] }
 0x9e8   : > { %v7400_v36 = vadd.f32 %v7330_v54, %v7255_v50  ;;  %v7253_v31 = vadd.f32 %v7180_v44, %v14836_v63  ;;  %v14911_v53 = vpop.permute.xlu1 %7525  ;;  %v7325_v30 = vsel %vm7260_vm6, %v7322_v24, %v7324_v2  ;;  %v6965_v32 = vadd.f32 %v14871_v39, %v14827_v22  ;;  %v7018_v50 = vld [vmem:[#allocation4 + $0x1a8] sm:$0x3] }
 0x9e9   : > { %7675 = vrot.lane.b32.xlu2 %v7460_v16, %s8289_s11  ;;  %v7427_v9 = vmul.f32 0.11111111, %v7395_v11  ;;  %v7399_v3 = vadd.f32 %v7328_v28, %v7254_v27  ;;  %v7064_v10 = vadd.f32 %v7016_v55, %v6967_v12  ;;  %v7065_v35 = vadd.f32 %v7017_v43, %v6968_v34  ;;  %v6873_v11 = vld [vmem:[#allocation4 + $0x178] sm:$0x3] }
 0x9ea   : > { %v7432_v45 = vmul.f32 0.11111111, %v7400_v36  ;;  %v14919_v33 = vpop.permute.xlu0 %7535  ;;  %v6966_v47 = vadd.f32 %v6918_v13, %v6870_v52  ;;  %v7398_v24 = vadd.f32 %v7325_v30, %v7253_v31  ;;  %v7062_v26 = vadd.f32 %v6965_v32, %v6920_v7 }
 0x9eb   : > { %v7459_v21 = vadd.f32 %v14430_v42, %v7427_v9  ;;  %v7191_v14 = vrot.slane %v7064_v10, 1  ;;  %v7336_v48 = vrot.slane %v7064_v10, 2  ;;  %v7192_v22 = vrot.slane %v7065_v35, 1 }
 0x9ec   : > { %v7464_v63 = vadd.f32 %v14556_v59, %v7432_v45  ;;  %v7337_v39 = vrot.slane %v7065_v35, 2  ;;  %v7063_v38 = vadd.f32 %v7015_v41, %v6966_v47  ;;  %v6964_v42 = vadd.f32 %v14876_v56, %v14814_v40  ;;  %v16499_v41 = vld [vmem:[#allocation81_spill] sm:$0xff] }
 0x9ed   : > { %v6969_v2 = vadd.f32 %v6921_v20, %v6873_v11  ;;  %v7193_v59 = vsel %vm7115_vm5, %v7191_v14, %v7192_v22  ;;  %v7187_v23 = vrot.slane %v7062_v26, 1  ;;  %v7332_v9 = vrot.slane %v7062_v26, 2 }
 0x9ee   : > { %7683 = vrot.lane.b32.xlu0 %v7464_v63, %s8289_s11  ;;  %v7338_v54 = vsel %vm7260_vm6, %v7336_v48, %v7337_v39  ;;  %v7258_v27 = vadd.f32 %v7193_v59, %v7064_v10  ;;  %v7189_v7 = vrot.slane %v7063_v38, 1  ;;  %v7334_v28 = vrot.slane %v7063_v38, 2 }
 0x9ef   : > { %7667 = vrot.lane.b32.xlu1 %v7456_v46, %s8289_s11  ;;  %v7431_v46 = vmul.f32 0.11111111, %v7399_v3  ;;  %v7061_v44 = vadd.f32 %v6964_v42, %v6919_v6  ;;  %v7430_v55 = vmul.f32 0.11111111, %v7398_v24  ;;  %v7066_v56 = vadd.f32 %v7018_v50, %v6969_v2  ;;  %v16500_v42 = vld [vmem:[#allocation160_spill] sm:$0xff] }
 0x9f0   : > { %v14933_v40 = vpop.permute.xlu1 %7531  ;;  %v7403_v36 = vadd.f32 %v7338_v54, %v7258_v27  ;;  %v7190_v31 = vsel %vm7115_vm5, %v7187_v23, %v7189_v7  ;;  %v7335_v12 = vsel %vm7260_vm6, %v7332_v9, %v7334_v28  ;;  %v16502_v27 = vld [vmem:[#allocation60_spill] sm:$0xff] }
 0x9f1   : > { %v7463_v16 = vadd.f32 %v14448_v1, %v7431_v46  ;;  %v14930_v1 = vpop.permute.xlu2 %7551  ;;  %v7257_v52 = vadd.f32 %v7190_v31, %v7062_v26  ;;  %v7186_v13 = vrot.slane %v7061_v44, 1  ;;  %v7331_v3 = vrot.slane %v7061_v44, 2 }
 0x9f2   : > { %v14937_v43 = vpop.permute.xlu0 %7541  ;;  %v7435_v30 = vmul.f32 0.11111111, %v7403_v36  ;;  %v7194_v34 = vrot.slane %v7066_v56, 1  ;;  %v7462_v6 = vadd.f32 %v14489_v19, %v7430_v55  ;;  %v7339_v11 = vrot.slane %v7066_v56, 2  ;;  %v8222_v19 = vld [vmem:[%s8565_s10 + $0xe8] sm:$0xff]  ;;  %s230_s10 = sand.u32 1, %s8277_s19  }
 0x9f3   : > { %7681 = vrot.lane.b32.xlu2 %v7463_v16, %s8289_s11  ;;  %v7402_v32 = vadd.f32 %v7335_v12, %v7257_v52  ;;  %v7188_v45 = vsel %vm7115_vm5, %v7186_v13, %v7187_v23  ;;  %v7333_v10 = vsel %vm7260_vm6, %v7331_v3, %v7332_v9  ;;  %s7915_s15 = sshll.u32 %s230_s10, 8  ;;  %v7727_v7 = vsel %vm307_vm0, %v16502_v27, %v14759_v17  ;;  %v16503_v36 = vld [vmem:[#allocation187_spill] sm:$0xff]  ;;  %v16504_v52 = vld [vmem:[#allocation144_spill] sm:$0xff] }
 0x9f4   : > { %v7256_v46 = vadd.f32 %v7188_v45, %v7061_v44  ;;  %v7195_v47 = vsel %vm7115_vm5, %v7192_v22, %v7194_v34  ;;  %v7340_v38 = vsel %vm7260_vm6, %v7337_v39, %v7339_v11  ;;  %s14972_s17 = scalar_lea.vmem [#allocation5], %s7915_s15  ;;  %v7730_v17 = vsel %vm307_vm0, %v16503_v36, %v14795_v18  ;;  %v16505_v18 = vld [vmem:[#allocation119_spill] sm:$0xff]  ;;  %v16512_v27 = vld [vmem:[#allocation168_spill] sm:$0xff]  ;;  %v16514_v36 = vld [vmem:[#allocation161_spill] sm:$0xff] }
 0x9f5   : > { %v7434_v20 = vmul.f32 0.11111111, %v7402_v32  ;;  %v7259_v16 = vadd.f32 %v7195_v47, %v7065_v35  ;;  %v16501_v35 = vld [vmem:[#allocation152_spill] sm:$0xff]  ;;  %v7725_v13 = vsel %vm307_vm0, %v16504_v52, %v14791_v51  ;;  %v16506_v51 = vld [vmem:[#allocation214_spill] sm:$0xff]  ;;  %s7834_s12 = sshll.u32 %s14972_s17, 4  ;;  %s7835_s12 = int_to_ptr.vmem [resolvable:$true] %s7834_s12 }
 0x9f6   : > { %v7401_v63 = vadd.f32 %v7333_v10, %v7256_v46  ;;  %v7728_v10 = vsel %vm307_vm0, %v16506_v51, %v14822_v37  ;;  %v16507_v46 = vld [vmem:[#allocation54_spill] sm:$0xff]  ;;  %v16508_v37 = vld [vmem:[#allocation151_spill] sm:$0xff] }
 0x9f7   : > { %7673 = vrot.lane.b32.xlu1 %v7459_v21, %s8289_s11  ;;  %v7467_v21 = vadd.f32 %v16499_v41, %v7435_v30  ;;  %v7466_v14 = vadd.f32 %v8222_v19, %v7434_v20  ;;  %v7404_v50 = vadd.f32 %v7340_v38, %v7259_v16 }
 0x9f8   : > { %v14949_v48 = vpop.permute.xlu1 %7537  ;;  %v7433_v26 = vmul.f32 0.11111111, %v7401_v63  ;;  %v7731_v63 = vsel %vm307_vm0, %v16508_v37, %v14858_v25  ;;  %v16511_v25 = vld [vmem:[#allocation199_spill] sm:$0xff] }
 0x9f9   : > { %7689 = vrot.lane.b32.xlu0 %v7467_v21, %s8289_s11  ;;  %v14945_v24 = vpop.permute.xlu2 %7557  ;;  %v7436_v54 = vmul.f32 0.11111111, %v7404_v50  ;;  %v7734_v50 = vsel %vm307_vm0, %v16511_v25, %v14889_v58 }
 0x9fa   : > { %v14952_v22 = vpop.permute.xlu0 %7547  ;;  %v7465_v2 = vadd.f32 %v16500_v42, %v7433_v26  ;;  %v16510_v42 = vld [vmem:[#allocation104_spill] sm:$0xff] }
 0x9fb   : > { %7687 = vrot.lane.b32.xlu2 %v7466_v14, %s8289_s11  ;;  %v7468_v39 = vadd.f32 %v16501_v35, %v7436_v54 }
 0x9ff   : > { %7679 = vrot.lane.b32.xlu1 %v7462_v6, %s8289_s11  ;;  %v7733_v6 = vsel %vm307_vm0, %v16505_v18, %v14831_v0  ;;  %v7736_v0 = vsel %vm307_vm0, %v16507_v46, %v14864_v57  ;;  %v16509_v57 = vld [vmem:[#allocation207_spill] sm:$0xff]  ;;  %v16519_v46 = vld [vmem:[#allocation190_spill] sm:$0xff] }
 0xa00   : > { %v14962_v9 = vpop.permute.xlu1 %7543  ;;  %v7739_v16 = vsel %vm307_vm0, %v16509_v57, %v14894_v61 }
 0xa01   : > { %v14956_v59 = vpop.permute.xlu2 %7563 }
 0xa02   : > { %v14960_v23 = vpop.permute.xlu0 %7553 }
 0xa07   : > { %7685 = vrot.lane.b32.xlu1 %v7465_v2, %s8289_s11  ;;  %v7726_v2 = vsel %vm307_vm0, %v16510_v42, %v14692_v15  ;;  %v7742_v15 = vsel %vm307_vm0, %v16512_v27, %v14919_v33  ;;  %v16523_v42 = vld [vmem:[#allocation39_spill] sm:$0xff] }
 0xa08   : > { %v14978_v56 = vpop.permute.xlu1 %7549 }
 0xa09   : > { %v7634_v28 = vpop.permute.xlu2 %7633 }
 0xa0a   : > { %v7759_v44 = vsel %vm2118_vm11, %v7727_v7, %v7634_v28  ;;  %v14976_v55 = vpop.permute.xlu0 %7559  ;;  %v16513_v28 = vld [vmem:[#allocation194_spill] sm:$0xff] }
 0xa0b   : > { %7791 = vst.msk [vmem:[%s14972_s17 + $0x10] sm:$0xff] %vm2151_vm15, %v7759_v44  ;;  %v7729_v44 = vsel %vm307_vm0, %v16513_v28, %v14722_v49 }
 0xa0f   : > { %7691 = vrot.lane.b32.xlu1 %v7468_v39, %s8289_s11  ;;  %s8023_s11 = sshll.u32 %s8348_s22, 8  ;;  %s7822_s22 = scalar_lea.sflag [#allocation6], %s230_s10 }
 0xa10   : > { %v14992_v34 = vpop.permute.xlu1 %7555  ;;  %s7833_s13 = scalar_lea.hbm %s15210_s5, %s8023_s11 }
 0xa11   : > { %v7640_v31 = vpop.permute.xlu2 %7639  ;;  %s7836_s14 = sshll.u32 %s7833_s13, 4  ;;  %s7837_s14 = int_to_ptr.hbm [resolvable:$true] %s7836_s14 }
 0xa12   : > { %v7762_v12 = vsel %vm2118_vm11, %v7730_v17, %v7640_v31  ;;  %v7630_v3 = vpop.permute.xlu0 %7629  ;;  %v7737_v17 = vsel %vm307_vm0, %v16514_v36, %v14911_v53  ;;  %v16516_v53 = vld [vmem:[#allocation65_spill] sm:$0xff]  ;;  %s8237_s26 = sshra.s32 %s7837_s14, 4  ;;  %s8238_s26 = int_to_ptr.hbm [resolvable:$true] %s8237_s26 }
 0xa13   : > { %7794 = vst.msk [vmem:[%s14972_s17 + $0x28] sm:$0xff] %vm2151_vm15, %v7762_v12  ;;  %v7757_v30 = vsel %vm2118_vm11, %v7725_v13, %v7630_v3  ;;  %v16515_v13 = vld [vmem:[#allocation212_spill] sm:$0xff]  ;;  %v7732_v18 = vsel %vm307_vm0, %v16516_v53, %v14749_v60  ;;  %v16531_v53 = vld [vmem:[#allocation175_spill] sm:$0xff]  ;;  %s8239_s8 = scalar_lea.hbm %s8238_s26, 256  ;;  %p8244_p0 = scmp.lt.s32.totalorder %s8238_s26, %s15210_s5 }
 0xa14   : > { %7789 = vst.msk [vmem:[%s14972_s17] sm:$0xff] %vm2151_vm15, %v7757_v30  ;;  %v7745_v49 = vsel %vm307_vm0, %v16515_v13, %v14937_v43  ;;  %p8240_p11 = scmp.ne.s32.totalorder %s8238_s26, %s8239_s8  ;;  %p8245_p1 = scmp.lt.s32.totalorder %s8243_s25, %s8239_s8 }
 0xa16   : > { %p8241_p12 = pnand %p8240_p11, %p8365_p5  ;;  %p8246_p2 = por %p8245_p1, %p8244_p0 }
 0xa18   : > { %v15009_v11 = vpop.permute.xlu1 %7561  ;;  %p8242_p13 = pneg %p8241_p12 }
 0xa19   : > { %v7646_v32 = vpop.permute.xlu2 %7645 }
 0xa1a   : > { %v7765_v45 = vsel %vm2118_vm11, %v7733_v6, %v7646_v32  ;;  %v7636_v41 = vpop.permute.xlu0 %7635  ;;  %v16517_v6 = vld [vmem:[#allocation202_spill] sm:$0xff]  ;;  %p8247_p3 = pnand %p8246_p2, %p8242_p13 }
 0xa1b   : > { %7797 = vst.msk [vmem:[%s14972_s17 + $0x40] sm:$0xff] %vm2151_vm15, %v7765_v45  ;;  %v7760_v21 = vsel %vm2118_vm11, %v7728_v10, %v7636_v41  ;;  %v7740_v32 = vsel %vm307_vm0, %v16517_v6, %v14933_v40  ;;  %v16518_v41 = vld [vmem:[#allocation140_spill] sm:$0xff] }
 0xa1c   : > { %7792 = vst.msk [vmem:[%s14972_s17 + $0x18] sm:$0xff] %vm2151_vm15, %v7760_v21  ;;  %v7748_v60 = vsel %vm307_vm0, %v16518_v41, %v14952_v22 }
 0xa21   : > { %v7652_v47 = vpop.permute.xlu2 %7651 }
 0xa22   : > { %v7768_v20 = vsel %vm2118_vm11, %v7736_v0, %v7652_v47  ;;  %v7642_v19 = vpop.permute.xlu0 %7641  ;;  %v7735_v0 = vsel %vm307_vm0, %v16519_v46, %v14782_v29  ;;  %v16520_v47 = vld [vmem:[#allocation107_spill] sm:$0xff]  ;;  %v16521_v29 = vld [vmem:[#allocation110_spill] sm:$0xff] }
 0xa23   : > { %7800 = vst.msk [vmem:[%s14972_s17 + $0x58] sm:$0xff] %vm2151_vm15, %v7768_v20  ;;  %v7763_v14 = vsel %vm2118_vm11, %v7731_v63, %v7642_v19  ;;  %v7743_v20 = vsel %vm307_vm0, %v16520_v47, %v14949_v48 }
 0xa24   : > { %7795 = vst.msk [vmem:[%s14972_s17 + $0x30] sm:$0xff] %vm2151_vm15, %v7763_v14  ;;  %v7751_v14 = vsel %vm307_vm0, %v16521_v29, %v14960_v23 }
 0xa29   : > { %v7658_v26 = vpop.permute.xlu2 %7657 }
 0xa2a   : > { %v7771_v38 = vsel %vm2118_vm11, %v7739_v16, %v7658_v26  ;;  %v7648_v35 = vpop.permute.xlu0 %7647  ;;  %v16522_v16 = vld [vmem:[#allocation58_spill] sm:$0xff] }
 0xa2b   : > { %7803 = vst.msk [vmem:[%s14972_s17 + $0x70] sm:$0xff] %vm2151_vm15, %v7771_v38  ;;  %v7766_v61 = vsel %vm2118_vm11, %v7734_v50, %v7648_v35  ;;  %v7738_v26 = vsel %vm307_vm0, %v16522_v16, %v14816_v62  ;;  %v16524_v62 = vld [vmem:[#allocation183_spill] sm:$0xff] }
 0xa2c   : > { %7798 = vst.msk [vmem:[%s14972_s17 + $0x48] sm:$0xff] %vm2151_vm15, %v7766_v61 }
 0xa31   : > { %v7632_v54 = vpop.permute.xlu1 %7631 }
 0xa32   : > { %v7758_v39 = vsel %vm2118_vm11, %v7726_v2, %v7632_v54  ;;  %v7664_v7 = vpop.permute.xlu2 %7663  ;;  %v7746_v2 = vsel %vm307_vm0, %v16523_v42, %v14962_v9  ;;  %v7741_v54 = vsel %vm307_vm0, %v16524_v62, %v14851_v4 }
 0xa33   : > { %7790 = vst.msk [vmem:[%s14972_s17 + $0x8] sm:$0xff] %vm2151_vm15, %v7758_v39  ;;  %v7774_v58 = vsel %vm2118_vm11, %v7742_v15, %v7664_v7  ;;  %v7654_v12 = vpop.permute.xlu0 %7653  ;;  %v16525_v39 = vld [vmem:[#allocation85_spill] sm:$0xff]  ;;  %v16526_v15 = vld [vmem:[#allocation55_spill] sm:$0xff] }
 0xa34   : > { %7806 = vst.msk [vmem:[%s14972_s17 + $0x88] sm:$0xff] %vm2151_vm15, %v7774_v58  ;;  %v7769_v33 = vsel %vm2118_vm11, %v7737_v17, %v7654_v12  ;;  %v7749_v9 = vsel %vm307_vm0, %v16525_v39, %v14978_v56  ;;  %v7754_v7 = vsel %vm307_vm0, %v16526_v15, %v14976_v55  ;;  %v16527_v56 = vld [vmem:[#allocation167_spill] sm:$0xff]  ;;  %v16528_v55 = vld [vmem:[#allocation41_spill] sm:$0xff] }
 0xa35   : > { %7801 = vst.msk [vmem:[%s14972_s17 + $0x60] sm:$0xff] %vm2151_vm15, %v7769_v33  ;;  %v16529_v33 = vld [vmem:[#allocation122_spill] sm:$0xff] }
 0xa39   : > { %v7638_v31 = vpop.permute.xlu1 %7637 }
 0xa3a   : > { %v7761_v52 = vsel %vm2118_vm11, %v7729_v44, %v7638_v31  ;;  %v7670_v3 = vpop.permute.xlu2 %7669  ;;  %v7744_v44 = vsel %vm307_vm0, %v16527_v56, %v14884_v8  ;;  %v7752_v31 = vsel %vm307_vm0, %v16528_v55, %v14992_v34  ;;  %v7747_v8 = vsel %vm307_vm0, %v16529_v33, %v14906_v5 }
 0xa3b   : > { %7793 = vst.msk [vmem:[%s14972_s17 + $0x20] sm:$0xff] %vm2151_vm15, %v7761_v52  ;;  %v7777_v30 = vsel %vm2118_vm11, %v7745_v49, %v7670_v3  ;;  %v7660_v51 = vpop.permute.xlu0 %7659  ;;  %v16530_v3 = vld [vmem:[#allocation96_spill] sm:$0xff] }
 0xa3c   : > { %7809 = vst.msk [vmem:[%s14972_s17 + $0xa0] sm:$0xff] %vm2151_vm15, %v7777_v30  ;;  %v7772_v10 = vsel %vm2118_vm11, %v7740_v32, %v7660_v51  ;;  %v7755_v34 = vsel %vm307_vm0, %v16530_v3, %v15009_v11 }
 0xa3d   : > { %7804 = vst.msk [vmem:[%s14972_s17 + $0x78] sm:$0xff] %vm2151_vm15, %v7772_v10 }
 0xa41   : > { %v7644_v45 = vpop.permute.xlu1 %7643 }
 0xa42   : > { %v7764_v43 = vsel %vm2118_vm11, %v7732_v18, %v7644_v45  ;;  %v7750_v18 = vsel %vm307_vm0, %v16531_v53, %v14930_v1  ;;  %v16532_v45 = vld [vmem:[#allocation61_spill] sm:$0xff]  ;;  %v16533_v1 = vld [vmem:[#allocation171_spill] sm:$0xff] }
 0xa43   : > { %7796 = vst.msk [vmem:[%s14972_s17 + $0x38] sm:$0xff] %vm2151_vm15, %v7764_v43  ;;  %v7676_v21 = vpop.permute.xlu2 %7675  ;;  %v7753_v11 = vsel %vm307_vm0, %v16532_v45, %v14945_v24  ;;  %v7756_v10 = vsel %vm307_vm0, %v16533_v1, %v14956_v59 }
 0xa44   : > { %v7780_v40 = vsel %vm2118_vm11, %v7748_v60, %v7676_v21  ;;  %v7666_v63 = vpop.permute.xlu0 %7665 }
 0xa45   : > { %7812 = vst.msk [vmem:[%s14972_s17 + $0xb8] sm:$0xff] %vm2151_vm15, %v7780_v40  ;;  %v7775_v19 = vsel %vm2118_vm11, %v7743_v20, %v7666_v63 }
 0xa46   : > { %7807 = vst.msk [vmem:[%s14972_s17 + $0x90] sm:$0xff] %vm2151_vm15, %v7775_v19 }
 0xa49   : > { %v7650_v37 = vpop.permute.xlu1 %7649 }
 0xa4a   : > { %v7767_v22 = vsel %vm2118_vm11, %v7735_v0, %v7650_v37 }
 0xa4b   : > { %7799 = vst.msk [vmem:[%s14972_s17 + $0x50] sm:$0xff] %vm2151_vm15, %v7767_v22 }
 0xa4d   : > { %v7682_v57 = vpop.permute.xlu2 %7681  ;;  %v7672_v23 = vpop.permute.xlu0 %7671 }
 0xa4e   : > { %v7783_v48 = vsel %vm2118_vm11, %v7751_v14, %v7682_v57  ;;  %v7778_v50 = vsel %vm2118_vm11, %v7746_v2, %v7672_v23 }
 0xa4f   : > { %7815 = vst.msk [vmem:[%s14972_s17 + $0xd0] sm:$0xff] %vm2151_vm15, %v7783_v48 }
 0xa50   : > { %7810 = vst.msk [vmem:[%s14972_s17 + $0xa8] sm:$0xff] %vm2151_vm15, %v7778_v50 }
 0xa51   : > { %v7656_v38 = vpop.permute.xlu1 %7655 }
 0xa52   : > { %v7770_v25 = vsel %vm2118_vm11, %v7738_v26, %v7656_v38 }
 0xa53   : > { %7802 = vst.msk [vmem:[%s14972_s17 + $0x68] sm:$0xff] %vm2151_vm15, %v7770_v25 }
 0xa55   : > { %v7688_v58 = vpop.permute.xlu2 %7687 }
 0xa56   : > { %v7786_v4 = vsel %vm2118_vm11, %v7754_v7, %v7688_v58 }
 0xa57   : > { %v7678_v27 = vpop.permute.xlu0 %7677  ;;  %7818 = vst.msk [vmem:[%s14972_s17 + $0xe8] sm:$0xff] %vm2151_vm15, %v7786_v4 }
 0xa58   : > { %v7781_v28 = vsel %vm2118_vm11, %v7749_v9, %v7678_v27 }
 0xa59   : > { %v7662_v35 = vpop.permute.xlu1 %7661  ;;  %7813 = vst.msk [vmem:[%s14972_s17 + $0xc0] sm:$0xff] %vm2151_vm15, %v7781_v28 }
 0xa5a   : > { %v7773_v61 = vsel %vm2118_vm11, %v7741_v54, %v7662_v35 }
 0xa5b   : > { %7805 = vst.msk [vmem:[%s14972_s17 + $0x80] sm:$0xff] %vm2151_vm15, %v7773_v61 }
 0xa60   : > { %v7684_v12 = vpop.permute.xlu0 %7683 }
 0xa61   : > { %v7668_v36 = vpop.permute.xlu1 %7667  ;;  %v7784_v52 = vsel %vm2118_vm11, %v7752_v31, %v7684_v12 }
 0xa62   : > { %v7776_v17 = vsel %vm2118_vm11, %v7744_v44, %v7668_v36  ;;  %7816 = vst.msk [vmem:[%s14972_s17 + $0xd8] sm:$0xff] %vm2151_vm15, %v7784_v52 }
 0xa63   : > { %7808 = vst.msk [vmem:[%s14972_s17 + $0x98] sm:$0xff] %vm2151_vm15, %v7776_v17 }
 0xa69   : > { %v7674_v13 = vpop.permute.xlu1 %7673 }
 0xa6a   : > { %v7779_v49 = vsel %vm2118_vm11, %v7747_v8, %v7674_v13 }
 0xa6b   : > { %7811 = vst.msk [vmem:[%s14972_s17 + $0xb0] sm:$0xff] %vm2151_vm15, %v7779_v49  ;;  %v7690_v30 = vpop.permute.xlu0 %7689 }
 0xa6c   : > { %v7787_v32 = vsel %vm2118_vm11, %v7755_v34, %v7690_v30 }
 0xa6d   : > { %7819 = vst.msk [vmem:[%s14972_s17 + $0xf0] sm:$0xff] %vm2151_vm15, %v7787_v32 }
 0xa71   : > { %v7680_v6 = vpop.permute.xlu1 %7679 }
 0xa72   : > { %v7782_v5 = vsel %vm2118_vm11, %v7750_v18, %v7680_v6 }
 0xa73   : > { %7814 = vst.msk [vmem:[%s14972_s17 + $0xc8] sm:$0xff] %vm2151_vm15, %v7782_v5 }
 0xa79   : > { %v7686_v51 = vpop.permute.xlu1 %7685 }
 0xa7a   : > { %v7785_v43 = vsel %vm2118_vm11, %v7753_v11, %v7686_v51 }
 0xa7b   : > { %7817 = vst.msk [vmem:[%s14972_s17 + $0xe0] sm:$0xff] %vm2151_vm15, %v7785_v43 }
 0xa81   : > { %v7692_v41 = vpop.permute.xlu1 %7691 }
 0xa82   : > { %v7788_v24 = vsel %vm2118_vm11, %v7756_v10, %v7692_v41 }
 0xa83   : > { %7820 = vst.msk [vmem:[%s14972_s17 + $0xf8] sm:$0xff] %vm2151_vm15, %v7788_v24 }
 0xa84   : > { %8250 = shalt.err (!%p8247_p3)
}
 0xa85   : > { %s8296_s10 = smov 128  }
 0xa86   : > { %8051 = dma.vmem_to_hbm [thread:$0]  (%p8365_p5), %s7835_s12, 4096, %s7837_s14, %s7822_s22, %s8296_s10, %s8296_s10, %s8288_s30  }
 0xa87 PF: > { %p8057_p4 = scmp.ge.s32.totalorder %s8285_s21, 2  ;;  %s7851_s17 = sand.u32 1, %s8273_s18  }
 0xa88   : > { %s7852_s11 = scalar_lea.sflag [#allocation6], %s7851_s17 }
 0xa89   : > { %p8054_p7 = pnand %p8057_p4, %p8369_p6 }
 0xa8b   : > { %p8055_p8 = pneg %p8054_p7 }
 0xa8d   : > { %8268 = dma.done.wait (%p8055_p8), %s7852_s11, 4096  }
 0xa8e   : > { %8270 = vsyncadd (%p8055_p8), %s7852_s11, 4294963200  ;;  %p15_p9 = scmp.ge.s32.totalorder %s8352_s24, 4   ;;  %s16534_s18 = smov %s8277_s19 }
 0xa8f   : > { %s16535_s19 = smov %s8281_s20  ;;  %s16536_s20 = smov %s8363_s27 }
 0xa90   : > { %s16537_s21 = smov %s8352_s24  ;;  %17 = sbr.rel (!%p15_p9) target bundleno = 3 (0x3), region = 90 }
 0xa95   :  { %7858 = vsyncpa [#allocation6], 1 }
 0xa96   :  { %7860 = vsyncpa [#allocation6 + $0x1], 1 }

</bundles_post_ra>
